<compile_context>
chip_gen: v5e
topology: v5e:2x2
jax: 0.10.0
libtpu: 0.0.40
codegen_flags: <defaults>
</compile_context>

<pallas_src>
import functools
import math

import jax
import jax.numpy as jnp
from jax import lax
from jax.experimental import pallas as pl
from jax.experimental.pallas import tpu as pltpu


# ----------------------------- configuration --------------------------------
VOCAB = 50
WORD_EMB = 32            # word_emb_size
HIDDEN = 64              # recurrent_size (must be even)
HALF = HIDDEN // 2       # per-direction LSTM hidden
GATES = 4 * HALF         # 128 gate lanes per direction
GATES2 = 2 * GATES       # 256 fused fwd+bwd gate lanes
NUM_ENC = 3              # question / column / table encoders
NUM_REL = 10             # number of relation types (schema_linking output ids)
NUM_RAT_LAYERS = 2
Q_LEN, N_COLS, N_TABS = 8, 4, 2          # one token per column/table (simplified)
L_TOTAL = Q_LEN + N_COLS + N_TABS        # 14
L_PAD = 16               # internal token length (sublane-tile aligned)
OUT_PAD = 128            # lane-dense packed output width
SCALE = 1.0 / math.sqrt(HIDDEN)
BT_MAX = 16              # max descs folded into one grid step (flattened M ~ 256)


# ------------------------------ kernel helpers -------------------------------
def _layer_norm(x, gamma, beta):
    mu = jnp.mean(x, axis=-1, keepdims=True)
    var = jnp.mean((x - mu) ** 2, axis=-1, keepdims=True)
    return (x - mu) * lax.rsqrt(var + 1e-5) * gamma + beta


def _softmax_lastdim(s):
    s = s - jnp.max(s, axis=-1, keepdims=True)
    e = jnp.exp(s)
    return e * pl.reciprocal(jnp.sum(e, axis=-1, keepdims=True), approx=True)


# ------------------------------ fused kernel ---------------------------------
def _fused_encoder_kernel(
    x_in_ref, rel_ref,
    wih_ref, whh_ref, lb_ref,
    wqkv_ref, wo_ref, ln1_ref, w1_ref, b1_ref, w2_ref, b2_ref, ln2_ref,
    relk_ref, relv_ref, alw_ref,
    out_ref,
):
    bt = x_in_ref.shape[0]
    bf16 = jnp.bfloat16

    # Hoisted lane mask: fwd half (lanes [0:32) of every 64-lane gate group).
    gate_lane = lax.broadcasted_iota(jnp.int32, (bt, GATES2), 1)
    fwd_gate_mask = (gate_lane % HIDDEN) < HALF

    # ---------------- BiLSTM encoders (batched, fwd+bwd fused) ---------------
    # One hoisted input projection for all three encoders: [Bt*16,32]x[32,768].
    x_in2 = x_in_ref[...].reshape(bt * L_PAD, WORD_EMB)
    xw_all = jnp.dot(x_in2.astype(bf16), wih_ref[...],
                     preferred_element_type=jnp.float32) + lb_ref[...]
    xw3 = xw_all.reshape(bt, L_PAD, NUM_ENC * GATES2)

    def run_bilstm(xw_seg, whh, seq_len):
        # xw_seg: [Bt, seq_len, 256] (bias folded); whh: block-diag [64, 256] bf16.
        h = jnp.zeros((bt, HIDDEN), jnp.float32)      # [h_f | h_b]
        c = jnp.zeros((bt, HIDDEN), jnp.float32)      # [c_f | c_b]
        hs = []
        for s in range(seq_len):                      # fully unrolled recurrence
            sb = seq_len - 1 - s
            # fwd gate lanes read time s, bwd gate lanes read time sb (one vselect)
            xg = jnp.where(fwd_gate_mask, xw_seg[:, s, :], xw_seg[:, sb, :])
            gates = xg + jnp.dot(h.astype(bf16), whh,
                                 preferred_element_type=jnp.float32)
            sig = jax.nn.sigmoid(gates[:, 0:3 * HIDDEN])          # i, f, o
            g_g = jnp.tanh(gates[:, 3 * HIDDEN:4 * HIDDEN])       # g
            i_g = sig[:, 0:HIDDEN]
            f_g = sig[:, HIDDEN:2 * HIDDEN]
            o_g = sig[:, 2 * HIDDEN:3 * HIDDEN]
            c = f_g * c + i_g * g_g
            h = o_g * jnp.tanh(c)
            hs.append(h)
        # Token t = [h_f of step t | h_b of step seq-1-t]: one select between two
        # stacked orders (no VMEM scratch, no masked stores).
        fwd_stack = jnp.concatenate(
            [jnp.reshape(hh, (bt, 1, HIDDEN)) for hh in hs], axis=1)
        rev_stack = jnp.concatenate(
            [jnp.reshape(hs[seq_len - 1 - t], (bt, 1, HIDDEN))
             for t in range(seq_len)], axis=1)
        half_mask = lax.broadcasted_iota(
            jnp.int32, (bt, seq_len, HIDDEN), 2) < HALF
        return jnp.where(half_mask, fwd_stack, rev_stack)         # [Bt, seq, 64]

    segs = []
    seg_defs = ((0, Q_LEN), (Q_LEN, N_COLS), (Q_LEN + N_COLS, N_TABS))
    for enc, (off, length) in enumerate(seg_defs):
        xw_seg = xw3[:, off:off + length, enc * GATES2:(enc + 1) * GATES2]
        segs.append(run_bilstm(xw_seg, whh_ref[enc], length))
    segs.append(jnp.zeros((bt, L_PAD - L_TOTAL, HIDDEN), jnp.float32))
    x3 = jnp.concatenate(segs, axis=1)                            # [Bt, 16, 64]

    # ---------------- RAT relation-aware transformer layers ------------------
    rel = rel_ref[...]                                            # [Bt, 16, 16]
    # relation one-hots hoisted out of the layer loop (layer-invariant)
    onehots = [(rel == r).astype(jnp.float32) for r in range(NUM_REL)]
    kpos = lax.broadcasted_iota(jnp.int32, (bt, L_PAD, L_PAD), 2)
    score_pad = jnp.where(kpos < L_TOTAL, 0.0, -1e30)             # mask pad keys

    x2 = x3.reshape(bt * L_PAD, HIDDEN)                           # flattened M
    for layer in range(NUM_RAT_LAYERS):
        qkv2 = jnp.dot(x2.astype(bf16), wqkv_ref[layer],
                       preferred_element_type=jnp.float32)        # [Bt*16, 192]
        qkv3 = qkv2.reshape(bt, L_PAD, 3 * HIDDEN)
        q3 = qkv3[..., 0:HIDDEN].astype(bf16)
        k3 = qkv3[..., HIDDEN:2 * HIDDEN].astype(bf16)
        v3 = qkv3[..., 2 * HIDDEN:3 * HIDDEN].astype(bf16)

        scores = jnp.einsum('bqd,bkd->bqk', q3, k3,
                            preferred_element_type=jnp.float32)   # [Bt, 16, 16]
        # Relation-key bias in relation-type basis (no [L, L, H] tensor):
        #   bias[b,q,k] = q[b,q] . rel_k_emb[rel[b,q,k]]
        qrel2 = lax.dot_general(qkv2[:, 0:HIDDEN].astype(bf16), relk_ref[layer],
                                (((1,), (1,)), ((), ())),
                                preferred_element_type=jnp.float32)
        qrel3 = qrel2.reshape(bt, L_PAD, NUM_REL)
        bias = jnp.zeros((bt, L_PAD, L_PAD), jnp.float32)
        for r in range(NUM_REL):
            bias = bias + onehots[r] * qrel3[..., r:r + 1]

        attn = _softmax_lastdim((scores + bias) * SCALE + score_pad)

        ctx3 = jnp.einsum('bqk,bkd->bqd', attn.astype(bf16), v3,
                          preferred_element_type=jnp.float32)     # [Bt, 16, 64]
        # Relation-value bias: per-relation attention mass -> one [.,10]x[10,64] matmul.
        mass3 = jnp.concatenate(
            [jnp.sum(onehots[r] * attn, axis=-1, keepdims=True)
             for r in range(NUM_REL)], axis=-1)                   # [Bt, 16, 10]
        ctx2 = ctx3.reshape(bt * L_PAD, HIDDEN) + jnp.dot(
            mass3.reshape(bt * L_PAD, NUM_REL).astype(bf16), relv_ref[layer],
            preferred_element_type=jnp.float32)

        attn_out2 = jnp.dot(ctx2.astype(bf16), wo_ref[layer],
                            preferred_element_type=jnp.float32)
        ln1 = ln1_ref[layer]                                      # [2, 64]
        y2 = _layer_norm(x2 + attn_out2, ln1[0:1, :], ln1[1:2, :])

        h1 = jnp.maximum(
            jnp.dot(y2.astype(bf16), w1_ref[layer],
                    preferred_element_type=jnp.float32) + b1_ref[layer], 0.0)
        h2 = jnp.dot(h1.astype(bf16), w2_ref[layer],
                     preferred_element_type=jnp.float32) + b2_ref[layer]
        ln2 = ln2_ref[layer]
        x2 = _layer_norm(y2 + h2, ln2[0:1, :], ln2[1:2, :])

    # ---------------- fused AlignmentWithRAT (m2c + m2t) ---------------------
    # One fused [64, 256] projection: lanes [q_c | q_t | k_c | k_t].
    al2 = jnp.dot(x2.astype(bf16), alw_ref[...],
                  preferred_element_type=jnp.float32)             # [Bt*16, 256]
    al3 = al2.reshape(bt, L_PAD, 4 * HIDDEN).astype(bf16)
    qa_c = al3[..., 0:HIDDEN]
    qa_t = al3[..., HIDDEN:2 * HIDDEN]
    ka_c = al3[:, Q_LEN:Q_LEN + N_COLS, 2 * HIDDEN:3 * HIDDEN]    # [Bt, 4, 64]
    ka_t = al3[:, Q_LEN + N_COLS:L_TOTAL, 3 * HIDDEN:4 * HIDDEN]  # [Bt, 2, 64]

    m2c = _softmax_lastdim(jnp.einsum('bqd,bcd->bqc', qa_c, ka_c,
                                      preferred_element_type=jnp.float32) * SCALE)
    m2t = _softmax_lastdim(jnp.einsum('bqd,btd->bqt', qa_t, ka_t,
                                      preferred_element_type=jnp.float32) * SCALE)

    # Single lane-dense packed output store: memory | m2c | m2t | zero pad.
    x3_out = x2.reshape(bt, L_PAD, HIDDEN)
    pad = jnp.zeros((bt, L_PAD, OUT_PAD - HIDDEN - N_COLS - N_TABS), jnp.float32)
    out_ref[...] = jnp.concatenate([x3_out, m2c, m2t, pad], axis=-1)


# ------------------------------ pallas_call glue ------------------------------
_WEIGHT_NAMES = (
    "lstm_wih", "lstm_whh", "lstm_b",
    "rat_wqkv", "rat_wo", "rat_ln1", "rat_w1", "rat_b1",
    "rat_w2", "rat_b2", "rat_ln2", "rat_relk", "rat_relv",
    "align_w",
)


def _block_spec(bt, shape):
    nd = 1 + len(shape)
    return pl.BlockSpec((bt,) + tuple(shape),
                        lambda g, _nd=nd: (g,) + (0,) * (_nd - 1))


def _const_spec(shape):
    nd = len(shape)
    return pl.BlockSpec(tuple(shape), lambda g, _nd=nd: (0,) * _nd)


def _pick_bt(batch):
    # Fold ~BT_MAX descs per grid step (flattened M ~ BT_MAX*16 rows), but keep
    # at least two grid steps when batch allows so both v7x TensorCores get work.
    return max(1, min(BT_MAX, (batch + 1) // 2))


@functools.partial(jax.jit, static_argnames=("bt",))
def _fused_forward(params, q_ids, c_ids, t_ids, rel_ids, *, bt):
    batch = q_ids.shape[0]
    b_pad = -(-batch // bt) * bt

    # Embedding gathers (glue) + single concatenated, padded [B, 16, 32] input.
    x_in = jnp.concatenate([params["q_emb"][q_ids],
                            params["c_emb"][c_ids],
                            params["t_emb"][t_ids]], axis=1)       # [B, 14, 32]
    x_in = jnp.pad(x_in, ((0, b_pad - batch), (0, L_PAD - L_TOTAL), (0, 0)))
    rel = jnp.pad(rel_ids, ((0, b_pad - batch), (0, L_PAD - L_TOTAL),
                            (0, L_PAD - L_TOTAL)),
                  constant_values=NUM_REL)                         # pad -> no relation

    weights = [params[n] for n in _WEIGHT_NAMES]
    in_specs = ([_block_spec(bt, (L_PAD, WORD_EMB)),
                 _block_spec(bt, (L_PAD, L_PAD))]
                + [_const_spec(w.shape) for w in weights])

    out = pl.pallas_call(
        _fused_encoder_kernel,
        grid=(b_pad // bt,),
        in_specs=in_specs,
        out_specs=_block_spec(bt, (L_PAD, OUT_PAD)),
        out_shape=jax.ShapeDtypeStruct((b_pad, L_PAD, OUT_PAD), jnp.float32),
        compiler_params=pltpu.CompilerParams(
            dimension_semantics=("parallel",)),
    )(x_in, rel, *weights)
    return out[:batch, :L_TOTAL, :]                                # [B, 14, 128]


# ------------------------------ parameters -----------------------------------
def init_params(key):
    keys = iter(jax.random.split(key, 128))

    def nrm(shape, scale=0.1):
        return scale * jax.random.normal(next(keys), shape, dtype=jnp.float32)

    # Fused gate-column layout (256 lanes): [i_f i_b | f_f f_b | o_f o_b | g_f g_b].
    # GATE_ORDER maps it onto PyTorch's (i, f, g, o) row blocks.
    GATE_ORDER = (0, 1, 3, 2)

    def pack_bilstm():
        wih = [nrm((GATES, WORD_EMB)) for _ in range(2)]   # per-dir W_ih (PyTorch layout)
        whh = [nrm((GATES, HALF)) for _ in range(2)]       # per-dir W_hh
        bias = [jnp.zeros((GATES,), jnp.float32) for _ in range(2)]  # b_ih + b_hh summed
        wih_cols, whh_cols, b_cols = [], [], []
        for g in GATE_ORDER:
            for d in range(2):
                sl = slice(g * HALF, (g + 1) * HALF)
                wih_cols.append(wih[d][sl, :].T)                        # [32, 32]
                b_cols.append(bias[d][sl])
                blk = jnp.zeros((HIDDEN, HALF), jnp.float32)            # block-diag cols
                blk = blk.at[d * HALF:(d + 1) * HALF, :].set(whh[d][sl, :].T)
                whh_cols.append(blk)
        return (jnp.concatenate(wih_cols, axis=1),          # [32, 256]
                jnp.concatenate(whh_cols, axis=1),          # [64, 256] block-diagonal
                jnp.concatenate(b_cols)[None, :])           # [1, 256]

    # question / column / table encoders each own emb + bilstm params
    # (module_types ('emb','bilstm') are not in shared_modules).
    packs = [pack_bilstm() for _ in range(NUM_ENC)]
    lstm_wih = jnp.concatenate([p[0] for p in packs], axis=1).astype(jnp.bfloat16)
    lstm_whh = jnp.stack([p[1] for p in packs], axis=0).astype(jnp.bfloat16)
    lstm_b = jnp.concatenate([p[2] for p in packs], axis=1)     # [1, 768] f32

    wqkv_l, wo_l, w1_l, w2_l, relk_l, relv_l = [], [], [], [], [], []
    for _ in range(NUM_RAT_LAYERS):
        wqkv_l.append(jnp.concatenate(
            [nrm((HIDDEN, HIDDEN)) for _ in range(3)], axis=-1))
        wo_l.append(nrm((HIDDEN, HIDDEN)))
        w1_l.append(nrm((HIDDEN, 4 * HIDDEN)))
        w2_l.append(nrm((4 * HIDDEN, HIDDEN)))
        relk_l.append(nrm((NUM_REL, HIDDEN)))
        relv_l.append(nrm((NUM_REL, HIDDEN)))

    ln = jnp.stack([jnp.ones((HIDDEN,), jnp.float32),
                    jnp.zeros((HIDDEN,), jnp.float32)], axis=0)       # [2, 64]
    ln_layers = jnp.stack([ln] * NUM_RAT_LAYERS, axis=0)

    # Fused alignment projection: [q_c | q_t | k_c | k_t] -> [64, 256].
    align_w = jnp.concatenate([nrm((HIDDEN, HIDDEN)) for _ in range(4)], axis=1)

    return {
        "q_emb": nrm((VOCAB, WORD_EMB)),
        "c_emb": nrm((VOCAB, WORD_EMB)),
        "t_emb": nrm((VOCAB, WORD_EMB)),
        "lstm_wih": lstm_wih, "lstm_whh": lstm_whh, "lstm_b": lstm_b,
        "rat_wqkv": jnp.stack(wqkv_l, 0).astype(jnp.bfloat16),
        "rat_wo": jnp.stack(wo_l, 0).astype(jnp.bfloat16),
        "rat_ln1": ln_layers,
        "rat_w1": jnp.stack(w1_l, 0).astype(jnp.bfloat16),
        "rat_b1": jnp.zeros((NUM_RAT_LAYERS, 1, 4 * HIDDEN), jnp.float32),
        "rat_w2": jnp.stack(w2_l, 0).astype(jnp.bfloat16),
        "rat_b2": jnp.zeros((NUM_RAT_LAYERS, 1, HIDDEN), jnp.float32),
        "rat_ln2": ln_layers,
        "rat_relk": jnp.stack(relk_l, 0).astype(jnp.bfloat16),
        "rat_relv": jnp.stack(relv_l, 0).astype(jnp.bfloat16),
        "align_w": align_w.astype(jnp.bfloat16),
    }


# ------------------------------ forward ---------------------------------------
def spider_encoder_v3_forward(params, descs):
    # TODO(synk): schema_linking / vocab preprocessing are Python data-structure
    # code; relation id matrices are supplied directly per desc.
    q_ids = jnp.stack([d["q_ids"] for d in descs])
    c_ids = jnp.stack([d["c_ids"] for d in descs])
    t_ids = jnp.stack([d["t_ids"] for d in descs])
    rel_ids = jnp.stack([d["rel_ids"] for d in descs])
    batch = q_ids.shape[0]

    bt = _pick_bt(batch)
    out = _fused_forward(params, q_ids, c_ids, t_ids, rel_ids, bt=bt)  # [B, 14, 128]

    c_bounds = list(range(N_COLS + 1))        # 1 token / column
    t_bounds = list(range(N_TABS + 1))        # 1 token / table
    results = []
    for b, d in enumerate(descs):
        memory = out[b, :, 0:HIDDEN]
        m2c = out[b, :, HIDDEN:HIDDEN + N_COLS]
        m2t = out[b, :, HIDDEN + N_COLS:HIDDEN + N_COLS + N_TABS]
        q_new = memory[:Q_LEN]
        c_new = memory[Q_LEN:Q_LEN + N_COLS]
        t_new = memory[Q_LEN + N_COLS:]
        results.append({
            "state": None,
            "memory": memory[None],                       # [1, L, H]
            "question_memory": q_new[None],               # [1, Lq, H]
            "schema_memory": jnp.concatenate([c_new, t_new], axis=0)[None],
            "words_for_copying": [int(w) for w in d["q_ids"]],  # TODO(synk): string tokens unavailable; use token ids
            "pointer_memories": {"column": c_new[None], "table": t_new[None]},
            "pointer_maps": {
                "column": {i: list(range(l, r))
                           for i, (l, r) in enumerate(zip(c_bounds, c_bounds[1:]))},
                "table": {i: list(range(l, r))
                          for i, (l, r) in enumerate(zip(t_bounds, t_bounds[1:]))},
            },
            "relation": d["rel_ids"],
            "m2c_align_mat": m2c,                          # [L, Lc]
            "m2t_align_mat": m2t,                          # [L, Lt]
        })
    return results


# ------------------------------ main ------------------------------------------
if __name__ == "__main__":
    root = jax.random.PRNGKey(0)
    pkey, dkey = jax.random.split(root)
    params = init_params(pkey)

    descs = []
    for _ in range(4):     # batch=4 -> Bt=2, grid=(2,) (both v7x cores get work)
        k1, k2, k3, k4, dkey = jax.random.split(dkey, 5)
        descs.append({
            "q_ids": jax.random.randint(k1, (Q_LEN,), 0, VOCAB),
            "c_ids": jax.random.randint(k2, (N_COLS,), 0, VOCAB),
            "t_ids": jax.random.randint(k3, (N_TABS,), 0, VOCAB),
            "rel_ids": jax.random.randint(k4, (L_TOTAL, L_TOTAL), 0, NUM_REL),
        })

    results = spider_encoder_v3_forward(params, descs)
    for r in results:
        jax.block_until_ready(r["memory"])
        jax.block_until_ready(r["m2c_align_mat"])
        jax.block_until_ready(r["m2t_align_mat"])

    assert len(results) == 4
    assert results[0]["memory"].shape == (1, L_TOTAL, HIDDEN)
    assert results[0]["m2c_align_mat"].shape == (L_TOTAL, N_COLS)
    assert results[0]["m2t_align_mat"].shape == (L_TOTAL, N_TABS)
    for r in results:
        assert bool(jnp.all(jnp.isfinite(r["memory"])))
        assert bool(jnp.all(jnp.isfinite(r["m2c_align_mat"])))
        assert bool(jnp.all(jnp.isfinite(r["m2t_align_mat"])))
    # softmax rows should sum to ~1 (approx reciprocal -> loose tolerance)
    row_sum = float(jnp.sum(results[0]["m2c_align_mat"][0]))
    assert abs(row_sum - 1.0) < 1e-2
    print("KERNEL_OK")
</pallas_src>

<mosaic_0001>
module attributes {stable_mosaic.version = 11 : i64} {
  func.func @_fused_encoder_kernel(%arg0: i32, %arg1: memref<2x16x32xf32, #tpu.memory_space<vmem>>, %arg2: memref<2x16x16xi32, #tpu.memory_space<vmem>>, %arg3: memref<32x768xbf16, #tpu.memory_space<vmem>>, %arg4: memref<3x64x256xbf16, #tpu.memory_space<vmem>>, %arg5: memref<1x768xf32, #tpu.memory_space<vmem>>, %arg6: memref<2x64x192xbf16, #tpu.memory_space<vmem>>, %arg7: memref<2x64x64xbf16, #tpu.memory_space<vmem>>, %arg8: memref<2x2x64xf32, #tpu.memory_space<vmem>>, %arg9: memref<2x64x256xbf16, #tpu.memory_space<vmem>>, %arg10: memref<2x1x256xf32, #tpu.memory_space<vmem>>, %arg11: memref<2x256x64xbf16, #tpu.memory_space<vmem>>, %arg12: memref<2x1x64xf32, #tpu.memory_space<vmem>>, %arg13: memref<2x2x64xf32, #tpu.memory_space<vmem>>, %arg14: memref<2x10x64xbf16, #tpu.memory_space<vmem>>, %arg15: memref<2x10x64xbf16, #tpu.memory_space<vmem>>, %arg16: memref<64x256xbf16, #tpu.memory_space<vmem>>, %arg17: memref<2x16x128xf32, #tpu.memory_space<vmem>>) attributes {dimension_semantics = [#tpu.dimension_semantics<parallel>], iteration_bounds = array<i64: 2>, scalar_prefetch = 0 : i64, scratch_operands = 0 : i64, tpu.core_type = #tpu.core_type<tc>, window_params = [{transform_indices = @transform_0, window_bounds = array<i64: 2, 16, 32>}, {transform_indices = @transform_1, window_bounds = array<i64: 2, 16, 16>}, {pipeline_mode = #tpu.pipeline_mode<synchronous>, transform_indices = @transform_2, window_bounds = array<i64: 32, 768>}, {pipeline_mode = #tpu.pipeline_mode<synchronous>, transform_indices = @transform_3, window_bounds = array<i64: 3, 64, 256>}, {pipeline_mode = #tpu.pipeline_mode<synchronous>, transform_indices = @transform_4, window_bounds = array<i64: 1, 768>}, {pipeline_mode = #tpu.pipeline_mode<synchronous>, transform_indices = @transform_5, window_bounds = array<i64: 2, 64, 192>}, {pipeline_mode = #tpu.pipeline_mode<synchronous>, transform_indices = @transform_6, window_bounds = array<i64: 2, 64, 64>}, {pipeline_mode = #tpu.pipeline_mode<synchronous>, transform_indices = @transform_7, window_bounds = array<i64: 2, 2, 64>}, {pipeline_mode = #tpu.pipeline_mode<synchronous>, transform_indices = @transform_8, window_bounds = array<i64: 2, 64, 256>}, {pipeline_mode = #tpu.pipeline_mode<synchronous>, transform_indices = @transform_9, window_bounds = array<i64: 2, 1, 256>}, {pipeline_mode = #tpu.pipeline_mode<synchronous>, transform_indices = @transform_10, window_bounds = array<i64: 2, 256, 64>}, {pipeline_mode = #tpu.pipeline_mode<synchronous>, transform_indices = @transform_11, window_bounds = array<i64: 2, 1, 64>}, {pipeline_mode = #tpu.pipeline_mode<synchronous>, transform_indices = @transform_12, window_bounds = array<i64: 2, 2, 64>}, {pipeline_mode = #tpu.pipeline_mode<synchronous>, transform_indices = @transform_13, window_bounds = array<i64: 2, 10, 64>}, {pipeline_mode = #tpu.pipeline_mode<synchronous>, transform_indices = @transform_14, window_bounds = array<i64: 2, 10, 64>}, {pipeline_mode = #tpu.pipeline_mode<synchronous>, transform_indices = @transform_15, window_bounds = array<i64: 64, 256>}, {transform_indices = @transform_16, window_bounds = array<i64: 2, 16, 128>}]} {
    %0 = tpu.iota {dimensions = array<i32: 1>} : vector<2x256xi32>
    %c64_i32 = arith.constant 64 : i32
    %c0_i32 = arith.constant 0 : i32
    %1 = arith.cmpi eq, %c64_i32, %c0_i32 : i32
    %c1_i32 = arith.constant 1 : i32
    %2 = arith.select %1, %c1_i32, %c64_i32 : i32
    %3 = vector.broadcast %2 : i32 to vector<2x256xi32>
    %4 = arith.remsi %0, %3 : vector<2x256xi32>
    %c0_i32_0 = arith.constant 0 : i32
    %5 = vector.broadcast %c0_i32_0 : i32 to vector<2x256xi32>
    %6 = arith.cmpi ne, %4, %5 : vector<2x256xi32>
    %c0_i32_1 = arith.constant 0 : i32
    %7 = vector.broadcast %c0_i32_1 : i32 to vector<2x256xi32>
    %8 = arith.cmpi slt, %4, %7 : vector<2x256xi32>
    %c0_i32_2 = arith.constant 0 : i32
    %9 = arith.cmpi slt, %2, %c0_i32_2 : i32
    %10 = vector.broadcast %9 : i1 to vector<2x256xi1>
    %11 = vector.broadcast %10 : vector<2x256xi1> to vector<2x256xi1>
    %12 = arith.xori %8, %11 : vector<2x256xi1>
    %13 = arith.andi %12, %6 : vector<2x256xi1>
    %14 = vector.broadcast %2 : i32 to vector<2x256xi32>
    %15 = arith.addi %4, %14 : vector<2x256xi32>
    %16 = arith.select %13, %15, %4 : vector<2x256xi1>, vector<2x256xi32>
    %c32_i32 = arith.constant 32 : i32
    %17 = vector.broadcast %c32_i32 : i32 to vector<2x256xi32>
    %18 = arith.cmpi slt, %16, %17 : vector<2x256xi32>
    %c0 = arith.constant 0 : index
    %c0_3 = arith.constant 0 : index
    %c0_4 = arith.constant 0 : index
    %19 = vector.load %arg1[%c0, %c0_3, %c0_4] : memref<2x16x32xf32, #tpu.memory_space<vmem>>, vector<2x16x32xf32>
    %20 = vector.shape_cast %19 : vector<2x16x32xf32> to vector<32x32xf32>
    %21 = arith.truncf %20 : vector<32x32xf32> to vector<32x32xbf16>
    %c0_5 = arith.constant 0 : index
    %c0_6 = arith.constant 0 : index
    %22 = vector.load %arg3[%c0_5, %c0_6] : memref<32x768xbf16, #tpu.memory_space<vmem>>, vector<32x768xbf16>
    %cst = arith.constant dense<0.000000e+00> : vector<32x768xf32>
    %23 = tpu.matmul %21, %22, %cst {dimension_numbers = #tpu.dot_dimension_numbers<[1], [0], [0], [1], [0, 0, 1, 1], [], []>} : vector<32x32xbf16>, vector<32x768xbf16>, vector<32x768xf32> -> vector<32x768xf32>
    %c0_7 = arith.constant 0 : index
    %c0_8 = arith.constant 0 : index
    %24 = vector.load %arg5[%c0_7, %c0_8] : memref<1x768xf32, #tpu.memory_space<vmem>>, vector<1x768xf32>
    %25 = vector.broadcast %24 : vector<1x768xf32> to vector<32x768xf32>
    %26 = arith.addf %23, %25 : vector<32x768xf32>
    %27 = vector.shape_cast %26 : vector<32x768xf32> to vector<2x16x768xf32>
    %28 = vector.extract_strided_slice %27 {offsets = [0, 0, 0], sizes = [2, 8, 256], strides = [1, 1, 1]} : vector<2x16x768xf32> to vector<2x8x256xf32>
    %c0_9 = arith.constant 0 : index
    %c0_10 = arith.constant 0 : index
    %c0_11 = arith.constant 0 : index
    %29 = vector.load %arg4[%c0_9, %c0_10, %c0_11] : memref<3x64x256xbf16, #tpu.memory_space<vmem>>, vector<1x64x256xbf16>
    %30 = vector.shape_cast %29 : vector<1x64x256xbf16> to vector<64x256xbf16>
    %cst_12 = arith.constant 0.000000e+00 : f32
    %31 = vector.broadcast %cst_12 : f32 to vector<2x64xf32>
    %cst_13 = arith.constant 0.000000e+00 : f32
    %32 = vector.broadcast %cst_13 : f32 to vector<2x64xf32>
    %33 = vector.extract_strided_slice %28 {offsets = [0, 0, 0], sizes = [2, 1, 256], strides = [1, 1, 1]} : vector<2x8x256xf32> to vector<2x1x256xf32>
    %34 = vector.shape_cast %33 : vector<2x1x256xf32> to vector<2x256xf32>
    %35 = vector.extract_strided_slice %28 {offsets = [0, 7, 0], sizes = [2, 1, 256], strides = [1, 1, 1]} : vector<2x8x256xf32> to vector<2x1x256xf32>
    %36 = vector.shape_cast %35 : vector<2x1x256xf32> to vector<2x256xf32>
    %37 = arith.select %18, %34, %36 : vector<2x256xi1>, vector<2x256xf32>
    %38 = arith.truncf %31 : vector<2x64xf32> to vector<2x64xbf16>
    %cst_14 = arith.constant dense<0.000000e+00> : vector<2x256xf32>
    %39 = tpu.matmul %38, %30, %cst_14 {dimension_numbers = #tpu.dot_dimension_numbers<[1], [0], [0], [1], [0, 0, 1, 1], [], []>} : vector<2x64xbf16>, vector<64x256xbf16>, vector<2x256xf32> -> vector<2x256xf32>
    %40 = arith.addf %37, %39 : vector<2x256xf32>
    %41 = vector.extract_strided_slice %40 {offsets = [0, 0], sizes = [2, 192], strides = [1, 1]} : vector<2x256xf32> to vector<2x192xf32>
    %42 = arith.negf %41 : vector<2x192xf32>
    %43 = math.exp %42 : vector<2x192xf32>
    %cst_15 = arith.constant 1.000000e+00 : f32
    %44 = vector.broadcast %cst_15 : f32 to vector<2x192xf32>
    %45 = arith.addf %44, %43 : vector<2x192xf32>
    %46 = arith.divf %44, %45 : vector<2x192xf32>
    %47 = vector.extract_strided_slice %40 {offsets = [0, 192], sizes = [2, 64], strides = [1, 1]} : vector<2x256xf32> to vector<2x64xf32>
    %48 = math.tanh %47 : vector<2x64xf32>
    %49 = vector.extract_strided_slice %46 {offsets = [0, 0], sizes = [2, 64], strides = [1, 1]} : vector<2x192xf32> to vector<2x64xf32>
    %50 = vector.extract_strided_slice %46 {offsets = [0, 64], sizes = [2, 64], strides = [1, 1]} : vector<2x192xf32> to vector<2x64xf32>
    %51 = vector.extract_strided_slice %46 {offsets = [0, 128], sizes = [2, 64], strides = [1, 1]} : vector<2x192xf32> to vector<2x64xf32>
    %52 = arith.mulf %50, %32 : vector<2x64xf32>
    %53 = arith.mulf %49, %48 : vector<2x64xf32>
    %54 = arith.addf %52, %53 : vector<2x64xf32>
    %55 = math.tanh %54 : vector<2x64xf32>
    %56 = arith.mulf %51, %55 : vector<2x64xf32>
    %57 = vector.extract_strided_slice %28 {offsets = [0, 1, 0], sizes = [2, 1, 256], strides = [1, 1, 1]} : vector<2x8x256xf32> to vector<2x1x256xf32>
    %58 = vector.shape_cast %57 : vector<2x1x256xf32> to vector<2x256xf32>
    %59 = vector.extract_strided_slice %28 {offsets = [0, 6, 0], sizes = [2, 1, 256], strides = [1, 1, 1]} : vector<2x8x256xf32> to vector<2x1x256xf32>
    %60 = vector.shape_cast %59 : vector<2x1x256xf32> to vector<2x256xf32>
    %61 = arith.select %18, %58, %60 : vector<2x256xi1>, vector<2x256xf32>
    %62 = arith.truncf %56 : vector<2x64xf32> to vector<2x64xbf16>
    %cst_16 = arith.constant dense<0.000000e+00> : vector<2x256xf32>
    %63 = tpu.matmul %62, %30, %cst_16 {dimension_numbers = #tpu.dot_dimension_numbers<[1], [0], [0], [1], [0, 0, 1, 1], [], []>} : vector<2x64xbf16>, vector<64x256xbf16>, vector<2x256xf32> -> vector<2x256xf32>
    %64 = arith.addf %61, %63 : vector<2x256xf32>
    %65 = vector.extract_strided_slice %64 {offsets = [0, 0], sizes = [2, 192], strides = [1, 1]} : vector<2x256xf32> to vector<2x192xf32>
    %66 = arith.negf %65 : vector<2x192xf32>
    %67 = math.exp %66 : vector<2x192xf32>
    %cst_17 = arith.constant 1.000000e+00 : f32
    %68 = vector.broadcast %cst_17 : f32 to vector<2x192xf32>
    %69 = arith.addf %68, %67 : vector<2x192xf32>
    %70 = arith.divf %68, %69 : vector<2x192xf32>
    %71 = vector.extract_strided_slice %64 {offsets = [0, 192], sizes = [2, 64], strides = [1, 1]} : vector<2x256xf32> to vector<2x64xf32>
    %72 = math.tanh %71 : vector<2x64xf32>
    %73 = vector.extract_strided_slice %70 {offsets = [0, 0], sizes = [2, 64], strides = [1, 1]} : vector<2x192xf32> to vector<2x64xf32>
    %74 = vector.extract_strided_slice %70 {offsets = [0, 64], sizes = [2, 64], strides = [1, 1]} : vector<2x192xf32> to vector<2x64xf32>
    %75 = vector.extract_strided_slice %70 {offsets = [0, 128], sizes = [2, 64], strides = [1, 1]} : vector<2x192xf32> to vector<2x64xf32>
    %76 = arith.mulf %74, %54 : vector<2x64xf32>
    %77 = arith.mulf %73, %72 : vector<2x64xf32>
    %78 = arith.addf %76, %77 : vector<2x64xf32>
    %79 = math.tanh %78 : vector<2x64xf32>
    %80 = arith.mulf %75, %79 : vector<2x64xf32>
    %81 = vector.extract_strided_slice %28 {offsets = [0, 2, 0], sizes = [2, 1, 256], strides = [1, 1, 1]} : vector<2x8x256xf32> to vector<2x1x256xf32>
    %82 = vector.shape_cast %81 : vector<2x1x256xf32> to vector<2x256xf32>
    %83 = vector.extract_strided_slice %28 {offsets = [0, 5, 0], sizes = [2, 1, 256], strides = [1, 1, 1]} : vector<2x8x256xf32> to vector<2x1x256xf32>
    %84 = vector.shape_cast %83 : vector<2x1x256xf32> to vector<2x256xf32>
    %85 = arith.select %18, %82, %84 : vector<2x256xi1>, vector<2x256xf32>
    %86 = arith.truncf %80 : vector<2x64xf32> to vector<2x64xbf16>
    %cst_18 = arith.constant dense<0.000000e+00> : vector<2x256xf32>
    %87 = tpu.matmul %86, %30, %cst_18 {dimension_numbers = #tpu.dot_dimension_numbers<[1], [0], [0], [1], [0, 0, 1, 1], [], []>} : vector<2x64xbf16>, vector<64x256xbf16>, vector<2x256xf32> -> vector<2x256xf32>
    %88 = arith.addf %85, %87 : vector<2x256xf32>
    %89 = vector.extract_strided_slice %88 {offsets = [0, 0], sizes = [2, 192], strides = [1, 1]} : vector<2x256xf32> to vector<2x192xf32>
    %90 = arith.negf %89 : vector<2x192xf32>
    %91 = math.exp %90 : vector<2x192xf32>
    %cst_19 = arith.constant 1.000000e+00 : f32
    %92 = vector.broadcast %cst_19 : f32 to vector<2x192xf32>
    %93 = arith.addf %92, %91 : vector<2x192xf32>
    %94 = arith.divf %92, %93 : vector<2x192xf32>
    %95 = vector.extract_strided_slice %88 {offsets = [0, 192], sizes = [2, 64], strides = [1, 1]} : vector<2x256xf32> to vector<2x64xf32>
    %96 = math.tanh %95 : vector<2x64xf32>
    %97 = vector.extract_strided_slice %94 {offsets = [0, 0], sizes = [2, 64], strides = [1, 1]} : vector<2x192xf32> to vector<2x64xf32>
    %98 = vector.extract_strided_slice %94 {offsets = [0, 64], sizes = [2, 64], strides = [1, 1]} : vector<2x192xf32> to vector<2x64xf32>
    %99 = vector.extract_strided_slice %94 {offsets = [0, 128], sizes = [2, 64], strides = [1, 1]} : vector<2x192xf32> to vector<2x64xf32>
    %100 = arith.mulf %98, %78 : vector<2x64xf32>
    %101 = arith.mulf %97, %96 : vector<2x64xf32>
    %102 = arith.addf %100, %101 : vector<2x64xf32>
    %103 = math.tanh %102 : vector<2x64xf32>
    %104 = arith.mulf %99, %103 : vector<2x64xf32>
    %105 = vector.extract_strided_slice %28 {offsets = [0, 3, 0], sizes = [2, 1, 256], strides = [1, 1, 1]} : vector<2x8x256xf32> to vector<2x1x256xf32>
    %106 = vector.shape_cast %105 : vector<2x1x256xf32> to vector<2x256xf32>
    %107 = vector.extract_strided_slice %28 {offsets = [0, 4, 0], sizes = [2, 1, 256], strides = [1, 1, 1]} : vector<2x8x256xf32> to vector<2x1x256xf32>
    %108 = vector.shape_cast %107 : vector<2x1x256xf32> to vector<2x256xf32>
    %109 = arith.select %18, %106, %108 : vector<2x256xi1>, vector<2x256xf32>
    %110 = arith.truncf %104 : vector<2x64xf32> to vector<2x64xbf16>
    %cst_20 = arith.constant dense<0.000000e+00> : vector<2x256xf32>
    %111 = tpu.matmul %110, %30, %cst_20 {dimension_numbers = #tpu.dot_dimension_numbers<[1], [0], [0], [1], [0, 0, 1, 1], [], []>} : vector<2x64xbf16>, vector<64x256xbf16>, vector<2x256xf32> -> vector<2x256xf32>
    %112 = arith.addf %109, %111 : vector<2x256xf32>
    %113 = vector.extract_strided_slice %112 {offsets = [0, 0], sizes = [2, 192], strides = [1, 1]} : vector<2x256xf32> to vector<2x192xf32>
    %114 = arith.negf %113 : vector<2x192xf32>
    %115 = math.exp %114 : vector<2x192xf32>
    %cst_21 = arith.constant 1.000000e+00 : f32
    %116 = vector.broadcast %cst_21 : f32 to vector<2x192xf32>
    %117 = arith.addf %116, %115 : vector<2x192xf32>
    %118 = arith.divf %116, %117 : vector<2x192xf32>
    %119 = vector.extract_strided_slice %112 {offsets = [0, 192], sizes = [2, 64], strides = [1, 1]} : vector<2x256xf32> to vector<2x64xf32>
    %120 = math.tanh %119 : vector<2x64xf32>
    %121 = vector.extract_strided_slice %118 {offsets = [0, 0], sizes = [2, 64], strides = [1, 1]} : vector<2x192xf32> to vector<2x64xf32>
    %122 = vector.extract_strided_slice %118 {offsets = [0, 64], sizes = [2, 64], strides = [1, 1]} : vector<2x192xf32> to vector<2x64xf32>
    %123 = vector.extract_strided_slice %118 {offsets = [0, 128], sizes = [2, 64], strides = [1, 1]} : vector<2x192xf32> to vector<2x64xf32>
    %124 = arith.mulf %122, %102 : vector<2x64xf32>
    %125 = arith.mulf %121, %120 : vector<2x64xf32>
    %126 = arith.addf %124, %125 : vector<2x64xf32>
    %127 = math.tanh %126 : vector<2x64xf32>
    %128 = arith.mulf %123, %127 : vector<2x64xf32>
    %129 = vector.extract_strided_slice %28 {offsets = [0, 4, 0], sizes = [2, 1, 256], strides = [1, 1, 1]} : vector<2x8x256xf32> to vector<2x1x256xf32>
    %130 = vector.shape_cast %129 : vector<2x1x256xf32> to vector<2x256xf32>
    %131 = vector.extract_strided_slice %28 {offsets = [0, 3, 0], sizes = [2, 1, 256], strides = [1, 1, 1]} : vector<2x8x256xf32> to vector<2x1x256xf32>
    %132 = vector.shape_cast %131 : vector<2x1x256xf32> to vector<2x256xf32>
    %133 = arith.select %18, %130, %132 : vector<2x256xi1>, vector<2x256xf32>
    %134 = arith.truncf %128 : vector<2x64xf32> to vector<2x64xbf16>
    %cst_22 = arith.constant dense<0.000000e+00> : vector<2x256xf32>
    %135 = tpu.matmul %134, %30, %cst_22 {dimension_numbers = #tpu.dot_dimension_numbers<[1], [0], [0], [1], [0, 0, 1, 1], [], []>} : vector<2x64xbf16>, vector<64x256xbf16>, vector<2x256xf32> -> vector<2x256xf32>
    %136 = arith.addf %133, %135 : vector<2x256xf32>
    %137 = vector.extract_strided_slice %136 {offsets = [0, 0], sizes = [2, 192], strides = [1, 1]} : vector<2x256xf32> to vector<2x192xf32>
    %138 = arith.negf %137 : vector<2x192xf32>
    %139 = math.exp %138 : vector<2x192xf32>
    %cst_23 = arith.constant 1.000000e+00 : f32
    %140 = vector.broadcast %cst_23 : f32 to vector<2x192xf32>
    %141 = arith.addf %140, %139 : vector<2x192xf32>
    %142 = arith.divf %140, %141 : vector<2x192xf32>
    %143 = vector.extract_strided_slice %136 {offsets = [0, 192], sizes = [2, 64], strides = [1, 1]} : vector<2x256xf32> to vector<2x64xf32>
    %144 = math.tanh %143 : vector<2x64xf32>
    %145 = vector.extract_strided_slice %142 {offsets = [0, 0], sizes = [2, 64], strides = [1, 1]} : vector<2x192xf32> to vector<2x64xf32>
    %146 = vector.extract_strided_slice %142 {offsets = [0, 64], sizes = [2, 64], strides = [1, 1]} : vector<2x192xf32> to vector<2x64xf32>
    %147 = vector.extract_strided_slice %142 {offsets = [0, 128], sizes = [2, 64], strides = [1, 1]} : vector<2x192xf32> to vector<2x64xf32>
    %148 = arith.mulf %146, %126 : vector<2x64xf32>
    %149 = arith.mulf %145, %144 : vector<2x64xf32>
    %150 = arith.addf %148, %149 : vector<2x64xf32>
    %151 = math.tanh %150 : vector<2x64xf32>
    %152 = arith.mulf %147, %151 : vector<2x64xf32>
    %153 = vector.extract_strided_slice %28 {offsets = [0, 5, 0], sizes = [2, 1, 256], strides = [1, 1, 1]} : vector<2x8x256xf32> to vector<2x1x256xf32>
    %154 = vector.shape_cast %153 : vector<2x1x256xf32> to vector<2x256xf32>
    %155 = vector.extract_strided_slice %28 {offsets = [0, 2, 0], sizes = [2, 1, 256], strides = [1, 1, 1]} : vector<2x8x256xf32> to vector<2x1x256xf32>
    %156 = vector.shape_cast %155 : vector<2x1x256xf32> to vector<2x256xf32>
    %157 = arith.select %18, %154, %156 : vector<2x256xi1>, vector<2x256xf32>
    %158 = arith.truncf %152 : vector<2x64xf32> to vector<2x64xbf16>
    %cst_24 = arith.constant dense<0.000000e+00> : vector<2x256xf32>
    %159 = tpu.matmul %158, %30, %cst_24 {dimension_numbers = #tpu.dot_dimension_numbers<[1], [0], [0], [1], [0, 0, 1, 1], [], []>} : vector<2x64xbf16>, vector<64x256xbf16>, vector<2x256xf32> -> vector<2x256xf32>
    %160 = arith.addf %157, %159 : vector<2x256xf32>
    %161 = vector.extract_strided_slice %160 {offsets = [0, 0], sizes = [2, 192], strides = [1, 1]} : vector<2x256xf32> to vector<2x192xf32>
    %162 = arith.negf %161 : vector<2x192xf32>
    %163 = math.exp %162 : vector<2x192xf32>
    %cst_25 = arith.constant 1.000000e+00 : f32
    %164 = vector.broadcast %cst_25 : f32 to vector<2x192xf32>
    %165 = arith.addf %164, %163 : vector<2x192xf32>
    %166 = arith.divf %164, %165 : vector<2x192xf32>
    %167 = vector.extract_strided_slice %160 {offsets = [0, 192], sizes = [2, 64], strides = [1, 1]} : vector<2x256xf32> to vector<2x64xf32>
    %168 = math.tanh %167 : vector<2x64xf32>
    %169 = vector.extract_strided_slice %166 {offsets = [0, 0], sizes = [2, 64], strides = [1, 1]} : vector<2x192xf32> to vector<2x64xf32>
    %170 = vector.extract_strided_slice %166 {offsets = [0, 64], sizes = [2, 64], strides = [1, 1]} : vector<2x192xf32> to vector<2x64xf32>
    %171 = vector.extract_strided_slice %166 {offsets = [0, 128], sizes = [2, 64], strides = [1, 1]} : vector<2x192xf32> to vector<2x64xf32>
    %172 = arith.mulf %170, %150 : vector<2x64xf32>
    %173 = arith.mulf %169, %168 : vector<2x64xf32>
    %174 = arith.addf %172, %173 : vector<2x64xf32>
    %175 = math.tanh %174 : vector<2x64xf32>
    %176 = arith.mulf %171, %175 : vector<2x64xf32>
    %177 = vector.extract_strided_slice %28 {offsets = [0, 6, 0], sizes = [2, 1, 256], strides = [1, 1, 1]} : vector<2x8x256xf32> to vector<2x1x256xf32>
    %178 = vector.shape_cast %177 : vector<2x1x256xf32> to vector<2x256xf32>
    %179 = vector.extract_strided_slice %28 {offsets = [0, 1, 0], sizes = [2, 1, 256], strides = [1, 1, 1]} : vector<2x8x256xf32> to vector<2x1x256xf32>
    %180 = vector.shape_cast %179 : vector<2x1x256xf32> to vector<2x256xf32>
    %181 = arith.select %18, %178, %180 : vector<2x256xi1>, vector<2x256xf32>
    %182 = arith.truncf %176 : vector<2x64xf32> to vector<2x64xbf16>
    %cst_26 = arith.constant dense<0.000000e+00> : vector<2x256xf32>
    %183 = tpu.matmul %182, %30, %cst_26 {dimension_numbers = #tpu.dot_dimension_numbers<[1], [0], [0], [1], [0, 0, 1, 1], [], []>} : vector<2x64xbf16>, vector<64x256xbf16>, vector<2x256xf32> -> vector<2x256xf32>
    %184 = arith.addf %181, %183 : vector<2x256xf32>
    %185 = vector.extract_strided_slice %184 {offsets = [0, 0], sizes = [2, 192], strides = [1, 1]} : vector<2x256xf32> to vector<2x192xf32>
    %186 = arith.negf %185 : vector<2x192xf32>
    %187 = math.exp %186 : vector<2x192xf32>
    %cst_27 = arith.constant 1.000000e+00 : f32
    %188 = vector.broadcast %cst_27 : f32 to vector<2x192xf32>
    %189 = arith.addf %188, %187 : vector<2x192xf32>
    %190 = arith.divf %188, %189 : vector<2x192xf32>
    %191 = vector.extract_strided_slice %184 {offsets = [0, 192], sizes = [2, 64], strides = [1, 1]} : vector<2x256xf32> to vector<2x64xf32>
    %192 = math.tanh %191 : vector<2x64xf32>
    %193 = vector.extract_strided_slice %190 {offsets = [0, 0], sizes = [2, 64], strides = [1, 1]} : vector<2x192xf32> to vector<2x64xf32>
    %194 = vector.extract_strided_slice %190 {offsets = [0, 64], sizes = [2, 64], strides = [1, 1]} : vector<2x192xf32> to vector<2x64xf32>
    %195 = vector.extract_strided_slice %190 {offsets = [0, 128], sizes = [2, 64], strides = [1, 1]} : vector<2x192xf32> to vector<2x64xf32>
    %196 = arith.mulf %194, %174 : vector<2x64xf32>
    %197 = arith.mulf %193, %192 : vector<2x64xf32>
    %198 = arith.addf %196, %197 : vector<2x64xf32>
    %199 = math.tanh %198 : vector<2x64xf32>
    %200 = arith.mulf %195, %199 : vector<2x64xf32>
    %201 = vector.extract_strided_slice %28 {offsets = [0, 7, 0], sizes = [2, 1, 256], strides = [1, 1, 1]} : vector<2x8x256xf32> to vector<2x1x256xf32>
    %202 = vector.shape_cast %201 : vector<2x1x256xf32> to vector<2x256xf32>
    %203 = vector.extract_strided_slice %28 {offsets = [0, 0, 0], sizes = [2, 1, 256], strides = [1, 1, 1]} : vector<2x8x256xf32> to vector<2x1x256xf32>
    %204 = vector.shape_cast %203 : vector<2x1x256xf32> to vector<2x256xf32>
    %205 = arith.select %18, %202, %204 : vector<2x256xi1>, vector<2x256xf32>
    %206 = arith.truncf %200 : vector<2x64xf32> to vector<2x64xbf16>
    %cst_28 = arith.constant dense<0.000000e+00> : vector<2x256xf32>
    %207 = tpu.matmul %206, %30, %cst_28 {dimension_numbers = #tpu.dot_dimension_numbers<[1], [0], [0], [1], [0, 0, 1, 1], [], []>} : vector<2x64xbf16>, vector<64x256xbf16>, vector<2x256xf32> -> vector<2x256xf32>
    %208 = arith.addf %205, %207 : vector<2x256xf32>
    %209 = vector.extract_strided_slice %208 {offsets = [0, 0], sizes = [2, 192], strides = [1, 1]} : vector<2x256xf32> to vector<2x192xf32>
    %210 = arith.negf %209 : vector<2x192xf32>
    %211 = math.exp %210 : vector<2x192xf32>
    %cst_29 = arith.constant 1.000000e+00 : f32
    %212 = vector.broadcast %cst_29 : f32 to vector<2x192xf32>
    %213 = arith.addf %212, %211 : vector<2x192xf32>
    %214 = arith.divf %212, %213 : vector<2x192xf32>
    %215 = vector.extract_strided_slice %208 {offsets = [0, 192], sizes = [2, 64], strides = [1, 1]} : vector<2x256xf32> to vector<2x64xf32>
    %216 = math.tanh %215 : vector<2x64xf32>
    %217 = vector.extract_strided_slice %214 {offsets = [0, 0], sizes = [2, 64], strides = [1, 1]} : vector<2x192xf32> to vector<2x64xf32>
    %218 = vector.extract_strided_slice %214 {offsets = [0, 64], sizes = [2, 64], strides = [1, 1]} : vector<2x192xf32> to vector<2x64xf32>
    %219 = vector.extract_strided_slice %214 {offsets = [0, 128], sizes = [2, 64], strides = [1, 1]} : vector<2x192xf32> to vector<2x64xf32>
    %220 = arith.mulf %218, %198 : vector<2x64xf32>
    %221 = arith.mulf %217, %216 : vector<2x64xf32>
    %222 = arith.addf %220, %221 : vector<2x64xf32>
    %223 = math.tanh %222 : vector<2x64xf32>
    %224 = arith.mulf %219, %223 : vector<2x64xf32>
    %225 = vector.shape_cast %56 : vector<2x64xf32> to vector<2x1x64xf32>
    %226 = vector.shape_cast %80 : vector<2x64xf32> to vector<2x1x64xf32>
    %227 = vector.shape_cast %104 : vector<2x64xf32> to vector<2x1x64xf32>
    %228 = vector.shape_cast %128 : vector<2x64xf32> to vector<2x1x64xf32>
    %229 = vector.shape_cast %152 : vector<2x64xf32> to vector<2x1x64xf32>
    %230 = vector.shape_cast %176 : vector<2x64xf32> to vector<2x1x64xf32>
    %231 = vector.shape_cast %200 : vector<2x64xf32> to vector<2x1x64xf32>
    %232 = vector.shape_cast %224 : vector<2x64xf32> to vector<2x1x64xf32>
    %233 = tpu.concatenate %225, %226, %227, %228, %229, %230, %231, %232 in 1 : vector<2x1x64xf32>, vector<2x1x64xf32>, vector<2x1x64xf32>, vector<2x1x64xf32>, vector<2x1x64xf32>, vector<2x1x64xf32>, vector<2x1x64xf32>, vector<2x1x64xf32> -> vector<2x8x64xf32>
    %234 = vector.shape_cast %224 : vector<2x64xf32> to vector<2x1x64xf32>
    %235 = vector.shape_cast %200 : vector<2x64xf32> to vector<2x1x64xf32>
    %236 = vector.shape_cast %176 : vector<2x64xf32> to vector<2x1x64xf32>
    %237 = vector.shape_cast %152 : vector<2x64xf32> to vector<2x1x64xf32>
    %238 = vector.shape_cast %128 : vector<2x64xf32> to vector<2x1x64xf32>
    %239 = vector.shape_cast %104 : vector<2x64xf32> to vector<2x1x64xf32>
    %240 = vector.shape_cast %80 : vector<2x64xf32> to vector<2x1x64xf32>
    %241 = vector.shape_cast %56 : vector<2x64xf32> to vector<2x1x64xf32>
    %242 = tpu.concatenate %234, %235, %236, %237, %238, %239, %240, %241 in 1 : vector<2x1x64xf32>, vector<2x1x64xf32>, vector<2x1x64xf32>, vector<2x1x64xf32>, vector<2x1x64xf32>, vector<2x1x64xf32>, vector<2x1x64xf32>, vector<2x1x64xf32> -> vector<2x8x64xf32>
    %243 = tpu.iota {dimensions = array<i32: 2>} : vector<2x8x64xi32>
    %c32_i32_30 = arith.constant 32 : i32
    %244 = vector.broadcast %c32_i32_30 : i32 to vector<2x8x64xi32>
    %245 = arith.cmpi slt, %243, %244 : vector<2x8x64xi32>
    %246 = arith.select %245, %233, %242 : vector<2x8x64xi1>, vector<2x8x64xf32>
    %247 = vector.extract_strided_slice %27 {offsets = [0, 8, 256], sizes = [2, 4, 256], strides = [1, 1, 1]} : vector<2x16x768xf32> to vector<2x4x256xf32>
    %c1 = arith.constant 1 : index
    %c0_31 = arith.constant 0 : index
    %c0_32 = arith.constant 0 : index
    %248 = vector.load %arg4[%c1, %c0_31, %c0_32] : memref<3x64x256xbf16, #tpu.memory_space<vmem>>, vector<1x64x256xbf16>
    %249 = vector.shape_cast %248 : vector<1x64x256xbf16> to vector<64x256xbf16>
    %cst_33 = arith.constant 0.000000e+00 : f32
    %250 = vector.broadcast %cst_33 : f32 to vector<2x64xf32>
    %cst_34 = arith.constant 0.000000e+00 : f32
    %251 = vector.broadcast %cst_34 : f32 to vector<2x64xf32>
    %252 = vector.extract_strided_slice %247 {offsets = [0, 0, 0], sizes = [2, 1, 256], strides = [1, 1, 1]} : vector<2x4x256xf32> to vector<2x1x256xf32>
    %253 = vector.shape_cast %252 : vector<2x1x256xf32> to vector<2x256xf32>
    %254 = vector.extract_strided_slice %247 {offsets = [0, 3, 0], sizes = [2, 1, 256], strides = [1, 1, 1]} : vector<2x4x256xf32> to vector<2x1x256xf32>
    %255 = vector.shape_cast %254 : vector<2x1x256xf32> to vector<2x256xf32>
    %256 = arith.select %18, %253, %255 : vector<2x256xi1>, vector<2x256xf32>
    %257 = arith.truncf %250 : vector<2x64xf32> to vector<2x64xbf16>
    %cst_35 = arith.constant dense<0.000000e+00> : vector<2x256xf32>
    %258 = tpu.matmul %257, %249, %cst_35 {dimension_numbers = #tpu.dot_dimension_numbers<[1], [0], [0], [1], [0, 0, 1, 1], [], []>} : vector<2x64xbf16>, vector<64x256xbf16>, vector<2x256xf32> -> vector<2x256xf32>
    %259 = arith.addf %256, %258 : vector<2x256xf32>
    %260 = vector.extract_strided_slice %259 {offsets = [0, 0], sizes = [2, 192], strides = [1, 1]} : vector<2x256xf32> to vector<2x192xf32>
    %261 = arith.negf %260 : vector<2x192xf32>
    %262 = math.exp %261 : vector<2x192xf32>
    %cst_36 = arith.constant 1.000000e+00 : f32
    %263 = vector.broadcast %cst_36 : f32 to vector<2x192xf32>
    %264 = arith.addf %263, %262 : vector<2x192xf32>
    %265 = arith.divf %263, %264 : vector<2x192xf32>
    %266 = vector.extract_strided_slice %259 {offsets = [0, 192], sizes = [2, 64], strides = [1, 1]} : vector<2x256xf32> to vector<2x64xf32>
    %267 = math.tanh %266 : vector<2x64xf32>
    %268 = vector.extract_strided_slice %265 {offsets = [0, 0], sizes = [2, 64], strides = [1, 1]} : vector<2x192xf32> to vector<2x64xf32>
    %269 = vector.extract_strided_slice %265 {offsets = [0, 64], sizes = [2, 64], strides = [1, 1]} : vector<2x192xf32> to vector<2x64xf32>
    %270 = vector.extract_strided_slice %265 {offsets = [0, 128], sizes = [2, 64], strides = [1, 1]} : vector<2x192xf32> to vector<2x64xf32>
    %271 = arith.mulf %269, %251 : vector<2x64xf32>
    %272 = arith.mulf %268, %267 : vector<2x64xf32>
    %273 = arith.addf %271, %272 : vector<2x64xf32>
    %274 = math.tanh %273 : vector<2x64xf32>
    %275 = arith.mulf %270, %274 : vector<2x64xf32>
    %276 = vector.extract_strided_slice %247 {offsets = [0, 1, 0], sizes = [2, 1, 256], strides = [1, 1, 1]} : vector<2x4x256xf32> to vector<2x1x256xf32>
    %277 = vector.shape_cast %276 : vector<2x1x256xf32> to vector<2x256xf32>
    %278 = vector.extract_strided_slice %247 {offsets = [0, 2, 0], sizes = [2, 1, 256], strides = [1, 1, 1]} : vector<2x4x256xf32> to vector<2x1x256xf32>
    %279 = vector.shape_cast %278 : vector<2x1x256xf32> to vector<2x256xf32>
    %280 = arith.select %18, %277, %279 : vector<2x256xi1>, vector<2x256xf32>
    %281 = arith.truncf %275 : vector<2x64xf32> to vector<2x64xbf16>
    %cst_37 = arith.constant dense<0.000000e+00> : vector<2x256xf32>
    %282 = tpu.matmul %281, %249, %cst_37 {dimension_numbers = #tpu.dot_dimension_numbers<[1], [0], [0], [1], [0, 0, 1, 1], [], []>} : vector<2x64xbf16>, vector<64x256xbf16>, vector<2x256xf32> -> vector<2x256xf32>
    %283 = arith.addf %280, %282 : vector<2x256xf32>
    %284 = vector.extract_strided_slice %283 {offsets = [0, 0], sizes = [2, 192], strides = [1, 1]} : vector<2x256xf32> to vector<2x192xf32>
    %285 = arith.negf %284 : vector<2x192xf32>
    %286 = math.exp %285 : vector<2x192xf32>
    %cst_38 = arith.constant 1.000000e+00 : f32
    %287 = vector.broadcast %cst_38 : f32 to vector<2x192xf32>
    %288 = arith.addf %287, %286 : vector<2x192xf32>
    %289 = arith.divf %287, %288 : vector<2x192xf32>
    %290 = vector.extract_strided_slice %283 {offsets = [0, 192], sizes = [2, 64], strides = [1, 1]} : vector<2x256xf32> to vector<2x64xf32>
    %291 = math.tanh %290 : vector<2x64xf32>
    %292 = vector.extract_strided_slice %289 {offsets = [0, 0], sizes = [2, 64], strides = [1, 1]} : vector<2x192xf32> to vector<2x64xf32>
    %293 = vector.extract_strided_slice %289 {offsets = [0, 64], sizes = [2, 64], strides = [1, 1]} : vector<2x192xf32> to vector<2x64xf32>
    %294 = vector.extract_strided_slice %289 {offsets = [0, 128], sizes = [2, 64], strides = [1, 1]} : vector<2x192xf32> to vector<2x64xf32>
    %295 = arith.mulf %293, %273 : vector<2x64xf32>
    %296 = arith.mulf %292, %291 : vector<2x64xf32>
    %297 = arith.addf %295, %296 : vector<2x64xf32>
    %298 = math.tanh %297 : vector<2x64xf32>
    %299 = arith.mulf %294, %298 : vector<2x64xf32>
    %300 = vector.extract_strided_slice %247 {offsets = [0, 2, 0], sizes = [2, 1, 256], strides = [1, 1, 1]} : vector<2x4x256xf32> to vector<2x1x256xf32>
    %301 = vector.shape_cast %300 : vector<2x1x256xf32> to vector<2x256xf32>
    %302 = vector.extract_strided_slice %247 {offsets = [0, 1, 0], sizes = [2, 1, 256], strides = [1, 1, 1]} : vector<2x4x256xf32> to vector<2x1x256xf32>
    %303 = vector.shape_cast %302 : vector<2x1x256xf32> to vector<2x256xf32>
    %304 = arith.select %18, %301, %303 : vector<2x256xi1>, vector<2x256xf32>
    %305 = arith.truncf %299 : vector<2x64xf32> to vector<2x64xbf16>
    %cst_39 = arith.constant dense<0.000000e+00> : vector<2x256xf32>
    %306 = tpu.matmul %305, %249, %cst_39 {dimension_numbers = #tpu.dot_dimension_numbers<[1], [0], [0], [1], [0, 0, 1, 1], [], []>} : vector<2x64xbf16>, vector<64x256xbf16>, vector<2x256xf32> -> vector<2x256xf32>
    %307 = arith.addf %304, %306 : vector<2x256xf32>
    %308 = vector.extract_strided_slice %307 {offsets = [0, 0], sizes = [2, 192], strides = [1, 1]} : vector<2x256xf32> to vector<2x192xf32>
    %309 = arith.negf %308 : vector<2x192xf32>
    %310 = math.exp %309 : vector<2x192xf32>
    %cst_40 = arith.constant 1.000000e+00 : f32
    %311 = vector.broadcast %cst_40 : f32 to vector<2x192xf32>
    %312 = arith.addf %311, %310 : vector<2x192xf32>
    %313 = arith.divf %311, %312 : vector<2x192xf32>
    %314 = vector.extract_strided_slice %307 {offsets = [0, 192], sizes = [2, 64], strides = [1, 1]} : vector<2x256xf32> to vector<2x64xf32>
    %315 = math.tanh %314 : vector<2x64xf32>
    %316 = vector.extract_strided_slice %313 {offsets = [0, 0], sizes = [2, 64], strides = [1, 1]} : vector<2x192xf32> to vector<2x64xf32>
    %317 = vector.extract_strided_slice %313 {offsets = [0, 64], sizes = [2, 64], strides = [1, 1]} : vector<2x192xf32> to vector<2x64xf32>
    %318 = vector.extract_strided_slice %313 {offsets = [0, 128], sizes = [2, 64], strides = [1, 1]} : vector<2x192xf32> to vector<2x64xf32>
    %319 = arith.mulf %317, %297 : vector<2x64xf32>
    %320 = arith.mulf %316, %315 : vector<2x64xf32>
    %321 = arith.addf %319, %320 : vector<2x64xf32>
    %322 = math.tanh %321 : vector<2x64xf32>
    %323 = arith.mulf %318, %322 : vector<2x64xf32>
    %324 = vector.extract_strided_slice %247 {offsets = [0, 3, 0], sizes = [2, 1, 256], strides = [1, 1, 1]} : vector<2x4x256xf32> to vector<2x1x256xf32>
    %325 = vector.shape_cast %324 : vector<2x1x256xf32> to vector<2x256xf32>
    %326 = vector.extract_strided_slice %247 {offsets = [0, 0, 0], sizes = [2, 1, 256], strides = [1, 1, 1]} : vector<2x4x256xf32> to vector<2x1x256xf32>
    %327 = vector.shape_cast %326 : vector<2x1x256xf32> to vector<2x256xf32>
    %328 = arith.select %18, %325, %327 : vector<2x256xi1>, vector<2x256xf32>
    %329 = arith.truncf %323 : vector<2x64xf32> to vector<2x64xbf16>
    %cst_41 = arith.constant dense<0.000000e+00> : vector<2x256xf32>
    %330 = tpu.matmul %329, %249, %cst_41 {dimension_numbers = #tpu.dot_dimension_numbers<[1], [0], [0], [1], [0, 0, 1, 1], [], []>} : vector<2x64xbf16>, vector<64x256xbf16>, vector<2x256xf32> -> vector<2x256xf32>
    %331 = arith.addf %328, %330 : vector<2x256xf32>
    %332 = vector.extract_strided_slice %331 {offsets = [0, 0], sizes = [2, 192], strides = [1, 1]} : vector<2x256xf32> to vector<2x192xf32>
    %333 = arith.negf %332 : vector<2x192xf32>
    %334 = math.exp %333 : vector<2x192xf32>
    %cst_42 = arith.constant 1.000000e+00 : f32
    %335 = vector.broadcast %cst_42 : f32 to vector<2x192xf32>
    %336 = arith.addf %335, %334 : vector<2x192xf32>
    %337 = arith.divf %335, %336 : vector<2x192xf32>
    %338 = vector.extract_strided_slice %331 {offsets = [0, 192], sizes = [2, 64], strides = [1, 1]} : vector<2x256xf32> to vector<2x64xf32>
    %339 = math.tanh %338 : vector<2x64xf32>
    %340 = vector.extract_strided_slice %337 {offsets = [0, 0], sizes = [2, 64], strides = [1, 1]} : vector<2x192xf32> to vector<2x64xf32>
    %341 = vector.extract_strided_slice %337 {offsets = [0, 64], sizes = [2, 64], strides = [1, 1]} : vector<2x192xf32> to vector<2x64xf32>
    %342 = vector.extract_strided_slice %337 {offsets = [0, 128], sizes = [2, 64], strides = [1, 1]} : vector<2x192xf32> to vector<2x64xf32>
    %343 = arith.mulf %341, %321 : vector<2x64xf32>
    %344 = arith.mulf %340, %339 : vector<2x64xf32>
    %345 = arith.addf %343, %344 : vector<2x64xf32>
    %346 = math.tanh %345 : vector<2x64xf32>
    %347 = arith.mulf %342, %346 : vector<2x64xf32>
    %348 = vector.shape_cast %275 : vector<2x64xf32> to vector<2x1x64xf32>
    %349 = vector.shape_cast %299 : vector<2x64xf32> to vector<2x1x64xf32>
    %350 = vector.shape_cast %323 : vector<2x64xf32> to vector<2x1x64xf32>
    %351 = vector.shape_cast %347 : vector<2x64xf32> to vector<2x1x64xf32>
    %352 = tpu.concatenate %348, %349, %350, %351 in 1 : vector<2x1x64xf32>, vector<2x1x64xf32>, vector<2x1x64xf32>, vector<2x1x64xf32> -> vector<2x4x64xf32>
    %353 = vector.shape_cast %347 : vector<2x64xf32> to vector<2x1x64xf32>
    %354 = vector.shape_cast %323 : vector<2x64xf32> to vector<2x1x64xf32>
    %355 = vector.shape_cast %299 : vector<2x64xf32> to vector<2x1x64xf32>
    %356 = vector.shape_cast %275 : vector<2x64xf32> to vector<2x1x64xf32>
    %357 = tpu.concatenate %353, %354, %355, %356 in 1 : vector<2x1x64xf32>, vector<2x1x64xf32>, vector<2x1x64xf32>, vector<2x1x64xf32> -> vector<2x4x64xf32>
    %358 = tpu.iota {dimensions = array<i32: 2>} : vector<2x4x64xi32>
    %c32_i32_43 = arith.constant 32 : i32
    %359 = vector.broadcast %c32_i32_43 : i32 to vector<2x4x64xi32>
    %360 = arith.cmpi slt, %358, %359 : vector<2x4x64xi32>
    %361 = arith.select %360, %352, %357 : vector<2x4x64xi1>, vector<2x4x64xf32>
    %362 = vector.extract_strided_slice %27 {offsets = [0, 12, 512], sizes = [2, 2, 256], strides = [1, 1, 1]} : vector<2x16x768xf32> to vector<2x2x256xf32>
    %c2 = arith.constant 2 : index
    %c0_44 = arith.constant 0 : index
    %c0_45 = arith.constant 0 : index
    %363 = vector.load %arg4[%c2, %c0_44, %c0_45] : memref<3x64x256xbf16, #tpu.memory_space<vmem>>, vector<1x64x256xbf16>
    %364 = vector.shape_cast %363 : vector<1x64x256xbf16> to vector<64x256xbf16>
    %cst_46 = arith.constant 0.000000e+00 : f32
    %365 = vector.broadcast %cst_46 : f32 to vector<2x64xf32>
    %cst_47 = arith.constant 0.000000e+00 : f32
    %366 = vector.broadcast %cst_47 : f32 to vector<2x64xf32>
    %367 = vector.extract_strided_slice %362 {offsets = [0, 0, 0], sizes = [2, 1, 256], strides = [1, 1, 1]} : vector<2x2x256xf32> to vector<2x1x256xf32>
    %368 = vector.shape_cast %367 : vector<2x1x256xf32> to vector<2x256xf32>
    %369 = vector.extract_strided_slice %362 {offsets = [0, 1, 0], sizes = [2, 1, 256], strides = [1, 1, 1]} : vector<2x2x256xf32> to vector<2x1x256xf32>
    %370 = vector.shape_cast %369 : vector<2x1x256xf32> to vector<2x256xf32>
    %371 = arith.select %18, %368, %370 : vector<2x256xi1>, vector<2x256xf32>
    %372 = arith.truncf %365 : vector<2x64xf32> to vector<2x64xbf16>
    %cst_48 = arith.constant dense<0.000000e+00> : vector<2x256xf32>
    %373 = tpu.matmul %372, %364, %cst_48 {dimension_numbers = #tpu.dot_dimension_numbers<[1], [0], [0], [1], [0, 0, 1, 1], [], []>} : vector<2x64xbf16>, vector<64x256xbf16>, vector<2x256xf32> -> vector<2x256xf32>
    %374 = arith.addf %371, %373 : vector<2x256xf32>
    %375 = vector.extract_strided_slice %374 {offsets = [0, 0], sizes = [2, 192], strides = [1, 1]} : vector<2x256xf32> to vector<2x192xf32>
    %376 = arith.negf %375 : vector<2x192xf32>
    %377 = math.exp %376 : vector<2x192xf32>
    %cst_49 = arith.constant 1.000000e+00 : f32
    %378 = vector.broadcast %cst_49 : f32 to vector<2x192xf32>
    %379 = arith.addf %378, %377 : vector<2x192xf32>
    %380 = arith.divf %378, %379 : vector<2x192xf32>
    %381 = vector.extract_strided_slice %374 {offsets = [0, 192], sizes = [2, 64], strides = [1, 1]} : vector<2x256xf32> to vector<2x64xf32>
    %382 = math.tanh %381 : vector<2x64xf32>
    %383 = vector.extract_strided_slice %380 {offsets = [0, 0], sizes = [2, 64], strides = [1, 1]} : vector<2x192xf32> to vector<2x64xf32>
    %384 = vector.extract_strided_slice %380 {offsets = [0, 64], sizes = [2, 64], strides = [1, 1]} : vector<2x192xf32> to vector<2x64xf32>
    %385 = vector.extract_strided_slice %380 {offsets = [0, 128], sizes = [2, 64], strides = [1, 1]} : vector<2x192xf32> to vector<2x64xf32>
    %386 = arith.mulf %384, %366 : vector<2x64xf32>
    %387 = arith.mulf %383, %382 : vector<2x64xf32>
    %388 = arith.addf %386, %387 : vector<2x64xf32>
    %389 = math.tanh %388 : vector<2x64xf32>
    %390 = arith.mulf %385, %389 : vector<2x64xf32>
    %391 = vector.extract_strided_slice %362 {offsets = [0, 1, 0], sizes = [2, 1, 256], strides = [1, 1, 1]} : vector<2x2x256xf32> to vector<2x1x256xf32>
    %392 = vector.shape_cast %391 : vector<2x1x256xf32> to vector<2x256xf32>
    %393 = vector.extract_strided_slice %362 {offsets = [0, 0, 0], sizes = [2, 1, 256], strides = [1, 1, 1]} : vector<2x2x256xf32> to vector<2x1x256xf32>
    %394 = vector.shape_cast %393 : vector<2x1x256xf32> to vector<2x256xf32>
    %395 = arith.select %18, %392, %394 : vector<2x256xi1>, vector<2x256xf32>
    %396 = arith.truncf %390 : vector<2x64xf32> to vector<2x64xbf16>
    %cst_50 = arith.constant dense<0.000000e+00> : vector<2x256xf32>
    %397 = tpu.matmul %396, %364, %cst_50 {dimension_numbers = #tpu.dot_dimension_numbers<[1], [0], [0], [1], [0, 0, 1, 1], [], []>} : vector<2x64xbf16>, vector<64x256xbf16>, vector<2x256xf32> -> vector<2x256xf32>
    %398 = arith.addf %395, %397 : vector<2x256xf32>
    %399 = vector.extract_strided_slice %398 {offsets = [0, 0], sizes = [2, 192], strides = [1, 1]} : vector<2x256xf32> to vector<2x192xf32>
    %400 = arith.negf %399 : vector<2x192xf32>
    %401 = math.exp %400 : vector<2x192xf32>
    %cst_51 = arith.constant 1.000000e+00 : f32
    %402 = vector.broadcast %cst_51 : f32 to vector<2x192xf32>
    %403 = arith.addf %402, %401 : vector<2x192xf32>
    %404 = arith.divf %402, %403 : vector<2x192xf32>
    %405 = vector.extract_strided_slice %398 {offsets = [0, 192], sizes = [2, 64], strides = [1, 1]} : vector<2x256xf32> to vector<2x64xf32>
    %406 = math.tanh %405 : vector<2x64xf32>
    %407 = vector.extract_strided_slice %404 {offsets = [0, 0], sizes = [2, 64], strides = [1, 1]} : vector<2x192xf32> to vector<2x64xf32>
    %408 = vector.extract_strided_slice %404 {offsets = [0, 64], sizes = [2, 64], strides = [1, 1]} : vector<2x192xf32> to vector<2x64xf32>
    %409 = vector.extract_strided_slice %404 {offsets = [0, 128], sizes = [2, 64], strides = [1, 1]} : vector<2x192xf32> to vector<2x64xf32>
    %410 = arith.mulf %408, %388 : vector<2x64xf32>
    %411 = arith.mulf %407, %406 : vector<2x64xf32>
    %412 = arith.addf %410, %411 : vector<2x64xf32>
    %413 = math.tanh %412 : vector<2x64xf32>
    %414 = arith.mulf %409, %413 : vector<2x64xf32>
    %415 = vector.shape_cast %390 : vector<2x64xf32> to vector<2x1x64xf32>
    %416 = vector.shape_cast %414 : vector<2x64xf32> to vector<2x1x64xf32>
    %417 = tpu.concatenate %415, %416 in 1 : vector<2x1x64xf32>, vector<2x1x64xf32> -> vector<2x2x64xf32>
    %418 = vector.shape_cast %414 : vector<2x64xf32> to vector<2x1x64xf32>
    %419 = vector.shape_cast %390 : vector<2x64xf32> to vector<2x1x64xf32>
    %420 = tpu.concatenate %418, %419 in 1 : vector<2x1x64xf32>, vector<2x1x64xf32> -> vector<2x2x64xf32>
    %421 = tpu.iota {dimensions = array<i32: 2>} : vector<2x2x64xi32>
    %c32_i32_52 = arith.constant 32 : i32
    %422 = vector.broadcast %c32_i32_52 : i32 to vector<2x2x64xi32>
    %423 = arith.cmpi slt, %421, %422 : vector<2x2x64xi32>
    %424 = arith.select %423, %417, %420 : vector<2x2x64xi1>, vector<2x2x64xf32>
    %cst_53 = arith.constant 0.000000e+00 : f32
    %425 = vector.broadcast %cst_53 : f32 to vector<2x2x64xf32>
    %426 = tpu.concatenate %246, %361, %424, %425 in 1 : vector<2x8x64xf32>, vector<2x4x64xf32>, vector<2x2x64xf32>, vector<2x2x64xf32> -> vector<2x16x64xf32>
    %c0_54 = arith.constant 0 : index
    %c0_55 = arith.constant 0 : index
    %c0_56 = arith.constant 0 : index
    %427 = vector.load %arg2[%c0_54, %c0_55, %c0_56] : memref<2x16x16xi32, #tpu.memory_space<vmem>>, vector<2x16x16xi32>
    %c0_i32_57 = arith.constant 0 : i32
    %428 = vector.broadcast %c0_i32_57 : i32 to vector<2x16x16xi32>
    %429 = arith.cmpi eq, %427, %428 : vector<2x16x16xi32>
    %430 = arith.extui %429 : vector<2x16x16xi1> to vector<2x16x16xi32>
    %431 = arith.sitofp %430 : vector<2x16x16xi32> to vector<2x16x16xf32>
    %c1_i32_58 = arith.constant 1 : i32
    %432 = vector.broadcast %c1_i32_58 : i32 to vector<2x16x16xi32>
    %433 = arith.cmpi eq, %427, %432 : vector<2x16x16xi32>
    %434 = arith.extui %433 : vector<2x16x16xi1> to vector<2x16x16xi32>
    %435 = arith.sitofp %434 : vector<2x16x16xi32> to vector<2x16x16xf32>
    %c2_i32 = arith.constant 2 : i32
    %436 = vector.broadcast %c2_i32 : i32 to vector<2x16x16xi32>
    %437 = arith.cmpi eq, %427, %436 : vector<2x16x16xi32>
    %438 = arith.extui %437 : vector<2x16x16xi1> to vector<2x16x16xi32>
    %439 = arith.sitofp %438 : vector<2x16x16xi32> to vector<2x16x16xf32>
    %c3_i32 = arith.constant 3 : i32
    %440 = vector.broadcast %c3_i32 : i32 to vector<2x16x16xi32>
    %441 = arith.cmpi eq, %427, %440 : vector<2x16x16xi32>
    %442 = arith.extui %441 : vector<2x16x16xi1> to vector<2x16x16xi32>
    %443 = arith.sitofp %442 : vector<2x16x16xi32> to vector<2x16x16xf32>
    %c4_i32 = arith.constant 4 : i32
    %444 = vector.broadcast %c4_i32 : i32 to vector<2x16x16xi32>
    %445 = arith.cmpi eq, %427, %444 : vector<2x16x16xi32>
    %446 = arith.extui %445 : vector<2x16x16xi1> to vector<2x16x16xi32>
    %447 = arith.sitofp %446 : vector<2x16x16xi32> to vector<2x16x16xf32>
    %c5_i32 = arith.constant 5 : i32
    %448 = vector.broadcast %c5_i32 : i32 to vector<2x16x16xi32>
    %449 = arith.cmpi eq, %427, %448 : vector<2x16x16xi32>
    %450 = arith.extui %449 : vector<2x16x16xi1> to vector<2x16x16xi32>
    %451 = arith.sitofp %450 : vector<2x16x16xi32> to vector<2x16x16xf32>
    %c6_i32 = arith.constant 6 : i32
    %452 = vector.broadcast %c6_i32 : i32 to vector<2x16x16xi32>
    %453 = arith.cmpi eq, %427, %452 : vector<2x16x16xi32>
    %454 = arith.extui %453 : vector<2x16x16xi1> to vector<2x16x16xi32>
    %455 = arith.sitofp %454 : vector<2x16x16xi32> to vector<2x16x16xf32>
    %c7_i32 = arith.constant 7 : i32
    %456 = vector.broadcast %c7_i32 : i32 to vector<2x16x16xi32>
    %457 = arith.cmpi eq, %427, %456 : vector<2x16x16xi32>
    %458 = arith.extui %457 : vector<2x16x16xi1> to vector<2x16x16xi32>
    %459 = arith.sitofp %458 : vector<2x16x16xi32> to vector<2x16x16xf32>
    %c8_i32 = arith.constant 8 : i32
    %460 = vector.broadcast %c8_i32 : i32 to vector<2x16x16xi32>
    %461 = arith.cmpi eq, %427, %460 : vector<2x16x16xi32>
    %462 = arith.extui %461 : vector<2x16x16xi1> to vector<2x16x16xi32>
    %463 = arith.sitofp %462 : vector<2x16x16xi32> to vector<2x16x16xf32>
    %c9_i32 = arith.constant 9 : i32
    %464 = vector.broadcast %c9_i32 : i32 to vector<2x16x16xi32>
    %465 = arith.cmpi eq, %427, %464 : vector<2x16x16xi32>
    %466 = arith.extui %465 : vector<2x16x16xi1> to vector<2x16x16xi32>
    %467 = arith.sitofp %466 : vector<2x16x16xi32> to vector<2x16x16xf32>
    %468 = tpu.iota {dimensions = array<i32: 2>} : vector<2x16x16xi32>
    %c14_i32 = arith.constant 14 : i32
    %469 = vector.broadcast %c14_i32 : i32 to vector<2x16x16xi32>
    %470 = arith.cmpi slt, %468, %469 : vector<2x16x16xi32>
    %cst_59 = arith.constant 0.000000e+00 : f32
    %cst_60 = arith.constant -1.000000e+30 : f32
    %471 = vector.broadcast %cst_59 : f32 to vector<2x16x16xf32>
    %472 = vector.broadcast %cst_60 : f32 to vector<2x16x16xf32>
    %473 = arith.select %470, %471, %472 : vector<2x16x16xi1>, vector<2x16x16xf32>
    %474 = vector.shape_cast %426 : vector<2x16x64xf32> to vector<32x64xf32>
    %475 = arith.truncf %474 : vector<32x64xf32> to vector<32x64xbf16>
    %c0_61 = arith.constant 0 : index
    %c0_62 = arith.constant 0 : index
    %c0_63 = arith.constant 0 : index
    %476 = vector.load %arg6[%c0_61, %c0_62, %c0_63] : memref<2x64x192xbf16, #tpu.memory_space<vmem>>, vector<1x64x192xbf16>
    %477 = vector.shape_cast %476 : vector<1x64x192xbf16> to vector<64x192xbf16>
    %cst_64 = arith.constant dense<0.000000e+00> : vector<32x192xf32>
    %478 = tpu.matmul %475, %477, %cst_64 {dimension_numbers = #tpu.dot_dimension_numbers<[1], [0], [0], [1], [0, 0, 1, 1], [], []>} : vector<32x64xbf16>, vector<64x192xbf16>, vector<32x192xf32> -> vector<32x192xf32>
    %479 = vector.shape_cast %478 : vector<32x192xf32> to vector<2x16x192xf32>
    %480 = vector.extract_strided_slice %479 {offsets = [0, 0, 0], sizes = [2, 16, 64], strides = [1, 1, 1]} : vector<2x16x192xf32> to vector<2x16x64xf32>
    %481 = arith.truncf %480 : vector<2x16x64xf32> to vector<2x16x64xbf16>
    %482 = vector.extract_strided_slice %479 {offsets = [0, 0, 64], sizes = [2, 16, 64], strides = [1, 1, 1]} : vector<2x16x192xf32> to vector<2x16x64xf32>
    %483 = arith.truncf %482 : vector<2x16x64xf32> to vector<2x16x64xbf16>
    %484 = vector.extract_strided_slice %479 {offsets = [0, 0, 128], sizes = [2, 16, 64], strides = [1, 1, 1]} : vector<2x16x192xf32> to vector<2x16x64xf32>
    %485 = arith.truncf %484 : vector<2x16x64xf32> to vector<2x16x64xbf16>
    "tpu.trace_start"() <{level = 10 : i32, message = "bqd,bkd->bqk"}> : () -> ()
    %cst_65 = arith.constant dense<0.000000e+00> : vector<2x16x16xf32>
    %486 = tpu.matmul %481, %483, %cst_65 {dimension_numbers = #tpu.dot_dimension_numbers<[2], [2], [1], [1], [0, 0, 0, 1, 1, 1], [0], [0]>} : vector<2x16x64xbf16>, vector<2x16x64xbf16>, vector<2x16x16xf32> -> vector<2x16x16xf32>
    "tpu.trace_stop"() : () -> ()
    %487 = vector.extract_strided_slice %478 {offsets = [0, 0], sizes = [32, 64], strides = [1, 1]} : vector<32x192xf32> to vector<32x64xf32>
    %488 = arith.truncf %487 : vector<32x64xf32> to vector<32x64xbf16>
    %c0_66 = arith.constant 0 : index
    %c0_67 = arith.constant 0 : index
    %c0_68 = arith.constant 0 : index
    %489 = vector.load %arg14[%c0_66, %c0_67, %c0_68] : memref<2x10x64xbf16, #tpu.memory_space<vmem>>, vector<1x10x64xbf16>
    %490 = vector.shape_cast %489 : vector<1x10x64xbf16> to vector<10x64xbf16>
    %cst_69 = arith.constant dense<0.000000e+00> : vector<32x10xf32>
    %491 = tpu.matmul %488, %490, %cst_69 {dimension_numbers = #tpu.dot_dimension_numbers<[1], [1], [0], [0], [0, 0, 1, 0], [], []>} : vector<32x64xbf16>, vector<10x64xbf16>, vector<32x10xf32> -> vector<32x10xf32>
    %492 = vector.shape_cast %491 : vector<32x10xf32> to vector<2x16x10xf32>
    %cst_70 = arith.constant 0.000000e+00 : f32
    %493 = vector.broadcast %cst_70 : f32 to vector<2x16x16xf32>
    %494 = vector.extract_strided_slice %492 {offsets = [0, 0, 0], sizes = [2, 16, 1], strides = [1, 1, 1]} : vector<2x16x10xf32> to vector<2x16x1xf32>
    %495 = vector.broadcast %494 : vector<2x16x1xf32> to vector<2x16x16xf32>
    %496 = arith.mulf %431, %495 : vector<2x16x16xf32>
    %497 = arith.addf %493, %496 : vector<2x16x16xf32>
    %498 = vector.extract_strided_slice %492 {offsets = [0, 0, 1], sizes = [2, 16, 1], strides = [1, 1, 1]} : vector<2x16x10xf32> to vector<2x16x1xf32>
    %499 = vector.broadcast %498 : vector<2x16x1xf32> to vector<2x16x16xf32>
    %500 = arith.mulf %435, %499 : vector<2x16x16xf32>
    %501 = arith.addf %497, %500 : vector<2x16x16xf32>
    %502 = vector.extract_strided_slice %492 {offsets = [0, 0, 2], sizes = [2, 16, 1], strides = [1, 1, 1]} : vector<2x16x10xf32> to vector<2x16x1xf32>
    %503 = vector.broadcast %502 : vector<2x16x1xf32> to vector<2x16x16xf32>
    %504 = arith.mulf %439, %503 : vector<2x16x16xf32>
    %505 = arith.addf %501, %504 : vector<2x16x16xf32>
    %506 = vector.extract_strided_slice %492 {offsets = [0, 0, 3], sizes = [2, 16, 1], strides = [1, 1, 1]} : vector<2x16x10xf32> to vector<2x16x1xf32>
    %507 = vector.broadcast %506 : vector<2x16x1xf32> to vector<2x16x16xf32>
    %508 = arith.mulf %443, %507 : vector<2x16x16xf32>
    %509 = arith.addf %505, %508 : vector<2x16x16xf32>
    %510 = vector.extract_strided_slice %492 {offsets = [0, 0, 4], sizes = [2, 16, 1], strides = [1, 1, 1]} : vector<2x16x10xf32> to vector<2x16x1xf32>
    %511 = vector.broadcast %510 : vector<2x16x1xf32> to vector<2x16x16xf32>
    %512 = arith.mulf %447, %511 : vector<2x16x16xf32>
    %513 = arith.addf %509, %512 : vector<2x16x16xf32>
    %514 = vector.extract_strided_slice %492 {offsets = [0, 0, 5], sizes = [2, 16, 1], strides = [1, 1, 1]} : vector<2x16x10xf32> to vector<2x16x1xf32>
    %515 = vector.broadcast %514 : vector<2x16x1xf32> to vector<2x16x16xf32>
    %516 = arith.mulf %451, %515 : vector<2x16x16xf32>
    %517 = arith.addf %513, %516 : vector<2x16x16xf32>
    %518 = vector.extract_strided_slice %492 {offsets = [0, 0, 6], sizes = [2, 16, 1], strides = [1, 1, 1]} : vector<2x16x10xf32> to vector<2x16x1xf32>
    %519 = vector.broadcast %518 : vector<2x16x1xf32> to vector<2x16x16xf32>
    %520 = arith.mulf %455, %519 : vector<2x16x16xf32>
    %521 = arith.addf %517, %520 : vector<2x16x16xf32>
    %522 = vector.extract_strided_slice %492 {offsets = [0, 0, 7], sizes = [2, 16, 1], strides = [1, 1, 1]} : vector<2x16x10xf32> to vector<2x16x1xf32>
    %523 = vector.broadcast %522 : vector<2x16x1xf32> to vector<2x16x16xf32>
    %524 = arith.mulf %459, %523 : vector<2x16x16xf32>
    %525 = arith.addf %521, %524 : vector<2x16x16xf32>
    %526 = vector.extract_strided_slice %492 {offsets = [0, 0, 8], sizes = [2, 16, 1], strides = [1, 1, 1]} : vector<2x16x10xf32> to vector<2x16x1xf32>
    %527 = vector.broadcast %526 : vector<2x16x1xf32> to vector<2x16x16xf32>
    %528 = arith.mulf %463, %527 : vector<2x16x16xf32>
    %529 = arith.addf %525, %528 : vector<2x16x16xf32>
    %530 = vector.extract_strided_slice %492 {offsets = [0, 0, 9], sizes = [2, 16, 1], strides = [1, 1, 1]} : vector<2x16x10xf32> to vector<2x16x1xf32>
    %531 = vector.broadcast %530 : vector<2x16x1xf32> to vector<2x16x16xf32>
    %532 = arith.mulf %467, %531 : vector<2x16x16xf32>
    %533 = arith.addf %529, %532 : vector<2x16x16xf32>
    %534 = arith.addf %486, %533 : vector<2x16x16xf32>
    %cst_71 = arith.constant 1.250000e-01 : f32
    %535 = vector.broadcast %cst_71 : f32 to vector<2x16x16xf32>
    %536 = arith.mulf %534, %535 : vector<2x16x16xf32>
    %537 = arith.addf %536, %473 : vector<2x16x16xf32>
    %cst_72 = arith.constant dense<0xFF800000> : vector<2x16xf32>
    %538 = vector.multi_reduction <maximumf>, %537, %cst_72 [2] : vector<2x16x16xf32> to vector<2x16xf32>
    %539 = vector.shape_cast %538 : vector<2x16xf32> to vector<2x16x1xf32>
    %540 = vector.broadcast %539 : vector<2x16x1xf32> to vector<2x16x16xf32>
    %541 = arith.subf %537, %540 : vector<2x16x16xf32>
    %542 = math.exp %541 : vector<2x16x16xf32>
    %cst_73 = arith.constant dense<0.000000e+00> : vector<2x16xf32>
    %543 = vector.multi_reduction <add>, %542, %cst_73 [2] : vector<2x16x16xf32> to vector<2x16xf32>
    %544 = vector.shape_cast %543 : vector<2x16xf32> to vector<2x16x1xf32>
    %545 = tpu.reciprocal %544 {approx = true} : vector<2x16x1xf32> -> vector<2x16x1xf32>
    %546 = vector.broadcast %545 : vector<2x16x1xf32> to vector<2x16x16xf32>
    %547 = arith.mulf %542, %546 : vector<2x16x16xf32>
    %548 = arith.truncf %547 : vector<2x16x16xf32> to vector<2x16x16xbf16>
    "tpu.trace_start"() <{level = 10 : i32, message = "bqk,bkd->bqd"}> : () -> ()
    %cst_74 = arith.constant dense<0.000000e+00> : vector<2x16x64xf32>
    %549 = tpu.matmul %548, %485, %cst_74 {dimension_numbers = #tpu.dot_dimension_numbers<[2], [1], [1], [2], [0, 0, 0, 1, 1, 2], [0], [0]>} : vector<2x16x16xbf16>, vector<2x16x64xbf16>, vector<2x16x64xf32> -> vector<2x16x64xf32>
    "tpu.trace_stop"() : () -> ()
    %550 = arith.mulf %431, %547 : vector<2x16x16xf32>
    %cst_75 = arith.constant dense<0.000000e+00> : vector<2x16xf32>
    %551 = vector.multi_reduction <add>, %550, %cst_75 [2] : vector<2x16x16xf32> to vector<2x16xf32>
    %552 = vector.shape_cast %551 : vector<2x16xf32> to vector<2x16x1xf32>
    %553 = arith.mulf %435, %547 : vector<2x16x16xf32>
    %cst_76 = arith.constant dense<0.000000e+00> : vector<2x16xf32>
    %554 = vector.multi_reduction <add>, %553, %cst_76 [2] : vector<2x16x16xf32> to vector<2x16xf32>
    %555 = vector.shape_cast %554 : vector<2x16xf32> to vector<2x16x1xf32>
    %556 = arith.mulf %439, %547 : vector<2x16x16xf32>
    %cst_77 = arith.constant dense<0.000000e+00> : vector<2x16xf32>
    %557 = vector.multi_reduction <add>, %556, %cst_77 [2] : vector<2x16x16xf32> to vector<2x16xf32>
    %558 = vector.shape_cast %557 : vector<2x16xf32> to vector<2x16x1xf32>
    %559 = arith.mulf %443, %547 : vector<2x16x16xf32>
    %cst_78 = arith.constant dense<0.000000e+00> : vector<2x16xf32>
    %560 = vector.multi_reduction <add>, %559, %cst_78 [2] : vector<2x16x16xf32> to vector<2x16xf32>
    %561 = vector.shape_cast %560 : vector<2x16xf32> to vector<2x16x1xf32>
    %562 = arith.mulf %447, %547 : vector<2x16x16xf32>
    %cst_79 = arith.constant dense<0.000000e+00> : vector<2x16xf32>
    %563 = vector.multi_reduction <add>, %562, %cst_79 [2] : vector<2x16x16xf32> to vector<2x16xf32>
    %564 = vector.shape_cast %563 : vector<2x16xf32> to vector<2x16x1xf32>
    %565 = arith.mulf %451, %547 : vector<2x16x16xf32>
    %cst_80 = arith.constant dense<0.000000e+00> : vector<2x16xf32>
    %566 = vector.multi_reduction <add>, %565, %cst_80 [2] : vector<2x16x16xf32> to vector<2x16xf32>
    %567 = vector.shape_cast %566 : vector<2x16xf32> to vector<2x16x1xf32>
    %568 = arith.mulf %455, %547 : vector<2x16x16xf32>
    %cst_81 = arith.constant dense<0.000000e+00> : vector<2x16xf32>
    %569 = vector.multi_reduction <add>, %568, %cst_81 [2] : vector<2x16x16xf32> to vector<2x16xf32>
    %570 = vector.shape_cast %569 : vector<2x16xf32> to vector<2x16x1xf32>
    %571 = arith.mulf %459, %547 : vector<2x16x16xf32>
    %cst_82 = arith.constant dense<0.000000e+00> : vector<2x16xf32>
    %572 = vector.multi_reduction <add>, %571, %cst_82 [2] : vector<2x16x16xf32> to vector<2x16xf32>
    %573 = vector.shape_cast %572 : vector<2x16xf32> to vector<2x16x1xf32>
    %574 = arith.mulf %463, %547 : vector<2x16x16xf32>
    %cst_83 = arith.constant dense<0.000000e+00> : vector<2x16xf32>
    %575 = vector.multi_reduction <add>, %574, %cst_83 [2] : vector<2x16x16xf32> to vector<2x16xf32>
    %576 = vector.shape_cast %575 : vector<2x16xf32> to vector<2x16x1xf32>
    %577 = arith.mulf %467, %547 : vector<2x16x16xf32>
    %cst_84 = arith.constant dense<0.000000e+00> : vector<2x16xf32>
    %578 = vector.multi_reduction <add>, %577, %cst_84 [2] : vector<2x16x16xf32> to vector<2x16xf32>
    %579 = vector.shape_cast %578 : vector<2x16xf32> to vector<2x16x1xf32>
    %580 = tpu.concatenate %552, %555, %558, %561, %564, %567, %570, %573, %576, %579 in 2 : vector<2x16x1xf32>, vector<2x16x1xf32>, vector<2x16x1xf32>, vector<2x16x1xf32>, vector<2x16x1xf32>, vector<2x16x1xf32>, vector<2x16x1xf32>, vector<2x16x1xf32>, vector<2x16x1xf32>, vector<2x16x1xf32> -> vector<2x16x10xf32>
    %581 = vector.shape_cast %549 : vector<2x16x64xf32> to vector<32x64xf32>
    %582 = vector.shape_cast %580 : vector<2x16x10xf32> to vector<32x10xf32>
    %583 = arith.truncf %582 : vector<32x10xf32> to vector<32x10xbf16>
    %c0_85 = arith.constant 0 : index
    %c0_86 = arith.constant 0 : index
    %c0_87 = arith.constant 0 : index
    %584 = vector.load %arg15[%c0_85, %c0_86, %c0_87] : memref<2x10x64xbf16, #tpu.memory_space<vmem>>, vector<1x10x64xbf16>
    %585 = vector.shape_cast %584 : vector<1x10x64xbf16> to vector<10x64xbf16>
    %cst_88 = arith.constant dense<0.000000e+00> : vector<32x64xf32>
    %586 = tpu.matmul %583, %585, %cst_88 {dimension_numbers = #tpu.dot_dimension_numbers<[1], [0], [0], [1], [0, 0, 1, 1], [], []>} : vector<32x10xbf16>, vector<10x64xbf16>, vector<32x64xf32> -> vector<32x64xf32>
    %587 = arith.addf %581, %586 : vector<32x64xf32>
    %588 = arith.truncf %587 : vector<32x64xf32> to vector<32x64xbf16>
    %c0_89 = arith.constant 0 : index
    %c0_90 = arith.constant 0 : index
    %c0_91 = arith.constant 0 : index
    %589 = vector.load %arg7[%c0_89, %c0_90, %c0_91] : memref<2x64x64xbf16, #tpu.memory_space<vmem>>, vector<1x64x64xbf16>
    %590 = vector.shape_cast %589 : vector<1x64x64xbf16> to vector<64x64xbf16>
    %cst_92 = arith.constant dense<0.000000e+00> : vector<32x64xf32>
    %591 = tpu.matmul %588, %590, %cst_92 {dimension_numbers = #tpu.dot_dimension_numbers<[1], [0], [0], [1], [0, 0, 1, 1], [], []>} : vector<32x64xbf16>, vector<64x64xbf16>, vector<32x64xf32> -> vector<32x64xf32>
    %c0_93 = arith.constant 0 : index
    %c0_94 = arith.constant 0 : index
    %c0_95 = arith.constant 0 : index
    %592 = vector.load %arg8[%c0_93, %c0_94, %c0_95] : memref<2x2x64xf32, #tpu.memory_space<vmem>>, vector<1x2x64xf32>
    %593 = vector.shape_cast %592 : vector<1x2x64xf32> to vector<2x64xf32>
    %594 = arith.addf %474, %591 : vector<32x64xf32>
    %595 = vector.extract_strided_slice %593 {offsets = [0, 0], sizes = [1, 64], strides = [1, 1]} : vector<2x64xf32> to vector<1x64xf32>
    %596 = vector.extract_strided_slice %593 {offsets = [1, 0], sizes = [1, 64], strides = [1, 1]} : vector<2x64xf32> to vector<1x64xf32>
    %cst_96 = arith.constant dense<0.000000e+00> : vector<32xf32>
    %597 = vector.multi_reduction <add>, %594, %cst_96 [1] : vector<32x64xf32> to vector<32xf32>
    %598 = vector.shape_cast %597 : vector<32xf32> to vector<32x1xf32>
    %cst_97 = arith.constant 6.400000e+01 : f32
    %599 = vector.broadcast %cst_97 : f32 to vector<32x1xf32>
    %600 = arith.divf %598, %599 : vector<32x1xf32>
    %601 = vector.broadcast %600 : vector<32x1xf32> to vector<32x64xf32>
    %602 = arith.subf %594, %601 : vector<32x64xf32>
    %603 = arith.mulf %602, %602 : vector<32x64xf32>
    %cst_98 = arith.constant dense<0.000000e+00> : vector<32xf32>
    %604 = vector.multi_reduction <add>, %603, %cst_98 [1] : vector<32x64xf32> to vector<32xf32>
    %605 = vector.shape_cast %604 : vector<32xf32> to vector<32x1xf32>
    %cst_99 = arith.constant 6.400000e+01 : f32
    %606 = vector.broadcast %cst_99 : f32 to vector<32x1xf32>
    %607 = arith.divf %605, %606 : vector<32x1xf32>
    %608 = vector.broadcast %600 : vector<32x1xf32> to vector<32x64xf32>
    %609 = arith.subf %594, %608 : vector<32x64xf32>
    %cst_100 = arith.constant 9.99999974E-6 : f32
    %610 = vector.broadcast %cst_100 : f32 to vector<32x1xf32>
    %611 = arith.addf %607, %610 : vector<32x1xf32>
    %612 = math.rsqrt %611 : vector<32x1xf32>
    %613 = vector.broadcast %612 : vector<32x1xf32> to vector<32x64xf32>
    %614 = arith.mulf %609, %613 : vector<32x64xf32>
    %615 = vector.broadcast %595 : vector<1x64xf32> to vector<32x64xf32>
    %616 = arith.mulf %614, %615 : vector<32x64xf32>
    %617 = vector.broadcast %596 : vector<1x64xf32> to vector<32x64xf32>
    %618 = arith.addf %616, %617 : vector<32x64xf32>
    %619 = arith.truncf %618 : vector<32x64xf32> to vector<32x64xbf16>
    %c0_101 = arith.constant 0 : index
    %c0_102 = arith.constant 0 : index
    %c0_103 = arith.constant 0 : index
    %620 = vector.load %arg9[%c0_101, %c0_102, %c0_103] : memref<2x64x256xbf16, #tpu.memory_space<vmem>>, vector<1x64x256xbf16>
    %621 = vector.shape_cast %620 : vector<1x64x256xbf16> to vector<64x256xbf16>
    %cst_104 = arith.constant dense<0.000000e+00> : vector<32x256xf32>
    %622 = tpu.matmul %619, %621, %cst_104 {dimension_numbers = #tpu.dot_dimension_numbers<[1], [0], [0], [1], [0, 0, 1, 1], [], []>} : vector<32x64xbf16>, vector<64x256xbf16>, vector<32x256xf32> -> vector<32x256xf32>
    %c0_105 = arith.constant 0 : index
    %c0_106 = arith.constant 0 : index
    %c0_107 = arith.constant 0 : index
    %623 = vector.load %arg10[%c0_105, %c0_106, %c0_107] : memref<2x1x256xf32, #tpu.memory_space<vmem>>, vector<1x1x256xf32>
    %624 = vector.shape_cast %623 : vector<1x1x256xf32> to vector<1x256xf32>
    %625 = vector.broadcast %624 : vector<1x256xf32> to vector<32x256xf32>
    %626 = arith.addf %622, %625 : vector<32x256xf32>
    %cst_108 = arith.constant 0.000000e+00 : f32
    %627 = vector.broadcast %cst_108 : f32 to vector<32x256xf32>
    %628 = arith.maximumf %626, %627 : vector<32x256xf32>
    %629 = arith.truncf %628 : vector<32x256xf32> to vector<32x256xbf16>
    %c0_109 = arith.constant 0 : index
    %c0_110 = arith.constant 0 : index
    %c0_111 = arith.constant 0 : index
    %630 = vector.load %arg11[%c0_109, %c0_110, %c0_111] : memref<2x256x64xbf16, #tpu.memory_space<vmem>>, vector<1x256x64xbf16>
    %631 = vector.shape_cast %630 : vector<1x256x64xbf16> to vector<256x64xbf16>
    %cst_112 = arith.constant dense<0.000000e+00> : vector<32x64xf32>
    %632 = tpu.matmul %629, %631, %cst_112 {dimension_numbers = #tpu.dot_dimension_numbers<[1], [0], [0], [1], [0, 0, 1, 1], [], []>} : vector<32x256xbf16>, vector<256x64xbf16>, vector<32x64xf32> -> vector<32x64xf32>
    %c0_113 = arith.constant 0 : index
    %c0_114 = arith.constant 0 : index
    %c0_115 = arith.constant 0 : index
    %633 = vector.load %arg12[%c0_113, %c0_114, %c0_115] : memref<2x1x64xf32, #tpu.memory_space<vmem>>, vector<1x1x64xf32>
    %634 = vector.shape_cast %633 : vector<1x1x64xf32> to vector<1x64xf32>
    %635 = vector.broadcast %634 : vector<1x64xf32> to vector<32x64xf32>
    %636 = arith.addf %632, %635 : vector<32x64xf32>
    %c0_116 = arith.constant 0 : index
    %c0_117 = arith.constant 0 : index
    %c0_118 = arith.constant 0 : index
    %637 = vector.load %arg13[%c0_116, %c0_117, %c0_118] : memref<2x2x64xf32, #tpu.memory_space<vmem>>, vector<1x2x64xf32>
    %638 = vector.shape_cast %637 : vector<1x2x64xf32> to vector<2x64xf32>
    %639 = arith.addf %618, %636 : vector<32x64xf32>
    %640 = vector.extract_strided_slice %638 {offsets = [0, 0], sizes = [1, 64], strides = [1, 1]} : vector<2x64xf32> to vector<1x64xf32>
    %641 = vector.extract_strided_slice %638 {offsets = [1, 0], sizes = [1, 64], strides = [1, 1]} : vector<2x64xf32> to vector<1x64xf32>
    %cst_119 = arith.constant dense<0.000000e+00> : vector<32xf32>
    %642 = vector.multi_reduction <add>, %639, %cst_119 [1] : vector<32x64xf32> to vector<32xf32>
    %643 = vector.shape_cast %642 : vector<32xf32> to vector<32x1xf32>
    %cst_120 = arith.constant 6.400000e+01 : f32
    %644 = vector.broadcast %cst_120 : f32 to vector<32x1xf32>
    %645 = arith.divf %643, %644 : vector<32x1xf32>
    %646 = vector.broadcast %645 : vector<32x1xf32> to vector<32x64xf32>
    %647 = arith.subf %639, %646 : vector<32x64xf32>
    %648 = arith.mulf %647, %647 : vector<32x64xf32>
    %cst_121 = arith.constant dense<0.000000e+00> : vector<32xf32>
    %649 = vector.multi_reduction <add>, %648, %cst_121 [1] : vector<32x64xf32> to vector<32xf32>
    %650 = vector.shape_cast %649 : vector<32xf32> to vector<32x1xf32>
    %cst_122 = arith.constant 6.400000e+01 : f32
    %651 = vector.broadcast %cst_122 : f32 to vector<32x1xf32>
    %652 = arith.divf %650, %651 : vector<32x1xf32>
    %653 = vector.broadcast %645 : vector<32x1xf32> to vector<32x64xf32>
    %654 = arith.subf %639, %653 : vector<32x64xf32>
    %cst_123 = arith.constant 9.99999974E-6 : f32
    %655 = vector.broadcast %cst_123 : f32 to vector<32x1xf32>
    %656 = arith.addf %652, %655 : vector<32x1xf32>
    %657 = math.rsqrt %656 : vector<32x1xf32>
    %658 = vector.broadcast %657 : vector<32x1xf32> to vector<32x64xf32>
    %659 = arith.mulf %654, %658 : vector<32x64xf32>
    %660 = vector.broadcast %640 : vector<1x64xf32> to vector<32x64xf32>
    %661 = arith.mulf %659, %660 : vector<32x64xf32>
    %662 = vector.broadcast %641 : vector<1x64xf32> to vector<32x64xf32>
    %663 = arith.addf %661, %662 : vector<32x64xf32>
    %664 = arith.truncf %663 : vector<32x64xf32> to vector<32x64xbf16>
    %c1_124 = arith.constant 1 : index
    %c0_125 = arith.constant 0 : index
    %c0_126 = arith.constant 0 : index
    %665 = vector.load %arg6[%c1_124, %c0_125, %c0_126] : memref<2x64x192xbf16, #tpu.memory_space<vmem>>, vector<1x64x192xbf16>
    %666 = vector.shape_cast %665 : vector<1x64x192xbf16> to vector<64x192xbf16>
    %cst_127 = arith.constant dense<0.000000e+00> : vector<32x192xf32>
    %667 = tpu.matmul %664, %666, %cst_127 {dimension_numbers = #tpu.dot_dimension_numbers<[1], [0], [0], [1], [0, 0, 1, 1], [], []>} : vector<32x64xbf16>, vector<64x192xbf16>, vector<32x192xf32> -> vector<32x192xf32>
    %668 = vector.shape_cast %667 : vector<32x192xf32> to vector<2x16x192xf32>
    %669 = vector.extract_strided_slice %668 {offsets = [0, 0, 0], sizes = [2, 16, 64], strides = [1, 1, 1]} : vector<2x16x192xf32> to vector<2x16x64xf32>
    %670 = arith.truncf %669 : vector<2x16x64xf32> to vector<2x16x64xbf16>
    %671 = vector.extract_strided_slice %668 {offsets = [0, 0, 64], sizes = [2, 16, 64], strides = [1, 1, 1]} : vector<2x16x192xf32> to vector<2x16x64xf32>
    %672 = arith.truncf %671 : vector<2x16x64xf32> to vector<2x16x64xbf16>
    %673 = vector.extract_strided_slice %668 {offsets = [0, 0, 128], sizes = [2, 16, 64], strides = [1, 1, 1]} : vector<2x16x192xf32> to vector<2x16x64xf32>
    %674 = arith.truncf %673 : vector<2x16x64xf32> to vector<2x16x64xbf16>
    "tpu.trace_start"() <{level = 10 : i32, message = "bqd,bkd->bqk"}> : () -> ()
    %cst_128 = arith.constant dense<0.000000e+00> : vector<2x16x16xf32>
    %675 = tpu.matmul %670, %672, %cst_128 {dimension_numbers = #tpu.dot_dimension_numbers<[2], [2], [1], [1], [0, 0, 0, 1, 1, 1], [0], [0]>} : vector<2x16x64xbf16>, vector<2x16x64xbf16>, vector<2x16x16xf32> -> vector<2x16x16xf32>
    "tpu.trace_stop"() : () -> ()
    %676 = vector.extract_strided_slice %667 {offsets = [0, 0], sizes = [32, 64], strides = [1, 1]} : vector<32x192xf32> to vector<32x64xf32>
    %677 = arith.truncf %676 : vector<32x64xf32> to vector<32x64xbf16>
    %c1_129 = arith.constant 1 : index
    %c0_130 = arith.constant 0 : index
    %c0_131 = arith.constant 0 : index
    %678 = vector.load %arg14[%c1_129, %c0_130, %c0_131] : memref<2x10x64xbf16, #tpu.memory_space<vmem>>, vector<1x10x64xbf16>
    %679 = vector.shape_cast %678 : vector<1x10x64xbf16> to vector<10x64xbf16>
    %cst_132 = arith.constant dense<0.000000e+00> : vector<32x10xf32>
    %680 = tpu.matmul %677, %679, %cst_132 {dimension_numbers = #tpu.dot_dimension_numbers<[1], [1], [0], [0], [0, 0, 1, 0], [], []>} : vector<32x64xbf16>, vector<10x64xbf16>, vector<32x10xf32> -> vector<32x10xf32>
    %681 = vector.shape_cast %680 : vector<32x10xf32> to vector<2x16x10xf32>
    %cst_133 = arith.constant 0.000000e+00 : f32
    %682 = vector.broadcast %cst_133 : f32 to vector<2x16x16xf32>
    %683 = vector.extract_strided_slice %681 {offsets = [0, 0, 0], sizes = [2, 16, 1], strides = [1, 1, 1]} : vector<2x16x10xf32> to vector<2x16x1xf32>
    %684 = vector.broadcast %683 : vector<2x16x1xf32> to vector<2x16x16xf32>
    %685 = arith.mulf %431, %684 : vector<2x16x16xf32>
    %686 = arith.addf %682, %685 : vector<2x16x16xf32>
    %687 = vector.extract_strided_slice %681 {offsets = [0, 0, 1], sizes = [2, 16, 1], strides = [1, 1, 1]} : vector<2x16x10xf32> to vector<2x16x1xf32>
    %688 = vector.broadcast %687 : vector<2x16x1xf32> to vector<2x16x16xf32>
    %689 = arith.mulf %435, %688 : vector<2x16x16xf32>
    %690 = arith.addf %686, %689 : vector<2x16x16xf32>
    %691 = vector.extract_strided_slice %681 {offsets = [0, 0, 2], sizes = [2, 16, 1], strides = [1, 1, 1]} : vector<2x16x10xf32> to vector<2x16x1xf32>
    %692 = vector.broadcast %691 : vector<2x16x1xf32> to vector<2x16x16xf32>
    %693 = arith.mulf %439, %692 : vector<2x16x16xf32>
    %694 = arith.addf %690, %693 : vector<2x16x16xf32>
    %695 = vector.extract_strided_slice %681 {offsets = [0, 0, 3], sizes = [2, 16, 1], strides = [1, 1, 1]} : vector<2x16x10xf32> to vector<2x16x1xf32>
    %696 = vector.broadcast %695 : vector<2x16x1xf32> to vector<2x16x16xf32>
    %697 = arith.mulf %443, %696 : vector<2x16x16xf32>
    %698 = arith.addf %694, %697 : vector<2x16x16xf32>
    %699 = vector.extract_strided_slice %681 {offsets = [0, 0, 4], sizes = [2, 16, 1], strides = [1, 1, 1]} : vector<2x16x10xf32> to vector<2x16x1xf32>
    %700 = vector.broadcast %699 : vector<2x16x1xf32> to vector<2x16x16xf32>
    %701 = arith.mulf %447, %700 : vector<2x16x16xf32>
    %702 = arith.addf %698, %701 : vector<2x16x16xf32>
    %703 = vector.extract_strided_slice %681 {offsets = [0, 0, 5], sizes = [2, 16, 1], strides = [1, 1, 1]} : vector<2x16x10xf32> to vector<2x16x1xf32>
    %704 = vector.broadcast %703 : vector<2x16x1xf32> to vector<2x16x16xf32>
    %705 = arith.mulf %451, %704 : vector<2x16x16xf32>
    %706 = arith.addf %702, %705 : vector<2x16x16xf32>
    %707 = vector.extract_strided_slice %681 {offsets = [0, 0, 6], sizes = [2, 16, 1], strides = [1, 1, 1]} : vector<2x16x10xf32> to vector<2x16x1xf32>
    %708 = vector.broadcast %707 : vector<2x16x1xf32> to vector<2x16x16xf32>
    %709 = arith.mulf %455, %708 : vector<2x16x16xf32>
    %710 = arith.addf %706, %709 : vector<2x16x16xf32>
    %711 = vector.extract_strided_slice %681 {offsets = [0, 0, 7], sizes = [2, 16, 1], strides = [1, 1, 1]} : vector<2x16x10xf32> to vector<2x16x1xf32>
    %712 = vector.broadcast %711 : vector<2x16x1xf32> to vector<2x16x16xf32>
    %713 = arith.mulf %459, %712 : vector<2x16x16xf32>
    %714 = arith.addf %710, %713 : vector<2x16x16xf32>
    %715 = vector.extract_strided_slice %681 {offsets = [0, 0, 8], sizes = [2, 16, 1], strides = [1, 1, 1]} : vector<2x16x10xf32> to vector<2x16x1xf32>
    %716 = vector.broadcast %715 : vector<2x16x1xf32> to vector<2x16x16xf32>
    %717 = arith.mulf %463, %716 : vector<2x16x16xf32>
    %718 = arith.addf %714, %717 : vector<2x16x16xf32>
    %719 = vector.extract_strided_slice %681 {offsets = [0, 0, 9], sizes = [2, 16, 1], strides = [1, 1, 1]} : vector<2x16x10xf32> to vector<2x16x1xf32>
    %720 = vector.broadcast %719 : vector<2x16x1xf32> to vector<2x16x16xf32>
    %721 = arith.mulf %467, %720 : vector<2x16x16xf32>
    %722 = arith.addf %718, %721 : vector<2x16x16xf32>
    %723 = arith.addf %675, %722 : vector<2x16x16xf32>
    %cst_134 = arith.constant 1.250000e-01 : f32
    %724 = vector.broadcast %cst_134 : f32 to vector<2x16x16xf32>
    %725 = arith.mulf %723, %724 : vector<2x16x16xf32>
    %726 = arith.addf %725, %473 : vector<2x16x16xf32>
    %cst_135 = arith.constant dense<0xFF800000> : vector<2x16xf32>
    %727 = vector.multi_reduction <maximumf>, %726, %cst_135 [2] : vector<2x16x16xf32> to vector<2x16xf32>
    %728 = vector.shape_cast %727 : vector<2x16xf32> to vector<2x16x1xf32>
    %729 = vector.broadcast %728 : vector<2x16x1xf32> to vector<2x16x16xf32>
    %730 = arith.subf %726, %729 : vector<2x16x16xf32>
    %731 = math.exp %730 : vector<2x16x16xf32>
    %cst_136 = arith.constant dense<0.000000e+00> : vector<2x16xf32>
    %732 = vector.multi_reduction <add>, %731, %cst_136 [2] : vector<2x16x16xf32> to vector<2x16xf32>
    %733 = vector.shape_cast %732 : vector<2x16xf32> to vector<2x16x1xf32>
    %734 = tpu.reciprocal %733 {approx = true} : vector<2x16x1xf32> -> vector<2x16x1xf32>
    %735 = vector.broadcast %734 : vector<2x16x1xf32> to vector<2x16x16xf32>
    %736 = arith.mulf %731, %735 : vector<2x16x16xf32>
    %737 = arith.truncf %736 : vector<2x16x16xf32> to vector<2x16x16xbf16>
    "tpu.trace_start"() <{level = 10 : i32, message = "bqk,bkd->bqd"}> : () -> ()
    %cst_137 = arith.constant dense<0.000000e+00> : vector<2x16x64xf32>
    %738 = tpu.matmul %737, %674, %cst_137 {dimension_numbers = #tpu.dot_dimension_numbers<[2], [1], [1], [2], [0, 0, 0, 1, 1, 2], [0], [0]>} : vector<2x16x16xbf16>, vector<2x16x64xbf16>, vector<2x16x64xf32> -> vector<2x16x64xf32>
    "tpu.trace_stop"() : () -> ()
    %739 = arith.mulf %431, %736 : vector<2x16x16xf32>
    %cst_138 = arith.constant dense<0.000000e+00> : vector<2x16xf32>
    %740 = vector.multi_reduction <add>, %739, %cst_138 [2] : vector<2x16x16xf32> to vector<2x16xf32>
    %741 = vector.shape_cast %740 : vector<2x16xf32> to vector<2x16x1xf32>
    %742 = arith.mulf %435, %736 : vector<2x16x16xf32>
    %cst_139 = arith.constant dense<0.000000e+00> : vector<2x16xf32>
    %743 = vector.multi_reduction <add>, %742, %cst_139 [2] : vector<2x16x16xf32> to vector<2x16xf32>
    %744 = vector.shape_cast %743 : vector<2x16xf32> to vector<2x16x1xf32>
    %745 = arith.mulf %439, %736 : vector<2x16x16xf32>
    %cst_140 = arith.constant dense<0.000000e+00> : vector<2x16xf32>
    %746 = vector.multi_reduction <add>, %745, %cst_140 [2] : vector<2x16x16xf32> to vector<2x16xf32>
    %747 = vector.shape_cast %746 : vector<2x16xf32> to vector<2x16x1xf32>
    %748 = arith.mulf %443, %736 : vector<2x16x16xf32>
    %cst_141 = arith.constant dense<0.000000e+00> : vector<2x16xf32>
    %749 = vector.multi_reduction <add>, %748, %cst_141 [2] : vector<2x16x16xf32> to vector<2x16xf32>
    %750 = vector.shape_cast %749 : vector<2x16xf32> to vector<2x16x1xf32>
    %751 = arith.mulf %447, %736 : vector<2x16x16xf32>
    %cst_142 = arith.constant dense<0.000000e+00> : vector<2x16xf32>
    %752 = vector.multi_reduction <add>, %751, %cst_142 [2] : vector<2x16x16xf32> to vector<2x16xf32>
    %753 = vector.shape_cast %752 : vector<2x16xf32> to vector<2x16x1xf32>
    %754 = arith.mulf %451, %736 : vector<2x16x16xf32>
    %cst_143 = arith.constant dense<0.000000e+00> : vector<2x16xf32>
    %755 = vector.multi_reduction <add>, %754, %cst_143 [2] : vector<2x16x16xf32> to vector<2x16xf32>
    %756 = vector.shape_cast %755 : vector<2x16xf32> to vector<2x16x1xf32>
    %757 = arith.mulf %455, %736 : vector<2x16x16xf32>
    %cst_144 = arith.constant dense<0.000000e+00> : vector<2x16xf32>
    %758 = vector.multi_reduction <add>, %757, %cst_144 [2] : vector<2x16x16xf32> to vector<2x16xf32>
    %759 = vector.shape_cast %758 : vector<2x16xf32> to vector<2x16x1xf32>
    %760 = arith.mulf %459, %736 : vector<2x16x16xf32>
    %cst_145 = arith.constant dense<0.000000e+00> : vector<2x16xf32>
    %761 = vector.multi_reduction <add>, %760, %cst_145 [2] : vector<2x16x16xf32> to vector<2x16xf32>
    %762 = vector.shape_cast %761 : vector<2x16xf32> to vector<2x16x1xf32>
    %763 = arith.mulf %463, %736 : vector<2x16x16xf32>
    %cst_146 = arith.constant dense<0.000000e+00> : vector<2x16xf32>
    %764 = vector.multi_reduction <add>, %763, %cst_146 [2] : vector<2x16x16xf32> to vector<2x16xf32>
    %765 = vector.shape_cast %764 : vector<2x16xf32> to vector<2x16x1xf32>
    %766 = arith.mulf %467, %736 : vector<2x16x16xf32>
    %cst_147 = arith.constant dense<0.000000e+00> : vector<2x16xf32>
    %767 = vector.multi_reduction <add>, %766, %cst_147 [2] : vector<2x16x16xf32> to vector<2x16xf32>
    %768 = vector.shape_cast %767 : vector<2x16xf32> to vector<2x16x1xf32>
    %769 = tpu.concatenate %741, %744, %747, %750, %753, %756, %759, %762, %765, %768 in 2 : vector<2x16x1xf32>, vector<2x16x1xf32>, vector<2x16x1xf32>, vector<2x16x1xf32>, vector<2x16x1xf32>, vector<2x16x1xf32>, vector<2x16x1xf32>, vector<2x16x1xf32>, vector<2x16x1xf32>, vector<2x16x1xf32> -> vector<2x16x10xf32>
    %770 = vector.shape_cast %738 : vector<2x16x64xf32> to vector<32x64xf32>
    %771 = vector.shape_cast %769 : vector<2x16x10xf32> to vector<32x10xf32>
    %772 = arith.truncf %771 : vector<32x10xf32> to vector<32x10xbf16>
    %c1_148 = arith.constant 1 : index
    %c0_149 = arith.constant 0 : index
    %c0_150 = arith.constant 0 : index
    %773 = vector.load %arg15[%c1_148, %c0_149, %c0_150] : memref<2x10x64xbf16, #tpu.memory_space<vmem>>, vector<1x10x64xbf16>
    %774 = vector.shape_cast %773 : vector<1x10x64xbf16> to vector<10x64xbf16>
    %cst_151 = arith.constant dense<0.000000e+00> : vector<32x64xf32>
    %775 = tpu.matmul %772, %774, %cst_151 {dimension_numbers = #tpu.dot_dimension_numbers<[1], [0], [0], [1], [0, 0, 1, 1], [], []>} : vector<32x10xbf16>, vector<10x64xbf16>, vector<32x64xf32> -> vector<32x64xf32>
    %776 = arith.addf %770, %775 : vector<32x64xf32>
    %777 = arith.truncf %776 : vector<32x64xf32> to vector<32x64xbf16>
    %c1_152 = arith.constant 1 : index
    %c0_153 = arith.constant 0 : index
    %c0_154 = arith.constant 0 : index
    %778 = vector.load %arg7[%c1_152, %c0_153, %c0_154] : memref<2x64x64xbf16, #tpu.memory_space<vmem>>, vector<1x64x64xbf16>
    %779 = vector.shape_cast %778 : vector<1x64x64xbf16> to vector<64x64xbf16>
    %cst_155 = arith.constant dense<0.000000e+00> : vector<32x64xf32>
    %780 = tpu.matmul %777, %779, %cst_155 {dimension_numbers = #tpu.dot_dimension_numbers<[1], [0], [0], [1], [0, 0, 1, 1], [], []>} : vector<32x64xbf16>, vector<64x64xbf16>, vector<32x64xf32> -> vector<32x64xf32>
    %c1_156 = arith.constant 1 : index
    %c0_157 = arith.constant 0 : index
    %c0_158 = arith.constant 0 : index
    %781 = vector.load %arg8[%c1_156, %c0_157, %c0_158] : memref<2x2x64xf32, #tpu.memory_space<vmem>>, vector<1x2x64xf32>
    %782 = vector.shape_cast %781 : vector<1x2x64xf32> to vector<2x64xf32>
    %783 = arith.addf %663, %780 : vector<32x64xf32>
    %784 = vector.extract_strided_slice %782 {offsets = [0, 0], sizes = [1, 64], strides = [1, 1]} : vector<2x64xf32> to vector<1x64xf32>
    %785 = vector.extract_strided_slice %782 {offsets = [1, 0], sizes = [1, 64], strides = [1, 1]} : vector<2x64xf32> to vector<1x64xf32>
    %cst_159 = arith.constant dense<0.000000e+00> : vector<32xf32>
    %786 = vector.multi_reduction <add>, %783, %cst_159 [1] : vector<32x64xf32> to vector<32xf32>
    %787 = vector.shape_cast %786 : vector<32xf32> to vector<32x1xf32>
    %cst_160 = arith.constant 6.400000e+01 : f32
    %788 = vector.broadcast %cst_160 : f32 to vector<32x1xf32>
    %789 = arith.divf %787, %788 : vector<32x1xf32>
    %790 = vector.broadcast %789 : vector<32x1xf32> to vector<32x64xf32>
    %791 = arith.subf %783, %790 : vector<32x64xf32>
    %792 = arith.mulf %791, %791 : vector<32x64xf32>
    %cst_161 = arith.constant dense<0.000000e+00> : vector<32xf32>
    %793 = vector.multi_reduction <add>, %792, %cst_161 [1] : vector<32x64xf32> to vector<32xf32>
    %794 = vector.shape_cast %793 : vector<32xf32> to vector<32x1xf32>
    %cst_162 = arith.constant 6.400000e+01 : f32
    %795 = vector.broadcast %cst_162 : f32 to vector<32x1xf32>
    %796 = arith.divf %794, %795 : vector<32x1xf32>
    %797 = vector.broadcast %789 : vector<32x1xf32> to vector<32x64xf32>
    %798 = arith.subf %783, %797 : vector<32x64xf32>
    %cst_163 = arith.constant 9.99999974E-6 : f32
    %799 = vector.broadcast %cst_163 : f32 to vector<32x1xf32>
    %800 = arith.addf %796, %799 : vector<32x1xf32>
    %801 = math.rsqrt %800 : vector<32x1xf32>
    %802 = vector.broadcast %801 : vector<32x1xf32> to vector<32x64xf32>
    %803 = arith.mulf %798, %802 : vector<32x64xf32>
    %804 = vector.broadcast %784 : vector<1x64xf32> to vector<32x64xf32>
    %805 = arith.mulf %803, %804 : vector<32x64xf32>
    %806 = vector.broadcast %785 : vector<1x64xf32> to vector<32x64xf32>
    %807 = arith.addf %805, %806 : vector<32x64xf32>
    %808 = arith.truncf %807 : vector<32x64xf32> to vector<32x64xbf16>
    %c1_164 = arith.constant 1 : index
    %c0_165 = arith.constant 0 : index
    %c0_166 = arith.constant 0 : index
    %809 = vector.load %arg9[%c1_164, %c0_165, %c0_166] : memref<2x64x256xbf16, #tpu.memory_space<vmem>>, vector<1x64x256xbf16>
    %810 = vector.shape_cast %809 : vector<1x64x256xbf16> to vector<64x256xbf16>
    %cst_167 = arith.constant dense<0.000000e+00> : vector<32x256xf32>
    %811 = tpu.matmul %808, %810, %cst_167 {dimension_numbers = #tpu.dot_dimension_numbers<[1], [0], [0], [1], [0, 0, 1, 1], [], []>} : vector<32x64xbf16>, vector<64x256xbf16>, vector<32x256xf32> -> vector<32x256xf32>
    %c1_168 = arith.constant 1 : index
    %c0_169 = arith.constant 0 : index
    %c0_170 = arith.constant 0 : index
    %812 = vector.load %arg10[%c1_168, %c0_169, %c0_170] : memref<2x1x256xf32, #tpu.memory_space<vmem>>, vector<1x1x256xf32>
    %813 = vector.shape_cast %812 : vector<1x1x256xf32> to vector<1x256xf32>
    %814 = vector.broadcast %813 : vector<1x256xf32> to vector<32x256xf32>
    %815 = arith.addf %811, %814 : vector<32x256xf32>
    %cst_171 = arith.constant 0.000000e+00 : f32
    %816 = vector.broadcast %cst_171 : f32 to vector<32x256xf32>
    %817 = arith.maximumf %815, %816 : vector<32x256xf32>
    %818 = arith.truncf %817 : vector<32x256xf32> to vector<32x256xbf16>
    %c1_172 = arith.constant 1 : index
    %c0_173 = arith.constant 0 : index
    %c0_174 = arith.constant 0 : index
    %819 = vector.load %arg11[%c1_172, %c0_173, %c0_174] : memref<2x256x64xbf16, #tpu.memory_space<vmem>>, vector<1x256x64xbf16>
    %820 = vector.shape_cast %819 : vector<1x256x64xbf16> to vector<256x64xbf16>
    %cst_175 = arith.constant dense<0.000000e+00> : vector<32x64xf32>
    %821 = tpu.matmul %818, %820, %cst_175 {dimension_numbers = #tpu.dot_dimension_numbers<[1], [0], [0], [1], [0, 0, 1, 1], [], []>} : vector<32x256xbf16>, vector<256x64xbf16>, vector<32x64xf32> -> vector<32x64xf32>
    %c1_176 = arith.constant 1 : index
    %c0_177 = arith.constant 0 : index
    %c0_178 = arith.constant 0 : index
    %822 = vector.load %arg12[%c1_176, %c0_177, %c0_178] : memref<2x1x64xf32, #tpu.memory_space<vmem>>, vector<1x1x64xf32>
    %823 = vector.shape_cast %822 : vector<1x1x64xf32> to vector<1x64xf32>
    %824 = vector.broadcast %823 : vector<1x64xf32> to vector<32x64xf32>
    %825 = arith.addf %821, %824 : vector<32x64xf32>
    %c1_179 = arith.constant 1 : index
    %c0_180 = arith.constant 0 : index
    %c0_181 = arith.constant 0 : index
    %826 = vector.load %arg13[%c1_179, %c0_180, %c0_181] : memref<2x2x64xf32, #tpu.memory_space<vmem>>, vector<1x2x64xf32>
    %827 = vector.shape_cast %826 : vector<1x2x64xf32> to vector<2x64xf32>
    %828 = arith.addf %807, %825 : vector<32x64xf32>
    %829 = vector.extract_strided_slice %827 {offsets = [0, 0], sizes = [1, 64], strides = [1, 1]} : vector<2x64xf32> to vector<1x64xf32>
    %830 = vector.extract_strided_slice %827 {offsets = [1, 0], sizes = [1, 64], strides = [1, 1]} : vector<2x64xf32> to vector<1x64xf32>
    %cst_182 = arith.constant dense<0.000000e+00> : vector<32xf32>
    %831 = vector.multi_reduction <add>, %828, %cst_182 [1] : vector<32x64xf32> to vector<32xf32>
    %832 = vector.shape_cast %831 : vector<32xf32> to vector<32x1xf32>
    %cst_183 = arith.constant 6.400000e+01 : f32
    %833 = vector.broadcast %cst_183 : f32 to vector<32x1xf32>
    %834 = arith.divf %832, %833 : vector<32x1xf32>
    %835 = vector.broadcast %834 : vector<32x1xf32> to vector<32x64xf32>
    %836 = arith.subf %828, %835 : vector<32x64xf32>
    %837 = arith.mulf %836, %836 : vector<32x64xf32>
    %cst_184 = arith.constant dense<0.000000e+00> : vector<32xf32>
    %838 = vector.multi_reduction <add>, %837, %cst_184 [1] : vector<32x64xf32> to vector<32xf32>
    %839 = vector.shape_cast %838 : vector<32xf32> to vector<32x1xf32>
    %cst_185 = arith.constant 6.400000e+01 : f32
    %840 = vector.broadcast %cst_185 : f32 to vector<32x1xf32>
    %841 = arith.divf %839, %840 : vector<32x1xf32>
    %842 = vector.broadcast %834 : vector<32x1xf32> to vector<32x64xf32>
    %843 = arith.subf %828, %842 : vector<32x64xf32>
    %cst_186 = arith.constant 9.99999974E-6 : f32
    %844 = vector.broadcast %cst_186 : f32 to vector<32x1xf32>
    %845 = arith.addf %841, %844 : vector<32x1xf32>
    %846 = math.rsqrt %845 : vector<32x1xf32>
    %847 = vector.broadcast %846 : vector<32x1xf32> to vector<32x64xf32>
    %848 = arith.mulf %843, %847 : vector<32x64xf32>
    %849 = vector.broadcast %829 : vector<1x64xf32> to vector<32x64xf32>
    %850 = arith.mulf %848, %849 : vector<32x64xf32>
    %851 = vector.broadcast %830 : vector<1x64xf32> to vector<32x64xf32>
    %852 = arith.addf %850, %851 : vector<32x64xf32>
    %853 = arith.truncf %852 : vector<32x64xf32> to vector<32x64xbf16>
    %c0_187 = arith.constant 0 : index
    %c0_188 = arith.constant 0 : index
    %854 = vector.load %arg16[%c0_187, %c0_188] : memref<64x256xbf16, #tpu.memory_space<vmem>>, vector<64x256xbf16>
    %cst_189 = arith.constant dense<0.000000e+00> : vector<32x256xf32>
    %855 = tpu.matmul %853, %854, %cst_189 {dimension_numbers = #tpu.dot_dimension_numbers<[1], [0], [0], [1], [0, 0, 1, 1], [], []>} : vector<32x64xbf16>, vector<64x256xbf16>, vector<32x256xf32> -> vector<32x256xf32>
    %856 = vector.shape_cast %855 : vector<32x256xf32> to vector<2x16x256xf32>
    %857 = arith.truncf %856 : vector<2x16x256xf32> to vector<2x16x256xbf16>
    %858 = vector.extract_strided_slice %857 {offsets = [0, 0, 0], sizes = [2, 16, 64], strides = [1, 1, 1]} : vector<2x16x256xbf16> to vector<2x16x64xbf16>
    %859 = vector.extract_strided_slice %857 {offsets = [0, 0, 64], sizes = [2, 16, 64], strides = [1, 1, 1]} : vector<2x16x256xbf16> to vector<2x16x64xbf16>
    %860 = vector.extract_strided_slice %857 {offsets = [0, 8, 128], sizes = [2, 4, 64], strides = [1, 1, 1]} : vector<2x16x256xbf16> to vector<2x4x64xbf16>
    %861 = vector.extract_strided_slice %857 {offsets = [0, 12, 192], sizes = [2, 2, 64], strides = [1, 1, 1]} : vector<2x16x256xbf16> to vector<2x2x64xbf16>
    "tpu.trace_start"() <{level = 10 : i32, message = "bqd,bcd->bqc"}> : () -> ()
    %cst_190 = arith.constant dense<0.000000e+00> : vector<2x16x4xf32>
    %862 = tpu.matmul %858, %860, %cst_190 {dimension_numbers = #tpu.dot_dimension_numbers<[2], [2], [1], [1], [0, 0, 0, 1, 1, 1], [0], [0]>} : vector<2x16x64xbf16>, vector<2x4x64xbf16>, vector<2x16x4xf32> -> vector<2x16x4xf32>
    "tpu.trace_stop"() : () -> ()
    %cst_191 = arith.constant 1.250000e-01 : f32
    %863 = vector.broadcast %cst_191 : f32 to vector<2x16x4xf32>
    %864 = arith.mulf %862, %863 : vector<2x16x4xf32>
    %cst_192 = arith.constant dense<0xFF800000> : vector<2x16xf32>
    %865 = vector.multi_reduction <maximumf>, %864, %cst_192 [2] : vector<2x16x4xf32> to vector<2x16xf32>
    %866 = vector.shape_cast %865 : vector<2x16xf32> to vector<2x16x1xf32>
    %867 = vector.broadcast %866 : vector<2x16x1xf32> to vector<2x16x4xf32>
    %868 = arith.subf %864, %867 : vector<2x16x4xf32>
    %869 = math.exp %868 : vector<2x16x4xf32>
    %cst_193 = arith.constant dense<0.000000e+00> : vector<2x16xf32>
    %870 = vector.multi_reduction <add>, %869, %cst_193 [2] : vector<2x16x4xf32> to vector<2x16xf32>
    %871 = vector.shape_cast %870 : vector<2x16xf32> to vector<2x16x1xf32>
    %872 = tpu.reciprocal %871 {approx = true} : vector<2x16x1xf32> -> vector<2x16x1xf32>
    %873 = vector.broadcast %872 : vector<2x16x1xf32> to vector<2x16x4xf32>
    %874 = arith.mulf %869, %873 : vector<2x16x4xf32>
    "tpu.trace_start"() <{level = 10 : i32, message = "bqd,btd->bqt"}> : () -> ()
    %cst_194 = arith.constant dense<0.000000e+00> : vector<2x16x2xf32>
    %875 = tpu.matmul %859, %861, %cst_194 {dimension_numbers = #tpu.dot_dimension_numbers<[2], [2], [1], [1], [0, 0, 0, 1, 1, 1], [0], [0]>} : vector<2x16x64xbf16>, vector<2x2x64xbf16>, vector<2x16x2xf32> -> vector<2x16x2xf32>
    "tpu.trace_stop"() : () -> ()
    %cst_195 = arith.constant 1.250000e-01 : f32
    %876 = vector.broadcast %cst_195 : f32 to vector<2x16x2xf32>
    %877 = arith.mulf %875, %876 : vector<2x16x2xf32>
    %cst_196 = arith.constant dense<0xFF800000> : vector<2x16xf32>
    %878 = vector.multi_reduction <maximumf>, %877, %cst_196 [2] : vector<2x16x2xf32> to vector<2x16xf32>
    %879 = vector.shape_cast %878 : vector<2x16xf32> to vector<2x16x1xf32>
    %880 = vector.broadcast %879 : vector<2x16x1xf32> to vector<2x16x2xf32>
    %881 = arith.subf %877, %880 : vector<2x16x2xf32>
    %882 = math.exp %881 : vector<2x16x2xf32>
    %cst_197 = arith.constant dense<0.000000e+00> : vector<2x16xf32>
    %883 = vector.multi_reduction <add>, %882, %cst_197 [2] : vector<2x16x2xf32> to vector<2x16xf32>
    %884 = vector.shape_cast %883 : vector<2x16xf32> to vector<2x16x1xf32>
    %885 = tpu.reciprocal %884 {approx = true} : vector<2x16x1xf32> -> vector<2x16x1xf32>
    %886 = vector.broadcast %885 : vector<2x16x1xf32> to vector<2x16x2xf32>
    %887 = arith.mulf %882, %886 : vector<2x16x2xf32>
    %888 = vector.shape_cast %852 : vector<32x64xf32> to vector<2x16x64xf32>
    %cst_198 = arith.constant 0.000000e+00 : f32
    %889 = vector.broadcast %cst_198 : f32 to vector<2x16x58xf32>
    %890 = tpu.concatenate %888, %874, %887, %889 in 2 : vector<2x16x64xf32>, vector<2x16x4xf32>, vector<2x16x2xf32>, vector<2x16x58xf32> -> vector<2x16x128xf32>
    %c0_199 = arith.constant 0 : index
    %c0_200 = arith.constant 0 : index
    %c0_201 = arith.constant 0 : index
    %891 = vector.load %arg17[%c0_199, %c0_200, %c0_201] : memref<2x16x128xf32, #tpu.memory_space<vmem>>, vector<2x16x128xf32>
    tpu.vector_store %arg17[%c0_199, %c0_200, %c0_201], %890 {strides = array<i32>} : memref<2x16x128xf32, #tpu.memory_space<vmem>>, vector<2x16x128xf32>,
    return
  }
  func.func @transform_0(%arg0: i32) -> (i32, i32, i32) {
    %c0_i32 = arith.constant 0 : i32
    %c0_i32_0 = arith.constant 0 : i32
    %c0_i32_1 = arith.constant 0 : i32
    return %arg0, %c0_i32, %c0_i32_0 : i32, i32, i32
  }
  func.func @transform_1(%arg0: i32) -> (i32, i32, i32) {
    %c0_i32 = arith.constant 0 : i32
    %c0_i32_0 = arith.constant 0 : i32
    %c0_i32_1 = arith.constant 0 : i32
    return %arg0, %c0_i32, %c0_i32_0 : i32, i32, i32
  }
  func.func @transform_2(%arg0: i32) -> (i32, i32) {
    %c0_i32 = arith.constant 0 : i32
    %c0_i32_0 = arith.constant 0 : i32
    %c0_i32_1 = arith.constant 0 : i32
    return %c0_i32, %c0_i32_0 : i32, i32
  }
  func.func @transform_3(%arg0: i32) -> (i32, i32, i32) {
    %c0_i32 = arith.constant 0 : i32
    %c0_i32_0 = arith.constant 0 : i32
    %c0_i32_1 = arith.constant 0 : i32
    %c0_i32_2 = arith.constant 0 : i32
    return %c0_i32, %c0_i32_0, %c0_i32_1 : i32, i32, i32
  }
  func.func @transform_4(%arg0: i32) -> (i32, i32) {
    %c0_i32 = arith.constant 0 : i32
    %c0_i32_0 = arith.constant 0 : i32
    %c0_i32_1 = arith.constant 0 : i32
    return %c0_i32, %c0_i32_0 : i32, i32
  }
  func.func @transform_5(%arg0: i32) -> (i32, i32, i32) {
    %c0_i32 = arith.constant 0 : i32
    %c0_i32_0 = arith.constant 0 : i32
    %c0_i32_1 = arith.constant 0 : i32
    %c0_i32_2 = arith.constant 0 : i32
    return %c0_i32, %c0_i32_0, %c0_i32_1 : i32, i32, i32
  }
  func.func @transform_6(%arg0: i32) -> (i32, i32, i32) {
    %c0_i32 = arith.constant 0 : i32
    %c0_i32_0 = arith.constant 0 : i32
    %c0_i32_1 = arith.constant 0 : i32
    %c0_i32_2 = arith.constant 0 : i32
    return %c0_i32, %c0_i32_0, %c0_i32_1 : i32, i32, i32
  }
  func.func @transform_7(%arg0: i32) -> (i32, i32, i32) {
    %c0_i32 = arith.constant 0 : i32
    %c0_i32_0 = arith.constant 0 : i32
    %c0_i32_1 = arith.constant 0 : i32
    %c0_i32_2 = arith.constant 0 : i32
    return %c0_i32, %c0_i32_0, %c0_i32_1 : i32, i32, i32
  }
  func.func @transform_8(%arg0: i32) -> (i32, i32, i32) {
    %c0_i32 = arith.constant 0 : i32
    %c0_i32_0 = arith.constant 0 : i32
    %c0_i32_1 = arith.constant 0 : i32
    %c0_i32_2 = arith.constant 0 : i32
    return %c0_i32, %c0_i32_0, %c0_i32_1 : i32, i32, i32
  }
  func.func @transform_9(%arg0: i32) -> (i32, i32, i32) {
    %c0_i32 = arith.constant 0 : i32
    %c0_i32_0 = arith.constant 0 : i32
    %c0_i32_1 = arith.constant 0 : i32
    %c0_i32_2 = arith.constant 0 : i32
    return %c0_i32, %c0_i32_0, %c0_i32_1 : i32, i32, i32
  }
  func.func @transform_10(%arg0: i32) -> (i32, i32, i32) {
    %c0_i32 = arith.constant 0 : i32
    %c0_i32_0 = arith.constant 0 : i32
    %c0_i32_1 = arith.constant 0 : i32
    %c0_i32_2 = arith.constant 0 : i32
    return %c0_i32, %c0_i32_0, %c0_i32_1 : i32, i32, i32
  }
  func.func @transform_11(%arg0: i32) -> (i32, i32, i32) {
    %c0_i32 = arith.constant 0 : i32
    %c0_i32_0 = arith.constant 0 : i32
    %c0_i32_1 = arith.constant 0 : i32
    %c0_i32_2 = arith.constant 0 : i32
    return %c0_i32, %c0_i32_0, %c0_i32_1 : i32, i32, i32
  }
  func.func @transform_12(%arg0: i32) -> (i32, i32, i32) {
    %c0_i32 = arith.constant 0 : i32
    %c0_i32_0 = arith.constant 0 : i32
    %c0_i32_1 = arith.constant 0 : i32
    %c0_i32_2 = arith.constant 0 : i32
    return %c0_i32, %c0_i32_0, %c0_i32_1 : i32, i32, i32
  }
  func.func @transform_13(%arg0: i32) -> (i32, i32, i32) {
    %c0_i32 = arith.constant 0 : i32
    %c0_i32_0 = arith.constant 0 : i32
    %c0_i32_1 = arith.constant 0 : i32
    %c0_i32_2 = arith.constant 0 : i32
    return %c0_i32, %c0_i32_0, %c0_i32_1 : i32, i32, i32
  }
  func.func @transform_14(%arg0: i32) -> (i32, i32, i32) {
    %c0_i32 = arith.constant 0 : i32
    %c0_i32_0 = arith.constant 0 : i32
    %c0_i32_1 = arith.constant 0 : i32
    %c0_i32_2 = arith.constant 0 : i32
    return %c0_i32, %c0_i32_0, %c0_i32_1 : i32, i32, i32
  }
  func.func @transform_15(%arg0: i32) -> (i32, i32) {
    %c0_i32 = arith.constant 0 : i32
    %c0_i32_0 = arith.constant 0 : i32
    %c0_i32_1 = arith.constant 0 : i32
    return %c0_i32, %c0_i32_0 : i32, i32
  }
  func.func @transform_16(%arg0: i32) -> (i32, i32, i32) {
    %c0_i32 = arith.constant 0 : i32
    %c0_i32_0 = arith.constant 0 : i32
    %c0_i32_1 = arith.constant 0 : i32
    return %arg0, %c0_i32, %c0_i32_0 : i32, i32, i32
  }
}

</mosaic_0001>

<bundles_post_ra>
// kernel: _fused_forward.1
= control target key start
LH: loop header
LB: loop body
LE: loop exit
PB: predicated region body
PF: predicated region fallthrough
CT: control target
= control target key end

     0   :  { %s7026_s21 = smov 0   ;;  %s9577_s0 = inlined_call_operand.vmem [shape: f32[4,16,32], index: 0, kind: input, shape index: {}]   ;;  %s9578_s1 = inlined_call_operand.vmem [shape: s32[4,16,16], index: 1, kind: input, shape index: {}]   ;;  %s9579_s2 = inlined_call_operand.vmem [shape: bf16[32,768], index: 2, kind: input, shape index: {}]   ;;  %s9580_s3 = inlined_call_operand.vmem [shape: bf16[3,64,256], index: 3, kind: input, shape index: {}]   ;;  %s9581_s4 = inlined_call_operand.vmem [shape: f32[1,768], index: 4, kind: input, shape index: {}]   ;;  %s9582_s5 = inlined_call_operand.vmem [shape: bf16[2,64,192], index: 5, kind: input, shape index: {}]   ;;  %s9583_s6 = inlined_call_operand.vmem [shape: bf16[2,64,64], index: 6, kind: input, shape index: {}]   ;;  %s9584_s7 = inlined_call_operand.vmem [shape: f32[2,2,64], index: 7, kind: input, shape index: {}]   ;;  %s9585_s8 = inlined_call_operand.vmem [shape: bf16[2,64,256], index: 8, kind: input, shape index: {}]   ;;  %s9586_s9 = inlined_call_operand.vmem [shape: f32[2,1,256], index: 9, kind: input, shape index: {}]   ;;  %s9587_s10 = inlined_call_operand.vmem [shape: bf16[2,256,64], index: 10, kind: input, shape index: {}]   ;;  %s9588_s11 = inlined_call_operand.vmem [shape: f32[2,1,64], index: 11, kind: input, shape index: {}]   ;;  %s9589_s12 = inlined_call_operand.vmem [shape: f32[2,2,64], index: 12, kind: input, shape index: {}]   ;;  %s9590_s13 = inlined_call_operand.vmem [shape: bf16[2,10,64], index: 13, kind: input, shape index: {}]   ;;  %s9591_s14 = inlined_call_operand.vmem [shape: bf16[2,10,64], index: 14, kind: input, shape index: {}]   ;;  %s9592_s15 = inlined_call_operand.vmem [shape: bf16[64,256], index: 15, kind: input, shape index: {}]   ;;  %s9593_s16 = inlined_call_operand.vmem [shape: f32[4,16,128], index: 16, kind: output, shape index: {}]  }
   0x1   :  { %9642 = sst [smem:[#allocation14_spill]] %s9577_s0 }
   0x2 LB: > { %s5701_s22 = sadd.s32 4294967295, %s6924_s21   ;;  %p5705_p0 = scmp.ge.s32.totalorder %s6924_s21, 1  ;;  %s6924_s21 = sphi %s7026_s21, %s26_s21  }
   0x3   : > { %p476_p1 = scmp.lt.s32.totalorder %s6924_s21, 3 }
   0x5   : > { %p477_p2 = pnand %p5705_p0, %p476_p1 }
   0x7   : > { %480 = sbr.rel (%p477_p2) target bundleno = 9696 (0x25e0), region = 84 }
   0xc   : > { %v6432_v0 = vld [vmem:[%s9579_s2 + $0x34] sm:$0xf]  ;;  %v5743_v1 = vld [vmem:[%s9579_s2 + $0x48] sm:$0xf0]  ;;  %v6433_v2 = vld [vmem:[%s9579_s2 + $0x3c] sm:$0xf]  ;;  %v556_v56 = vlaneseq }
   0xd   : > { %v5746_v3 = vor.u32 %v6432_v0, %v5743_v1  ;;  %v5751_v4 = vld [vmem:[%s9579_s2 + $0x50] sm:$0xf0]  ;;  %v6426_v5 = vld [vmem:[%s9579_s2 + $0x4] sm:$0xf]  ;;  %v5719_v6 = vld [vmem:[%s9579_s2 + $0x18] sm:$0xf0] }
   0xe   : > { %v5754_v7 = vor.u32 %v6433_v2, %v5751_v4  ;;  %v6427_v8 = vld [vmem:[%s9579_s2 + $0xc] sm:$0xf]  ;;  %v5727_v9 = vld [vmem:[%s9579_s2 + $0x20] sm:$0xf0]  ;;  %s5706_s26 = sshll.u32 %s5701_s22, 1  ;;  %v5722_v10 = vor.u32 %v6426_v5, %v5719_v6  ;;  %v9594_v14 = vmov 0  }
   0xf   : > { %707 = vmatpush.bf16.msra.mxu1 %v5746_v3  ;;  %p535_p3 = scmp.lt.s32.totalorder %s5706_s26, 3  ;;  %v6444_v11 = vld [vmem:[%s9580_s3 + $0x34] sm:$0xf]  ;;  %v5803_v12 = vld [vmem:[%s9580_s3 + $0x38] sm:$0xf0]  ;;  %v5730_v13 = vor.u32 %v6427_v8, %v5727_v9  ;;  %6569 = vset.pattern.permute.xlu2 %v9594_v14  ;;  %s9643_s24 = sld [smem:[#allocation14_spill]] }
  0x10   : > { %741 = vmatpush.bf16.msra.mxu3 %v5754_v7  ;;  %v7065_v15 = vor.u32 %v6444_v11, %v5803_v12  ;;  %v6442_v16 = vld [vmem:[%s9580_s3 + $0x24] sm:$0xf]  ;;  %v5795_v17 = vld [vmem:[%s9580_s3 + $0x28] sm:$0xf0]  ;;  %vm677_vm0 = vcmask 261120   ;;  %v7210_v59 = vand.u32 127, %v556_v56 }
  0x11   : > { %s9713_s26 = smov (!%p535_p3, %s5706_s26), 3  ;;  %v7084_v20 = vor.u32 %v6442_v16, %v5795_v17  ;;  %v6440_v22 = vld [vmem:[%s9580_s3 + $0x14] sm:$0xf]  ;;  %v5787_v23 = vld [vmem:[%s9580_s3 + $0x18] sm:$0xf0]  ;;  %vm799_vm1 = vcmask 1041409  }
  0x12   : > { %s7073_s19 = sshll.u32 %s9713_s26, 4  ;;  %v6438_v24 = vld [vmem:[%s9580_s3 + $0x4] sm:$0xf]  ;;  %v5779_v25 = vld [vmem:[%s9580_s3 + $0x8] sm:$0xf0]  ;;  %v7114_v29 = vor.u32 %v6440_v22, %v5787_v23  ;;  %v558_v62 = vadd.s32 128, %v7210_v59 }
  0x13   : > { %708 = vmatpush.bf16.msra.mxu1 %v5722_v10  ;;  %v5749_v26 = vld [vmem:[%s9579_s2 + $0x38] sm:$0xf]  ;;  %v6436_v27 = vld [vmem:[%s9579_s2 + $0x4c] sm:$0xf0]  ;;  %v5725_v28 = vld [vmem:[%s9579_s2 + $0x8] sm:$0xf]  ;;  %v7140_v42 = vor.u32 %v6438_v24, %v5779_v25  ;;  %s8300_s29 = scalar_lea.vmem %s9578_s1, %s7073_s19  ;;  %s553_s28 = scalar_lea.vmem %s9593_s16, %s7073_s19 }
  0x14   : > { %742 = vmatpush.bf16.msra.mxu3 %v5730_v13  ;;  %v5750_v30 = vor.u32 %v6436_v27, %v5749_v26  ;;  %v6430_v31 = vld [vmem:[%s9579_s2 + $0x1c] sm:$0xf0]  ;;  %v5741_v32 = vld [vmem:[%s9579_s2 + $0x30] sm:$0xf]  ;;  %v6435_v33 = vld [vmem:[%s9579_s2 + $0x44] sm:$0xf0] }
  0x15   : > { %s7079_s25 = scalar_lea.vmem %s9643_s24, %s7073_s19  ;;  %v5742_v34 = vor.u32 %v6435_v33, %v5741_v32  ;;  %v5717_v35 = vld [vmem:[%s9579_s2] sm:$0xf]  ;;  %v6429_v36 = vld [vmem:[%s9579_s2 + $0x14] sm:$0xf0]  ;;  %v5801_v37 = vld [vmem:[%s9580_s3 + $0x30] sm:$0xf]  ;;  %v5726_v38 = vor.u32 %v6430_v31, %v5725_v28 }
  0x16   : > { %v585_v18 = vld [vmem:[%s7079_s25] sm:$0xff]  ;;  %v586_v19 = vld [vmem:[%s7079_s25 + $0x8] sm:$0xff]  ;;  %724 = vmatpush.bf16.msra.mxu2 %v5750_v30  ;;  %v6445_v39 = vld [vmem:[%s9580_s3 + $0x34] sm:$0xf0]  ;;  %v5718_v40 = vor.u32 %v6429_v36, %v5717_v35  ;;  %v570_v1 = vand.u32 63, %v558_v62  ;;  %s6927_s22 = smov 64  }
  0x17   : > { %v7086_v21 = vpack.c.bf16 %v586_v19, %v585_v18  ;;  %690 = vmatpush.bf16.msra.mxu0 %v5742_v34  ;;  %v7137_v41 = vor.u32 %v6445_v39, %v5801_v37  ;;  %v5793_v43 = vld [vmem:[%s9580_s3 + $0x20] sm:$0xf]  ;;  %v6443_v44 = vld [vmem:[%s9580_s3 + $0x24] sm:$0xf0]  ;;  %v587_v46 = vld [vmem:[%s7079_s25 + $0x10] sm:$0xff]  ;;  %vm855_vm12 = vcmask 523264  }
  0x18   : > { %876 = vmatpush.bf16.msrb.mxu3 %v7065_v15  ;;  %v7149_v45 = vor.u32 %v6443_v44, %v5793_v43  ;;  %v588_v47 = vld [vmem:[%s7079_s25 + $0x18] sm:$0xff]  ;;  %v5785_v48 = vld [vmem:[%s9580_s3 + $0x10] sm:$0xf]  ;;  %v5777_v52 = vld [vmem:[%s9580_s3] sm:$0xf]  ;;  %vm7214_vm2 = vcmp.lt.s32.totalorder %v570_v1, 32 }
  0x19   : > { %5765 = vmatmul.msk.bf16.vlgmr.msra.gmra.mxu1 %vm677_vm0, %v7086_v21  ;;  %5769 = vmatmul.msk.bf16.vlgmr.msra.gmra.mxu3 %vm677_vm0, %v7086_v21  ;;  %v6441_v49 = vld [vmem:[%s9580_s3 + $0x14] sm:$0xf0]  ;;  %v7165_v50 = vpack.c.bf16 %v588_v47, %v587_v46  ;;  %v6439_v53 = vld [vmem:[%s9580_s3 + $0x4] sm:$0xf0]  ;;  %v7208_v57 = vld [vmem:[%s9581_s4] sm:$0x3f] }
  0x1a   : > { %725 = vmatpush.bf16.msra.mxu2 %v5726_v38  ;;  %v7168_v51 = vor.u32 %v6441_v49, %v5785_v48  ;;  %v7182_v54 = vor.u32 %v6439_v53, %v5777_v52  ;;  %v606_v60 = vperm.slane %v7208_v57, 1  ;;  %v608_v25 = vperm.slane %v7208_v57, 3  ;;  %s6940_s26 = smov 68  }
  0x1b   : > { %691 = vmatpush.bf16.msra.mxu0 %v5718_v40  ;;  %v605_v53 = vperm.slane %v7208_v57, 0 }
  0x1c   : > { %877 = vmatpush.bf16.msrb.mxu3 %v7084_v20 }
  0x1d   : > { %5767 = vmatmul.msk.bf16.vlgmr.msra.gmra.mxu2 %vm677_vm0, %v7086_v21 }
  0x1e   : > { %863 = vmatpush.bf16.msrb.mxu2 %v7137_v41  ;;  %5763 = vmatmul.msk.bf16.vlgmr.msra.gmra.mxu0 %vm677_vm0, %v7086_v21 }
  0x20   : > { %878 = vmatpush.bf16.msrb.mxu3 %v7114_v29 }
  0x22   : > { %864 = vmatpush.bf16.msrb.mxu2 %v7149_v45 }
  0x24   : > { %879 = vmatpush.bf16.msrb.mxu3 %v7140_v42 }
  0x26   : > { %865 = vmatpush.bf16.msrb.mxu2 %v7168_v51 }
  0x28   : > { %980 = vmatpush.bf16.msra.mxu3 %v7065_v15 }
  0x29   : > { %5766 = vmatmul.msk.bf16.gmra.mxu1 %vm677_vm0, %v7165_v50  ;;  %5770 = vmatmul.msk.bf16.gmra.mxu3 %vm677_vm0, %v7165_v50 }
  0x2a   : > { %866 = vmatpush.bf16.msrb.mxu2 %v7182_v54 }
  0x2c   : > { %981 = vmatpush.bf16.msra.mxu3 %v7084_v20 }
  0x2d   : > { %5768 = vmatmul.msk.bf16.gmra.mxu2 %vm677_vm0, %v7165_v50 }
  0x2e   : > { %967 = vmatpush.bf16.msra.mxu2 %v7137_v41  ;;  %5764 = vmatmul.msk.bf16.gmra.mxu0 %vm677_vm0, %v7165_v50 }
  0x30   : > { %982 = vmatpush.bf16.msra.mxu3 %v7114_v29 }
  0x32   : > { %968 = vmatpush.bf16.msra.mxu2 %v7149_v45 }
  0x34   : > { %983 = vmatpush.bf16.msra.mxu3 %v7140_v42 }
  0x36   : > { %969 = vmatpush.bf16.msra.mxu2 %v7168_v51 }
  0x39   : > { %880 = vmatmul.bf16.vlgmr.msrb.gmra.mxu3 %v9594_v14 }
  0x3a   : > { %1192 = vmatpush.bf16.msrb.mxu3 %v7065_v15  ;;  %970 = vmatpush.bf16.msra.mxu2 %v7182_v54 }
  0x3d   : > { %867 = vmatmul.bf16.vlgmr.msrb.gmra.mxu2 %v9594_v14 }
  0x3e   : > { %1193 = vmatpush.bf16.msrb.mxu3 %v7084_v20  ;;  %1179 = vmatpush.bf16.msrb.mxu2 %v7137_v41 }
  0x42   : > { %1194 = vmatpush.bf16.msrb.mxu3 %v7114_v29  ;;  %1180 = vmatpush.bf16.msrb.mxu2 %v7149_v45 }
  0x46   : > { %1195 = vmatpush.bf16.msrb.mxu3 %v7140_v42  ;;  %1181 = vmatpush.bf16.msrb.mxu2 %v7168_v51 }
  0x4a   : > { %1182 = vmatpush.bf16.msrb.mxu2 %v7182_v54 }
  0x96   : > { %v710_v55 = vpop.f32.mrf.mxu1 }
  0x97   : > { %v711_v63 = vadd.f32 %v710_v55, %v606_v60 }
  0x99   : > { %v945_v2 = vrot.slane %v711_v63, 1  ;;  %v952_v6 = vrot.slane %v711_v63, 6  ;;  %v808_v8 = vrot.slane %v711_v63, 7  ;;  %v1050_v9 = vrot.slane %v711_v63, 2 }
  0x9a   : > { %v1058_v10 = vrot.slane %v711_v63, 5  ;;  %v1156_v23 = vrot.slane %v711_v63, 3  ;;  %v1164_v24 = vrot.slane %v711_v63, 4 }
  0x9b   : > { %v693_v17 = vpop.f32.mrf.mxu0 }
  0x9c   : > { %v744_v58 = vpop.f32.mrf.mxu3 }
  0x9e   : > { %v712_v61 = vpop.f32.mrf.mxu1 }
  0xa0   : > { %v727_v4 = vpop.f32.mrf.mxu2 }
  0xa3   : > { %v695_v49 = vpop.f32.mrf.mxu0 }
  0xa4   : > { %v745_v0 = vpop.f32.mrf.mxu3 }
  0xa5   : > { %v746_v48 = vadd.f32 %v745_v0, %v608_v25 }
  0xa6   : > { %v714_v3 = vpop.f32.mrf.mxu1 }
  0xa7   : > { %v715_v5 = vadd.f32 %v714_v3, %v606_v60  ;;  %v1862_v56 = vrot.slane %v746_v48, 1  ;;  %v1729_v60 = vrot.slane %v746_v48, 3  ;;  %v1869_v61 = vrot.slane %v746_v48, 2 }
  0xa8   : > { %v728_v36 = vpop.f32.mrf.mxu2  ;;  %v7275_v3 = vadd.f32 %v693_v17, %v605_v53 }
  0xa9   : > { %v801_v11 = vrot.slane %v715_v5, 7  ;;  %v809_v12 = vrot.slane %v715_v5, 6  ;;  %v7219_v13 = vsel %vm799_vm1, %v715_v5, %v945_v2  ;;  %v953_v16 = vrot.slane %v715_v5, 5 }
  0xaa   : > { %v1051_v18 = vrot.slane %v715_v5, 1  ;;  %v1059_v22 = vrot.slane %v715_v5, 4  ;;  %v1157_v33 = vrot.slane %v715_v5, 2  ;;  %v1165_v34 = vrot.slane %v715_v5, 3 }
  0xab   : > { %v7222_v19 = vsel %vm799_vm1, %v953_v16, %v952_v6  ;;  %v7226_v27 = vsel %vm799_vm1, %v801_v11, %v711_v63  ;;  %v7229_v28 = vsel %vm799_vm1, %v809_v12, %v808_v8  ;;  %v697_v6 = vpop.f32.mrf.mxu0  ;;  %v563_v8 = vand.u32 63, %v7210_v59 }
  0xac   : > { %v748_v26 = vpop.f32.mrf.mxu3  ;;  %v958_v30 = vsel %vm7214_vm2, %v7219_v13, %v7222_v19  ;;  %v7236_v31 = vsel %vm799_vm1, %v1051_v18, %v1050_v9  ;;  %v7239_v32 = vsel %vm799_vm1, %v1059_v22, %v1058_v10  ;;  %v7254_v40 = vsel %vm799_vm1, %v1157_v33, %v1156_v23 }
  0xad   : > { %v1064_v37 = vsel %vm7214_vm2, %v7236_v31, %v7239_v32  ;;  %v7257_v43 = vsel %vm799_vm1, %v1165_v34, %v1164_v24  ;;  %v698_v12 = vadd.f32 %v697_v6, %v605_v53  ;;  %v814_v16 = vsel %vm7214_vm2, %v7226_v27, %v7229_v28 }
  0xae   : > { %v716_v35 = vpop.f32.mrf.mxu1  ;;  %v1170_v46 = vsel %vm7214_vm2, %v7254_v40, %v7257_v43  ;;  %v1260_v47 = vsel %vm7214_vm2, %v7257_v43, %v7254_v40  ;;  %v805_v18 = vrot.slane %v7275_v3, 7  ;;  %vm7306_vm3 = vcmp.lt.s32.totalorder %v563_v8, 32 }
  0xaf   : > { %v798_v23 = vrot.slane %v698_v12, 7  ;;  %v806_v24 = vrot.slane %v698_v12, 6  ;;  %v1162_v11 = vrot.slane %v698_v12, 3 }
  0xb0   : > { %v731_v58 = vpop.f32.mrf.mxu2 }
  0xb1   : > { %v7313_v33 = vsel %vm799_vm1, %v798_v23, %v7275_v3  ;;  %v7316_v34 = vsel %vm799_vm1, %v806_v24, %v805_v18  ;;  %v607_v58 = vperm.slane %v7208_v57, 2 }
  0xb2   : > { %v813_v35 = vsel %vm7306_vm3, %v7313_v33, %v7316_v34 }
  0xb4   : > { %v749_v52 = vpop.f32.mrf.mxu3 }
  0xb5   : > { %v750_v55 = vadd.f32 %v749_v52, %v608_v25 }
  0xb7   : > { %v1722_v62 = vrot.slane %v750_v55, 7  ;;  %v1730_v63 = vrot.slane %v750_v55, 2  ;;  %v7273_v1 = vsel %vm799_vm1, %v750_v55, %v1862_v56  ;;  %v1870_v2 = vrot.slane %v750_v55, 1 }
  0xb8   : > { %v732_v25 = vpop.f32.mrf.mxu2 }
  0xb9   : > { %v7278_v4 = vsel %vm799_vm1, %v1722_v62, %v746_v48  ;;  %v7281_v0 = vsel %vm799_vm1, %v1730_v63, %v1729_v60  ;;  %v7284_v5 = vsel %vm799_vm1, %v1870_v2, %v1869_v61  ;;  %v699_v48 = vpop.f32.mrf.mxu0  ;;  %v729_v60 = vadd.f32 %v728_v36, %v607_v58 }
  0xba   : > { %v733_v61 = vadd.f32 %v732_v25, %v607_v58  ;;  %v943_v48 = vrot.slane %v7275_v3, 1  ;;  %v1055_v58 = vrot.slane %v7275_v3, 5 }
  0xbb   : > { %v1726_v63 = vrot.slane %v729_v60, 3 }
  0xbc   : > { %v881_v17 = vpop.f32.mrf.mxu3  ;;  %v1720_v62 = vrot.slane %v733_v61, 7  ;;  %v1727_v2 = vrot.slane %v733_v61, 2  ;;  %v1867_v18 = vrot.slane %v733_v61, 1 }
  0xbd   : > { %v7304_v22 = vadd.f32 %v881_v17, %v814_v16  ;;  %v1860_v16 = vrot.slane %v729_v60, 1  ;;  %v1866_v17 = vrot.slane %v729_v60, 2 }
  0xbe   : > { %v7325_v6 = vsel %vm799_vm1, %v1720_v62, %v729_v60  ;;  %v7328_v8 = vsel %vm799_vm1, %v1727_v2, %v1726_v63  ;;  %v1056_v60 = vrot.slane %v698_v12, 4  ;;  %v1153_v63 = vrot.slane %v7275_v3, 3 }
  0xbf   : > { %6652 = vtanh.f32 %v7304_v22  ;;  %v7335_v36 = vsel %vm799_vm1, %v733_v61, %v1860_v16  ;;  %v7338_v24 = vsel %vm799_vm1, %v1867_v18, %v1866_v17  ;;  %v7353_v61 = vsel %vm799_vm1, %v698_v12, %v943_v48 }
  0xc0   : > { %v868_v53 = vpop.f32.mrf.mxu2  ;;  %v1154_v2 = vrot.slane %v698_v12, 2  ;;  %v7367_v18 = vsel %vm799_vm1, %v1056_v60, %v1055_v58  ;;  %v1161_v48 = vrot.slane %v7275_v3, 4 }
  0xc1   : > { %v885_v55 = vadd.f32 %v868_v53, %v813_v35  ;;  %v1047_v53 = vrot.slane %v7275_v3, 2 }
  0xc3   : > { %v5807_v60 = vmul.f32 -1.442695, %v885_v55 }
  0xc4   : > { %v883_v49 = vpop.f32.mrf.mxu3 }
  0xc5   : > { %v6653_v52 = vpop.eup %6652  ;;  %v949_v49 = vrot.slane %v7275_v3, 6  ;;  %6654 = vpow2.f32 %v5807_v60 }
  0xc6   : > { %928 = vrot.lane.b32.xlu0 %v6653_v52, %s6927_s22  ;;  %v950_v52 = vrot.slane %v698_v12, 5 }
  0xc8   : > { %v870_v56 = vpop.f32.mrf.mxu2  ;;  %v7356_v62 = vsel %vm799_vm1, %v950_v52, %v949_v49  ;;  %v7375_v52 = vsel %vm799_vm1, %v1154_v2, %v1153_v63 }
  0xc9   : > { %v1048_v56 = vrot.slane %v698_v12, 1  ;;  %v957_v16 = vsel %vm7306_vm3, %v7353_v61, %v7356_v62 }
  0xcb   : > { %v7364_v17 = vsel %vm799_vm1, %v1048_v56, %v1047_v53  ;;  %v7382_v56 = vsel %vm799_vm1, %v1162_v11, %v1161_v48  ;;  %v6655_v63 = vpop.eup %6654 }
  0xcc   : > { %v1063_v49 = vsel %vm7306_vm3, %v7364_v17, %v7367_v18  ;;  %v1169_v3 = vsel %vm7306_vm3, %v7375_v52, %v7382_v56  ;;  %v1259_v58 = vsel %vm7306_vm3, %v7382_v56, %v7375_v52  ;;  %v1349_v12 = vsel %vm7306_vm3, %v7367_v18, %v7364_v17 }
  0xcd   : > { %v893_v2 = vadd.f32 1.0, %v6655_v63 }
  0xcf   : > { %6656 = vrcp.f32 %v893_v2  ;;  %vm900_vm4 = vweird.f32 %v893_v2  ;;  %v906_v9 = vand.u32 2147483648, %v893_v2  ;;  %v904_v44 = vand.u32 2147483647, %v893_v2 }
  0xd1   : > { %v907_v53 = vor.u32 1.1754944e-38, %v906_v9  ;;  %vm905_vm7 = vcmp.eq.f32.partialorder %v904_v44, 8.507059e+37 }
  0xd5   : > { %v6657_v48 = vpop.eup %6656 }
  0xd6   : > { %v896_v23 = vmul.f32 %v6657_v48, %v893_v2  ;;  %vm901_vm5 = vweird.f32 %v6657_v48 }
  0xd7   : > { %vm902_vm6 = vmor %vm900_vm4, %vm901_vm5 }
  0xd8   : > { %v897_v10 = vsub.f32 1.0, %v896_v23  ;;  %v5808_v23 = vmul.f32 -1.442695, %v7304_v22 }
  0xda   : > { %v898_v35 = vmul.f32 %v6657_v48, %v897_v10 }
  0xdc   : > { %v899_v25 = vadd.f32 %v6657_v48, %v898_v35 }
  0xde   : > { %v903_v39 = vsel %vm902_vm6, %v6657_v48, %v899_v25 }
  0xdf   : > { %v908_v11 = vsel %vm905_vm7, %v907_v53, %v903_v39 }
  0xe0   : > { %v926_v60 = vmul.f32 0.0, %v908_v11 }
 0x138   : > { %v929_v14 = vpop.permute.xlu0 %928 }
 0x139   : > { %v931_v55 = vmul.f32 %v929_v14, %v908_v11 }
 0x13b   : > { %933 = vrot.lane.b32.xlu0 %v931_v55, %s6927_s22 }
 0x1ad   : > { %v934_v63 = vpop.permute.xlu0 %933 }
 0x1ae   : > { %v7401_v38 = vadd.f32 %v934_v63, %v926_v60 }
 0x1b0   : > { %6658 = vtanh.f32 %v7401_v38 }
 0x1b1   : > { %6660 = vpow2.f32 %v5808_v23 }
 0x1b6   : > { %v6659_v10 = vpop.eup %6658 }
 0x1b7   : > { %939 = vrot.lane.b32.xlu1 %v6659_v10, %s6927_s22  ;;  %v6661_v9 = vpop.eup %6660 }
 0x1b8   : > { %v894_v25 = vadd.f32 1.0, %v6661_v9 }
 0x1ba   : > { %6662 = vrcp.f32 %v894_v25  ;;  %v921_v11 = vand.u32 2147483648, %v894_v25  ;;  %vm915_vm9 = vweird.f32 %v894_v25  ;;  %v919_v2 = vand.u32 2147483647, %v894_v25 }
 0x1bc   : > { %v922_v55 = vor.u32 1.1754944e-38, %v921_v11  ;;  %vm920_vm11 = vcmp.eq.f32.partialorder %v919_v2, 8.507059e+37 }
 0x1c0   : > { %v6663_v44 = vpop.eup %6662 }
 0x1c1   : > { %v911_v39 = vmul.f32 %v6663_v44, %v894_v25  ;;  %vm916_vm8 = vweird.f32 %v6663_v44 }
 0x1c2   : > { %vm917_vm10 = vmor %vm915_vm9, %vm916_vm8 }
 0x1c3   : > { %v912_v14 = vsub.f32 1.0, %v911_v39 }
 0x1c5   : > { %v913_v35 = vmul.f32 %v6663_v44, %v912_v14 }
 0x1c7   : > { %v914_v53 = vadd.f32 %v6663_v44, %v913_v35 }
 0x1c9   : > { %v918_v48 = vsel %vm917_vm10, %v6663_v44, %v914_v53 }
 0x1ca   : > { %v923_v60 = vsel %vm920_vm11, %v922_v55, %v918_v48 }
 0x229   : > { %v940_v63 = vpop.permute.xlu1 %939 }
 0x22a   : > { %v7406_v22 = vmul.f32 %v940_v63, %v923_v60 }
 0x22c   : > { %v959_v10 = vpack.c.bf16 %v7406_v22, %v7406_v22 }
 0x22e   : > { %5809 = vmatmul.msk.bf16.vlgmr.msra.gmra.mxu2 %vm855_vm12, %v959_v10  ;;  %5810 = vmatmul.msk.bf16.vlgmr.msra.gmra.mxu3 %vm855_vm12, %v959_v10 }
 0x22f   : > { %1359 = vmatpush.bf16.msra.mxu2 %v7137_v41  ;;  %1372 = vmatpush.bf16.msra.mxu3 %v7065_v15 }
 0x233   : > { %1360 = vmatpush.bf16.msra.mxu2 %v7149_v45  ;;  %1373 = vmatpush.bf16.msra.mxu3 %v7084_v20 }
 0x237   : > { %1361 = vmatpush.bf16.msra.mxu2 %v7168_v51  ;;  %1374 = vmatpush.bf16.msra.mxu3 %v7114_v29 }
 0x23b   : > { %1362 = vmatpush.bf16.msra.mxu2 %v7182_v54  ;;  %1375 = vmatpush.bf16.msra.mxu3 %v7140_v42 }
 0x2b1   : > { %v972_v23 = vpop.f32.mrf.mxu2  ;;  %v985_v9 = vpop.f32.mrf.mxu3 }
 0x2b2   : > { %v989_v25 = vadd.f32 %v972_v23, %v957_v16  ;;  %v7430_v44 = vadd.f32 %v985_v9, %v958_v30 }
 0x2b4   : > { %6664 = vtanh.f32 %v7430_v44  ;;  %v5811_v53 = vmul.f32 -1.442695, %v989_v25 }
 0x2b6   : > { %6666 = vpow2.f32 %v5811_v53  ;;  %v5759_v53 = vld [vmem:[%s9579_s2 + $0x58] sm:$0xf0] }
 0x2b9   : > { %v974_v39 = vpop.f32.mrf.mxu2  ;;  %v987_v14 = vpop.f32.mrf.mxu3 }
 0x2ba   : > { %v6665_v35 = vpop.eup %6664 }
 0x2bb   : > { %1032 = vrot.lane.b32.xlu1 %v6665_v35, %s6927_s22  ;;  %v6434_v35 = vld [vmem:[%s9579_s2 + $0x44] sm:$0xf] }
 0x2bc   : > { %v6667_v11 = vpop.eup %6666 }
 0x2bd   : > { %v997_v2 = vadd.f32 1.0, %v6667_v11  ;;  %v6428_v11 = vld [vmem:[%s9579_s2 + $0x14] sm:$0xf] }
 0x2bf   : > { %6668 = vrcp.f32 %v997_v2  ;;  %v1010_v30 = vand.u32 2147483648, %v997_v2  ;;  %vm1004_vm14 = vweird.f32 %v997_v2  ;;  %v1008_v10 = vand.u32 2147483647, %v997_v2 }
 0x2c1   : > { %v1011_v9 = vor.u32 1.1754944e-38, %v1010_v30  ;;  %vm1009_vm4 = vcmp.eq.f32.partialorder %v1008_v10, 8.507059e+37  ;;  %v6431_v30 = vld [vmem:[%s9579_s2 + $0x24] sm:$0xf0] }
 0x2c5   : > { %v6669_v16 = vpop.eup %6668 }
 0x2c6   : > { %v1000_v48 = vmul.f32 %v6669_v16, %v997_v2  ;;  %vm1005_vm13 = vweird.f32 %v6669_v16  ;;  %v5762_v2 = vor.u32 %v6434_v35, %v5759_v53 }
 0x2c7   : > { %vm1006_vm15 = vmor %vm1004_vm14, %vm1005_vm13 }
 0x2c8   : > { %v1001_v55 = vsub.f32 1.0, %v1000_v48  ;;  %v5757_v48 = vld [vmem:[%s9579_s2 + $0x40] sm:$0xf]  ;;  %775 = vmatpush.bf16.msrb.mxu1 %v5762_v2 }
 0x2ca   : > { %v1002_v60 = vmul.f32 %v6669_v16, %v1001_v55  ;;  %v6437_v55 = vld [vmem:[%s9579_s2 + $0x54] sm:$0xf0] }
 0x2cc   : > { %v1003_v63 = vadd.f32 %v6669_v16, %v1002_v60  ;;  %v5758_v60 = vor.u32 %v6437_v55, %v5757_v48 }
 0x2ce   : > { %v1007_v23 = vsel %vm1006_vm15, %v6669_v16, %v1003_v63  ;;  %v5735_v16 = vld [vmem:[%s9579_s2 + $0x28] sm:$0xf0]  ;;  %v5733_v63 = vld [vmem:[%s9579_s2 + $0x10] sm:$0xf]  ;;  %758 = vmatpush.bf16.msrb.mxu0 %v5758_v60 }
 0x2cf   : > { %v1012_v14 = vsel %vm1009_vm4, %v1011_v9, %v1007_v23  ;;  %v5738_v10 = vor.u32 %v6428_v11, %v5735_v16  ;;  %v5734_v23 = vor.u32 %v6431_v30, %v5733_v63  ;;  %vm1665_vm4 = vcmask 1040384  }
 0x2d0   : > { %v1030_v9 = vmul.f32 %v1012_v14, %v7401_v38 }
 0x2d1   : > { %776 = vmatpush.bf16.msrb.mxu1 %v5738_v10 }
 0x2d2   : > { %759 = vmatpush.bf16.msrb.mxu0 %v5734_v23 }
 0x2d4   : > { %5773 = vmatmul.msk.bf16.vlgmr.msrb.gmra.mxu1 %vm677_vm0, %v7086_v21 }
 0x2d5   : > { %1086 = vmatpush.bf16.msra.mxu1 %v7065_v15  ;;  %5771 = vmatmul.msk.bf16.vlgmr.msrb.gmra.mxu0 %vm677_vm0, %v7086_v21 }
 0x2d6   : > { %1073 = vmatpush.bf16.msra.mxu0 %v7137_v41 }
 0x2d9   : > { %1087 = vmatpush.bf16.msra.mxu1 %v7084_v20 }
 0x2da   : > { %1074 = vmatpush.bf16.msra.mxu0 %v7149_v45 }
 0x2dd   : > { %1088 = vmatpush.bf16.msra.mxu1 %v7114_v29 }
 0x2de   : > { %1075 = vmatpush.bf16.msra.mxu0 %v7168_v51 }
 0x2e1   : > { %1089 = vmatpush.bf16.msra.mxu1 %v7140_v42 }
 0x2e2   : > { %1076 = vmatpush.bf16.msra.mxu0 %v7182_v54 }
 0x2e4   : > { %5774 = vmatmul.msk.bf16.gmra.mxu1 %vm677_vm0, %v7165_v50 }
 0x2e5   : > { %1282 = vmatpush.bf16.msrb.mxu1 %v7065_v15  ;;  %5772 = vmatmul.msk.bf16.gmra.mxu0 %vm677_vm0, %v7165_v50 }
 0x2e6   : > { %1269 = vmatpush.bf16.msrb.mxu0 %v7137_v41 }
 0x2e9   : > { %1283 = vmatpush.bf16.msrb.mxu1 %v7084_v20 }
 0x2ea   : > { %1270 = vmatpush.bf16.msrb.mxu0 %v7149_v45 }
 0x2ed   : > { %1284 = vmatpush.bf16.msrb.mxu1 %v7114_v29 }
 0x2ee   : > { %1271 = vmatpush.bf16.msrb.mxu0 %v7168_v51 }
 0x2f1   : > { %1285 = vmatpush.bf16.msrb.mxu1 %v7140_v42 }
 0x2f2   : > { %1272 = vmatpush.bf16.msrb.mxu0 %v7182_v54 }
 0x32d   : > { %v1033_v39 = vpop.permute.xlu1 %1032 }
 0x32e   : > { %v1035_v25 = vmul.f32 %v1033_v39, %v1012_v14  ;;  %v5812_v14 = vmul.f32 -1.442695, %v7430_v44 }
 0x330   : > { %1037 = vrot.lane.b32.xlu2 %v1035_v25, %s6927_s22 }
 0x38a   : > { %v1038_v39 = vpop.permute.xlu2 %1037 }
 0x38b   : > { %v7474_v21 = vadd.f32 %v1038_v39, %v1030_v9  ;;  %v778_v9 = vpop.f32.mrf.mxu1  ;;  %v761_v39 = vpop.f32.mrf.mxu0 }
 0x38d   : > { %6670 = vtanh.f32 %v7474_v21 }
 0x38e   : > { %6672 = vpow2.f32 %v5812_v14 }
 0x393   : > { %v6671_v38 = vpop.eup %6670  ;;  %v762_v14 = vpop.f32.mrf.mxu0 }
 0x394   : > { %1043 = vrot.lane.b32.xlu2 %v6671_v38, %s6927_s22  ;;  %v6673_v25 = vpop.eup %6672  ;;  %v779_v38 = vpop.f32.mrf.mxu1 }
 0x395   : > { %v998_v35 = vadd.f32 1.0, %v6673_v25 }
 0x397   : > { %6674 = vrcp.f32 %v998_v35  ;;  %v1025_v48 = vand.u32 2147483648, %v998_v35  ;;  %vm1019_vm5 = vweird.f32 %v998_v35  ;;  %v1023_v55 = vand.u32 2147483647, %v998_v35 }
 0x399   : > { %v1026_v63 = vor.u32 1.1754944e-38, %v1025_v48  ;;  %vm1024_vm7 = vcmp.eq.f32.partialorder %v1023_v55, 8.507059e+37 }
 0x39c   : > { %v782_v25 = vpop.f32.mrf.mxu1 }
 0x39d   : > { %v6675_v53 = vpop.eup %6674 }
 0x39e   : > { %v1015_v11 = vmul.f32 %v6675_v53, %v998_v35  ;;  %vm1020_vm0 = vweird.f32 %v6675_v53  ;;  %v765_v35 = vpop.f32.mrf.mxu0 }
 0x39f   : > { %vm1021_vm6 = vmor %vm1019_vm5, %vm1020_vm0  ;;  %vm1668_vm0 = vcmask 1041408  }
 0x3a0   : > { %v1016_v50 = vsub.f32 1.0, %v1015_v11 }
 0x3a2   : > { %v1017_v2 = vmul.f32 %v6675_v53, %v1016_v50 }
 0x3a4   : > { %v1018_v16 = vadd.f32 %v6675_v53, %v1017_v2  ;;  %v783_v11 = vpop.f32.mrf.mxu1 }
 0x3a6   : > { %v1022_v60 = vsel %vm1021_vm6, %v6675_v53, %v1018_v16  ;;  %v610_v53 = vperm.slane %v7208_v57, 5 }
 0x3a7   : > { %v1027_v30 = vsel %vm1024_vm7, %v1026_v63, %v1022_v60 }
 0x3a8   : > { %v780_v50 = vadd.f32 %v779_v38, %v610_v53  ;;  %v784_v2 = vadd.f32 %v783_v11, %v610_v53 }
 0x3aa   : > { %v2200_v16 = vrot.slane %v780_v50, 4  ;;  %v2208_v48 = vrot.slane %v780_v50, 5  ;;  %v2201_v55 = vrot.slane %v784_v2, 3  ;;  %v2209_v60 = vrot.slane %v784_v2, 4 }
 0x3ab   : > { %v609_v50 = vperm.slane %v7208_v57, 4 }
 0x3ac   : > { %v7505_v63 = vsel %vm799_vm1, %v2201_v55, %v2200_v16 }
 0x3ad   : > { %v763_v2 = vadd.f32 %v762_v14, %v609_v50 }
 0x3af   : > { %v2205_v55 = vrot.slane %v763_v2, 5 }
 0x3ee   : > { %v1044_v10 = vpop.permute.xlu2 %1043 }
 0x3ef   : > { %v7489_v44 = vmul.f32 %v1044_v10, %v1027_v30  ;;  %v7508_v30 = vsel %vm799_vm1, %v2209_v60, %v2208_v48  ;;  %v2197_v48 = vrot.slane %v763_v2, 4 }
 0x3f1   : > { %v1065_v23 = vpack.c.bf16 %v7489_v44, %v7489_v44 }
 0x3f3   : > { %5813 = vmatmul.msk.bf16.vlgmr.msra.gmra.mxu0 %vm855_vm12, %v1065_v23  ;;  %5814 = vmatmul.msk.bf16.vlgmr.msra.gmra.mxu1 %vm855_vm12, %v1065_v23  ;;  %v766_v23 = vpop.f32.mrf.mxu0 }
 0x3f4   : > { %1449 = vmatpush.bf16.msra.mxu0 %v7137_v41  ;;  %1462 = vmatpush.bf16.msra.mxu1 %v7065_v15  ;;  %v767_v16 = vadd.f32 %v766_v23, %v609_v50 }
 0x3f6   : > { %v2198_v60 = vrot.slane %v767_v16, 3 }
 0x3f8   : > { %1450 = vmatpush.bf16.msra.mxu0 %v7149_v45  ;;  %1463 = vmatpush.bf16.msra.mxu1 %v7084_v20 }
 0x3fc   : > { %1451 = vmatpush.bf16.msra.mxu0 %v7168_v51  ;;  %1464 = vmatpush.bf16.msra.mxu1 %v7114_v29 }
 0x400   : > { %1452 = vmatpush.bf16.msra.mxu0 %v7182_v54  ;;  %1465 = vmatpush.bf16.msra.mxu1 %v7140_v42 }
 0x470   : > { %v1078_v9 = vpop.f32.mrf.mxu0  ;;  %v1091_v39 = vpop.f32.mrf.mxu1 }
 0x471   : > { %v1095_v38 = vadd.f32 %v1078_v9, %v1063_v49  ;;  %v1096_v25 = vadd.f32 %v1091_v39, %v1064_v37  ;;  %v2206_v49 = vrot.slane %v767_v16, 4  ;;  %v7527_v9 = vsel %vm799_vm1, %v2198_v60, %v2197_v48 }
 0x473   : > { %6676 = vtanh.f32 %v1096_v25  ;;  %v7530_v10 = vsel %vm799_vm1, %v2206_v49, %v2205_v55  ;;  %v5815_v39 = vmul.f32 -1.442695, %v1095_v38 }
 0x475   : > { %6678 = vpow2.f32 %v5815_v39 }
 0x478   : > { %v1080_v35 = vpop.f32.mrf.mxu0  ;;  %v1093_v53 = vpop.f32.mrf.mxu1 }
 0x479   : > { %v6677_v11 = vpop.eup %6676 }
 0x47a   : > { %1138 = vrot.lane.b32.xlu0 %v6677_v11, %s6927_s22 }
 0x47b   : > { %v6679_v57 = vpop.eup %6678 }
 0x47c   : > { %v1103_v14 = vadd.f32 1.0, %v6679_v57 }
 0x47e   : > { %6680 = vrcp.f32 %v1103_v14  ;;  %v1116_v2 = vand.u32 2147483648, %v1103_v14  ;;  %vm1110_vm9 = vweird.f32 %v1103_v14  ;;  %v1114_v16 = vand.u32 2147483647, %v1103_v14 }
 0x480   : > { %v1117_v55 = vor.u32 1.1754944e-38, %v1116_v2  ;;  %vm1115_vm10 = vcmp.eq.f32.partialorder %v1114_v16, 8.507059e+37 }
 0x484   : > { %v6681_v23 = vpop.eup %6680 }
 0x485   : > { %v1106_v35 = vmul.f32 %v6681_v23, %v1103_v14  ;;  %vm1111_vm8 = vweird.f32 %v6681_v23  ;;  %v5816_v14 = vmul.f32 -1.442695, %v1096_v25  ;;  %v9597_v25 = vperm.slane %v7489_v44, 0 }
 0x486   : > { %vm1112_vm1 = vmor %vm1110_vm9, %vm1111_vm8 }
 0x487   : > { %v1107_v53 = vsub.f32 1.0, %v1106_v35 }
 0x489   : > { %v1108_v11 = vmul.f32 %v6681_v23, %v1107_v53 }
 0x48b   : > { %v1109_v50 = vadd.f32 %v6681_v23, %v1108_v11 }
 0x48d   : > { %v1113_v48 = vsel %vm1112_vm1, %v6681_v23, %v1109_v50 }
 0x48e   : > { %v1118_v49 = vsel %vm1115_vm10, %v1117_v55, %v1113_v48 }
 0x48f   : > { %v1136_v39 = vmul.f32 %v1118_v49, %v7474_v21 }
 0x4ec   : > { %v1139_v60 = vpop.permute.xlu0 %1138 }
 0x4ed   : > { %v1141_v38 = vmul.f32 %v1139_v60, %v1118_v49  ;;  %v1623_v49 = vrot.slane %v7489_v44, 1 }
 0x4ef   : > { %1143 = vrot.lane.b32.xlu1 %v1141_v38, %s6927_s22 }
 0x561   : > { %v1144_v57 = vpop.permute.xlu1 %1143 }
 0x562   : > { %v7538_v37 = vadd.f32 %v1144_v57, %v1136_v39 }
 0x564   : > { %6682 = vtanh.f32 %v7538_v37 }
 0x565   : > { %6684 = vpow2.f32 %v5816_v14  ;;  %v7546_v14 = vperm.slane %v1623_v49, 0 }
 0x56a   : > { %v6683_v35 = vpop.eup %6682 }
 0x56b   : > { %1149 = vrot.lane.b32.xlu2 %v6683_v35, %s6927_s22  ;;  %v6685_v23 = vpop.eup %6684 }
 0x56c   : > { %v1104_v53 = vadd.f32 1.0, %v6685_v23 }
 0x56e   : > { %6686 = vrcp.f32 %v1104_v53  ;;  %v1131_v21 = vand.u32 2147483648, %v1104_v53  ;;  %vm1125_vm13 = vweird.f32 %v1104_v53  ;;  %v1129_v55 = vand.u32 2147483647, %v1104_v53 }
 0x570   : > { %v1132_v38 = vor.u32 1.1754944e-38, %v1131_v21  ;;  %vm1130_vm15 = vcmp.eq.f32.partialorder %v1129_v55, 8.507059e+37 }
 0x574   : > { %v6687_v11 = vpop.eup %6686 }
 0x575   : > { %v1121_v50 = vmul.f32 %v6687_v11, %v1104_v53  ;;  %vm1126_vm11 = vweird.f32 %v6687_v11 }
 0x576   : > { %vm1127_vm14 = vmor %vm1125_vm13, %vm1126_vm11  ;;  %vm1671_vm13 = vcmask 1042432  }
 0x577   : > { %v1122_v2 = vsub.f32 1.0, %v1121_v50  ;;  %v9596_v50 = vrot.slane %v7406_v22, 1 }
 0x579   : > { %v1123_v16 = vmul.f32 %v6687_v11, %v1122_v2  ;;  %v1666_v2 = vsel %vm1665_vm4, %v7406_v22, %v9597_v25  ;;  %v1667_v21 = vsel %vm1665_vm4, %v9596_v50, %v7546_v14 }
 0x57b   : > { %v1124_v48 = vadd.f32 %v6687_v11, %v1123_v16 }
 0x57d   : > { %v1128_v60 = vsel %vm1127_vm14, %v6687_v11, %v1124_v48 }
 0x57e   : > { %v1133_v39 = vsel %vm1130_vm15, %v1132_v38, %v1128_v60 }
 0x5c5   : > { %v1150_v57 = vpop.permute.xlu2 %1149 }
 0x5c6   : > { %v7544_v35 = vmul.f32 %v1150_v57, %v1133_v39 }
 0x5c8   : > { %v1171_v23 = vpack.c.bf16 %v7544_v35, %v7544_v35  ;;  %v1625_v53 = vrot.slane %v7544_v35, 1  ;;  %v9598_v11 = vperm.slane %v7544_v35, 0 }
 0x5ca   : > { %v7557_v16 = vperm.slane %v1625_v53, 0  ;;  %v7562_v48 = vsel %vm1668_vm0, %v1666_v2, %v9598_v11  ;;  %5817 = vmatmul.msk.bf16.vlgmr.msrb.gmra.mxu2 %vm855_vm12, %v1171_v23  ;;  %5818 = vmatmul.msk.bf16.vlgmr.msrb.gmra.mxu3 %vm855_vm12, %v1171_v23 }
 0x5cb   : > { %1539 = vmatpush.bf16.msrb.mxu2 %v7137_v41  ;;  %1552 = vmatpush.bf16.msrb.mxu3 %v7065_v15 }
 0x5cc   : > { %v7574_v55 = vsel %vm1668_vm0, %v1667_v21, %v7557_v16 }
 0x5cf   : > { %1540 = vmatpush.bf16.msrb.mxu2 %v7149_v45  ;;  %1553 = vmatpush.bf16.msrb.mxu3 %v7084_v20 }
 0x5d3   : > { %1541 = vmatpush.bf16.msrb.mxu2 %v7168_v51  ;;  %1554 = vmatpush.bf16.msrb.mxu3 %v7114_v29 }
 0x5d7   : > { %1542 = vmatpush.bf16.msrb.mxu2 %v7182_v54  ;;  %1555 = vmatpush.bf16.msrb.mxu3 %v7140_v42 }
 0x64d   : > { %v1184_v60 = vpop.f32.mrf.mxu2  ;;  %v1197_v41 = vpop.f32.mrf.mxu3 }
 0x64e   : > { %v1201_v15 = vadd.f32 %v1184_v60, %v1169_v3  ;;  %v1202_v20 = vadd.f32 %v1197_v41, %v1170_v46 }
 0x650   : > { %6688 = vtanh.f32 %v1202_v20  ;;  %v5819_v42 = vmul.f32 -1.442695, %v1201_v15 }
 0x652   : > { %6690 = vpow2.f32 %v5819_v42 }
 0x655   : > { %v1186_v29 = vpop.f32.mrf.mxu2  ;;  %v1199_v45 = vpop.f32.mrf.mxu3 }
 0x656   : > { %v6689_v51 = vpop.eup %6688 }
 0x657   : > { %1244 = vrot.lane.b32.xlu0 %v6689_v51, %s6927_s22 }
 0x658   : > { %v6691_v54 = vpop.eup %6690 }
 0x659   : > { %v1209_v49 = vadd.f32 1.0, %v6691_v54  ;;  %v5820_v54 = vmul.f32 -1.442695, %v1202_v20 }
 0x65b   : > { %6692 = vrcp.f32 %v1209_v49  ;;  %v1222_v53 = vand.u32 2147483648, %v1209_v49  ;;  %vm1216_vm6 = vweird.f32 %v1209_v49  ;;  %v1220_v46 = vand.u32 2147483647, %v1209_v49 }
 0x65d   : > { %v1223_v21 = vor.u32 1.1754944e-38, %v1222_v53  ;;  %vm1221_vm8 = vcmp.eq.f32.partialorder %v1220_v46, 8.507059e+37 }
 0x661   : > { %v6693_v38 = vpop.eup %6692 }
 0x662   : > { %v1212_v39 = vmul.f32 %v6693_v38, %v1209_v49  ;;  %vm1217_vm5 = vweird.f32 %v6693_v38 }
 0x663   : > { %vm1218_vm7 = vmor %vm1216_vm6, %vm1217_vm5 }
 0x664   : > { %v1213_v3 = vsub.f32 1.0, %v1212_v39 }
 0x666   : > { %v1214_v57 = vmul.f32 %v6693_v38, %v1213_v3 }
 0x668   : > { %v1215_v23 = vadd.f32 %v6693_v38, %v1214_v57 }
 0x66a   : > { %v1219_v2 = vsel %vm1218_vm7, %v6693_v38, %v1215_v23 }
 0x66b   : > { %v1224_v41 = vsel %vm1221_vm8, %v1223_v21, %v1219_v2 }
 0x66c   : > { %v1242_v29 = vmul.f32 %v1224_v41, %v7538_v37 }
 0x6c9   : > { %v1245_v60 = vpop.permute.xlu0 %1244 }
 0x6ca   : > { %v1247_v15 = vmul.f32 %v1245_v60, %v1224_v41 }
 0x6cc   : > { %1249 = vrot.lane.b32.xlu1 %v1247_v15, %s6927_s22 }
 0x73e   : > { %v1250_v45 = vpop.permute.xlu1 %1249 }
 0x73f   : > { %v7595_v51 = vadd.f32 %v1250_v45, %v1242_v29 }
 0x741   : > { %6694 = vtanh.f32 %v7595_v51 }
 0x742   : > { %6696 = vpow2.f32 %v5820_v54 }
 0x747   : > { %v6695_v42 = vpop.eup %6694 }
 0x748   : > { %1255 = vrot.lane.b32.xlu2 %v6695_v42, %s6927_s22  ;;  %v6697_v49 = vpop.eup %6696 }
 0x749   : > { %v1210_v38 = vadd.f32 1.0, %v6697_v49 }
 0x74b   : > { %6698 = vrcp.f32 %v1210_v38  ;;  %v1237_v37 = vand.u32 2147483648, %v1210_v38  ;;  %vm1231_vm1 = vweird.f32 %v1210_v38  ;;  %v1235_v46 = vand.u32 2147483647, %v1210_v38 }
 0x74d   : > { %v1238_v21 = vor.u32 1.1754944e-38, %v1237_v37  ;;  %vm1236_vm11 = vcmp.eq.f32.partialorder %v1235_v46, 8.507059e+37 }
 0x751   : > { %v6699_v39 = vpop.eup %6698 }
 0x752   : > { %v1227_v3 = vmul.f32 %v6699_v39, %v1210_v38  ;;  %vm1232_vm9 = vweird.f32 %v6699_v39 }
 0x753   : > { %vm1233_vm10 = vmor %vm1231_vm1, %vm1232_vm9 }
 0x754   : > { %v1228_v57 = vsub.f32 1.0, %v1227_v3 }
 0x756   : > { %v1229_v23 = vmul.f32 %v6699_v39, %v1228_v57 }
 0x758   : > { %v1230_v53 = vadd.f32 %v6699_v39, %v1229_v23 }
 0x75a   : > { %v1234_v2 = vsel %vm1233_vm10, %v6699_v39, %v1230_v53  ;;  %vm1674_vm10 = vcmask 1043456  }
 0x75b   : > { %v1239_v60 = vsel %vm1236_vm11, %v1238_v21, %v1234_v2 }
 0x7a2   : > { %v1256_v41 = vpop.permute.xlu2 %1255 }
 0x7a3   : > { %v7599_v20 = vmul.f32 %v1256_v41, %v1239_v60 }
 0x7a5   : > { %v1261_v15 = vpack.c.bf16 %v7599_v20, %v7599_v20  ;;  %v1627_v29 = vrot.slane %v7599_v20, 1  ;;  %v9599_v45 = vperm.slane %v7599_v20, 0 }
 0x7a7   : > { %v7605_v42 = vperm.slane %v1627_v29, 0  ;;  %v7611_v54 = vsel %vm1671_vm13, %v7562_v48, %v9599_v45  ;;  %5821 = vmatmul.msk.bf16.vlgmr.msrb.gmra.mxu0 %vm855_vm12, %v1261_v15  ;;  %5822 = vmatmul.msk.bf16.vlgmr.msrb.gmra.mxu1 %vm855_vm12, %v1261_v15 }
 0x7a9   : > { %v7618_v49 = vsel %vm1671_vm13, %v7574_v55, %v7605_v42 }
 0x824   : > { %v1274_v38 = vpop.f32.mrf.mxu0  ;;  %v1287_v39 = vpop.f32.mrf.mxu1 }
 0x825   : > { %v1291_v3 = vadd.f32 %v1274_v38, %v1259_v58  ;;  %v1292_v48 = vadd.f32 %v1287_v39, %v1260_v47 }
 0x827   : > { %6700 = vtanh.f32 %v1292_v48  ;;  %v5823_v55 = vmul.f32 -1.442695, %v1291_v3 }
 0x829   : > { %6702 = vpow2.f32 %v5823_v55 }
 0x82c   : > { %v1276_v57 = vpop.f32.mrf.mxu0  ;;  %v1289_v23 = vpop.f32.mrf.mxu1 }
 0x82d   : > { %v6701_v53 = vpop.eup %6700  ;;  %v5824_v23 = vmul.f32 -1.442695, %v1292_v48 }
 0x82e   : > { %1334 = vrot.lane.b32.xlu0 %v6701_v53, %s6927_s22 }
 0x82f   : > { %v6703_v37 = vpop.eup %6702 }
 0x830   : > { %v1299_v46 = vadd.f32 1.0, %v6703_v37 }
 0x832   : > { %6704 = vrcp.f32 %v1299_v46  ;;  %v1312_v60 = vand.u32 2147483648, %v1299_v46  ;;  %vm1306_vm15 = vweird.f32 %v1299_v46  ;;  %v1310_v40 = vand.u32 2147483647, %v1299_v46 }
 0x834   : > { %v1313_v47 = vor.u32 1.1754944e-38, %v1312_v60  ;;  %vm1311_vm6 = vcmp.eq.f32.partialorder %v1310_v40, 8.507059e+37 }
 0x838   : > { %v6705_v2 = vpop.eup %6704 }
 0x839   : > { %v1302_v52 = vmul.f32 %v6705_v2, %v1299_v46  ;;  %vm1307_vm14 = vweird.f32 %v6705_v2 }
 0x83a   : > { %vm1308_vm5 = vmor %vm1306_vm15, %vm1307_vm14 }
 0x83b   : > { %v1303_v56 = vsub.f32 1.0, %v1302_v52 }
 0x83d   : > { %v1304_v58 = vmul.f32 %v6705_v2, %v1303_v56 }
 0x83f   : > { %v1305_v21 = vadd.f32 %v6705_v2, %v1304_v58 }
 0x841   : > { %v1309_v43 = vsel %vm1308_vm5, %v6705_v2, %v1305_v21 }
 0x842   : > { %v1314_v15 = vsel %vm1311_vm6, %v1313_v47, %v1309_v43 }
 0x843   : > { %v1332_v38 = vmul.f32 %v1314_v15, %v7595_v51 }
 0x8a0   : > { %v1335_v41 = vpop.permute.xlu0 %1334 }
 0x8a1   : > { %v1337_v29 = vmul.f32 %v1335_v41, %v1314_v15 }
 0x8a3   : > { %1339 = vrot.lane.b32.xlu1 %v1337_v29, %s6927_s22 }
 0x915   : > { %v1340_v39 = vpop.permute.xlu1 %1339 }
 0x916   : > { %v7633_v3 = vadd.f32 %v1340_v39, %v1332_v38 }
 0x918   : > { %6706 = vtanh.f32 %v7633_v3 }
 0x919   : > { %6708 = vpow2.f32 %v5824_v23 }
 0x91e   : > { %v6707_v57 = vpop.eup %6706 }
 0x91f   : > { %1345 = vrot.lane.b32.xlu2 %v6707_v57, %s6927_s22  ;;  %v6709_v53 = vpop.eup %6708 }
 0x920   : > { %v1300_v55 = vadd.f32 1.0, %v6709_v53 }
 0x922   : > { %6710 = vrcp.f32 %v1300_v55  ;;  %v1327_v51 = vand.u32 2147483648, %v1300_v55  ;;  %vm1321_vm8 = vweird.f32 %v1300_v55  ;;  %v1325_v58 = vand.u32 2147483647, %v1300_v55 }
 0x924   : > { %v1328_v60 = vor.u32 1.1754944e-38, %v1327_v51  ;;  %vm1326_vm1 = vcmp.eq.f32.partialorder %v1325_v58, 8.507059e+37 }
 0x928   : > { %v6711_v37 = vpop.eup %6710 }
 0x929   : > { %v1317_v46 = vmul.f32 %v6711_v37, %v1300_v55  ;;  %vm1322_vm7 = vweird.f32 %v6711_v37 }
 0x92a   : > { %vm1323_vm9 = vmor %vm1321_vm8, %vm1322_vm7 }
 0x92b   : > { %v1318_v2 = vsub.f32 1.0, %v1317_v46 }
 0x92d   : > { %v1319_v52 = vmul.f32 %v6711_v37, %v1318_v2 }
 0x92f   : > { %v1320_v56 = vadd.f32 %v6711_v37, %v1319_v52 }
 0x931   : > { %v1324_v21 = vsel %vm1323_vm9, %v6711_v37, %v1320_v56 }
 0x932   : > { %v1329_v40 = vsel %vm1326_vm1, %v1328_v60, %v1324_v21  ;;  %vm1677_vm1 = vcmask 1044480  }
 0x979   : > { %v1346_v43 = vpop.permute.xlu2 %1345 }
 0x97a   : > { %v7637_v48 = vmul.f32 %v1346_v43, %v1329_v40 }
 0x97c   : > { %v1351_v47 = vpack.c.bf16 %v7637_v48, %v7637_v48  ;;  %v1629_v41 = vrot.slane %v7637_v48, 1  ;;  %v9600_v15 = vperm.slane %v7637_v48, 0 }
 0x97e   : > { %v7643_v29 = vperm.slane %v1629_v41, 0  ;;  %v7649_v38 = vsel %vm1674_vm10, %v7611_v54, %v9600_v15  ;;  %5825 = vmatmul.msk.bf16.vlgmr.msra.gmra.mxu2 %vm855_vm12, %v1351_v47  ;;  %5826 = vmatmul.msk.bf16.vlgmr.msra.gmra.mxu3 %vm855_vm12, %v1351_v47  ;;  %v9648_v54 = vsel %vm7214_vm2, %v7239_v32, %v7236_v31 }
 0x980   : > { %v7656_v39 = vsel %vm1674_vm10, %v7618_v49, %v7643_v29 }
 0xa01   : > { %v1364_v57 = vpop.f32.mrf.mxu2  ;;  %v1377_v23 = vpop.f32.mrf.mxu3 }
 0xa02   : > { %v1381_v53 = vadd.f32 %v1364_v57, %v1349_v12  ;;  %v1382_v55 = vadd.f32 %v1377_v23, %v9648_v54 }
 0xa04   : > { %6712 = vtanh.f32 %v1382_v55  ;;  %v5827_v49 = vmul.f32 -1.442695, %v1381_v53  ;;  %v5828_v54 = vmul.f32 -1.442695, %v1382_v55  ;;  %v5873_v55 = vld [vmem:[%s9580_s3 + $0x78] sm:$0xf0] }
 0xa06   : > { %6714 = vpow2.f32 %v5827_v49  ;;  %v6452_v49 = vld [vmem:[%s9580_s3 + $0x74] sm:$0xf] }
 0xa09   : > { %v1366_v37 = vpop.f32.mrf.mxu2  ;;  %v1379_v46 = vpop.f32.mrf.mxu3 }
 0xa0a   : > { %v6713_v2 = vpop.eup %6712 }
 0xa0b   : > { %1424 = vrot.lane.b32.xlu0 %v6713_v2, %s6927_s22  ;;  %v5871_v2 = vld [vmem:[%s9580_s3 + $0x70] sm:$0xf] }
 0xa0c   : > { %v6715_v52 = vpop.eup %6714 }
 0xa0d   : > { %v1389_v56 = vadd.f32 1.0, %v6715_v52 }
 0xa0f   : > { %6716 = vrcp.f32 %v1389_v56  ;;  %v1402_v21 = vand.u32 2147483648, %v1389_v56  ;;  %vm1396_vm14 = vweird.f32 %v1389_v56  ;;  %v1400_v31 = vand.u32 2147483647, %v1389_v56 }
 0xa11   : > { %v1403_v60 = vor.u32 1.1754944e-38, %v1402_v21  ;;  %vm1401_vm5 = vcmp.eq.f32.partialorder %v1400_v31, 8.507059e+37 }
 0xa15   : > { %v6717_v51 = vpop.eup %6716 }
 0xa16   : > { %v1392_v17 = vmul.f32 %v6717_v51, %v1389_v56  ;;  %vm1397_vm11 = vweird.f32 %v6717_v51  ;;  %v5863_v56 = vld [vmem:[%s9580_s3 + $0x60] sm:$0xf] }
 0xa17   : > { %vm1398_vm15 = vmor %vm1396_vm14, %vm1397_vm11 }
 0xa18   : > { %v1393_v18 = vsub.f32 1.0, %v1392_v17  ;;  %v7695_v17 = vor.u32 %v6452_v49, %v5873_v55 }
 0xa1a   : > { %v1394_v12 = vmul.f32 %v6717_v51, %v1393_v18  ;;  %v6450_v18 = vld [vmem:[%s9580_s3 + $0x64] sm:$0xf]  ;;  %1793 = vmatpush.bf16.msrb.mxu1 %v7695_v17  ;;  %1897 = vmatpush.bf16.msra.mxu3 %v7695_v17 }
 0xa1c   : > { %v1395_v58 = vadd.f32 %v6717_v51, %v1394_v12  ;;  %v5865_v12 = vld [vmem:[%s9580_s3 + $0x68] sm:$0xf0] }
 0xa1d   : > { %v7708_v31 = vor.u32 %v6450_v18, %v5865_v12 }
 0xa1e   : > { %v1399_v32 = vsel %vm1398_vm15, %v6717_v51, %v1395_v58  ;;  %v6451_v51 = vld [vmem:[%s9580_s3 + $0x64] sm:$0xf0] }
 0xa1f   : > { %v1404_v43 = vsel %vm1401_vm5, %v1403_v60, %v1399_v32  ;;  %v7704_v21 = vor.u32 %v6451_v51, %v5863_v56  ;;  %v5855_v32 = vld [vmem:[%s9580_s3 + $0x50] sm:$0xf]  ;;  %v6449_v60 = vld [vmem:[%s9580_s3 + $0x54] sm:$0xf0]  ;;  %1794 = vmatpush.bf16.msrb.mxu1 %v7708_v31  ;;  %1898 = vmatpush.bf16.msra.mxu3 %v7708_v31 }
 0xa20   : > { %v1422_v41 = vmul.f32 %v1404_v43, %v7633_v3  ;;  %v6453_v3 = vld [vmem:[%s9580_s3 + $0x74] sm:$0xf0] }
 0xa21   : > { %v7684_v52 = vor.u32 %v6453_v3, %v5871_v2  ;;  %v5849_v2 = vld [vmem:[%s9580_s3 + $0x48] sm:$0xf0] }
 0xa23   : > { %1780 = vmatpush.bf16.msrb.mxu0 %v7684_v52  ;;  %1884 = vmatpush.bf16.msra.mxu2 %v7684_v52 }
 0xa27   : > { %1781 = vmatpush.bf16.msrb.mxu0 %v7704_v21  ;;  %1885 = vmatpush.bf16.msra.mxu2 %v7704_v21 }
 0xa7d   : > { %v1425_v40 = vpop.permute.xlu0 %1424 }
 0xa7e   : > { %v1427_v47 = vmul.f32 %v1425_v40, %v1404_v43  ;;  %v6448_v40 = vld [vmem:[%s9580_s3 + $0x54] sm:$0xf]  ;;  %v5857_v43 = vld [vmem:[%s9580_s3 + $0x58] sm:$0xf0] }
 0xa80   : > { %1429 = vrot.lane.b32.xlu1 %v1427_v47, %s6927_s22 }
 0xaf2   : > { %v1430_v57 = vpop.permute.xlu1 %1429 }
 0xaf3   : > { %v7671_v23 = vadd.f32 %v1430_v57, %v1422_v41  ;;  %v7724_v41 = vor.u32 %v6449_v60, %v5855_v32  ;;  %v7728_v57 = vor.u32 %v6448_v40, %v5857_v43 }
 0xaf5   : > { %6718 = vtanh.f32 %v7671_v23  ;;  %1782 = vmatpush.bf16.msrb.mxu0 %v7724_v41  ;;  %1886 = vmatpush.bf16.msra.mxu2 %v7724_v41 }
 0xaf6   : > { %6720 = vpow2.f32 %v5828_v54  ;;  %v6447_v54 = vld [vmem:[%s9580_s3 + $0x44] sm:$0xf0]  ;;  %1795 = vmatpush.bf16.msrb.mxu1 %v7728_v57  ;;  %1899 = vmatpush.bf16.msra.mxu3 %v7728_v57 }
 0xafb   : > { %v6719_v53 = vpop.eup %6718 }
 0xafc   : > { %1435 = vrot.lane.b32.xlu2 %v6719_v53, %s6927_s22  ;;  %v6721_v37 = vpop.eup %6720  ;;  %v5847_v53 = vld [vmem:[%s9580_s3 + $0x40] sm:$0xf] }
 0xafd   : > { %v1390_v46 = vadd.f32 1.0, %v6721_v37  ;;  %v6446_v37 = vld [vmem:[%s9580_s3 + $0x44] sm:$0xf]  ;;  %v7744_v49 = vor.u32 %v6447_v54, %v5847_v53 }
 0xafe   : > { %v7748_v55 = vor.u32 %v6446_v37, %v5849_v2 }
 0xaff   : > { %6722 = vrcp.f32 %v1390_v46  ;;  %1783 = vmatpush.bf16.msrb.mxu0 %v7744_v49  ;;  %1887 = vmatpush.bf16.msra.mxu2 %v7744_v49  ;;  %v1417_v18 = vand.u32 2147483648, %v1390_v46  ;;  %vm1411_vm7 = vweird.f32 %v1390_v46  ;;  %v1415_v12 = vand.u32 2147483647, %v1390_v46 }
 0xb00   : > { %1796 = vmatpush.bf16.msrb.mxu1 %v7748_v55  ;;  %1900 = vmatpush.bf16.msra.mxu3 %v7748_v55 }
 0xb01   : > { %v1418_v60 = vor.u32 1.1754944e-38, %v1417_v18  ;;  %vm1416_vm9 = vcmp.eq.f32.partialorder %v1415_v12, 8.507059e+37  ;;  %v9651_v18 = vsel %vm7214_vm2, %v7222_v19, %v7219_v13 }
 0xb05   : > { %v6723_v58 = vpop.eup %6722 }
 0xb06   : > { %v1407_v47 = vmul.f32 %v6723_v58, %v1390_v46  ;;  %vm1412_vm6 = vweird.f32 %v6723_v58 }
 0xb07   : > { %vm1413_vm8 = vmor %vm1411_vm7, %vm1412_vm6 }
 0xb08   : > { %v1408_v3 = vsub.f32 1.0, %v1407_v47 }
 0xb0a   : > { %v1409_v56 = vmul.f32 %v6723_v58, %v1408_v3 }
 0xb0c   : > { %v1410_v51 = vadd.f32 %v6723_v58, %v1409_v56 }
 0xb0e   : > { %v1414_v32 = vsel %vm1413_vm8, %v6723_v58, %v1410_v51 }
 0xb0f   : > { %v1419_v40 = vsel %vm1416_vm9, %v1418_v60, %v1414_v32 }
 0xb56   : > { %v1436_v43 = vpop.permute.xlu2 %1435 }
 0xb57   : > { %v7755_v47 = vmul.f32 %v1436_v43, %v1419_v40 }
 0xb59   : > { %v1441_v53 = vpack.c.bf16 %v7755_v47, %v7755_v47  ;;  %v1631_v54 = vrot.slane %v7755_v47, 1  ;;  %v1653_v37 = vperm.slane %v7755_v47, 0  ;;  %v9663_v47 = vperm.slane %v7599_v20, 0 }
 0xb5b   : > { %v7761_v2 = vperm.slane %v1631_v54, 0  ;;  %v7767_v46 = vsel %vm1677_vm1, %v7649_v38, %v1653_v37  ;;  %5829 = vmatmul.msk.bf16.vlgmr.msra.gmra.mxu0 %vm855_vm12, %v1441_v53  ;;  %5830 = vmatmul.msk.bf16.vlgmr.msra.gmra.mxu1 %vm855_vm12, %v1441_v53  ;;  %v9649_v38 = vmov 0  }
 0xb5c   : > { %1974 = vmatpush.bf16.msra.mxu0 %v7684_v52  ;;  %1987 = vmatpush.bf16.msra.mxu1 %v7695_v17 }
 0xb5d   : > { %v7776_v58 = vsel %vm1677_vm1, %v7656_v39, %v7761_v2  ;;  %v9650_v39 = vsel %vm7306_vm3, %v7356_v62, %v7353_v61  ;;  %v1735_v61 = vsel %vm7214_vm2, %v7278_v4, %v7281_v0 }
 0xb60   : > { %1975 = vmatpush.bf16.msra.mxu0 %v7704_v21  ;;  %1988 = vmatpush.bf16.msra.mxu1 %v7708_v31 }
 0xb64   : > { %1976 = vmatpush.bf16.msra.mxu0 %v7724_v41  ;;  %1989 = vmatpush.bf16.msra.mxu1 %v7728_v57 }
 0xb68   : > { %1977 = vmatpush.bf16.msra.mxu0 %v7744_v49  ;;  %1990 = vmatpush.bf16.msra.mxu1 %v7748_v55 }
 0xb6b   : > { %1784 = vmatmul.bf16.vlgmr.msrb.gmra.mxu0 %v9649_v38  ;;  %1797 = vmatmul.bf16.vlgmr.msrb.gmra.mxu1 %v9649_v38 }
 0xbd8   : > { %v1454_v3 = vpop.f32.mrf.mxu0  ;;  %v1467_v56 = vpop.f32.mrf.mxu1 }
 0xbd9   : > { %v1471_v51 = vadd.f32 %v1454_v3, %v9650_v39  ;;  %v7796_v12 = vadd.f32 %v1467_v56, %v9651_v18  ;;  %v1734_v39 = vsel %vm7306_vm3, %v7325_v6, %v7328_v8 }
 0xbdb   : > { %6724 = vtanh.f32 %v7796_v12  ;;  %v5831_v3 = vmul.f32 -1.442695, %v1471_v51 }
 0xbe0   : > { %v1456_v32 = vpop.f32.mrf.mxu0  ;;  %v1469_v60 = vpop.f32.mrf.mxu1 }
 0xbe1   : > { %v6725_v40 = vpop.eup %6724 }
 0xbe2   : > { %1514 = vrot.lane.b32.xlu0 %v6725_v40, %s6927_s22 }
 0xbe8   : > { %v1785_v43 = vpop.f32.mrf.mxu0  ;;  %v1798_v62 = vpop.f32.mrf.mxu1 }
 0xbe9   : > { %v7804_v53 = vadd.f32 %v1798_v62, %v1735_v61  ;;  %v1802_v18 = vadd.f32 %v1785_v43, %v1734_v39 }
 0xbeb   : > { %6726 = vtanh.f32 %v7804_v53  ;;  %v5877_v60 = vmul.f32 -1.442695, %v1802_v18 }
 0xbec   : > { %6728 = vpow2.f32 %v5831_v3 }
 0xbf0   : > { %v1800_v13 = vpop.f32.mrf.mxu1  ;;  %v1787_v19 = vpop.f32.mrf.mxu0 }
 0xbf1   : > { %v6727_v54 = vpop.eup %6726 }
 0xbf2   : > { %1845 = vrot.lane.b32.xlu1 %v6727_v54, %s6927_s22  ;;  %v6729_v56 = vpop.eup %6728 }
 0xbf3   : > { %v1479_v32 = vadd.f32 1.0, %v6729_v56 }
 0xbf5   : > { %6730 = vrcp.f32 %v1479_v32  ;;  %v1492_v50 = vand.u32 2147483648, %v1479_v32  ;;  %vm1486_vm14 = vweird.f32 %v1479_v32  ;;  %v1490_v25 = vand.u32 2147483647, %v1479_v32 }
 0xbf6   : > { %6732 = vpow2.f32 %v5877_v60 }
 0xbf7   : > { %v1493_v56 = vor.u32 1.1754944e-38, %v1492_v50  ;;  %vm1491_vm5 = vcmp.eq.f32.partialorder %v1490_v25, 8.507059e+37 }
 0xbfb   : > { %v6731_v40 = vpop.eup %6730 }
 0xbfc   : > { %v6733_v61 = vpop.eup %6732  ;;  %v1482_v62 = vmul.f32 %v6731_v40, %v1479_v32  ;;  %vm1487_vm11 = vweird.f32 %v6731_v40 }
 0xbfd   : > { %v1810_v13 = vadd.f32 1.0, %v6733_v61  ;;  %vm1488_vm15 = vmor %vm1486_vm14, %vm1487_vm11 }
 0xbfe   : > { %v1483_v19 = vsub.f32 1.0, %v1482_v62 }
 0xbff   : > { %6734 = vrcp.f32 %v1810_v13  ;;  %vm1817_vm7 = vweird.f32 %v1810_v13 }
 0xc00   : > { %v1484_v54 = vmul.f32 %v6731_v40, %v1483_v19  ;;  %v1823_v19 = vand.u32 2147483648, %v1810_v13 }
 0xc02   : > { %v1485_v51 = vadd.f32 %v6731_v40, %v1484_v54  ;;  %v1821_v54 = vand.u32 2147483647, %v1810_v13  ;;  %v1824_v32 = vor.u32 1.1754944e-38, %v1823_v19 }
 0xc04   : > { %v1489_v11 = vsel %vm1488_vm15, %v6731_v40, %v1485_v51  ;;  %vm1822_vm9 = vcmp.eq.f32.partialorder %v1821_v54, 8.507059e+37 }
 0xc05   : > { %v6735_v3 = vpop.eup %6734  ;;  %v1494_v18 = vsel %vm1491_vm5, %v1493_v56, %v1489_v11 }
 0xc06   : > { %v1813_v43 = vmul.f32 %v6735_v3, %v1810_v13  ;;  %vm1818_vm6 = vweird.f32 %v6735_v3  ;;  %v1512_v25 = vmul.f32 %v1494_v18, %v7671_v23 }
 0xc07   : > { %vm1819_vm8 = vmor %vm1817_vm7, %vm1818_vm6  ;;  %vm1680_vm6 = vcmask 1045504  }
 0xc08   : > { %v1814_v45 = vsub.f32 1.0, %v1813_v43 }
 0xc0a   : > { %v1815_v61 = vmul.f32 %v6735_v3, %v1814_v45 }
 0xc0c   : > { %v1816_v62 = vadd.f32 %v6735_v3, %v1815_v61 }
 0xc0e   : > { %v1820_v15 = vsel %vm1819_vm8, %v6735_v3, %v1816_v62 }
 0xc0f   : > { %v1825_v51 = vsel %vm1822_vm9, %v1824_v32, %v1820_v15 }
 0xc10   : > { %v1843_v13 = vmul.f32 0.0, %v1825_v51 }
 0xc54   : > { %v1515_v39 = vpop.permute.xlu0 %1514 }
 0xc55   : > { %v1517_v60 = vmul.f32 %v1515_v39, %v1494_v18  ;;  %v5832_v39 = vmul.f32 -1.442695, %v7796_v12 }
 0xc57   : > { %1519 = vrot.lane.b32.xlu2 %v1517_v60, %s6927_s22  ;;  %v5878_v60 = vmul.f32 -1.442695, %v7804_v53 }
 0xc64   : > { %v1846_v40 = vpop.permute.xlu1 %1845 }
 0xc65   : > { %v1848_v50 = vmul.f32 %v1846_v40, %v1825_v51 }
 0xc67   : > { %1850 = vrot.lane.b32.xlu0 %v1848_v50, %s6927_s22 }
 0xcb1   : > { %v1520_v11 = vpop.permute.xlu2 %1519 }
 0xcb2   : > { %v7815_v43 = vadd.f32 %v1520_v11, %v1512_v25 }
 0xcb4   : > { %6736 = vtanh.f32 %v7815_v43 }
 0xcba   : > { %v6737_v45 = vpop.eup %6736 }
 0xcbb   : > { %1525 = vrot.lane.b32.xlu1 %v6737_v45, %s6927_s22 }
 0xcd9   : > { %v1851_v56 = vpop.permute.xlu0 %1850 }
 0xcda   : > { %v7819_v3 = vadd.f32 %v1851_v56, %v1843_v13 }
 0xcdc   : > { %6738 = vtanh.f32 %v7819_v3 }
 0xcdd   : > { %6740 = vpow2.f32 %v5832_v39 }
 0xce2   : > { %v6739_v15 = vpop.eup %6738 }
 0xce3   : > { %1856 = vrot.lane.b32.xlu2 %v6739_v15, %s6927_s22  ;;  %v6741_v23 = vpop.eup %6740 }
 0xce4   : > { %v1480_v18 = vadd.f32 1.0, %v6741_v23 }
 0xce6   : > { %6742 = vrcp.f32 %v1480_v18  ;;  %v1507_v25 = vand.u32 2147483648, %v1480_v18  ;;  %vm1501_vm14 = vweird.f32 %v1480_v18  ;;  %v1505_v12 = vand.u32 2147483647, %v1480_v18 }
 0xce7   : > { %6744 = vpow2.f32 %v5878_v60 }
 0xce8   : > { %v1508_v13 = vor.u32 1.1754944e-38, %v1507_v25  ;;  %vm1506_vm5 = vcmp.eq.f32.partialorder %v1505_v12, 8.507059e+37 }
 0xcec   : > { %v6743_v61 = vpop.eup %6742 }
 0xced   : > { %v6745_v62 = vpop.eup %6744  ;;  %v1497_v19 = vmul.f32 %v6743_v61, %v1480_v18  ;;  %vm1502_vm11 = vweird.f32 %v6743_v61 }
 0xcee   : > { %v1811_v54 = vadd.f32 1.0, %v6745_v62  ;;  %vm1503_vm15 = vmor %vm1501_vm14, %vm1502_vm11 }
 0xcef   : > { %v1498_v32 = vsub.f32 1.0, %v1497_v19 }
 0xcf0   : > { %6746 = vrcp.f32 %v1811_v54  ;;  %vm1832_vm8 = vweird.f32 %v1811_v54 }
 0xcf1   : > { %v1499_v40 = vmul.f32 %v6743_v61, %v1498_v32 }
 0xcf3   : > { %v1500_v51 = vadd.f32 %v6743_v61, %v1499_v40 }
 0xcf5   : > { %v1504_v11 = vsel %vm1503_vm15, %v6743_v61, %v1500_v51  ;;  %v1838_v51 = vand.u32 2147483648, %v1811_v54 }
 0xcf6   : > { %v6747_v50 = vpop.eup %6746  ;;  %v1509_v53 = vsel %vm1506_vm5, %v1508_v13, %v1504_v11 }
 0xcf7   : > { %v1828_v45 = vmul.f32 %v6747_v50, %v1811_v54  ;;  %vm1833_vm7 = vweird.f32 %v6747_v50  ;;  %v1839_v12 = vor.u32 1.1754944e-38, %v1838_v51 }
 0xcf8   : > { %vm1834_vm9 = vmor %vm1832_vm8, %vm1833_vm7 }
 0xcf9   : > { %v1829_v39 = vsub.f32 1.0, %v1828_v45 }
 0xcfb   : > { %v1830_v61 = vmul.f32 %v6747_v50, %v1829_v39 }
 0xcfd   : > { %v1831_v40 = vadd.f32 %v6747_v50, %v1830_v61 }
 0xcff   : > { %v1835_v25 = vsel %vm1834_vm9, %v6747_v50, %v1831_v40 }
 0xd2d   : > { %v1526_v56 = vpop.permute.xlu1 %1525 }
 0xd2e   : > { %v7825_v15 = vmul.f32 %v1526_v56, %v1509_v53  ;;  %v9654_v53 = vsel %vm7306_vm3, %v7335_v36, %v7338_v24 }
 0xd30   : > { %v1531_v23 = vpack.c.bf16 %v7825_v15, %v7825_v15  ;;  %v1633_v60 = vrot.slane %v7825_v15, 1  ;;  %v1657_v62 = vperm.slane %v7825_v15, 0 }
 0xd32   : > { %v7831_v19 = vperm.slane %v1633_v60, 0  ;;  %v7837_v18 = vsel %vm1680_vm6, %v7767_v46, %v1657_v62  ;;  %5833 = vmatmul.msk.bf16.vlgmr.msrb.gmra.mxu2 %vm855_vm12, %v1531_v23  ;;  %5834 = vmatmul.msk.bf16.vlgmr.msrb.gmra.mxu3 %vm855_vm12, %v1531_v23  ;;  %v1836_v46 = vand.u32 2147483647, %v1811_v54 }
 0xd33   : > { %2064 = vmatpush.bf16.msrb.mxu2 %v7684_v52  ;;  %2077 = vmatpush.bf16.msrb.mxu3 %v7695_v17 }
 0xd34   : > { %v7846_v32 = vsel %vm1680_vm6, %v7776_v58, %v7831_v19  ;;  %vm1837_vm11 = vcmp.eq.f32.partialorder %v1836_v46, 8.507059e+37 }
 0xd35   : > { %v1840_v52 = vsel %vm1837_vm11, %v1839_v12, %v1835_v25 }
 0xd37   : > { %2065 = vmatpush.bf16.msrb.mxu2 %v7704_v21  ;;  %2078 = vmatpush.bf16.msrb.mxu3 %v7708_v31 }
 0xd3b   : > { %2066 = vmatpush.bf16.msrb.mxu2 %v7724_v41  ;;  %2079 = vmatpush.bf16.msrb.mxu3 %v7728_v57  ;;  %v9652_v57 = vsel %vm7306_vm3, %v7316_v34, %v7313_v33  ;;  %v9655_v33 = vsel %vm7214_vm2, %v7273_v1, %v7284_v5 }
 0xd3d   : > { %v1857_v17 = vpop.permute.xlu2 %1856 }
 0xd3e   : > { %v7852_v58 = vmul.f32 %v1857_v17, %v1840_v52 }
 0xd3f   : > { %2067 = vmatpush.bf16.msrb.mxu2 %v7744_v49  ;;  %2080 = vmatpush.bf16.msrb.mxu3 %v7748_v55  ;;  %v9653_v49 = vsel %vm7214_vm2, %v7229_v28, %v7226_v27 }
 0xd40   : > { %v1876_v21 = vpack.c.bf16 %v7852_v58, %v7852_v58 }
 0xd42   : > { %5879 = vmatmul.msk.bf16.vlgmr.msra.gmra.mxu2 %vm855_vm12, %v1876_v21  ;;  %5880 = vmatmul.msk.bf16.vlgmr.msra.gmra.mxu3 %vm855_vm12, %v1876_v21 }
 0xdb5   : > { %v1544_v31 = vpop.f32.mrf.mxu2  ;;  %v1557_v41 = vpop.f32.mrf.mxu3 }
 0xdb6   : > { %v7865_v54 = vadd.f32 %v1544_v31, %v9652_v57  ;;  %v7872_v55 = vadd.f32 %v1557_v41, %v9653_v49 }
 0xdbd   : > { %v1546_v50 = vpop.f32.mrf.mxu2  ;;  %v1559_v11 = vpop.f32.mrf.mxu3 }
 0xdc5   : > { %v1889_v45 = vpop.f32.mrf.mxu2  ;;  %v1902_v13 = vpop.f32.mrf.mxu3 }
 0xdc6   : > { %v1906_v56 = vadd.f32 %v1889_v45, %v9654_v53  ;;  %v1907_v34 = vadd.f32 %v1902_v13, %v9655_v33 }
 0xdc8   : > { %6748 = vtanh.f32 %v1907_v34  ;;  %v5881_v23 = vmul.f32 -1.442695, %v1906_v56  ;;  %v5882_v53 = vmul.f32 -1.442695, %v1907_v34  ;;  %v5927_v34 = vld [vmem:[%s9580_s3 + $0xb8] sm:$0xf0] }
 0xdca   : > { %6750 = vpow2.f32 %v5881_v23  ;;  %v5917_v23 = vld [vmem:[%s9580_s3 + $0xa0] sm:$0xf] }
 0xdcd   : > { %v1891_v27 = vpop.f32.mrf.mxu2  ;;  %v1904_v28 = vpop.f32.mrf.mxu3 }
 0xdce   : > { %v6749_v39 = vpop.eup %6748  ;;  %v5925_v27 = vld [vmem:[%s9580_s3 + $0xb0] sm:$0xf]  ;;  %v6460_v28 = vld [vmem:[%s9580_s3 + $0xb4] sm:$0xf] }
 0xdcf   : > { %1949 = vrot.lane.b32.xlu0 %v6749_v39, %s6927_s22 }
 0xdd0   : > { %v6751_v60 = vpop.eup %6750 }
 0xdd1   : > { %v1914_v61 = vadd.f32 1.0, %v6751_v60  ;;  %v6459_v60 = vld [vmem:[%s9580_s3 + $0xa4] sm:$0xf0] }
 0xdd3   : > { %6752 = vrcp.f32 %v1914_v61  ;;  %v1927_v52 = vand.u32 2147483648, %v1914_v61  ;;  %vm1921_vm15 = vweird.f32 %v1914_v61  ;;  %v1925_v17 = vand.u32 2147483647, %v1914_v61 }
 0xdd5   : > { %v1928_v31 = vor.u32 1.1754944e-38, %v1927_v52  ;;  %vm1926_vm7 = vcmp.eq.f32.partialorder %v1925_v17, 8.507059e+37  ;;  %v5909_v52 = vld [vmem:[%s9580_s3 + $0x90] sm:$0xf]  ;;  %v6457_v17 = vld [vmem:[%s9580_s3 + $0x94] sm:$0xf0] }
 0xdd9   : > { %v6753_v40 = vpop.eup %6752 }
 0xdda   : > { %v1917_v51 = vmul.f32 %v6753_v40, %v1914_v61  ;;  %vm1922_vm14 = vweird.f32 %v6753_v40  ;;  %v5930_v61 = vor.u32 %v6460_v28, %v5927_v34 }
 0xddb   : > { %vm1923_vm5 = vmor %vm1921_vm15, %vm1922_vm14 }
 0xddc   : > { %v1918_v46 = vsub.f32 1.0, %v1917_v51  ;;  %v5919_v51 = vld [vmem:[%s9580_s3 + $0xa8] sm:$0xf0]  ;;  %2272 = vmatpush.bf16.msrb.mxu1 %v5930_v61  ;;  %2362 = vmatpush.bf16.msra.mxu3 %v5930_v61 }
 0xdde   : > { %v1919_v25 = vmul.f32 %v6753_v40, %v1918_v46 }
 0xde0   : > { %v1920_v12 = vadd.f32 %v6753_v40, %v1919_v25  ;;  %v5918_v25 = vor.u32 %v6459_v60, %v5917_v23 }
 0xde2   : > { %v1924_v21 = vsel %vm1923_vm5, %v6753_v40, %v1920_v12  ;;  %v6458_v40 = vld [vmem:[%s9580_s3 + $0xa4] sm:$0xf] }
 0xde3   : > { %v1929_v57 = vsel %vm1926_vm7, %v1928_v31, %v1924_v21  ;;  %v5922_v12 = vor.u32 %v6458_v40, %v5919_v51  ;;  %v6456_v21 = vld [vmem:[%s9580_s3 + $0x94] sm:$0xf]  ;;  %v5911_v31 = vld [vmem:[%s9580_s3 + $0x98] sm:$0xf0] }
 0xde4   : > { %v1947_v50 = vmul.f32 %v1929_v57, %v7819_v3  ;;  %v6461_v3 = vld [vmem:[%s9580_s3 + $0xb4] sm:$0xf0] }
 0xde5   : > { %v5926_v39 = vor.u32 %v6461_v3, %v5925_v27  ;;  %2273 = vmatpush.bf16.msrb.mxu1 %v5922_v12  ;;  %2363 = vmatpush.bf16.msra.mxu3 %v5922_v12 }
 0xde7   : > { %2259 = vmatpush.bf16.msrb.mxu0 %v5926_v39  ;;  %2349 = vmatpush.bf16.msra.mxu2 %v5926_v39 }
 0xdeb   : > { %2260 = vmatpush.bf16.msrb.mxu0 %v5918_v25  ;;  %2350 = vmatpush.bf16.msra.mxu2 %v5918_v25 }
 0xe41   : > { %v1950_v41 = vpop.permute.xlu0 %1949 }
 0xe42   : > { %v1952_v49 = vmul.f32 %v1950_v41, %v1929_v57  ;;  %v5910_v57 = vor.u32 %v6457_v17, %v5909_v52 }
 0xe44   : > { %1954 = vrot.lane.b32.xlu1 %v1952_v49, %s6927_s22  ;;  %v5914_v49 = vor.u32 %v6456_v21, %v5911_v31  ;;  %2261 = vmatpush.bf16.msrb.mxu0 %v5910_v57  ;;  %v9657_v21 = vsel %vm7214_vm2, %v7284_v5, %v7273_v1 }
 0xe45   : > { %2351 = vmatpush.bf16.msra.mxu2 %v5910_v57 }
 0xe46   : > { %2274 = vmatpush.bf16.msrb.mxu1 %v5914_v49  ;;  %2364 = vmatpush.bf16.msra.mxu3 %v5914_v49 }
 0xeb6   : > { %v1955_v11 = vpop.permute.xlu1 %1954 }
 0xeb7   : > { %v7887_v45 = vadd.f32 %v1955_v11, %v1947_v50  ;;  %v5901_v50 = vld [vmem:[%s9580_s3 + $0x80] sm:$0xf]  ;;  %v6455_v11 = vld [vmem:[%s9580_s3 + $0x84] sm:$0xf0] }
 0xeb8   : > { %v5902_v27 = vor.u32 %v6455_v11, %v5901_v50 }
 0xeb9   : > { %6754 = vtanh.f32 %v7887_v45 }
 0xeba   : > { %6756 = vpow2.f32 %v5882_v53  ;;  %v5903_v53 = vld [vmem:[%s9580_s3 + $0x88] sm:$0xf0]  ;;  %2262 = vmatpush.bf16.msrb.mxu0 %v5902_v27  ;;  %2352 = vmatpush.bf16.msra.mxu2 %v5902_v27  ;;  %v2213_v27 = vsel %vm7306_vm3, %v7527_v9, %v7530_v10 }
 0xebf   : > { %v6755_v13 = vpop.eup %6754 }
 0xec0   : > { %1960 = vrot.lane.b32.xlu2 %v6755_v13, %s6927_s22  ;;  %v6757_v56 = vpop.eup %6756  ;;  %v6454_v13 = vld [vmem:[%s9580_s3 + $0x84] sm:$0xf] }
 0xec1   : > { %v1915_v33 = vadd.f32 1.0, %v6757_v56  ;;  %v5906_v3 = vor.u32 %v6454_v13, %v5903_v53 }
 0xec3   : > { %6758 = vrcp.f32 %v1915_v33  ;;  %2275 = vmatpush.bf16.msrb.mxu1 %v5906_v3  ;;  %2365 = vmatpush.bf16.msra.mxu3 %v5906_v3  ;;  %v1942_v34 = vand.u32 2147483648, %v1915_v33  ;;  %vm1936_vm9 = vweird.f32 %v1915_v33  ;;  %v1940_v23 = vand.u32 2147483647, %v1915_v33 }
 0xec5   : > { %v1943_v61 = vor.u32 1.1754944e-38, %v1942_v34  ;;  %vm1941_vm14 = vcmp.eq.f32.partialorder %v1940_v23, 8.507059e+37 }
 0xec9   : > { %v6759_v46 = vpop.eup %6758 }
 0xeca   : > { %v1932_v41 = vmul.f32 %v6759_v46, %v1915_v33  ;;  %vm1937_vm8 = vweird.f32 %v6759_v46 }
 0xecb   : > { %vm1938_vm11 = vmor %vm1936_vm9, %vm1937_vm8 }
 0xecc   : > { %v1933_v56 = vsub.f32 1.0, %v1932_v41 }
 0xece   : > { %v1934_v28 = vmul.f32 %v6759_v46, %v1933_v56 }
 0xed0   : > { %v1935_v39 = vadd.f32 %v6759_v46, %v1934_v28 }
 0xed2   : > { %v1939_v60 = vsel %vm1938_vm11, %v6759_v46, %v1935_v39  ;;  %v9656_v46 = vsel %vm7306_vm3, %v7338_v24, %v7335_v36  ;;  %v2214_v36 = vsel %vm7214_vm2, %v7505_v63, %v7508_v30 }
 0xed3   : > { %v1944_v40 = vsel %vm1941_vm14, %v1943_v61, %v1939_v60 }
 0xf1a   : > { %v1961_v51 = vpop.permute.xlu2 %1960 }
 0xf1b   : > { %v7939_v25 = vmul.f32 %v1961_v51, %v1944_v40 }
 0xf1d   : > { %v1966_v12 = vpack.c.bf16 %v7939_v25, %v7939_v25 }
 0xf1f   : > { %5883 = vmatmul.msk.bf16.vlgmr.msra.gmra.mxu0 %vm855_vm12, %v1966_v12  ;;  %5884 = vmatmul.msk.bf16.vlgmr.msra.gmra.mxu1 %vm855_vm12, %v1966_v12 }
 0xf2f   : > { %2263 = vmatmul.bf16.vlgmr.msrb.gmra.mxu0 %v9649_v38  ;;  %2276 = vmatmul.bf16.vlgmr.msrb.gmra.mxu1 %v9649_v38 }
 0xf9c   : > { %v1979_v33 = vpop.f32.mrf.mxu0  ;;  %v1992_v52 = vpop.f32.mrf.mxu1 }
 0xf9d   : > { %v1996_v17 = vadd.f32 %v1979_v33, %v9656_v46  ;;  %v7957_v31 = vadd.f32 %v1992_v52, %v9657_v21 }
 0xf9f   : > { %6760 = vtanh.f32 %v7957_v31  ;;  %v5885_v53 = vmul.f32 -1.442695, %v1996_v17 }
 0xfa4   : > { %v1981_v41 = vpop.f32.mrf.mxu0  ;;  %v1994_v57 = vpop.f32.mrf.mxu1 }
 0xfa5   : > { %v6761_v49 = vpop.eup %6760 }
 0xfa6   : > { %2039 = vrot.lane.b32.xlu0 %v6761_v49, %s6927_s22 }
 0xfac   : > { %v2264_v50 = vpop.f32.mrf.mxu0  ;;  %v2277_v24 = vpop.f32.mrf.mxu1 }
 0xfad   : > { %v7965_v11 = vadd.f32 %v2277_v24, %v2214_v36  ;;  %v2281_v3 = vadd.f32 %v2264_v50, %v2213_v27 }
 0xfaf   : > { %6762 = vtanh.f32 %v7965_v11  ;;  %v5931_v39 = vmul.f32 -1.442695, %v2281_v3 }
 0xfb0   : > { %6764 = vpow2.f32 %v5885_v53 }
 0xfb4   : > { %v2279_v1 = vpop.f32.mrf.mxu1  ;;  %v2266_v5 = vpop.f32.mrf.mxu0 }
 0xfb5   : > { %v6763_v13 = vpop.eup %6762 }
 0xfb6   : > { %2324 = vrot.lane.b32.xlu1 %v6763_v13, %s6927_s22  ;;  %v6765_v56 = vpop.eup %6764 }
 0xfb7   : > { %v2004_v28 = vadd.f32 1.0, %v6765_v56 }
 0xfb9   : > { %6766 = vrcp.f32 %v2004_v28  ;;  %v2017_v52 = vand.u32 2147483648, %v2004_v28  ;;  %vm2011_vm5 = vweird.f32 %v2004_v28  ;;  %v2015_v46 = vand.u32 2147483647, %v2004_v28 }
 0xfba   : > { %6768 = vpow2.f32 %v5931_v39 }
 0xfbb   : > { %v2018_v41 = vor.u32 1.1754944e-38, %v2017_v52  ;;  %vm2016_vm8 = vcmp.eq.f32.partialorder %v2015_v46, 8.507059e+37 }
 0xfbf   : > { %v6767_v34 = vpop.eup %6766 }
 0xfc0   : > { %v6769_v23 = vpop.eup %6768  ;;  %v2007_v60 = vmul.f32 %v6767_v34, %v2004_v28  ;;  %vm2012_vm15 = vweird.f32 %v6767_v34 }
 0xfc1   : > { %v2289_v61 = vadd.f32 1.0, %v6769_v23  ;;  %vm2013_vm7 = vmor %vm2011_vm5, %vm2012_vm15 }
 0xfc2   : > { %v2008_v40 = vsub.f32 1.0, %v2007_v60 }
 0xfc3   : > { %6770 = vrcp.f32 %v2289_v61  ;;  %v2302_v5 = vand.u32 2147483648, %v2289_v61  ;;  %vm2296_vm11 = vweird.f32 %v2289_v61  ;;  %v2300_v13 = vand.u32 2147483647, %v2289_v61 }
 0xfc4   : > { %v2009_v51 = vmul.f32 %v6767_v34, %v2008_v40  ;;  %6772 = vtanh.f32 %v7872_v55 }
 0xfc5   : > { %v2303_v56 = vor.u32 1.1754944e-38, %v2302_v5  ;;  %vm2301_vm15 = vcmp.eq.f32.partialorder %v2300_v13, 8.507059e+37 }
 0xfc6   : > { %v2010_v12 = vadd.f32 %v6767_v34, %v2009_v51 }
 0xfc8   : > { %v2014_v17 = vsel %vm2013_vm7, %v6767_v34, %v2010_v12 }
 0xfc9   : > { %v6771_v33 = vpop.eup %6770  ;;  %v2019_v49 = vsel %vm2016_vm8, %v2018_v41, %v2014_v17 }
 0xfca   : > { %v2292_v21 = vmul.f32 %v6771_v33, %v2289_v61  ;;  %vm2297_vm9 = vweird.f32 %v6771_v33  ;;  %v6773_v39 = vpop.eup %6772  ;;  %v2037_v34 = vmul.f32 %v2019_v49, %v7887_v45  ;;  %v5835_v61 = vmul.f32 -1.442695, %v7865_v54 }
 0xfcb   : > { %vm2298_vm14 = vmor %vm2296_vm11, %vm2297_vm9 }
 0xfcc   : > { %v2293_v36 = vsub.f32 1.0, %v2292_v21 }
 0xfce   : > { %v2294_v24 = vmul.f32 %v6771_v33, %v2293_v36 }
 0xfd0   : > { %v2295_v1 = vadd.f32 %v6771_v33, %v2294_v24 }
 0xfd2   : > { %v2299_v53 = vsel %vm2298_vm14, %v6771_v33, %v2295_v1 }
 0xfd3   : > { %v2304_v3 = vsel %vm2301_vm15, %v2303_v56, %v2299_v53  ;;  %v5886_v53 = vmul.f32 -1.442695, %v7957_v31 }
 0xfd4   : > { %v2322_v21 = vmul.f32 0.0, %v2304_v3 }
0x1018   : > { %v2040_v57 = vpop.permute.xlu0 %2039 }
0x1019   : > { %v2042_v50 = vmul.f32 %v2040_v57, %v2019_v49 }
0x101b   : > { %2044 = vrot.lane.b32.xlu2 %v2042_v50, %s6927_s22 }
0x1028   : > { %v2325_v27 = vpop.permute.xlu1 %2324 }
0x1029   : > { %v2327_v28 = vmul.f32 %v2325_v27, %v2304_v3  ;;  %v5932_v3 = vmul.f32 -1.442695, %v7965_v11  ;;  %v2148_v11 = vrot.slane %v7939_v25, 1 }
0x102b   : > { %2329 = vrot.lane.b32.xlu0 %v2327_v28, %s6927_s22 }
0x1033   : > { %1604 = vrot.lane.b32.xlu0 %v6773_v39, %s6927_s22 }
0x1075   : > { %v2045_v23 = vpop.permute.xlu2 %2044 }
0x1076   : > { %v7978_v60 = vadd.f32 %v2045_v23, %v2037_v34 }
0x1078   : > { %6774 = vtanh.f32 %v7978_v60 }
0x1079   : > { %6776 = vpow2.f32 %v5835_v61 }
0x107e   : > { %v6775_v40 = vpop.eup %6774 }
0x107f   : > { %2050 = vrot.lane.b32.xlu1 %v6775_v40, %s6927_s22  ;;  %v6777_v51 = vpop.eup %6776 }
0x1080   : > { %v1569_v12 = vadd.f32 1.0, %v6777_v51 }
0x1082   : > { %6778 = vrcp.f32 %v1569_v12  ;;  %v1582_v54 = vand.u32 2147483648, %v1569_v12  ;;  %vm1576_vm7 = vweird.f32 %v1569_v12  ;;  %v1580_v49 = vand.u32 2147483647, %v1569_v12 }
0x1084   : > { %v1583_v36 = vor.u32 1.1754944e-38, %v1582_v54  ;;  %vm1581_vm9 = vcmp.eq.f32.partialorder %v1580_v49, 8.507059e+37 }
0x1088   : > { %v6779_v33 = vpop.eup %6778 }
0x1089   : > { %v1572_v52 = vmul.f32 %v6779_v33, %v1569_v12  ;;  %vm1577_vm5 = vweird.f32 %v6779_v33 }
0x108a   : > { %vm1578_vm8 = vmor %vm1576_vm7, %vm1577_vm5 }
0x108b   : > { %v1573_v46 = vsub.f32 1.0, %v1572_v52 }
0x108d   : > { %v1574_v17 = vmul.f32 %v6779_v33, %v1573_v46 }
0x108f   : > { %v1575_v57 = vadd.f32 %v6779_v33, %v1574_v17 }
0x1091   : > { %v1579_v50 = vsel %vm1578_vm8, %v6779_v33, %v1575_v57 }
0x1092   : > { %v7986_v24 = vsel %vm1581_vm9, %v1583_v36, %v1579_v50  ;;  %v7997_v50 = vperm.slane %v2148_v11, 0 }
0x109d   : > { %v2330_v45 = vpop.permute.xlu0 %2329 }
0x109e   : > { %v7983_v41 = vadd.f32 %v2330_v45, %v2322_v21  ;;  %v2154_v21 = vperm.slane %v7939_v25, 0 }
0x10a0   : > { %6780 = vtanh.f32 %v7983_v41 }
0x10a1   : > { %6782 = vpow2.f32 %v5886_v53  ;;  %v2166_v53 = vsel %vm1665_vm4, %v7852_v58, %v2154_v21 }
0x10a5   : > { %v1605_v1 = vpop.permute.xlu0 %1604 }
0x10a6   : > { %v6781_v5 = vpop.eup %6780  ;;  %v1607_v13 = vmul.f32 %v1605_v1, %v7986_v24 }
0x10a7   : > { %2335 = vrot.lane.b32.xlu2 %v6781_v5, %s6927_s22  ;;  %v6783_v56 = vpop.eup %6782 }
0x10a8   : > { %1609 = vrot.lane.b32.xlu0 %v1607_v13, %s6927_s22  ;;  %v2005_v27 = vadd.f32 1.0, %v6783_v56  ;;  %v2145_v13 = vrot.slane %v7852_v58, 1 }
0x10aa   : > { %6784 = vrcp.f32 %v2005_v27  ;;  %v2032_v33 = vand.u32 2147483648, %v2005_v27  ;;  %vm2026_vm14 = vweird.f32 %v2005_v27  ;;  %v2030_v31 = vand.u32 2147483647, %v2005_v27 }
0x10ab   : > { %6786 = vpow2.f32 %v5932_v3 }
0x10ac   : > { %v2033_v17 = vor.u32 1.1754944e-38, %v2032_v33  ;;  %vm2031_vm5 = vcmp.eq.f32.partialorder %v2030_v31, 8.507059e+37 }
0x10b0   : > { %v6785_v28 = vpop.eup %6784 }
0x10b1   : > { %v6787_v39 = vpop.eup %6786  ;;  %v2022_v34 = vmul.f32 %v6785_v28, %v2005_v27  ;;  %vm2027_vm11 = vweird.f32 %v6785_v28 }
0x10b2   : > { %v2290_v23 = vadd.f32 1.0, %v6787_v39  ;;  %vm2028_vm15 = vmor %vm2026_vm14, %vm2027_vm11 }
0x10b3   : > { %v2023_v61 = vsub.f32 1.0, %v2022_v34 }
0x10b4   : > { %6788 = vrcp.f32 %v2290_v23  ;;  %vm2311_vm8 = vweird.f32 %v2290_v23 }
0x10b5   : > { %v2024_v40 = vmul.f32 %v6785_v28, %v2023_v61  ;;  %v2317_v61 = vand.u32 2147483648, %v2290_v23 }
0x10b7   : > { %v2025_v51 = vadd.f32 %v6785_v28, %v2024_v40  ;;  %v2315_v40 = vand.u32 2147483647, %v2290_v23  ;;  %v2318_v33 = vor.u32 1.1754944e-38, %v2317_v61 }
0x10b9   : > { %v2029_v52 = vsel %vm2028_vm15, %v6785_v28, %v2025_v51  ;;  %v2167_v28 = vsel %vm1665_vm4, %v2145_v13, %v7997_v50  ;;  %vm2316_vm11 = vcmp.eq.f32.partialorder %v2315_v40, 8.507059e+37 }
0x10ba   : > { %v6789_v12 = vpop.eup %6788  ;;  %v2034_v45 = vsel %vm2031_vm5, %v2033_v17, %v2029_v52  ;;  %v1602_v17 = vmul.f32 %v7986_v24, %v7815_v43  ;;  %v9659_v24 = vsel %vm7214_vm2, %v7281_v0, %v7278_v4  ;;  %v9661_v0 = vsel %vm7214_vm2, %v7508_v30, %v7505_v63 }
0x10bb   : > { %v2307_v46 = vmul.f32 %v6789_v12, %v2290_v23  ;;  %vm2312_vm7 = vweird.f32 %v6789_v12  ;;  %vm1683_vm2 = vcmask 1046528  }
0x10bc   : > { %vm2313_vm9 = vmor %vm2311_vm8, %vm2312_vm7  ;;  %vm1704_vm7 = vcmp.lt.s32.totalorder %v7210_v59, 32 }
0x10bd   : > { %v2308_v49 = vsub.f32 1.0, %v2307_v46 }
0x10bf   : > { %v2309_v3 = vmul.f32 %v6789_v12, %v2308_v49 }
0x10c1   : > { %v2310_v34 = vadd.f32 %v6789_v12, %v2309_v3  ;;  %v9658_v3 = vsel %vm7306_vm3, %v7328_v8, %v7325_v6  ;;  %v9660_v8 = vsel %vm7306_vm3, %v7530_v10, %v7527_v9 }
0x10c3   : > { %v2314_v51 = vsel %vm2313_vm9, %v6789_v12, %v2310_v34 }
0x10c4   : > { %v2319_v31 = vsel %vm2316_vm11, %v2318_v33, %v2314_v51 }
0x10f1   : > { %v2051_v57 = vpop.permute.xlu1 %2050 }
0x10f2   : > { %v7995_v54 = vmul.f32 %v2051_v57, %v2034_v45  ;;  %v5836_v57 = vmul.f32 -1.442695, %v7872_v55 }
0x10f4   : > { %v2056_v36 = vpack.c.bf16 %v7995_v54, %v7995_v54  ;;  %v2150_v1 = vrot.slane %v7995_v54, 1  ;;  %v2158_v5 = vperm.slane %v7995_v54, 0 }
0x10f6   : > { %v8008_v56 = vperm.slane %v2150_v1, 0  ;;  %v8013_v27 = vsel %vm1668_vm0, %v2166_v53, %v2158_v5  ;;  %5887 = vmatmul.msk.bf16.vlgmr.msrb.gmra.mxu2 %vm855_vm12, %v2056_v36  ;;  %5888 = vmatmul.msk.bf16.vlgmr.msrb.gmra.mxu3 %vm855_vm12, %v2056_v36 }
0x10f8   : > { %v8023_v39 = vsel %vm1668_vm0, %v2167_v28, %v8008_v56 }
0x1101   : > { %v2336_v52 = vpop.permute.xlu2 %2335 }
0x1102   : > { %v8025_v46 = vmul.f32 %v2336_v52, %v2319_v31 }
0x1104   : > { %v2341_v11 = vpack.c.bf16 %v8025_v46, %v8025_v46 }
0x1106   : > { %5933 = vmatmul.msk.bf16.vlgmr.msra.gmra.mxu2 %vm855_vm12, %v2341_v11  ;;  %5934 = vmatmul.msk.bf16.vlgmr.msra.gmra.mxu3 %vm855_vm12, %v2341_v11 }
0x111a   : > { %v1610_v45 = vpop.permute.xlu0 %1609 }
0x111b   : > { %v1612_v23 = vadd.f32 %v1610_v45, %v1602_v17 }
0x111d   : > { %6790 = vtanh.f32 %v1612_v23 }
0x111e   : > { %6792 = vpow2.f32 %v5836_v57 }
0x1123   : > { %v6791_v12 = vpop.eup %6790 }
0x1124   : > { %1615 = vrot.lane.b32.xlu0 %v6791_v12, %s6927_s22  ;;  %v6793_v49 = vpop.eup %6792 }
0x1125   : > { %v1570_v36 = vadd.f32 1.0, %v6793_v49 }
0x1127   : > { %6794 = vrcp.f32 %v1570_v36  ;;  %v1597_v45 = vand.u32 2147483648, %v1570_v36  ;;  %vm1591_vm15 = vweird.f32 %v1570_v36  ;;  %v1595_v26 = vand.u32 2147483647, %v1570_v36 }
0x1129   : > { %v1598_v10 = vor.u32 1.1754944e-38, %v1597_v45  ;;  %vm1596_vm5 = vcmp.eq.f32.partialorder %v1595_v26, 8.507059e+37 }
0x112d   : > { %v6795_v55 = vpop.eup %6794 }
0x112e   : > { %v1587_v51 = vmul.f32 %v6795_v55, %v1570_v36  ;;  %vm1592_vm14 = vweird.f32 %v6795_v55 }
0x112f   : > { %vm1593_vm3 = vmor %vm1591_vm15, %vm1592_vm14 }
0x1130   : > { %v1588_v33 = vsub.f32 1.0, %v1587_v51  ;;  %v9665_v51 = vperm.slane %v7489_v44, 0 }
0x1132   : > { %v1589_v11 = vmul.f32 %v6795_v55, %v1588_v33 }
0x1134   : > { %v1590_v17 = vadd.f32 %v6795_v55, %v1589_v11 }
0x1136   : > { %v1594_v7 = vsel %vm1593_vm3, %v6795_v55, %v1590_v17 }
0x1137   : > { %v1599_v63 = vsel %vm1596_vm5, %v1598_v10, %v1594_v7 }
0x1179   : > { %v2069_v1 = vpop.f32.mrf.mxu2  ;;  %v2082_v53 = vpop.f32.mrf.mxu3 }
0x117a   : > { %v2086_v43 = vadd.f32 %v2069_v1, %v9658_v3  ;;  %v8045_v28 = vadd.f32 %v2082_v53, %v9659_v24 }
0x117c   : > { %6796 = vtanh.f32 %v8045_v28 }
0x1181   : > { %v2071_v34 = vpop.f32.mrf.mxu2  ;;  %v2084_v61 = vpop.f32.mrf.mxu3 }
0x1182   : > { %v6797_v40 = vpop.eup %6796  ;;  %v9662_v34 = vperm.slane %v7637_v48, 0 }
0x1183   : > { %2129 = vrot.lane.b32.xlu2 %v6797_v40, %s6927_s22  ;;  %v1686_v40 = vperm.slane %v7406_v22, 0 }
0x1189   : > { %v2354_v31 = vpop.f32.mrf.mxu2  ;;  %v2367_v6 = vpop.f32.mrf.mxu3 }
0x118a   : > { %v2371_v4 = vadd.f32 %v2354_v31, %v9660_v8  ;;  %v8059_v52 = vadd.f32 %v2367_v6, %v9661_v0  ;;  %v5889_v0 = vmul.f32 -1.442695, %v2086_v43 }
0x118c   : > { %6798 = vtanh.f32 %v8059_v52  ;;  %v5935_v26 = vmul.f32 -1.442695, %v2371_v4 }
0x118d   : > { %6800 = vpow2.f32 %v5889_v0 }
0x1191   : > { %v2356_v23 = vpop.f32.mrf.mxu2  ;;  %v2369_v12 = vpop.f32.mrf.mxu3 }
0x1192   : > { %v6799_v57 = vpop.eup %6798 }
0x1193   : > { %2414 = vrot.lane.b32.xlu1 %v6799_v57, %s6927_s22  ;;  %v6801_v11 = vpop.eup %6800 }
0x1194   : > { %v2094_v17 = vadd.f32 1.0, %v6801_v11 }
0x1196   : > { %v1616_v30 = vpop.permute.xlu0 %1615  ;;  %6802 = vrcp.f32 %v2094_v17  ;;  %vm2101_vm9 = vweird.f32 %v2094_v17 }
0x1197   : > { %v1618_v9 = vmul.f32 %v1616_v30, %v1599_v63  ;;  %6804 = vpow2.f32 %v5935_v26 }
0x1199   : > { %v1635_v49 = vrot.slane %v1618_v9, 1  ;;  %v1661_v1 = vperm.slane %v1618_v9, 0  ;;  %v1690_v53 = vsel %vm1665_vm4, %v1618_v9, %v1657_v62 }
0x119a   : > { %v1692_v36 = vsel %vm1668_vm0, %v1690_v53, %v1653_v37 }
0x119b   : > { %v1662_v3 = vperm.slane %v1635_v49, 0  ;;  %v1684_v24 = vsel %vm1683_vm2, %v7837_v18, %v1661_v1  ;;  %v1691_v55 = vsel %vm1665_vm4, %v1635_v49, %v7831_v19  ;;  %v1694_v61 = vsel %vm1671_vm13, %v1692_v36, %v9662_v34 }
0x119c   : > { %v1693_v15 = vsel %vm1668_vm0, %v1691_v55, %v7761_v2  ;;  %v1696_v37 = vsel %vm1674_vm10, %v1694_v61, %v9663_v47  ;;  %v9664_v18 = vperm.slane %v7544_v35, 0 }
0x119d   : > { %v1695_v62 = vsel %vm1671_vm13, %v1693_v15, %v7643_v29  ;;  %v1685_v48 = vsel %vm1683_vm2, %v7846_v32, %v1662_v3  ;;  %v9666_v29 = vrot.slane %v7406_v22, 1 }
0x119e   : > { %v1698_v19 = vsel %vm1677_vm1, %v1696_v37, %v9664_v18  ;;  %v1697_v35 = vsel %vm1674_vm10, %v1695_v62, %v7605_v42  ;;  %v6803_v42 = vpop.eup %6802 }
0x119f   : > { %v1700_v2 = vsel %vm1680_vm6, %v1698_v19, %v9665_v51  ;;  %v1687_v31 = vperm.slane %v9666_v29, 0  ;;  %v1699_v6 = vsel %vm1677_vm1, %v1697_v35, %v7557_v16  ;;  %v2097_v22 = vmul.f32 %v6803_v42, %v2094_v17  ;;  %v6805_v30 = vpop.eup %6804 }
0x11a0   : > { %v1702_v20 = vsel %vm1683_vm2, %v1700_v2, %v1686_v40  ;;  %v1701_v44 = vsel %vm1680_vm6, %v1699_v6, %v7546_v14  ;;  %vm2102_vm8 = vweird.f32 %v6803_v42  ;;  %v2107_v16 = vand.u32 2147483648, %v2094_v17  ;;  %v6005_v6 = vld [vmem:[%s9582_s5 + $0x38] sm:$0xf0] }
0x11a1   : > { %v8096_v33 = vsel %vm1704_vm7, %v1684_v24, %v1702_v20  ;;  %v1703_v32 = vsel %vm1683_vm2, %v1701_v44, %v1687_v31  ;;  %v2098_v45 = vsub.f32 1.0, %v2097_v22  ;;  %v2105_v14 = vand.u32 2147483647, %v2094_v17  ;;  %vm2103_vm11 = vmor %vm2101_vm9, %vm2102_vm8 }
0x11a2   : > { %v8109_v8 = vsel %vm1704_vm7, %v1685_v48, %v1703_v32  ;;  %v2108_v7 = vor.u32 1.1754944e-38, %v2107_v16  ;;  %v2379_v9 = vadd.f32 1.0, %v6805_v30  ;;  %v5890_v19 = vmul.f32 -1.442695, %v8045_v28  ;;  %v6469_v28 = vld [vmem:[%s9582_s5 + $0x34] sm:$0xf0] }
0x11a3   : > { %v2099_v23 = vmul.f32 %v6803_v42, %v2098_v45  ;;  %vm2106_vm14 = vcmp.eq.f32.partialorder %v2105_v14, 8.507059e+37 }
0x11a4   : > { %6806 = vrcp.f32 %v2379_v9  ;;  %v2392_v3 = vand.u32 2147483648, %v2379_v9  ;;  %vm2386_vm3 = vweird.f32 %v2379_v9  ;;  %v2390_v24 = vand.u32 2147483647, %v2379_v9 }
0x11a5   : > { %v2100_v12 = vadd.f32 %v6803_v42, %v2099_v23 }
0x11a6   : > { %v2393_v34 = vor.u32 1.1754944e-38, %v2392_v3  ;;  %vm2391_vm2 = vcmp.eq.f32.partialorder %v2390_v24, 8.507059e+37  ;;  %v5987_v24 = vld [vmem:[%s9582_s5 + $0x10] sm:$0xf] }
0x11a7   : > { %v2104_v57 = vsel %vm2103_vm11, %v6803_v42, %v2100_v12 }
0x11a8   : > { %v2109_v10 = vsel %vm2106_vm14, %v2108_v7, %v2104_v57  ;;  %v2172_v57 = vperm.slane %v7852_v58, 0 }
0x11a9   : > { %v2127_v47 = vmul.f32 %v2109_v10, %v7978_v60  ;;  %v6003_v60 = vld [vmem:[%s9582_s5 + $0x30] sm:$0xf] }
0x11aa   : > { %v6807_v49 = vpop.eup %6806  ;;  %v6004_v31 = vor.u32 %v6469_v28, %v6003_v60 }
0x11ab   : > { %v2382_v1 = vmul.f32 %v6807_v49, %v2379_v9  ;;  %vm2387_vm15 = vweird.f32 %v6807_v49 }
0x11ac   : > { %vm2388_vm5 = vmor %vm2386_vm3, %vm2387_vm15  ;;  %2645 = vmatpush.bf16.msra.mxu0 %v6004_v31 }
0x11ad   : > { %v2383_v53 = vsub.f32 1.0, %v2382_v1 }
0x11af   : > { %v2384_v36 = vmul.f32 %v6807_v49, %v2383_v53 }
0x11b1   : > { %v2385_v4 = vadd.f32 %v6807_v49, %v2384_v36  ;;  %v5995_v36 = vld [vmem:[%s9582_s5 + $0x20] sm:$0xf] }
0x11b3   : > { %v2389_v55 = vsel %vm2388_vm5, %v6807_v49, %v2385_v4 }
0x11b4   : > { %v2394_v40 = vsel %vm2391_vm2, %v2393_v34, %v2389_v55  ;;  %v6465_v55 = vld [vmem:[%s9582_s5 + $0x14] sm:$0xf0]  ;;  %v6464_v34 = vld [vmem:[%s9582_s5 + $0x14] sm:$0xf] }
0x11b5   : > { %v2412_v48 = vmul.f32 %v2394_v40, %v7983_v41  ;;  %v6468_v41 = vld [vmem:[%s9582_s5 + $0x34] sm:$0xf] }
0x11b6   : > { %v6008_v44 = vor.u32 %v6468_v41, %v6005_v6 }
0x11b8   : > { %2664 = vmatpush.bf16.msra.mxu1 %v6008_v44 }
0x11dd   : > { %v2130_v43 = vpop.permute.xlu2 %2129 }
0x11de   : > { %v2132_v63 = vmul.f32 %v2130_v43, %v2109_v10 }
0x11e0   : > { %2134 = vrot.lane.b32.xlu2 %v2132_v63, %s6927_s22  ;;  %v2173_v63 = vperm.slane %v2145_v13, 0  ;;  %v5936_v13 = vmul.f32 -1.442695, %v8059_v52  ;;  %v5997_v52 = vld [vmem:[%s9582_s5 + $0x28] sm:$0xf0] }
0x1205   : > { %v2415_v61 = vpop.permute.xlu1 %2414 }
0x1206   : > { %v2417_v15 = vmul.f32 %v2415_v61, %v2394_v40  ;;  %v5988_v40 = vor.u32 %v6465_v55, %v5987_v24 }
0x1208   : > { %2419 = vrot.lane.b32.xlu1 %v2417_v15, %s6927_s22  ;;  %v5989_v15 = vld [vmem:[%s9582_s5 + $0x18] sm:$0xf0] }
0x123a   : > { %v2135_v37 = vpop.permute.xlu2 %2134 }
0x123b   : > { %v2137_v62 = vadd.f32 %v2135_v37, %v2127_v47  ;;  %v5979_v47 = vld [vmem:[%s9582_s5] sm:$0xf]  ;;  %v6463_v37 = vld [vmem:[%s9582_s5 + $0x4] sm:$0xf0] }
0x123d   : > { %6808 = vtanh.f32 %v2137_v62  ;;  %v5992_v62 = vor.u32 %v6464_v34, %v5989_v15 }
0x123e   : > { %6810 = vpow2.f32 %v5890_v19  ;;  %v5981_v19 = vld [vmem:[%s9582_s5 + $0x8] sm:$0xf0] }
0x1243   : > { %v6809_v18 = vpop.eup %6808 }
0x1244   : > { %2140 = vrot.lane.b32.xlu2 %v6809_v18, %s6927_s22  ;;  %v6811_v2 = vpop.eup %6810  ;;  %v6462_v18 = vld [vmem:[%s9582_s5 + $0x4] sm:$0xf] }
0x1245   : > { %v2095_v35 = vadd.f32 1.0, %v6811_v2  ;;  %v5984_v2 = vor.u32 %v6462_v18, %v5981_v19 }
0x1247   : > { %v2122_v22 = vand.u32 2147483648, %v2095_v35  ;;  %vm2116_vm9 = vweird.f32 %v2095_v35  ;;  %v2120_v45 = vand.u32 2147483647, %v2095_v35 }
0x1249   : > { %v2123_v12 = vor.u32 1.1754944e-38, %v2122_v22  ;;  %vm2121_vm14 = vcmp.eq.f32.partialorder %v2120_v45, 8.507059e+37 }
0x127a   : > { %v2420_v51 = vpop.permute.xlu1 %2419 }
0x127b   : > { %v2422_v20 = vadd.f32 %v2420_v51, %v2412_v48  ;;  %v5980_v48 = vor.u32 %v6463_v37, %v5979_v47 }
0x127d   : > { %6812 = vtanh.f32 %v2422_v20 }
0x127e   : > { %6814 = vrcp.f32 %v2095_v35 }
0x127f   : > { %6816 = vpow2.f32 %v5936_v13 }
0x1283   : > { %v6813_v29 = vpop.eup %6812 }
0x1284   : > { %2425 = vrot.lane.b32.xlu1 %v6813_v29, %s6927_s22  ;;  %v6815_v32 = vpop.eup %6814 }
0x1285   : > { %v2112_v0 = vmul.f32 %v6815_v32, %v2095_v35  ;;  %vm2117_vm8 = vweird.f32 %v6815_v32 }
0x1286   : > { %vm2118_vm11 = vmor %vm2116_vm9, %vm2117_vm8 }
0x1287   : > { %v2113_v11 = vsub.f32 1.0, %v2112_v0 }
0x1289   : > { %v2114_v17 = vmul.f32 %v6815_v32, %v2113_v11  ;;  %v2441_v11 = vperm.slane %v8025_v46, 0 }
0x128b   : > { %v2115_v42 = vadd.f32 %v6815_v32, %v2114_v17 }
0x128d   : > { %v2119_v23 = vsel %vm2118_vm11, %v6815_v32, %v2115_v42  ;;  %v2430_v32 = vrot.slane %v8025_v46, 1 }
0x128e   : > { %v2124_v16 = vsel %vm2121_vm14, %v2123_v12, %v2119_v23 }
0x128f   : > { %v2442_v22 = vperm.slane %v2430_v32, 0 }
0x129e   : > { %v2141_v26 = vpop.permute.xlu2 %2140 }
0x129f   : > { %v2143_v14 = vmul.f32 %v2141_v26, %v2124_v16 }
0x12a1   : > { %v2152_v7 = vrot.slane %v2143_v14, 1  ;;  %v2162_v43 = vperm.slane %v2143_v14, 0  ;;  %v2176_v10 = vsel %vm1665_vm4, %v2143_v14, %v2158_v5 }
0x12a2   : > { %v2178_v30 = vsel %vm1668_vm0, %v2176_v10, %v2154_v21 }
0x12a3   : > { %v2163_v9 = vperm.slane %v2152_v7, 0  ;;  %v2170_v49 = vsel %vm1671_vm13, %v8013_v27, %v2162_v43  ;;  %v2177_v1 = vsel %vm1665_vm4, %v2152_v7, %v8008_v56  ;;  %v2180_v53 = vsel %vm1671_vm13, %v2178_v30, %v2172_v57  ;;  %v6817_v56 = vpop.eup %6816 }
0x12a4   : > { %v8146_v54 = vsel %vm1704_vm7, %v2170_v49, %v2180_v53  ;;  %v2179_v58 = vsel %vm1668_vm0, %v2177_v1, %v7997_v50  ;;  %v2380_v27 = vadd.f32 1.0, %v6817_v56  ;;  %v6467_v50 = vld [vmem:[%s9582_s5 + $0x24] sm:$0xf0]  ;;  %v6015_v1 = vld [vmem:[%s9590_s13] sm:$0xf] }
0x12a5   : > { %v2171_v25 = vsel %vm1671_vm13, %v8023_v39, %v2163_v9  ;;  %v2181_v21 = vsel %vm1671_vm13, %v2179_v58, %v2173_v63  ;;  %v6466_v39 = vld [vmem:[%s9582_s5 + $0x24] sm:$0xf]  ;;  %v5996_v4 = vor.u32 %v6467_v50, %v5995_v36 }
0x12a6   : > { %v8155_v5 = vsel %vm1704_vm7, %v2171_v25, %v2181_v21  ;;  %6818 = vrcp.f32 %v2380_v27  ;;  %v6000_v3 = vor.u32 %v6466_v39, %v5997_v52  ;;  %v2407_v60 = vand.u32 2147483648, %v2380_v27  ;;  %v6470_v53 = vld [vmem:[%s9590_s13] sm:$0x10] }
0x12a7   : > { %2646 = vmatpush.bf16.msra.mxu0 %v5996_v4  ;;  %vm2401_vm13 = vweird.f32 %v2380_v27  ;;  %v2405_v28 = vand.u32 2147483647, %v2380_v27 }
0x12a8   : > { %2665 = vmatpush.bf16.msra.mxu1 %v6000_v3  ;;  %v2408_v31 = vor.u32 1.1754944e-38, %v2407_v60 }
0x12a9   : > { %vm2406_vm3 = vcmp.eq.f32.partialorder %v2405_v28, 8.507059e+37  ;;  %v9601_v28 = vmov 3  }
0x12aa   : > { %6572 = vset.pattern.permute.xlu0 %v9601_v28 }
0x12ab   : > { %2647 = vmatpush.bf16.msra.mxu0 %v5988_v40 }
0x12ac   : > { %v6819_v61 = vpop.eup %6818  ;;  %2666 = vmatpush.bf16.msra.mxu1 %v5992_v62 }
0x12ad   : > { %v2397_v51 = vmul.f32 %v6819_v61, %v2380_v27  ;;  %vm2402_vm0 = vweird.f32 %v6819_v61 }
0x12ae   : > { %vm2403_vm15 = vmor %vm2401_vm13, %vm2402_vm0 }
0x12af   : > { %2648 = vmatpush.bf16.msra.mxu0 %v5980_v48  ;;  %v2398_v20 = vsub.f32 1.0, %v2397_v51 }
0x12b0   : > { %2667 = vmatpush.bf16.msra.mxu1 %v5984_v2 }
0x12b1   : > { %v2399_v35 = vmul.f32 %v6819_v61, %v2398_v20 }
0x12b3   : > { %v2400_v29 = vadd.f32 %v6819_v61, %v2399_v35 }
0x12b5   : > { %v2404_v41 = vsel %vm2403_vm15, %v6819_v61, %v2400_v29 }
0x12b6   : > { %v2409_v6 = vsel %vm2406_vm3, %v2408_v31, %v2404_v41  ;;  %v9607_v41 = vmov 1  }
0x12b7   : > { %6570 = vset.pattern.permute.xlu1 %v9607_v41 }
0x12f6   : > { %v2426_v44 = vpop.permute.xlu1 %2425 }
0x12f7   : > { %v2428_v0 = vmul.f32 %v2426_v44, %v2409_v6 }
0x12f9   : > { %v2433_v17 = vrot.slane %v2428_v0, 1  ;;  %v2435_v42 = vperm.slane %v2428_v0, 0  ;;  %v2445_v12 = vsel %vm1665_vm4, %v2428_v0, %v2441_v11  ;;  %v9613_v11 = vmov 8  }
0x12fb   : > { %v2436_v45 = vperm.slane %v2433_v17, 0  ;;  %v2439_v23 = vsel %vm1665_vm4, %v8025_v46, %v2435_v42  ;;  %v2446_v14 = vsel %vm1665_vm4, %v2433_v17, %v2442_v22  ;;  %v9615_v17 = vmov 2  }
0x12fc   : > { %v2447_v16 = vsel %vm1704_vm7, %v2439_v23, %v2445_v12  ;;  %v9617_v42 = vmov 4   ;;  %v9609_v22 = vmov 6   ;;  %v9605_v12 = vmov 7  }
0x12fd   : > { %v2440_v26 = vsel %vm1665_vm4, %v2430_v32, %v2436_v45  ;;  %v2451_v57 = vrot.slane %v2447_v16, 4  ;;  %v9611_v45 = vmov 5   ;;  %v9603_v16 = vmov 9  }
0x12fe   : > { %v2448_v7 = vsel %vm1704_vm7, %v2440_v26, %v2446_v14 }
0x12ff   : > { %v2455_v43 = vsel %vm1674_vm10, %v8146_v54, %v2451_v57  ;;  %v2452_v10 = vrot.slane %v2448_v7, 4  ;;  %v6016_v54 = vor.u32 %v6470_v53, %v6015_v1  ;;  %v6937_v53 = vmov 0.0  }
0x1300   : > { %v8208_v63 = vsel %vm1680_vm6, %v2455_v43, 0.0 }
0x1301   : > { %v2585_v46 = vpack.c.bf16 %v8208_v63, %v8096_v33  ;;  %v2456_v30 = vsel %vm1674_vm10, %v8155_v5, %v2452_v10  ;;  %v2703_v58 = vsel %vm855_vm12, %v6016_v54, 0 }
0x1302   : > { %v8217_v9 = vsel %vm1680_vm6, %v2456_v30, 0.0  ;;  %2712 = vmatpush.bf16.xpose.msrb.mxu2 %v2703_v58 }
0x1303   : > { %6009 = vmatmul.msk.bf16.vlgmr.msra.gmra.mxu0 %vm855_vm12, %v2585_v46  ;;  %6011 = vmatmul.msk.bf16.vlgmr.msra.gmra.mxu1 %vm855_vm12, %v2585_v46  ;;  %v2586_v49 = vpack.c.bf16 %v8217_v9, %v8109_v8 }
0x1313   : > { %6010 = vmatmul.msk.bf16.gmra.mxu0 %vm855_vm12, %v2586_v49  ;;  %6012 = vmatmul.msk.bf16.gmra.mxu1 %vm855_vm12, %v2586_v49  ;;  %v2459_v49 = vld [vmem:[%s8300_s29] sm:$0xff] }
0x1314   : > { %vm2475_vm4 = vcmp.eq.s32.totalorder %v2459_v49, 1  ;;  %vm2463_vm10 = vcmp.eq.s32.totalorder %v2459_v49, 0  ;;  %vm2487_vm6 = vcmp.eq.s32.totalorder %v2459_v49, 2  ;;  %vm2499_vm7 = vcmp.eq.s32.totalorder %v2459_v49, 3 }
0x1315   : > { %v8309_v54 = vsel %vm2475_vm4, 1.0, %v6937_v53  ;;  %v8313_v58 = vsel %vm2463_vm10, 1.0, %v6937_v53  ;;  %vm2511_vm5 = vcmp.eq.s32.totalorder %v2459_v49, 4  ;;  %vm2523_vm2 = vcmp.eq.s32.totalorder %v2459_v49, 5 }
0x1316   : > { %vm2535_vm8 = vcmp.eq.s32.totalorder %v2459_v49, 6  ;;  %vm2547_vm9 = vcmp.eq.s32.totalorder %v2459_v49, 7  ;;  %vm2559_vm11 = vcmp.eq.s32.totalorder %v2459_v49, 8  ;;  %vm2571_vm14 = vcmp.eq.s32.totalorder %v2459_v49, 9 }
0x1380   : > { %v2650_v25 = vpop.f32.mrf.mxu0  ;;  %v2669_v21 = vpop.f32.mrf.mxu1 }
0x1381   : > { %v2679_v5 = vpack.c.bf16 %v2650_v25, %v2650_v25  ;;  %v2683_v13 = vpack.c.bf16 %v2669_v21, %v2669_v21 }
0x1383   : > { %v2970_v4 = vunpack.c.l.b16 %v2679_v5  ;;  %v3086_v52 = vunpack.c.l.b16 %v2683_v13 }
0x1388   : > { %v2652_v56 = vpop.f32.mrf.mxu0  ;;  %v2671_v27 = vpop.f32.mrf.mxu1 }
0x1389   : > { %v2680_v36 = vpack.c.bf16 %v2652_v56, %v2652_v56  ;;  %v2687_v50 = vpack.c.bf16 %v2652_v56, %v2650_v25  ;;  %v2684_v39 = vpack.c.bf16 %v2671_v27, %v2671_v27  ;;  %v8316_v25 = vsel %vm2487_vm6, 1.0, %v6937_v53 }
0x138a   : > { %vm2583_vm6 = vcmp.lt.s32.totalorder %v7210_v59, 14 }
0x138b   : > { %v2971_v3 = vunpack.c.l.b16 %v2680_v36  ;;  %v3087_v24 = vunpack.c.l.b16 %v2684_v39  ;;  %6017 = vmatmul.msk.bf16.vlgmr.msrb.gmra.mxu2 %vm855_vm12, %v2687_v50  ;;  %v8323_v36 = vsel %vm2499_vm7, 1.0, %v6937_v53 }
0x138d   : > { %v3088_v55 = vpack.c.b16 %v3087_v24, %v3086_v52  ;;  %v2972_v34 = vpack.c.b16 %v2971_v3, %v2970_v4  ;;  %v8332_v3 = vsel %vm2511_vm5, 1.0, %v6937_v53 }
0x138f   : > { %3100 = vmatpush.bf16.msrb.mxu0 %v3088_v55  ;;  %2973 = vrot.lane.b32.xlu0 %v2972_v34, %s6927_s22 }
0x1390   : > { %v2655_v61 = vpop.f32.mrf.mxu0  ;;  %v2674_v40 = vpop.f32.mrf.mxu1 }
0x1391   : > { %v2681_v15 = vpack.c.bf16 %v2655_v61, %v2655_v61  ;;  %v2685_v47 = vpack.c.bf16 %v2674_v40, %v2674_v40 }
0x1393   : > { %v2997_v51 = vunpack.c.l.b16 %v2681_v15  ;;  %v3114_v2 = vunpack.c.l.b16 %v2685_v47  ;;  %v8343_v47 = vsel %vm2535_vm8, 1.0, %v6937_v53  ;;  %vm3030_vm8 = vcmask 130048  }
0x1398   : > { %v2657_v37 = vpop.f32.mrf.mxu0  ;;  %v2676_v62 = vpop.f32.mrf.mxu1 }
0x1399   : > { %v2682_v18 = vpack.c.bf16 %v2657_v37, %v2657_v37  ;;  %v2688_v19 = vpack.c.bf16 %v2657_v37, %v2655_v61  ;;  %v2686_v48 = vpack.c.bf16 %v2676_v62, %v2676_v62  ;;  %v8336_v61 = vsel %vm2523_vm2, 1.0, %v6937_v53 }
0x139b   : > { %v2998_v20 = vunpack.c.l.b16 %v2682_v18  ;;  %v3115_v35 = vunpack.c.l.b16 %v2686_v48  ;;  %6018 = vmatmul.msk.bf16.gmra.mxu2 %vm855_vm12, %v2688_v19  ;;  %v8347_v18 = vsel %vm2547_vm9, 1.0, %v6937_v53 }
0x139d   : > { %v3116_v29 = vpack.c.b16 %v3115_v35, %v3114_v2  ;;  %v2999_v60 = vpack.c.b16 %v2998_v20, %v2997_v51  ;;  %v2460_v20 = vld [vmem:[%s8300_s29 + $0x8] sm:$0xff] }
0x139e   : > { %vm2464_vm0 = vcmp.eq.s32.totalorder %v2460_v20, 0  ;;  %vm2476_vm13 = vcmp.eq.s32.totalorder %v2460_v20, 1  ;;  %vm2488_vm15 = vcmp.eq.s32.totalorder %v2460_v20, 2  ;;  %vm2500_vm3 = vcmp.eq.s32.totalorder %v2460_v20, 3 }
0x139f   : > { %3128 = vmatpush.bf16.msrb.mxu1 %v3116_v29  ;;  %3000 = vrot.lane.b32.xlu1 %v2999_v60, %s6927_s22  ;;  %v8353_v29 = vsel %vm2559_vm11, 1.0, %v6937_v53  ;;  %v8373_v49 = vsel %vm2500_vm3, 1.0, %v6937_v53  ;;  %vm2512_vm4 = vcmp.eq.s32.totalorder %v2460_v20, 4  ;;  %vm2524_vm10 = vcmp.eq.s32.totalorder %v2460_v20, 5 }
0x13a0   : > { %vm2536_vm7 = vcmp.eq.s32.totalorder %v2460_v20, 6  ;;  %vm2548_vm5 = vcmp.eq.s32.totalorder %v2460_v20, 7  ;;  %vm2560_vm2 = vcmp.eq.s32.totalorder %v2460_v20, 8  ;;  %vm2572_vm9 = vcmp.eq.s32.totalorder %v2460_v20, 9 }
0x1401   : > { %v2974_v31 = vpop.permute.xlu0 %2973 }
0x1402   : > { %v2979_v6 = vsel %vm855_vm12, %v2974_v31, 0 }
0x1403   : > { %2988 = vmatpush.bf16.xpose.msrb.mxu3 %v2979_v6 }
0x140a   : > { %6019 = vmatmul.msk.bf16.vlgmr.msrb.gmra.mxu3 %vm855_vm12, %v2972_v34 }
0x140e   : > { %v2714_v44 = vpop.f32.mrf.mxu2 }
0x140f   : > { %2801 = vperm.xlu0 %6572, %v2714_v44   ;;  %2753 = vperm.xlu1 %6570, %v2714_v44  }
0x1410   : > { %2726 = vperm.xlu2 %6569, %v2714_v44  }
0x1411   : > { %v3001_v32 = vpop.permute.xlu1 %3000 }
0x1412   : > { %v3006_v0 = vsel %vm855_vm12, %v3001_v32, 0  ;;  %v8360_v32 = vsel %vm2464_vm0, 1.0, %v6937_v53 }
0x1413   : > { %3015 = vmatpush.bf16.xpose.msra.mxu3 %v3006_v0 }
0x1416   : > { %v2716_v23 = vpop.f32.mrf.mxu2 }
0x1417   : > { %6577 = vset.pattern.permute.xlu0 %v9613_v11  ;;  %6571 = vset.pattern.permute.xlu1 %v9615_v17 }
0x1418   : > { %6573 = vset.pattern.permute.xlu2 %v9617_v42  ;;  %2921 = vperm.xlu0 %6577, %v2714_v44  }
0x1419   : > { %2777 = vperm.xlu1 %6571, %v2714_v44   ;;  %2825 = vperm.xlu2 %6573, %v2714_v44  }
0x141a   : > { %6020 = vmatmul.msk.bf16.vlgmr.msra.gmra.mxu3 %vm855_vm12, %v2999_v60  ;;  %v8356_v60 = vsel %vm2571_vm14, 1.0, %v6937_v53 }
0x141e   : > { %v8250_v26 = vpop.f32.mrf.mxu2 }
0x1420   : > { %6579 = vset.pattern.permute.xlu0 %v9649_v38 }
0x1421   : > { %6575 = vset.pattern.permute.xlu1 %v9609_v22  ;;  %6574 = vset.pattern.permute.xlu2 %v9611_v45 }
0x1422   : > { %2873 = vperm.xlu1 %6575, %v2714_v44   ;;  %2849 = vperm.xlu2 %6574, %v2714_v44  }
0x1423   : > { %2731 = vperm.xlu0 %6579, %v2716_v23  }
0x1426   : > { %v8257_v14 = vpop.f32.mrf.mxu2 }
0x142a   : > { %6576 = vset.pattern.permute.xlu1 %v9605_v12  ;;  %6580 = vset.pattern.permute.xlu2 %v9607_v41 }
0x142b   : > { %6584 = vset.pattern.permute.xlu0 %v9611_v45  ;;  %2897 = vperm.xlu1 %6576, %v2714_v44  }
0x142c   : > { %2757 = vperm.xlu2 %6580, %v2716_v23   ;;  %2853 = vperm.xlu0 %6584, %v2716_v23  }
0x1433   : > { %6578 = vset.pattern.permute.xlu1 %v9603_v16 }
0x1434   : > { %6581 = vset.pattern.permute.xlu2 %v9615_v17  ;;  %6592 = vset.pattern.permute.xlu0 %v9601_v28 }
0x1435   : > { %2945 = vperm.xlu1 %6578, %v2714_v44   ;;  %2781 = vperm.xlu2 %6581, %v2716_v23  }
0x1436   : > { %2809 = vperm.xlu0 %6592, %v8250_v26  }
0x143d   : > { %6582 = vset.pattern.permute.xlu1 %v9601_v28  ;;  %6585 = vset.pattern.permute.xlu2 %v9609_v22 }
0x143e   : > { %6598 = vset.pattern.permute.xlu0 %v9607_v41  ;;  %2805 = vperm.xlu1 %6582, %v2716_v23  }
0x143f   : > { %2877 = vperm.xlu2 %6585, %v2716_v23   ;;  %2765 = vperm.xlu0 %6598, %v8257_v14  }
0x1446   : > { %6583 = vset.pattern.permute.xlu1 %v9617_v42 }
0x1447   : > { %6586 = vset.pattern.permute.xlu2 %v9605_v12  ;;  %6602 = vset.pattern.permute.xlu0 %v9611_v45 }
0x1448   : > { %2829 = vperm.xlu1 %6583, %v2716_v23   ;;  %2901 = vperm.xlu2 %6586, %v2716_v23  }
0x1449   : > { %2861 = vperm.xlu0 %6602, %v8257_v14  }
0x1450   : > { %6587 = vset.pattern.permute.xlu1 %v9613_v11  ;;  %6588 = vset.pattern.permute.xlu2 %v9603_v16 }
0x1451   : > { %6603 = vset.pattern.permute.xlu0 %v9613_v11  ;;  %2925 = vperm.xlu1 %6587, %v2716_v23  }
0x1452   : > { %2949 = vperm.xlu2 %6588, %v2716_v23   ;;  %2929 = vperm.xlu0 %6603, %v8250_v26  }
0x1459   : > { %6591 = vset.pattern.permute.xlu1 %v9615_v17 }
0x145a   : > { %6589 = vset.pattern.permute.xlu2 %v9649_v38  ;;  %2785 = vperm.xlu1 %6591, %v8250_v26  }
0x145b   : > { %2736 = vperm.xlu2 %6589, %v8250_v26   ;;  %6612 = vset.pattern.permute.xlu0 %v9601_v28 }
0x1462   : > { %6595 = vset.pattern.permute.xlu1 %v9609_v22 }
0x1463   : > { %6590 = vset.pattern.permute.xlu2 %v9607_v41  ;;  %2881 = vperm.xlu1 %6595, %v8250_v26  }
0x1464   : > { %2761 = vperm.xlu2 %6590, %v8250_v26  }
0x146a   : > { %v2727_v57 = vpop.permute.xlu2 %2726 }
0x146b   : > { %6596 = vset.pattern.permute.xlu1 %v9605_v12  ;;  %v2744_v13 = vmul.f32 %v8313_v58, %v2727_v57 }
0x146c   : > { %6593 = vset.pattern.permute.xlu2 %v9617_v42  ;;  %2905 = vperm.xlu1 %6596, %v8250_v26  }
0x146d   : > { %2833 = vperm.xlu2 %6593, %v8250_v26  }
0x1473   : > { %v2826_v7 = vpop.permute.xlu2 %2825 }
0x1474   : > { %6597 = vset.pattern.permute.xlu1 %v9649_v38  ;;  %v2840_v34 = vmul.f32 %v8332_v3, %v2826_v7 }
0x1475   : > { %6594 = vset.pattern.permute.xlu2 %v9611_v45  ;;  %2741 = vperm.xlu1 %6597, %v8257_v14  }
0x1476   : > { %2857 = vperm.xlu2 %6594, %v8250_v26  }
0x147c   : > { %v2850_v43 = vpop.permute.xlu2 %2849 }
0x147d   : > { %6600 = vset.pattern.permute.xlu1 %v9601_v28  ;;  %v2864_v37 = vmul.f32 %v8336_v61, %v2850_v43 }
0x147e   : > { %6599 = vset.pattern.permute.xlu2 %v9615_v17  ;;  %2813 = vperm.xlu1 %6600, %v8257_v14  }
0x147f   : > { %2789 = vperm.xlu2 %6599, %v8257_v14  }
0x1481   : > { %v2754_v10 = vpop.permute.xlu1 %2753  ;;  %v2802_v50 = vpop.permute.xlu0 %2801 }
0x1482   : > { %v2768_v21 = vmul.f32 %v8309_v54, %v2754_v10  ;;  %v2816_v52 = vmul.f32 %v8323_v36, %v2802_v50 }
0x1484   : > { %v2772_v27 = vadd.f32 %v2768_v21, %v2744_v13 }
0x1486   : > { %6601 = vset.pattern.permute.xlu1 %v9617_v42  ;;  %v8291_v46 = vpop.permute.xlu2 %2757 }
0x1487   : > { %6604 = vset.pattern.permute.xlu2 %v9609_v22  ;;  %2837 = vperm.xlu1 %6601, %v8257_v14  }
0x1488   : > { %2885 = vperm.xlu2 %6604, %v8257_v14  }
0x148a   : > { %v2922_v62 = vpop.permute.xlu0 %2921 }
0x148b   : > { %v2778_v30 = vpop.permute.xlu1 %2777  ;;  %v2936_v44 = vmul.f32 %v8353_v29, %v2922_v62 }
0x148c   : > { %v2792_v56 = vmul.f32 %v8316_v25, %v2778_v30  ;;  %v8370_v30 = vsel %vm2488_vm15, 1.0, %v6937_v53 }
0x148d   : > { %v2990_v21 = vpop.f32.mrf.mxu3 }
0x148e   : > { %v2796_v4 = vadd.f32 %v2792_v56, %v2772_v27 }
0x148f   : > { %6607 = vset.pattern.permute.xlu1 %v9613_v11  ;;  %v8304_v1 = vpop.permute.xlu2 %2781 }
0x1490   : > { %6605 = vset.pattern.permute.xlu2 %v9605_v12  ;;  %2933 = vperm.xlu1 %6607, %v8257_v14   ;;  %v2820_v55 = vadd.f32 %v2816_v52, %v2796_v4  ;;  %v2793_v27 = vmul.f32 %v8370_v30, %v8304_v1  ;;  %v8385_v52 = vsel %vm2524_vm10, 1.0, %v6937_v53 }
0x1491   : > { %2909 = vperm.xlu2 %6605, %v8257_v14  }
0x1492   : > { %v2844_v40 = vadd.f32 %v2840_v34, %v2820_v55 }
0x1494   : > { %v2874_v5 = vpop.permute.xlu1 %2873  ;;  %v2868_v19 = vadd.f32 %v2864_v37, %v2844_v40  ;;  %v6938_v37 = vmov -1e+30  }
0x1495   : > { %v2888_v48 = vmul.f32 %v8343_v47, %v2874_v5  ;;  %v2732_v0 = vpop.permute.xlu0 %2731  ;;  %v8388_v62 = vsel %vm2583_vm6, 0.0, %v6938_v37 }
0x1496   : > { %v2745_v7 = vmul.f32 %v8360_v32, %v2732_v0 }
0x1497   : > { %v2892_v35 = vadd.f32 %v2888_v48, %v2868_v19  ;;  %v8391_v19 = vsel %vm2536_vm7, 1.0, %v6937_v53 }
0x1498   : > { %6608 = vset.pattern.permute.xlu1 %v9603_v16 }
0x1499   : > { %6606 = vset.pattern.permute.xlu2 %v9603_v16  ;;  %v8326_v39 = vpop.permute.xlu2 %2877  ;;  %2957 = vperm.xlu1 %6608, %v8257_v14  }
0x149a   : > { %2953 = vperm.xlu2 %6606, %v8250_v26   ;;  %v8364_v26 = vsel %vm2476_vm13, 1.0, %v6937_v53 }
0x149b   : > { %v2769_v10 = vmul.f32 %v8364_v26, %v8291_v46  ;;  %v8381_v46 = vsel %vm2512_vm4, 1.0, %v6937_v53 }
0x149d   : > { %v2898_v24 = vpop.permute.xlu1 %2897  ;;  %v2773_v5 = vadd.f32 %v2769_v10, %v2745_v7  ;;  %v8410_v7 = vsel %vm2572_vm9, 1.0, %v6937_v53 }
0x149e   : > { %v2912_v2 = vmul.f32 %v8347_v18, %v2898_v24  ;;  %v2854_v24 = vpop.permute.xlu0 %2853 }
0x149f   : > { %v2797_v4 = vadd.f32 %v2793_v27, %v2773_v5  ;;  %v2865_v59 = vmul.f32 %v8385_v52, %v2854_v24 }
0x14a0   : > { %v2916_v31 = vadd.f32 %v2912_v2, %v2892_v35 }
0x14a1   : > { %6609 = vset.pattern.permute.xlu1 %v9649_v38 }
0x14a2   : > { %v8339_v15 = vpop.permute.xlu2 %2901  ;;  %6610 = vset.pattern.permute.xlu2 %v9607_v41  ;;  %v2940_v14 = vadd.f32 %v2936_v44, %v2916_v31  ;;  %v2889_v31 = vmul.f32 %v8391_v19, %v8326_v39 }
0x14a7   : > { %v2946_v51 = vpop.permute.xlu1 %2945 }
0x14a8   : > { %v2960_v23 = vmul.f32 %v8356_v60, %v2946_v51  ;;  %v8395_v51 = vsel %vm2548_vm5, 1.0, %v6937_v53 }
0x14a9   : > { %v2913_v0 = vmul.f32 %v8395_v51, %v8339_v15 }
0x14aa   : > { %v2964_v43 = vadd.f32 %v2960_v23, %v2940_v14  ;;  %v8405_v23 = vsel %vm2560_vm2, 1.0, %v6937_v53 }
0x14ac   : > { %v2950_v6 = vpop.permute.xlu2 %2949  ;;  %v2991_v56 = vadd.f32 %v2990_v21, %v2964_v43 }
0x14ad   : > { %v2961_v20 = vmul.f32 %v8410_v7, %v2950_v6 }
0x14ae   : > { %v3022_v34 = vmul.f32 0.125, %v2991_v56  ;;  %v2992_v56 = vpop.f32.mrf.mxu3 }
0x14b0   : > { %v2806_v57 = vpop.permute.xlu1 %2805  ;;  %v8398_v35 = vadd.f32 %v3022_v34, %v8388_v62 }
0x14b1   : > { %v2817_v50 = vmul.f32 %v8373_v49, %v2806_v57 }
0x14b2   : > { %v3031_v57 = vsel %vm3030_vm8, %v8398_v35, -inf }
0x14b3   : > { %v2821_v40 = vadd.f32 %v2817_v50, %v2797_v4 }
0x14b5   : > { %v8375_v13 = vpop.permute.xlu2 %2736 }
0x14b6   : > { %v3017_v11 = vpop.f32.mrf.mxu3 }
0x14ba   : > { %v2830_v55 = vpop.permute.xlu1 %2829 }
0x14bb   : > { %v2841_v1 = vmul.f32 %v8381_v46, %v2830_v55 }
0x14bd   : > { %v2845_v48 = vadd.f32 %v2841_v1, %v2821_v40  ;;  %v2461_v40 = vld [vmem:[%s8300_s29 + $0x10] sm:$0xff]  ;;  %v2810_v1 = vpop.permute.xlu0 %2809 }
0x14be   : > { %v2762_v2 = vpop.permute.xlu2 %2761  ;;  %vm2477_vm11 = vcmp.eq.s32.totalorder %v2461_v40, 1  ;;  %vm2465_vm14 = vcmp.eq.s32.totalorder %v2461_v40, 0  ;;  %vm2489_vm0 = vcmp.eq.s32.totalorder %v2461_v40, 2  ;;  %vm2501_vm13 = vcmp.eq.s32.totalorder %v2461_v40, 3 }
0x14bf   : > { %v2869_v44 = vadd.f32 %v2865_v59, %v2845_v48  ;;  %v8421_v37 = vsel %vm2477_vm11, 1.0, %v6937_v53  ;;  %v8424_v59 = vsel %vm2465_vm14, 1.0, %v6937_v53  ;;  %v8427_v48 = vsel %vm2489_vm0, 1.0, %v6937_v53 }
0x14c0   : > { %vm2513_vm15 = vcmp.eq.s32.totalorder %v2461_v40, 4  ;;  %vm2525_vm3 = vcmp.eq.s32.totalorder %v2461_v40, 5  ;;  %vm2537_vm4 = vcmp.eq.s32.totalorder %v2461_v40, 6  ;;  %vm2549_vm10 = vcmp.eq.s32.totalorder %v2461_v40, 7 }
0x14c1   : > { %v2893_v14 = vadd.f32 %v2889_v31, %v2869_v44  ;;  %v2770_v31 = vmul.f32 %v8421_v37, %v2762_v2  ;;  %v8438_v2 = vsel %vm2513_vm15, 1.0, %v6937_v53  ;;  %vm2561_vm5 = vcmp.eq.s32.totalorder %v2461_v40, 8 }
0x14c2   : > { %vm2573_vm2 = vcmp.eq.s32.totalorder %v2461_v40, 9  ;;  %v8467_v28 = vsel %vm2561_vm5, 1.0, %v6937_v53  ;;  %vm3310_vm5 = vcmask 31744  }
0x14c3   : > { %3032 = vmax.xlane.f32.xlu2 %v3031_v57  ;;  %v2926_v43 = vpop.permute.xlu1 %2925  ;;  %v2917_v39 = vadd.f32 %v2913_v0, %v2893_v14  ;;  %v2746_v0 = vmul.f32 %v8424_v59, %v8375_v13  ;;  %9668 = vst [vmem:[#allocation3_spill] sm:$0xff] %v8467_v28  ;;  %v8474_v12 = vsel %vm2573_vm2, 1.0, %v6937_v53  ;;  %vm3315_vm2 = vcmask 39936  }
0x14c4   : > { %v2937_v10 = vmul.f32 %v8405_v23, %v2926_v43  ;;  %9669 = vst [vmem:[#allocation4_spill] sm:$0xff] %v8474_v12 }
0x14c5   : > { %v2766_v57 = vpop.permute.xlu0 %2765  ;;  %v2774_v43 = vadd.f32 %v2770_v31, %v2746_v0  ;;  %v8447_v31 = vsel %vm2537_vm4, 1.0, %v6937_v53 }
0x14c6   : > { %v2941_v21 = vadd.f32 %v2937_v10, %v2917_v39  ;;  %v8434_v39 = vsel %vm2501_vm13, 1.0, %v6937_v53 }
0x14c7   : > { %v2834_v15 = vpop.permute.xlu2 %2833 }
0x14c8   : > { %v2965_v5 = vadd.f32 %v2961_v20, %v2941_v21  ;;  %v2818_v21 = vmul.f32 %v8434_v39, %v2810_v1  ;;  %v2842_v13 = vmul.f32 %v8438_v2, %v2834_v15  ;;  %v8450_v1 = vld [vmem:[%s8300_s29 + $0x18] sm:$0xff] }
0x14c9   : > { %vm2466_vm6 = vcmp.eq.s32.totalorder %v8450_v1, 0  ;;  %vm2478_vm7 = vcmp.eq.s32.totalorder %v8450_v1, 1  ;;  %vm2490_vm9 = vcmp.eq.s32.totalorder %v8450_v1, 2  ;;  %vm2502_vm11 = vcmp.eq.s32.totalorder %v8450_v1, 3 }
0x14ca   : > { %v2993_v27 = vadd.f32 %v2992_v56, %v2965_v5  ;;  %v8478_v40 = vsel %vm2490_vm9, 1.0, %v6937_v53  ;;  %vm2514_vm14 = vcmp.eq.s32.totalorder %v8450_v1, 4  ;;  %vm2526_vm0 = vcmp.eq.s32.totalorder %v8450_v1, 5 }
0x14cb   : > { %vm2538_vm13 = vcmp.eq.s32.totalorder %v8450_v1, 6  ;;  %vm2550_vm15 = vcmp.eq.s32.totalorder %v8450_v1, 7  ;;  %vm2574_vm4 = vcmp.eq.s32.totalorder %v8450_v1, 9  ;;  %vm3320_vm9 = vcmask 48128  }
0x14cc   : > { %v2786_v50 = vpop.permute.xlu1 %2785  ;;  %v3023_v4 = vmul.f32 0.125, %v2993_v27 }
0x14cd   : > { %v2794_v14 = vmul.f32 %v8427_v48, %v2786_v50  ;;  %v2862_v27 = vpop.permute.xlu0 %2861  ;;  %v8444_v50 = vsel %vm2525_vm3, 1.0, %v6937_v53  ;;  %vm2562_vm3 = vcmp.eq.s32.totalorder %v8450_v1, 8 }
0x14ce   : > { %v8415_v24 = vadd.f32 %v3023_v4, %v8388_v62 }
0x14cf   : > { %v2798_v20 = vadd.f32 %v2794_v14, %v2774_v43  ;;  %v8454_v14 = vsel %vm2549_vm10, 1.0, %v6937_v53  ;;  %vm3295_vm10 = vcmask 7168  }
0x14d0   : > { %v2858_v55 = vpop.permute.xlu2 %2857  ;;  %v3034_v34 = vsel %vm3030_vm8, %v8415_v24, -inf  ;;  %9667 = vst [vmem:[#allocation2_spill] sm:$0xff] %v8454_v14 }
0x14d1   : > { %3035 = vmax.xlane.f32.xlu0 %v3034_v34  ;;  %v2822_v56 = vadd.f32 %v2818_v21, %v2798_v20  ;;  %v2866_v0 = vmul.f32 %v8444_v50, %v2858_v55 }
0x14d3   : > { %v2846_v4 = vadd.f32 %v2842_v13, %v2822_v56  ;;  %v8461_v56 = vsel %vm2466_vm6, 1.0, %v6937_v53  ;;  %v8464_v13 = vsel %vm2478_vm7, 1.0, %v6937_v53  ;;  %vm3300_vm6 = vcmask 15360  }
0x14d4   : > { %v2771_v16 = vmul.f32 %v8464_v13, %v2766_v57  ;;  %vm3305_vm7 = vcmask 23552  }
0x14d5   : > { %v2882_v6 = vpop.permute.xlu1 %2881  ;;  %v2870_v15 = vadd.f32 %v2866_v0, %v2846_v4  ;;  %v2930_v4 = vpop.permute.xlu0 %2929 }
0x14d6   : > { %v2890_v43 = vmul.f32 %v8447_v31, %v2882_v6 }
0x14d8   : > { %v2894_v55 = vadd.f32 %v2890_v43, %v2870_v15  ;;  %v2938_v15 = vmul.f32 %v8467_v28, %v2930_v4  ;;  %v8481_v43 = vsel %vm2502_vm11, 1.0, %v6937_v53  ;;  %v8488_v4 = vsel %vm2514_vm14, 1.0, %v6937_v53 }
0x14d9   : > { %v2790_v44 = vpop.permute.xlu2 %2789  ;;  %vm3325_vm11 = vcmask 56320   ;;  %vm9632_vm14 = vcmask 64512  }
0x14da   : > { %v2795_v57 = vmul.f32 %v8478_v40, %v2790_v44 }
0x14de   : > { %v2906_v10 = vpop.permute.xlu1 %2905 }
0x14df   : > { %v2914_v21 = vmul.f32 %v8454_v14, %v2906_v10 }
0x14e1   : > { %v2918_v10 = vadd.f32 %v2914_v21, %v2894_v55 }
0x14e2   : > { %v8440_v5 = vpop.permute.xlu2 %2885 }
0x14e7   : > { %v2742_v34 = vpop.permute.xlu1 %2741 }
0x14e8   : > { %v2747_v6 = vmul.f32 %v8461_v56, %v2742_v34  ;;  %v2942_v34 = vadd.f32 %v2938_v15, %v2918_v10  ;;  %v8493_v10 = vsel %vm2526_vm0, 1.0, %v6937_v53  ;;  %vm9631_vm0 = vcmask 72704  }
0x14e9   : > { %v2867_v15 = vmul.f32 %v8493_v10, %v2862_v27  ;;  %v8510_v27 = vsel %vm2562_vm3, 1.0, %v6937_v53 }
0x14ea   : > { %v2775_v41 = vadd.f32 %v2771_v16, %v2747_v6  ;;  %9672 = vst [vmem:[#allocation7_spill] sm:$0xff] %v8510_v27 }
0x14eb   : > { %v2910_v20 = vpop.permute.xlu2 %2909 }
0x14ec   : > { %v2799_v17 = vadd.f32 %v2795_v57, %v2775_v41 }
0x14f0   : > { %v2814_v0 = vpop.permute.xlu1 %2813 }
0x14f1   : > { %v2819_v55 = vmul.f32 %v8481_v43, %v2814_v0 }
0x14f3   : > { %v2823_v6 = vadd.f32 %v2819_v55, %v2799_v17 }
0x14f4   : > { %v2954_v22 = vpop.permute.xlu2 %2953 }
0x14f5   : > { %v2962_v21 = vmul.f32 %v8474_v12, %v2954_v22 }
0x14f7   : > { %v2966_v45 = vadd.f32 %v2962_v21, %v2942_v34  ;;  %v8499_v34 = vsel %vm2538_vm13, 1.0, %v6937_v53  ;;  %vm9630_vm13 = vcmask 80896  }
0x14f8   : > { %9670 = vst [vmem:[#allocation5_spill] sm:$0xff] %v8499_v34  ;;  %v2891_v17 = vmul.f32 %v8499_v34, %v8440_v5 }
0x14f9   : > { %v2838_v42 = vpop.permute.xlu1 %2837  ;;  %v3018_v16 = vadd.f32 %v3017_v11, %v2966_v45 }
0x14fa   : > { %v2843_v38 = vmul.f32 %v8488_v4, %v2838_v42 }
0x14fb   : > { %v3024_v22 = vmul.f32 0.125, %v3018_v16  ;;  %v8516_v16 = vsel %vm2574_vm4, 1.0, %v6937_v53 }
0x14fc   : > { %v2847_v44 = vadd.f32 %v2843_v38, %v2823_v6  ;;  %v8507_v38 = vsel %vm2550_vm15, 1.0, %v6937_v53  ;;  %9673 = vst [vmem:[#allocation8_spill] sm:$0xff] %v8516_v16 }
0x14fd   : > { %v3028_v0 = vadd.f32 %v3024_v22, %v8388_v62  ;;  %9671 = vst [vmem:[#allocation6_spill] sm:$0xff] %v8507_v38  ;;  %v2915_v21 = vmul.f32 %v8507_v38, %v2910_v20 }
0x14fe   : > { %v2871_v11 = vadd.f32 %v2867_v15, %v2847_v44  ;;  %v3019_v15 = vpop.f32.mrf.mxu3 }
0x14ff   : > { %v3037_v41 = vsel %vm3030_vm8, %v3028_v0, -inf }
0x1500   : > { %3038 = vmax.xlane.f32.xlu1 %v3037_v41  ;;  %v2895_v45 = vadd.f32 %v2891_v17, %v2871_v11 }
0x1502   : > { %v2934_v42 = vpop.permute.xlu1 %2933  ;;  %v2919_v57 = vadd.f32 %v2915_v21, %v2895_v45 }
0x1503   : > { %v2939_v55 = vmul.f32 %v8510_v27, %v2934_v42 }
0x1505   : > { %v2943_v6 = vadd.f32 %v2939_v55, %v2919_v57 }
0x150b   : > { %v2958_v5 = vpop.permute.xlu1 %2957 }
0x150c   : > { %v2963_v22 = vmul.f32 %v8516_v16, %v2958_v5 }
0x150e   : > { %v2967_v44 = vadd.f32 %v2963_v22, %v2943_v6 }
0x1510   : > { %v3020_v41 = vadd.f32 %v3019_v15, %v2967_v44 }
0x1512   : > { %v3025_v11 = vmul.f32 0.125, %v3020_v41 }
0x1514   : > { %v3029_v17 = vadd.f32 %v3025_v11, %v8388_v62 }
0x1516   : > { %v3040_v20 = vsel %vm3030_vm8, %v3029_v17, -inf }
0x1517   : > { %3041 = vmax.xlane.f32.xlu2 %v3040_v20 }
0x1536   : > { %v3033_v1 = vpop.xlane.xlu2 %3032 }
0x1537   : > { %v3043_v45 = vsub.f32 %v8398_v35, %v3033_v1 }
0x1539   : > { %v3047_v42 = vmul.f32 1.442695, %v3043_v45 }
0x153b   : > { %6820 = vpow2.f32 %v3047_v42 }
0x1541   : > { %v6821_v53 = vpop.eup %6820 }
0x1542   : > { %v3055_v21 = vsel %vm3030_vm8, %v6821_v53, 0.0 }
0x1543   : > { %3056 = vadd.xlane.f32.xlu2 %v3055_v21 }
0x1544   : > { %v3036_v57 = vpop.xlane.xlu0 %3035 }
0x1545   : > { %v3044_v55 = vsub.f32 %v8415_v24, %v3036_v57 }
0x1547   : > { %v3049_v5 = vmul.f32 1.442695, %v3044_v55 }
0x1549   : > { %6822 = vpow2.f32 %v3049_v5 }
0x154f   : > { %v6823_v6 = vpop.eup %6822 }
0x1550   : > { %v3058_v22 = vsel %vm3030_vm8, %v6823_v6, 0.0 }
0x1551   : > { %3059 = vadd.xlane.f32.xlu0 %v3058_v22 }
0x1573   : > { %v3039_v44 = vpop.xlane.xlu1 %3038 }
0x1574   : > { %v3045_v15 = vsub.f32 %v3028_v0, %v3039_v44 }
0x1576   : > { %v3051_v41 = vmul.f32 1.442695, %v3045_v15 }
0x1578   : > { %6824 = vpow2.f32 %v3051_v41 }
0x157e   : > { %v8525_v35 = vpop.eup %6824 }
0x157f   : > { %v3061_v11 = vsel %vm3030_vm8, %v8525_v35, 0.0 }
0x1580   : > { %3062 = vadd.xlane.f32.xlu1 %v3061_v11 }
0x158a   : > { %v3042_v20 = vpop.xlane.xlu2 %3041 }
0x158b   : > { %v3046_v1 = vsub.f32 %v3029_v17, %v3042_v20 }
0x158d   : > { %v3053_v45 = vmul.f32 1.442695, %v3046_v1 }
0x158f   : > { %6826 = vpow2.f32 %v3053_v45 }
0x1595   : > { %v8529_v24 = vpop.eup %6826 }
0x1596   : > { %v3064_v42 = vsel %vm3030_vm8, %v8529_v24, 0.0 }
0x1597   : > { %3065 = vadd.xlane.f32.xlu2 %v3064_v42 }
0x15b6   : > { %v3057_v21 = vpop.xlane.xlu2 %3056 }
0x15b7   : > { %6828 = vrcp.f32 %v3057_v21 }
0x15bd   : > { %v6829_v0 = vpop.eup %6828 }
0x15be   : > { %v3071_v57 = vmul.f32 %v6829_v0, %v6821_v53 }
0x15c0   : > { %v3151_v55 = vmul.f32 %v8309_v54, %v3071_v57  ;;  %v3135_v5 = vmul.f32 %v8313_v58, %v3071_v57  ;;  %v3167_v22 = vmul.f32 %v8316_v25, %v3071_v57  ;;  %v3199_v11 = vmul.f32 %v8332_v3, %v3071_v57 }
0x15c1   : > { %v3183_v53 = vmul.f32 %v8323_v36, %v3071_v57  ;;  %v3215_v20 = vmul.f32 %v8336_v61, %v3071_v57 }
0x15c2   : > { %v3155_v17 = vsel %vm3030_vm8, %v3151_v55, 0.0  ;;  %v3139_v44 = vsel %vm3030_vm8, %v3135_v5, 0.0  ;;  %v3171_v15 = vsel %vm3030_vm8, %v3167_v22, 0.0  ;;  %v3203_v1 = vsel %vm3030_vm8, %v3199_v11, 0.0 }
0x15c3   : > { %3156 = vadd.xlane.f32.xlu2 %v3155_v17  ;;  %3140 = vadd.xlane.f32.xlu0 %v3139_v44  ;;  %v3187_v45 = vsel %vm3030_vm8, %v3183_v53, 0.0  ;;  %v3219_v21 = vsel %vm3030_vm8, %v3215_v20, 0.0  ;;  %v3075_v55 = vpack.c.bf16 %v3071_v57, %v3071_v57  ;;  %v3247_v5 = vmul.f32 %v8347_v18, %v3071_v57 }
0x15c4   : > { %3172 = vadd.xlane.f32.xlu1 %v3171_v15  ;;  %v3060_v41 = vpop.xlane.xlu0 %3059  ;;  %v3231_v22 = vmul.f32 %v8343_v47, %v3071_v57  ;;  %v3263_v44 = vmul.f32 %v8353_v29, %v3071_v57 }
0x15c5   : > { %6830 = vrcp.f32 %v3060_v41  ;;  %v3081_v15 = vunpack.c.l.b16 %v3075_v55  ;;  %v3251_v11 = vsel %vm3030_vm8, %v3247_v5, 0.0 }
0x15c6   : > { %v3235_v53 = vsel %vm3030_vm8, %v3231_v22, 0.0 }
0x15cb   : > { %v6831_v42 = vpop.eup %6830  ;;  %3204 = vadd.xlane.f32.xlu2 %v3203_v1  ;;  %3188 = vadd.xlane.f32.xlu0 %v3187_v45  ;;  %v3279_v45 = vmul.f32 %v8356_v60, %v3071_v57 }
0x15cc   : > { %v3072_v0 = vmul.f32 %v6831_v42, %v6823_v6  ;;  %3220 = vadd.xlane.f32.xlu1 %v3219_v21  ;;  %v3267_v6 = vsel %vm3030_vm8, %v3263_v44, 0.0 }
0x15cd   : > { %v3283_v55 = vsel %vm3030_vm8, %v3279_v45, 0.0 }
0x15ce   : > { %v3076_v17 = vpack.c.bf16 %v3072_v0, %v3072_v0  ;;  %v3168_v20 = vmul.f32 %v8370_v30, %v3072_v0  ;;  %v3136_v42 = vmul.f32 %v8360_v32, %v3072_v0  ;;  %v3216_v22 = vmul.f32 %v8385_v52, %v3072_v0 }
0x15cf   : > { %v3184_v44 = vmul.f32 %v8373_v49, %v3072_v0 }
0x15d0   : > { %v3082_v41 = vunpack.c.l.b16 %v3076_v17  ;;  %v3174_v21 = vsel %vm3030_vm8, %v3168_v20, 0.0  ;;  %v3142_v5 = vsel %vm3030_vm8, %v3136_v42, 0.0  ;;  %v3152_v17 = vmul.f32 %v8364_v26, %v3072_v0 }
0x15d1   : > { %v3248_v42 = vmul.f32 %v8395_v51, %v3072_v0 }
0x15d2   : > { %v3083_v1 = vpack.c.b16 %v3082_v41, %v3081_v15  ;;  %v3222_v15 = vsel %vm3030_vm8, %v3216_v22, 0.0  ;;  %v3158_v57 = vsel %vm3030_vm8, %v3152_v17, 0.0  ;;  %v3190_v41 = vsel %vm3030_vm8, %v3184_v44, 0.0 }
0x15d3   : > { %3252 = vadd.xlane.f32.xlu2 %v3251_v11  ;;  %3236 = vadd.xlane.f32.xlu0 %v3235_v53  ;;  %v3264_v11 = vmul.f32 %v8405_v23, %v3072_v0  ;;  %v3200_v53 = vmul.f32 %v8381_v46, %v3072_v0 }
0x15d4   : > { %3268 = vadd.xlane.f32.xlu1 %v3267_v6  ;;  %6021 = vmatmul.msk.bf16.vlgmr.msrb.gmra.mxu0 %vm3030_vm8, %v3083_v1  ;;  %v3232_v1 = vmul.f32 %v8391_v19, %v3072_v0 }
0x15d5   : > { %v3270_v6 = vsel %vm3030_vm8, %v3264_v11, 0.0  ;;  %v3206_v20 = vsel %vm3030_vm8, %v3200_v53, 0.0 }
0x15d6   : > { %v3238_v45 = vsel %vm3030_vm8, %v3232_v1, 0.0 }
0x15db   : > { %3175 = vadd.xlane.f32.xlu2 %v3174_v21  ;;  %3284 = vadd.xlane.f32.xlu0 %v3283_v55  ;;  %v3280_v21 = vmul.f32 %v8410_v7, %v3072_v0  ;;  %v3254_v55 = vsel %vm3030_vm8, %v3248_v42, 0.0 }
0x15dc   : > { %3143 = vadd.xlane.f32.xlu1 %v3142_v5 }
0x15dd   : > { %v3286_v5 = vsel %vm3030_vm8, %v3280_v21, 0.0 }
0x15e3   : > { %3223 = vadd.xlane.f32.xlu2 %v3222_v15  ;;  %3159 = vadd.xlane.f32.xlu0 %v3158_v57 }
0x15e4   : > { %3191 = vadd.xlane.f32.xlu1 %v3190_v41 }
0x15eb   : > { %3271 = vadd.xlane.f32.xlu2 %v3270_v6  ;;  %3207 = vadd.xlane.f32.xlu0 %v3206_v20 }
0x15ec   : > { %3239 = vadd.xlane.f32.xlu1 %v3238_v45 }
0x15f3   : > { %3255 = vadd.xlane.f32.xlu0 %v3254_v55  ;;  %v3063_v22 = vpop.xlane.xlu1 %3062 }
0x15f4   : > { %3287 = vadd.xlane.f32.xlu1 %v3286_v5  ;;  %6832 = vrcp.f32 %v3063_v22 }
0x15fa   : > { %v6833_v17 = vpop.eup %6832 }
0x15fb   : > { %v8575_v44 = vmul.f32 %v6833_v17, %v8525_v35 }
0x15fd   : > { %v3169_v15 = vmul.f32 %v8427_v48, %v8575_v44  ;;  %v3153_v57 = vmul.f32 %v8421_v37, %v8575_v44  ;;  %v3137_v0 = vmul.f32 %v8424_v59, %v8575_v44  ;;  %v3217_v35 = vmul.f32 %v8444_v50, %v8575_v44 }
0x15fe   : > { %v3201_v1 = vmul.f32 %v8438_v2, %v8575_v44  ;;  %v3185_v6 = vmul.f32 %v8434_v39, %v8575_v44  ;;  %v3265_v55 = vmul.f32 %v8467_v28, %v8575_v44  ;;  %v3249_v5 = vmul.f32 %v8454_v14, %v8575_v44 }
0x15ff   : > { %v3177_v41 = vsel %vm3030_vm8, %v3169_v15, 0.0  ;;  %v3161_v11 = vsel %vm3030_vm8, %v3153_v57, 0.0  ;;  %v3145_v53 = vsel %vm3030_vm8, %v3137_v0, 0.0  ;;  %v3225_v20 = vsel %vm3030_vm8, %v3217_v35, 0.0 }
0x1600   : > { %3178 = vadd.xlane.f32.xlu0 %v3177_v41  ;;  %3162 = vadd.xlane.f32.xlu1 %v3161_v11  ;;  %v3209_v45 = vsel %vm3030_vm8, %v3201_v1, 0.0  ;;  %v3193_v42 = vsel %vm3030_vm8, %v3185_v6, 0.0  ;;  %v3233_v22 = vmul.f32 %v8447_v31, %v8575_v44  ;;  %v3273_v17 = vsel %vm3030_vm8, %v3265_v55, 0.0 }
0x1601   : > { %3146 = vadd.xlane.f32.xlu2 %v3145_v53  ;;  %v3257_v15 = vsel %vm3030_vm8, %v3249_v5, 0.0  ;;  %v3077_v41 = vpack.c.bf16 %v8575_v44, %v8575_v44 }
0x1602   : > { %v3241_v57 = vsel %vm3030_vm8, %v3233_v22, 0.0 }
0x1608   : > { %3226 = vadd.xlane.f32.xlu0 %v3225_v20  ;;  %3210 = vadd.xlane.f32.xlu1 %v3209_v45  ;;  %v3109_v20 = vunpack.c.l.b16 %v3077_v41 }
0x1609   : > { %3194 = vadd.xlane.f32.xlu2 %v3193_v42 }
0x160a   : > { %v3066_v21 = vpop.xlane.xlu2 %3065 }
0x160b   : > { %6834 = vrcp.f32 %v3066_v21 }
0x1610   : > { %3274 = vadd.xlane.f32.xlu0 %v3273_v17  ;;  %3258 = vadd.xlane.f32.xlu1 %v3257_v15 }
0x1611   : > { %v6835_v0 = vpop.eup %6834  ;;  %3242 = vadd.xlane.f32.xlu2 %v3241_v57 }
0x1612   : > { %v3074_v11 = vmul.f32 %v6835_v0, %v8529_v24 }
0x1614   : > { %v3138_v53 = vmul.f32 %v8461_v56, %v3074_v11  ;;  %v3170_v35 = vmul.f32 %v8478_v40, %v3074_v11  ;;  %v3154_v1 = vmul.f32 %v8464_v13, %v3074_v11  ;;  %v3078_v6 = vpack.c.bf16 %v3074_v11, %v3074_v11 }
0x1615   : > { %v3186_v24 = vmul.f32 %v8481_v43, %v3074_v11  ;;  %v3218_v22 = vmul.f32 %v8493_v10, %v3074_v11  ;;  %v3202_v17 = vmul.f32 %v8488_v4, %v3074_v11  ;;  %v3234_v41 = vmul.f32 %v8499_v34, %v3074_v11 }
0x1616   : > { %v3148_v45 = vsel %vm3030_vm8, %v3138_v53, 0.0  ;;  %v3180_v42 = vsel %vm3030_vm8, %v3170_v35, 0.0  ;;  %v3164_v21 = vsel %vm3030_vm8, %v3154_v1, 0.0  ;;  %v3110_v55 = vunpack.c.l.b16 %v3078_v6 }
0x1617   : > { %v3196_v15 = vsel %vm3030_vm8, %v3186_v24, 0.0  ;;  %v3228_v57 = vsel %vm3030_vm8, %v3218_v22, 0.0  ;;  %v3212_v0 = vsel %vm3030_vm8, %v3202_v17, 0.0  ;;  %v3266_v53 = vmul.f32 %v8510_v27, %v3074_v11 }
0x1618   : > { %3149 = vadd.xlane.f32.xlu0 %v3148_v45  ;;  %3181 = vadd.xlane.f32.xlu1 %v3180_v42  ;;  %v3111_v5 = vpack.c.b16 %v3110_v55, %v3109_v20  ;;  %v3250_v35 = vmul.f32 %v8507_v38, %v3074_v11  ;;  %v3244_v1 = vsel %vm3030_vm8, %v3234_v41, 0.0  ;;  %v3282_v45 = vmul.f32 %v8516_v16, %v3074_v11 }
0x1619   : > { %3165 = vadd.xlane.f32.xlu2 %v3164_v21  ;;  %v3276_v6 = vsel %vm3030_vm8, %v3266_v53, 0.0  ;;  %v3281_v42 = vmul.f32 %v8474_v12, %v8575_v44  ;;  %v6471_v44 = vld [vmem:[%s9591_s14] sm:$0x10] }
0x161a   : > { %6022 = vmatmul.msk.bf16.vlgmr.msrb.gmra.mxu1 %vm3030_vm8, %v3111_v5  ;;  %v3260_v20 = vsel %vm3030_vm8, %v3250_v35, 0.0  ;;  %v3292_v21 = vsel %vm3030_vm8, %v3282_v45, 0.0 }
0x161b   : > { %v3289_v55 = vsel %vm3030_vm8, %v3281_v42, 0.0 }
0x1620   : > { %3197 = vadd.xlane.f32.xlu0 %v3196_v15  ;;  %3229 = vadd.xlane.f32.xlu1 %v3228_v57 }
0x1621   : > { %3213 = vadd.xlane.f32.xlu2 %v3212_v0  ;;  %v6025_v0 = vld [vmem:[%s9591_s14] sm:$0xf] }
0x1622   : > { %v6026_v11 = vor.u32 %v6471_v44, %v6025_v0 }
0x1624   : > { %v3357_v41 = vsel %vm1677_vm1, %v6026_v11, 0 }
0x1625   : > { %3366 = vmatpush.bf16.msra.mxu2 %v3357_v41 }
0x1628   : > { %3245 = vadd.xlane.f32.xlu0 %v3244_v1  ;;  %3277 = vadd.xlane.f32.xlu1 %v3276_v6 }
0x1629   : > { %3261 = vadd.xlane.f32.xlu2 %v3260_v20 }
0x1630   : > { %3293 = vadd.xlane.f32.xlu0 %v3292_v21 }
0x1631   : > { %3290 = vadd.xlane.f32.xlu2 %v3289_v55 }
0x1636   : > { %v3141_v5 = vpop.xlane.xlu0 %3140  ;;  %v3157_v24 = vpop.xlane.xlu2 %3156 }
0x1637   : > { %v3173_v22 = vpop.xlane.xlu1 %3172  ;;  %v3296_v21 = vsel %vm3295_vm10, %v3141_v5, %v3157_v24 }
0x1638   : > { %v3301_v0 = vsel %vm3300_vm6, %v3296_v21, %v3173_v22 }
0x163e   : > { %v3189_v17 = vpop.xlane.xlu0 %3188  ;;  %v3205_v15 = vpop.xlane.xlu2 %3204 }
0x163f   : > { %v3221_v57 = vpop.xlane.xlu1 %3220  ;;  %v3306_v44 = vsel %vm3305_vm7, %v3301_v0, %v3189_v17 }
0x1640   : > { %v3311_v28 = vsel %vm3310_vm5, %v3306_v44, %v3205_v15 }
0x1646   : > { %v3237_v53 = vpop.xlane.xlu0 %3236  ;;  %v3253_v1 = vpop.xlane.xlu2 %3252 }
0x1647   : > { %v3269_v35 = vpop.xlane.xlu1 %3268 }
0x164e   : > { %v3285_v6 = vpop.xlane.xlu0 %3284  ;;  %v3176_v45 = vpop.xlane.xlu2 %3175 }
0x164f   : > { %v3144_v20 = vpop.xlane.xlu1 %3143 }
0x1656   : > { %v3160_v42 = vpop.xlane.xlu0 %3159  ;;  %v3224_v41 = vpop.xlane.xlu2 %3223 }
0x1657   : > { %v3192_v55 = vpop.xlane.xlu1 %3191  ;;  %v3297_v12 = vsel %vm3295_vm10, %v3144_v20, %v3160_v42  ;;  %v3316_v20 = vsel %vm3315_vm2, %v3311_v28, %v3221_v57 }
0x1658   : > { %v3302_v11 = vsel %vm3300_vm6, %v3297_v12, %v3176_v45  ;;  %v3321_v22 = vsel %vm3320_vm9, %v3316_v20, %v3237_v53 }
0x1659   : > { %v3307_v5 = vsel %vm3305_vm7, %v3302_v11, %v3192_v55  ;;  %v3326_v12 = vsel %vm3325_vm11, %v3321_v22, %v3253_v1  ;;  %v6475_v22 = vld [vmem:[%s9583_s6 + $0x18] sm:$0xff] }
0x165a   : > { %v3331_v55 = vsel %vm9632_vm14, %v3326_v12, %v3269_v35  ;;  %3426 = vmatpush.bf16.msrb.mxu3 %v6475_v22 }
0x165b   : > { %v3336_v57 = vsel %vm9631_vm0, %v3331_v55, %v3285_v6 }
0x165e   : > { %v3208_v16 = vpop.xlane.xlu0 %3207  ;;  %v3272_v42 = vpop.xlane.xlu2 %3271 }
0x165f   : > { %v3240_v24 = vpop.xlane.xlu1 %3239  ;;  %v3312_v14 = vsel %vm3310_vm5, %v3307_v5, %v3208_v16 }
0x1660   : > { %v3317_v17 = vsel %vm3315_vm2, %v3312_v14, %v3224_v41 }
0x1661   : > { %v3322_v15 = vsel %vm3320_vm9, %v3317_v17, %v3240_v24 }
0x1666   : > { %v3256_v45 = vpop.xlane.xlu0 %3255 }
0x1667   : > { %v3327_v21 = vsel %vm3325_vm11, %v3322_v15, %v3256_v45  ;;  %v3288_v28 = vpop.xlane.xlu1 %3287 }
0x1668   : > { %v3332_v16 = vsel %vm9632_vm14, %v3327_v21, %v3272_v42 }
0x1669   : > { %v3337_v53 = vsel %vm9631_vm0, %v3332_v16, %v3288_v28 }
0x166a   : > { %v3340_v14 = vpack.c.bf16 %v3337_v53, %v3336_v57 }
0x166c   : > { %6027 = vmatmul.msk.bf16.vlgmr.msra.gmra.mxu2 %vm9630_vm13, %v3340_v14 }
0x1673   : > { %v3179_v1 = vpop.xlane.xlu0 %3178  ;;  %v3163_v0 = vpop.xlane.xlu1 %3162 }
0x1674   : > { %v3147_v44 = vpop.xlane.xlu2 %3146 }
0x1675   : > { %v3298_v45 = vsel %vm3295_vm10, %v3147_v44, %v3163_v0 }
0x1676   : > { %v3303_v16 = vsel %vm3300_vm6, %v3298_v45, %v3179_v1 }
0x167b   : > { %v3227_v11 = vpop.xlane.xlu0 %3226  ;;  %v3211_v41 = vpop.xlane.xlu1 %3210 }
0x167c   : > { %v3195_v5 = vpop.xlane.xlu2 %3194 }
0x167d   : > { %v3308_v57 = vsel %vm3305_vm7, %v3303_v16, %v3195_v5 }
0x167e   : > { %v3313_v22 = vsel %vm3310_vm5, %v3308_v57, %v3211_v41 }
0x167f   : > { %v3318_v0 = vsel %vm3315_vm2, %v3313_v22, %v3227_v11 }
0x1683   : > { %v3275_v24 = vpop.xlane.xlu0 %3274  ;;  %v3259_v35 = vpop.xlane.xlu1 %3258 }
0x1684   : > { %v3243_v20 = vpop.xlane.xlu2 %3242 }
0x168b   : > { %v3150_v6 = vpop.xlane.xlu0 %3149  ;;  %v3182_v12 = vpop.xlane.xlu1 %3181 }
0x168c   : > { %v3166_v17 = vpop.xlane.xlu2 %3165 }
0x168d   : > { %v3299_v15 = vsel %vm3295_vm10, %v3150_v6, %v3166_v17 }
0x168e   : > { %v3304_v55 = vsel %vm3300_vm6, %v3299_v15, %v3182_v12  ;;  %v3323_v12 = vsel %vm3320_vm9, %v3318_v0, %v3243_v20  ;;  %v6473_v20 = vld [vmem:[%s9583_s6 + $0x8] sm:$0xff] }
0x168f   : > { %v3328_v15 = vsel %vm3325_vm11, %v3323_v12, %v3259_v35  ;;  %v6472_v35 = vld [vmem:[%s9583_s6] sm:$0xff] }
0x1693   : > { %v3198_v42 = vpop.xlane.xlu0 %3197  ;;  %v3230_v53 = vpop.xlane.xlu1 %3229 }
0x1694   : > { %v3214_v21 = vpop.xlane.xlu2 %3213  ;;  %v3309_v28 = vsel %vm3305_vm7, %v3304_v55, %v3198_v42  ;;  %v3333_v55 = vsel %vm9632_vm14, %v3328_v15, %v3275_v24  ;;  %v3102_v24 = vpop.f32.mrf.mxu0 }
0x1695   : > { %v3314_v14 = vsel %vm3310_vm5, %v3309_v28, %v3214_v21 }
0x1696   : > { %v3319_v6 = vsel %vm3315_vm2, %v3314_v14, %v3230_v53 }
0x169b   : > { %v3246_v27 = vpop.xlane.xlu0 %3245  ;;  %v3278_v5 = vpop.xlane.xlu1 %3277 }
0x169c   : > { %v3262_v17 = vpop.xlane.xlu2 %3261  ;;  %v3324_v44 = vsel %vm3320_vm9, %v3319_v6, %v3246_v27  ;;  %v6474_v27 = vld [vmem:[%s9583_s6 + $0x10] sm:$0xff]  ;;  %v3104_v57 = vpop.f32.mrf.mxu0 }
0x169d   : > { %v3329_v1 = vsel %vm3325_vm11, %v3324_v44, %v3262_v17  ;;  %3427 = vmatpush.bf16.msrb.mxu3 %v6474_v27  ;;  %v3130_v17 = vpop.f32.mrf.mxu1 }
0x169e   : > { %v3334_v45 = vsel %vm9632_vm14, %v3329_v1, %v3278_v5 }
0x16a1   : > { %3428 = vmatpush.bf16.msrb.mxu3 %v6473_v20 }
0x16a3   : > { %v3294_v42 = vpop.xlane.xlu0 %3293 }
0x16a4   : > { %v3339_v41 = vsel %vm9631_vm0, %v3334_v45, %v3294_v42  ;;  %v3291_v21 = vpop.xlane.xlu2 %3290 }
0x16a5   : > { %v3338_v16 = vsel %vm9631_vm0, %v3333_v55, %v3291_v21  ;;  %3429 = vmatpush.bf16.msrb.mxu3 %v6472_v35  ;;  %v3132_v44 = vpop.f32.mrf.mxu1 }
0x16a6   : > { %v3341_v11 = vpack.c.bf16 %v3339_v41, %v3338_v16 }
0x16a8   : > { %6028 = vmatmul.msk.bf16.gmra.mxu2 %vm9630_vm13, %v3341_v11 }
0x16ef   : > { %v3368_v28 = vpop.f32.mrf.mxu2 }
0x16f0   : > { %v3378_v14 = vadd.f32 %v3368_v28, %v3102_v24  ;;  %v6939_v28 = vmov 64.0  }
0x16f1   : > { %6836 = vrcp.f32 %v6939_v28 }
0x16f7   : > { %v3370_v53 = vpop.f32.mrf.mxu2 }
0x16f8   : > { %v3379_v22 = vadd.f32 %v3370_v53, %v3104_v57  ;;  %v6837_v57 = vpop.eup %6836 }
0x16f9   : > { %v3459_v53 = vmul.f32 64.0, %v6837_v57  ;;  %vm3463_vm15 = vweird.f32 %v6837_v57 }
0x16fa   : > { %v3382_v6 = vpack.c.bf16 %v3379_v22, %v3378_v14 }
0x16fc   : > { %6045 = vmatmul.msk.bf16.vlgmr.msrb.gmra.mxu3 %vm855_vm12, %v3382_v6 }
0x172b   : > { %v3373_v0 = vpop.f32.mrf.mxu2 }
0x172c   : > { %v3380_v1 = vadd.f32 %v3373_v0, %v3130_v17 }
0x1733   : > { %v3375_v12 = vpop.f32.mrf.mxu2 }
0x1734   : > { %v3381_v15 = vadd.f32 %v3375_v12, %v3132_v44 }
0x1736   : > { %v3383_v5 = vpack.c.bf16 %v3381_v15, %v3380_v1 }
0x1738   : > { %6046 = vmatmul.msk.bf16.gmra.mxu3 %vm855_vm12, %v3383_v5 }
0x177f   : > { %v3431_v45 = vpop.f32.mrf.mxu3 }
0x1780   : > { %v3442_v42 = vadd.f32 %v3431_v45, %v8096_v33 }
0x1782   : > { %v3446_v41 = vsel %vm855_vm12, %v3442_v42, 0.0 }
0x1783   : > { %3447 = vadd.xlane.f32.xlu1 %v3446_v41 }
0x1787   : > { %v3433_v21 = vpop.f32.mrf.mxu3 }
0x1788   : > { %v3443_v55 = vadd.f32 %v3433_v21, %v8208_v63  ;;  %v3460_v63 = vsub.f32 1.0, %v3459_v53  ;;  %v6482_v53 = vld [vmem:[%s9585_s8 + $0x34] sm:$0xf] }
0x178a   : > { %v3449_v16 = vsel %vm855_vm12, %v3443_v55, 0.0  ;;  %v3461_v14 = vmul.f32 %v6837_v57, %v3460_v63  ;;  %v6075_v63 = vld [vmem:[%s9585_s8 + $0x38] sm:$0xf0] }
0x178b   : > { %3450 = vadd.xlane.f32.xlu2 %v3449_v16 }
0x178c   : > { %v3462_v22 = vadd.f32 %v6837_v57, %v3461_v14  ;;  %v6078_v14 = vor.u32 %v6482_v53, %v6075_v63  ;;  %v6051_v53 = vld [vmem:[%s9585_s8 + $0x8] sm:$0xf0] }
0x178e   : > { %v8698_v6 = vsel %vm3463_vm15, %v6837_v57, %v3462_v22  ;;  %v6483_v57 = vld [vmem:[%s9585_s8 + $0x34] sm:$0xf0]  ;;  %3636 = vmatpush.bf16.msra.mxu1 %v6078_v14  ;;  %v6065_v22 = vld [vmem:[%s9585_s8 + $0x20] sm:$0xf] }
0x178f   : > { %9674 = vst [vmem:[#allocation9_spill] sm:$0xff] %v8698_v6 }
0x17bb   : > { %v3436_v11 = vpop.f32.mrf.mxu3 }
0x17bc   : > { %v3444_v27 = vadd.f32 %v3436_v11, %v8109_v8 }
0x17be   : > { %v3452_v20 = vsel %vm855_vm12, %v3444_v27, 0.0 }
0x17bf   : > { %3453 = vadd.xlane.f32.xlu0 %v3452_v20 }
0x17c3   : > { %v3438_v35 = vpop.f32.mrf.mxu3 }
0x17c4   : > { %v3445_v24 = vadd.f32 %v3438_v35, %v8217_v9 }
0x17c6   : > { %v3455_v33 = vsel %vm855_vm12, %v3445_v24, 0.0 }
0x17c7   : > { %3456 = vadd.xlane.f32.xlu1 %v3455_v33 }
0x17f6   : > { %v3448_v8 = vpop.xlane.xlu1 %3447 }
0x17f7   : > { %v3465_v17 = vmul.f32 %v8698_v6, %v3448_v8  ;;  %v6481_v8 = vld [vmem:[%s9585_s8 + $0x24] sm:$0xf0] }
0x17f9   : > { %v8701_v0 = vsub.f32 %v3442_v42, %v3465_v17  ;;  %v6480_v17 = vld [vmem:[%s9585_s8 + $0x24] sm:$0xf] }
0x17fb   : > { %v3473_v9 = vmul.f32 %v8701_v0, %v8701_v0 }
0x17fd   : > { %v3477_v44 = vsel %vm855_vm12, %v3473_v9, 0.0  ;;  %v6066_v9 = vor.u32 %v6481_v8, %v6065_v22 }
0x17fe   : > { %v3451_v12 = vpop.xlane.xlu2 %3450  ;;  %3478 = vadd.xlane.f32.xlu2 %v3477_v44  ;;  %v6067_v44 = vld [vmem:[%s9585_s8 + $0x28] sm:$0xf0] }
0x17ff   : > { %v3466_v1 = vmul.f32 %v8698_v6, %v3451_v12  ;;  %v6070_v12 = vor.u32 %v6480_v17, %v6067_v44 }
0x1801   : > { %v8707_v15 = vsub.f32 %v3443_v55, %v3466_v1  ;;  %3637 = vmatpush.bf16.msra.mxu1 %v6070_v12 }
0x1803   : > { %v3474_v5 = vmul.f32 %v8707_v15, %v8707_v15 }
0x1805   : > { %v3480_v45 = vsel %vm855_vm12, %v3474_v5, 0.0 }
0x1806   : > { %3481 = vadd.xlane.f32.xlu0 %v3480_v45  ;;  %v6057_v45 = vld [vmem:[%s9585_s8 + $0x10] sm:$0xf] }
0x1832   : > { %v3454_v41 = vpop.xlane.xlu0 %3453 }
0x1833   : > { %v3467_v42 = vmul.f32 %v8698_v6, %v3454_v41  ;;  %v6479_v41 = vld [vmem:[%s9585_s8 + $0x14] sm:$0xf0] }
0x1835   : > { %v8713_v21 = vsub.f32 %v3444_v27, %v3467_v42  ;;  %v6073_v27 = vld [vmem:[%s9585_s8 + $0x30] sm:$0xf]  ;;  %v6478_v42 = vld [vmem:[%s9585_s8 + $0x14] sm:$0xf] }
0x1837   : > { %v3475_v16 = vmul.f32 %v8713_v21, %v8713_v21 }
0x1839   : > { %v3483_v11 = vsel %vm855_vm12, %v3475_v16, 0.0  ;;  %v6058_v16 = vor.u32 %v6479_v41, %v6057_v45 }
0x183a   : > { %3484 = vadd.xlane.f32.xlu1 %v3483_v11  ;;  %v3457_v20 = vpop.xlane.xlu1 %3456  ;;  %v6059_v11 = vld [vmem:[%s9585_s8 + $0x18] sm:$0xf0] }
0x183b   : > { %v3468_v55 = vmul.f32 %v8698_v6, %v3457_v20 }
0x183d   : > { %v8719_v35 = vsub.f32 %v3445_v24, %v3468_v55  ;;  %v6074_v24 = vor.u32 %v6483_v57, %v6073_v27  ;;  %v6062_v55 = vor.u32 %v6478_v42, %v6059_v11  ;;  %v6476_v27 = vld [vmem:[%s9585_s8 + $0x4] sm:$0xf]  ;;  %v3441_v42 = vld [vmem:[%s9584_s7] sm:$0x3] }
0x183f   : > { %v3476_v33 = vmul.f32 %v8719_v35, %v8719_v35  ;;  %3617 = vmatpush.bf16.msra.mxu0 %v6074_v24  ;;  %3638 = vmatpush.bf16.msra.mxu1 %v6062_v55  ;;  %v6054_v24 = vor.u32 %v6476_v27, %v6051_v53  ;;  %v3546_v53 = vperm.slane %v3441_v42, 1 }
0x1841   : > { %v3486_v28 = vsel %vm855_vm12, %v3476_v33, 0.0  ;;  %v6049_v33 = vld [vmem:[%s9585_s8] sm:$0xf] }
0x1842   : > { %3487 = vadd.xlane.f32.xlu2 %v3486_v28  ;;  %v6477_v28 = vld [vmem:[%s9585_s8 + $0x4] sm:$0xf0] }
0x1843   : > { %3618 = vmatpush.bf16.msra.mxu0 %v6066_v9  ;;  %v6050_v57 = vor.u32 %v6477_v28, %v6049_v33  ;;  %3639 = vmatpush.bf16.msra.mxu1 %v6054_v24  ;;  %v3541_v33 = vperm.slane %v3441_v42, 0 }
0x1847   : > { %3619 = vmatpush.bf16.msra.mxu0 %v6058_v16 }
0x184b   : > { %3620 = vmatpush.bf16.msra.mxu0 %v6050_v57 }
0x1871   : > { %v3479_v1 = vpop.xlane.xlu2 %3478 }
0x1872   : > { %v3489_v5 = vmul.f32 %v3479_v1, %v8698_v6 }
0x1874   : > { %v3493_v20 = vadd.f32 1e-05, %v3489_v5 }
0x1876   : > { %6838 = vrsqrt.f32 %v3493_v20  ;;  %vm3503_vm4 = vweird.f32 %v3493_v20 }
0x1879   : > { %v3482_v63 = vpop.xlane.xlu0 %3481 }
0x187a   : > { %v3490_v14 = vmul.f32 %v3482_v63, %v8698_v6 }
0x187c   : > { %v6839_v22 = vpop.eup %6838  ;;  %v3494_v8 = vadd.f32 1e-05, %v3490_v14 }
0x187d   : > { %v3498_v17 = vmul.f32 %v6839_v22, %v3493_v20  ;;  %vm3504_vm3 = vweird.f32 %v6839_v22 }
0x187e   : > { %6840 = vrsqrt.f32 %v3494_v8  ;;  %vm3505_vm15 = vmor %vm3503_vm4, %vm3504_vm3  ;;  %vm3513_vm0 = vweird.f32 %v3494_v8 }
0x187f   : > { %v3499_v9 = vmul.f32 %v6839_v22, %v3498_v17 }
0x1881   : > { %v3500_v44 = vmul.f32 0.5, %v3499_v9 }
0x1883   : > { %v3501_v12 = vsub.f32 1.5, %v3500_v44  ;;  %v6499_v44 = vld [vmem:[%s9587_s10 + $0x78] sm:$0xff] }
0x1884   : > { %v6841_v1 = vpop.eup %6840  ;;  %3814 = vmatpush.bf16.msra.mxu3 %v6499_v44 }
0x1885   : > { %v3502_v5 = vmul.f32 %v6839_v22, %v3501_v12  ;;  %v3508_v45 = vmul.f32 %v6841_v1, %v3494_v8  ;;  %vm3514_vm13 = vweird.f32 %v6841_v1 }
0x1886   : > { %vm3515_vm14 = vmor %vm3513_vm0, %vm3514_vm13 }
0x1887   : > { %v3509_v41 = vmul.f32 %v6841_v1, %v3508_v45  ;;  %v3506_v16 = vsel %vm3505_vm15, %v6839_v22, %v3502_v5  ;;  %v6490_v5 = vld [vmem:[%s9587_s10 + $0x30] sm:$0xff] }
0x1888   : > { %v3537_v28 = vmul.f32 %v3506_v16, %v8701_v0  ;;  %v6498_v45 = vld [vmem:[%s9587_s10 + $0x70] sm:$0xff] }
0x1889   : > { %v3510_v11 = vmul.f32 0.5, %v3509_v41  ;;  %3815 = vmatpush.bf16.msra.mxu3 %v6498_v45 }
0x188a   : > { %v3542_v24 = vmul.f32 %v3541_v33, %v3537_v28 }
0x188b   : > { %v3511_v55 = vsub.f32 1.5, %v3510_v11  ;;  %v6489_v11 = vld [vmem:[%s9587_s10 + $0x28] sm:$0xff] }
0x188c   : > { %v8779_v14 = vadd.f32 %v3546_v53, %v3542_v24  ;;  %v6496_v24 = vld [vmem:[%s9587_s10 + $0x60] sm:$0xff] }
0x188d   : > { %v3512_v27 = vmul.f32 %v6841_v1, %v3511_v55  ;;  %v6497_v55 = vld [vmem:[%s9587_s10 + $0x68] sm:$0xff] }
0x188e   : > { %3816 = vmatpush.bf16.msra.mxu3 %v6497_v55 }
0x188f   : > { %v3516_v57 = vsel %vm3515_vm14, %v6841_v1, %v3512_v27 }
0x1890   : > { %v3538_v20 = vmul.f32 %v3516_v57, %v8707_v15  ;;  %v6491_v15 = vld [vmem:[%s9587_s10 + $0x38] sm:$0xff]  ;;  %v6488_v57 = vld [vmem:[%s9587_s10 + $0x20] sm:$0xff] }
0x1891   : > { %3795 = vmatpush.bf16.msrb.mxu2 %v6491_v15 }
0x1892   : > { %v3543_v63 = vmul.f32 %v3541_v33, %v3538_v20  ;;  %3817 = vmatpush.bf16.msra.mxu3 %v6496_v24  ;;  %v6492_v24 = vld [vmem:[%s9587_s10 + $0x40] sm:$0xff] }
0x1894   : > { %v8781_v17 = vadd.f32 %v3546_v53, %v3543_v63 }
0x1895   : > { %3796 = vmatpush.bf16.msrb.mxu2 %v6490_v5 }
0x1896   : > { %v3551_v22 = vpack.c.bf16 %v8781_v17, %v8779_v14 }
0x1898   : > { %6079 = vmatmul.msk.bf16.vlgmr.msra.gmra.mxu0 %vm855_vm12, %v3551_v22  ;;  %6081 = vmatmul.msk.bf16.vlgmr.msra.gmra.mxu1 %vm855_vm12, %v3551_v22 }
0x1899   : > { %3797 = vmatpush.bf16.msrb.mxu2 %v6489_v11 }
0x189d   : > { %3798 = vmatpush.bf16.msrb.mxu2 %v6488_v57  ;;  %v6484_v57 = vld [vmem:[%s9587_s10] sm:$0xff] }
0x18ad   : > { %v3485_v0 = vpop.xlane.xlu1 %3484 }
0x18ae   : > { %v3491_v8 = vmul.f32 %v3485_v0, %v8698_v6 }
0x18b0   : > { %v3495_v9 = vadd.f32 1e-05, %v3491_v8 }
0x18b2   : > { %6842 = vrsqrt.f32 %v3495_v9  ;;  %vm3523_vm0 = vweird.f32 %v3495_v9 }
0x18b5   : > { %v3488_v12 = vpop.xlane.xlu2 %3487 }
0x18b6   : > { %v3492_v1 = vmul.f32 %v3488_v12, %v8698_v6 }
0x18b8   : > { %v6843_v41 = vpop.eup %6842  ;;  %v3496_v42 = vadd.f32 1e-05, %v3492_v1 }
0x18b9   : > { %v3518_v16 = vmul.f32 %v6843_v41, %v3495_v9  ;;  %vm3524_vm14 = vweird.f32 %v6843_v41 }
0x18ba   : > { %6844 = vrsqrt.f32 %v3496_v42  ;;  %vm3525_vm13 = vmor %vm3523_vm0, %vm3524_vm14  ;;  %vm3533_vm4 = vweird.f32 %v3496_v42 }
0x18bb   : > { %v3519_v28 = vmul.f32 %v6843_v41, %v3518_v16 }
0x18bd   : > { %v3520_v27 = vmul.f32 0.5, %v3519_v28 }
0x18bf   : > { %v3521_v20 = vsub.f32 1.5, %v3520_v27 }
0x18c0   : > { %v6845_v63 = vpop.eup %6844 }
0x18c1   : > { %v3522_v22 = vmul.f32 %v6843_v41, %v3521_v20  ;;  %v3528_v0 = vmul.f32 %v6845_v63, %v3496_v42  ;;  %vm3534_vm3 = vweird.f32 %v6845_v63  ;;  %v6493_v42 = vld [vmem:[%s9587_s10 + $0x48] sm:$0xff]  ;;  %v3561_v20 = vld [vmem:[%s9586_s9] sm:$0x3] }
0x18c2   : > { %vm3535_vm15 = vmor %vm3533_vm4, %vm3534_vm3 }
0x18c3   : > { %v3529_v8 = vmul.f32 %v6845_v63, %v3528_v0  ;;  %v3526_v15 = vsel %vm3525_vm13, %v6843_v41, %v3522_v22  ;;  %v6485_v41 = vld [vmem:[%s9587_s10 + $0x8] sm:$0xff]  ;;  %v3563_v0 = vperm.slane %v3561_v20, 0 }
0x18c4   : > { %v3539_v1 = vmul.f32 %v3526_v15, %v8713_v21  ;;  %v6487_v21 = vld [vmem:[%s9587_s10 + $0x18] sm:$0xff] }
0x18c5   : > { %v3530_v44 = vmul.f32 0.5, %v3529_v8  ;;  %3799 = vmatpush.bf16.msrb.mxu2 %v6487_v21  ;;  %v3564_v8 = vperm.slane %v3561_v20, 1 }
0x18c6   : > { %v3544_v11 = vmul.f32 %v3541_v33, %v3539_v1 }
0x18c7   : > { %v3531_v12 = vsub.f32 1.5, %v3530_v44 }
0x18c8   : > { %v8815_v28 = vadd.f32 %v3546_v53, %v3544_v11 }
0x18c9   : > { %v3532_v5 = vmul.f32 %v6845_v63, %v3531_v12 }
0x18cb   : > { %v3536_v45 = vsel %vm3535_vm15, %v6845_v63, %v3532_v5 }
0x18cc   : > { %v3540_v16 = vmul.f32 %v3536_v45, %v8719_v35  ;;  %v6495_v35 = vld [vmem:[%s9587_s10 + $0x58] sm:$0xff] }
0x18cd   : > { %3818 = vmatpush.bf16.msra.mxu3 %v6495_v35 }
0x18ce   : > { %v3545_v55 = vmul.f32 %v3541_v33, %v3540_v16  ;;  %v6486_v33 = vld [vmem:[%s9587_s10 + $0x10] sm:$0xff] }
0x18cf   : > { %3800 = vmatpush.bf16.msrb.mxu2 %v6486_v33 }
0x18d0   : > { %v8817_v27 = vadd.f32 %v3546_v53, %v3545_v55  ;;  %v6494_v53 = vld [vmem:[%s9587_s10 + $0x50] sm:$0xff] }
0x18d1   : > { %3819 = vmatpush.bf16.msra.mxu3 %v6494_v53 }
0x18d2   : > { %v3552_v9 = vpack.c.bf16 %v8817_v27, %v8815_v28 }
0x18d3   : > { %3801 = vmatpush.bf16.msrb.mxu2 %v6485_v41 }
0x18d4   : > { %6080 = vmatmul.msk.bf16.gmra.mxu0 %vm855_vm12, %v3552_v9  ;;  %6082 = vmatmul.msk.bf16.gmra.mxu1 %vm855_vm12, %v3552_v9 }
0x18d5   : > { %3820 = vmatpush.bf16.msra.mxu3 %v6493_v42 }
0x18d7   : > { %3802 = vmatpush.bf16.msrb.mxu2 %v6484_v57 }
0x18d9   : > { %3821 = vmatpush.bf16.msra.mxu3 %v6492_v24 }
0x1915   : > { %v3622_v63 = vpop.f32.mrf.mxu0  ;;  %v3641_v22 = vpop.f32.mrf.mxu1 }
0x1916   : > { %v3623_v15 = vadd.f32 %v3622_v63, %v3563_v0  ;;  %v3642_v44 = vadd.f32 %v3641_v22, %v3564_v8 }
0x1918   : > { %v3651_v16 = vmax.f32 %v3623_v15, 0.0  ;;  %v3652_v11 = vmax.f32 %v3642_v44, 0.0 }
0x191d   : > { %v3624_v12 = vpop.f32.mrf.mxu0  ;;  %v3643_v1 = vpop.f32.mrf.mxu1 }
0x191e   : > { %v3625_v5 = vadd.f32 %v3624_v12, %v3563_v0  ;;  %v3644_v45 = vadd.f32 %v3643_v1, %v3564_v8 }
0x1920   : > { %v3653_v55 = vmax.f32 %v3625_v5, 0.0  ;;  %v3654_v9 = vmax.f32 %v3644_v45, 0.0  ;;  %v6650_v5 = vld [vmem:[%s9588_s11] ss:$0 sm:$0xff] }
0x1922   : > { %v3659_v21 = vpack.c.bf16 %v3653_v55, %v3651_v16  ;;  %v3660_v35 = vpack.c.bf16 %v3654_v9, %v3652_v11 }
0x1924   : > { %3803 = vmatmul.bf16.vlgmr.msrb.gmra.mxu2 %v3659_v21  ;;  %3822 = vmatmul.bf16.vlgmr.msra.gmra.mxu3 %v3660_v35 }
0x1951   : > { %v3627_v33 = vpop.f32.mrf.mxu0  ;;  %v3646_v53 = vpop.f32.mrf.mxu1 }
0x1952   : > { %v3628_v41 = vadd.f32 %v3627_v33, %v3563_v0  ;;  %v3647_v42 = vadd.f32 %v3646_v53, %v3564_v8 }
0x1954   : > { %v3655_v22 = vmax.f32 %v3628_v41, 0.0  ;;  %v3656_v38 = vmax.f32 %v3647_v42, 0.0 }
0x1959   : > { %v3629_v57 = vpop.f32.mrf.mxu0  ;;  %v3648_v24 = vpop.f32.mrf.mxu1 }
0x195a   : > { %v3630_v20 = vadd.f32 %v3629_v57, %v3563_v0  ;;  %v3649_v63 = vadd.f32 %v3648_v24, %v3564_v8 }
0x195c   : > { %v3657_v12 = vmax.f32 %v3630_v20, 0.0  ;;  %v3658_v1 = vmax.f32 %v3649_v63, 0.0 }
0x195e   : > { %v3661_v15 = vpack.c.bf16 %v3657_v12, %v3655_v22  ;;  %v3662_v44 = vpack.c.bf16 %v3658_v1, %v3656_v38 }
0x1960   : > { %3808 = vmatmul.bf16.gmra.mxu2 %v3661_v15  ;;  %3827 = vmatmul.bf16.gmra.mxu3 %v3662_v44 }
0x19a7   : > { %v3804_v45 = vpop.f32.mrf.mxu2  ;;  %v3823_v16 = vpop.f32.mrf.mxu3 }
0x19a8   : > { %v3805_v11 = vadd.f32 %v6650_v5, %v3804_v45 }
0x19aa   : > { %v3824_v55 = vadd.f32 %v3823_v16, %v3805_v11 }
0x19ac   : > { %v3834_v9 = vadd.f32 %v3824_v55, %v8779_v14 }
0x19ae   : > { %v3838_v0 = vsel %vm855_vm12, %v3834_v9, 0.0 }
0x19af   : > { %v3806_v8 = vpop.f32.mrf.mxu2  ;;  %3839 = vadd.xlane.f32.xlu0 %v3838_v0  ;;  %v3825_v35 = vpop.f32.mrf.mxu3 }
0x19b0   : > { %v3807_v21 = vadd.f32 %v6650_v5, %v3806_v8 }
0x19b2   : > { %v3826_v33 = vadd.f32 %v3825_v35, %v3807_v21 }
0x19b4   : > { %v3835_v38 = vadd.f32 %v3826_v33, %v8781_v17 }
0x19b6   : > { %v3841_v53 = vsel %vm855_vm12, %v3835_v38, 0.0 }
0x19b7   : > { %3842 = vadd.xlane.f32.xlu1 %v3841_v53 }
0x19e3   : > { %v3809_v41 = vpop.f32.mrf.mxu2  ;;  %v3828_v42 = vpop.f32.mrf.mxu3 }
0x19e4   : > { %v3810_v57 = vadd.f32 %v6650_v5, %v3809_v41 }
0x19e6   : > { %v3829_v24 = vadd.f32 %v3828_v42, %v3810_v57 }
0x19e8   : > { %v3836_v20 = vadd.f32 %v3829_v24, %v8815_v28 }
0x19ea   : > { %v3844_v14 = vsel %vm855_vm12, %v3836_v20, 0.0 }
0x19eb   : > { %v3811_v63 = vpop.f32.mrf.mxu2  ;;  %3845 = vadd.xlane.f32.xlu2 %v3844_v14  ;;  %v3830_v12 = vpop.f32.mrf.mxu3  ;;  %v6507_v14 = vld [vmem:[%s9582_s5 + $0x74] sm:$0xf0] }
0x19ec   : > { %v3812_v22 = vadd.f32 %v6650_v5, %v3811_v63  ;;  %v6506_v63 = vld [vmem:[%s9582_s5 + $0x74] sm:$0xf] }
0x19ee   : > { %v3831_v1 = vadd.f32 %v3830_v12, %v3812_v22  ;;  %v6183_v12 = vld [vmem:[%s9582_s5 + $0x78] sm:$0xf0] }
0x19f0   : > { %v3837_v15 = vadd.f32 %v3831_v1, %v8817_v27  ;;  %v6186_v1 = vor.u32 %v6506_v63, %v6183_v12 }
0x19f2   : > { %v3847_v17 = vsel %vm855_vm12, %v3837_v15, 0.0  ;;  %4016 = vmatpush.bf16.msrb.mxu1 %v6186_v1 }
0x19f3   : > { %3848 = vadd.xlane.f32.xlu0 %v3847_v17  ;;  %v6505_v17 = vld [vmem:[%s9582_s5 + $0x64] sm:$0xf0] }
0x1a22   : > { %v3840_v44 = vpop.xlane.xlu0 %3839 }
0x1a23   : > { %v3850_v45 = vmul.f32 %v3840_v44, %v8698_v6  ;;  %v6504_v44 = vld [vmem:[%s9582_s5 + $0x64] sm:$0xf] }
0x1a25   : > { %v8862_v16 = vsub.f32 %v3834_v9, %v3850_v45 }
0x1a27   : > { %v3858_v28 = vmul.f32 %v8862_v16, %v8862_v16 }
0x1a29   : > { %v3862_v11 = vsel %vm855_vm12, %v3858_v28, 0.0  ;;  %v6175_v28 = vld [vmem:[%s9582_s5 + $0x68] sm:$0xf0] }
0x1a2a   : > { %3863 = vadd.xlane.f32.xlu1 %v3862_v11  ;;  %v3843_v55 = vpop.xlane.xlu1 %3842  ;;  %v6178_v11 = vor.u32 %v6504_v44, %v6175_v28 }
0x1a2b   : > { %v3851_v5 = vmul.f32 %v3843_v55, %v8698_v6 }
0x1a2c   : > { %4017 = vmatpush.bf16.msrb.mxu1 %v6178_v11 }
0x1a2d   : > { %v8868_v0 = vsub.f32 %v3835_v38, %v3851_v5 }
0x1a2f   : > { %v3859_v27 = vmul.f32 %v8868_v0, %v8868_v0 }
0x1a31   : > { %v3865_v8 = vsel %vm855_vm12, %v3859_v27, 0.0  ;;  %v6165_v27 = vld [vmem:[%s9582_s5 + $0x50] sm:$0xf] }
0x1a32   : > { %3866 = vadd.xlane.f32.xlu2 %v3865_v8  ;;  %v6503_v8 = vld [vmem:[%s9582_s5 + $0x54] sm:$0xf0] }
0x1a5e   : > { %v3846_v21 = vpop.xlane.xlu2 %3845 }
0x1a5f   : > { %v3852_v9 = vmul.f32 %v3846_v21, %v8698_v6  ;;  %v6502_v21 = vld [vmem:[%s9582_s5 + $0x54] sm:$0xf] }
0x1a61   : > { %v8874_v35 = vsub.f32 %v3836_v20, %v3852_v9  ;;  %v6181_v20 = vld [vmem:[%s9582_s5 + $0x70] sm:$0xf]  ;;  %v6166_v9 = vor.u32 %v6503_v8, %v6165_v27  ;;  %v3833_v8 = vld [vmem:[%s9589_s12] sm:$0x3] }
0x1a62   : > { %v6182_v22 = vor.u32 %v6507_v14, %v6181_v20  ;;  %v6159_v14 = vld [vmem:[%s9582_s5 + $0x48] sm:$0xf0] }
0x1a63   : > { %v3860_v33 = vmul.f32 %v8874_v35, %v8874_v35 }
0x1a64   : > { %3997 = vmatpush.bf16.msrb.mxu0 %v6182_v22 }
0x1a65   : > { %v3868_v53 = vsel %vm855_vm12, %v3860_v33, 0.0  ;;  %v6167_v33 = vld [vmem:[%s9582_s5 + $0x58] sm:$0xf0] }
0x1a66   : > { %v3849_v41 = vpop.xlane.xlu0 %3848  ;;  %3869 = vadd.xlane.f32.xlu0 %v3868_v53 }
0x1a67   : > { %v3853_v38 = vmul.f32 %v3849_v41, %v8698_v6  ;;  %v6170_v41 = vor.u32 %v6502_v21, %v6167_v33 }
0x1a69   : > { %v8880_v42 = vsub.f32 %v3837_v15, %v3853_v38  ;;  %v6173_v15 = vld [vmem:[%s9582_s5 + $0x60] sm:$0xf]  ;;  %4018 = vmatpush.bf16.msrb.mxu1 %v6170_v41  ;;  %v3926_v41 = vperm.slane %v3833_v8, 0 }
0x1a6a   : > { %v6174_v45 = vor.u32 %v6505_v17, %v6173_v15  ;;  %v6157_v38 = vld [vmem:[%s9582_s5 + $0x40] sm:$0xf] }
0x1a6b   : > { %v3861_v57 = vmul.f32 %v8880_v42, %v8880_v42 }
0x1a6c   : > { %3998 = vmatpush.bf16.msrb.mxu0 %v6174_v45 }
0x1a6d   : > { %v3871_v24 = vsel %vm855_vm12, %v3861_v57, 0.0  ;;  %v6501_v57 = vld [vmem:[%s9582_s5 + $0x44] sm:$0xf0] }
0x1a6e   : > { %3872 = vadd.xlane.f32.xlu1 %v3871_v24  ;;  %v6500_v24 = vld [vmem:[%s9582_s5 + $0x44] sm:$0xf]  ;;  %v6158_v20 = vor.u32 %v6501_v57, %v6157_v38 }
0x1a6f   : > { %v6162_v63 = vor.u32 %v6500_v24, %v6159_v14 }
0x1a70   : > { %3999 = vmatpush.bf16.msrb.mxu0 %v6166_v9 }
0x1a71   : > { %4019 = vmatpush.bf16.msrb.mxu1 %v6162_v63 }
0x1a74   : > { %4000 = vmatpush.bf16.msrb.mxu0 %v6158_v20  ;;  %v3931_v20 = vperm.slane %v3833_v8, 1 }
0x1a9d   : > { %v3864_v55 = vpop.xlane.xlu1 %3863 }
0x1a9e   : > { %v3874_v5 = vmul.f32 %v3864_v55, %v8698_v6 }
0x1aa0   : > { %v3878_v53 = vadd.f32 1e-05, %v3874_v5 }
0x1aa2   : > { %6846 = vrsqrt.f32 %v3878_v53  ;;  %vm3888_vm0 = vweird.f32 %v3878_v53 }
0x1aa5   : > { %v3867_v22 = vpop.xlane.xlu2 %3866 }
0x1aa6   : > { %v3875_v12 = vmul.f32 %v3867_v22, %v8698_v6 }
0x1aa8   : > { %v6847_v1 = vpop.eup %6846  ;;  %v3879_v15 = vadd.f32 1e-05, %v3875_v12 }
0x1aa9   : > { %v3883_v17 = vmul.f32 %v6847_v1, %v3878_v53  ;;  %vm3889_vm14 = vweird.f32 %v6847_v1 }
0x1aaa   : > { %6848 = vrsqrt.f32 %v3879_v15  ;;  %vm3890_vm13 = vmor %vm3888_vm0, %vm3889_vm14  ;;  %vm3898_vm4 = vweird.f32 %v3879_v15 }
0x1aab   : > { %v3884_v44 = vmul.f32 %v6847_v1, %v3883_v17 }
0x1aad   : > { %v3885_v45 = vmul.f32 0.5, %v3884_v44 }
0x1aaf   : > { %v3886_v28 = vsub.f32 1.5, %v3885_v45 }
0x1ab0   : > { %v6849_v11 = vpop.eup %6848 }
0x1ab1   : > { %v3887_v55 = vmul.f32 %v6847_v1, %v3886_v28  ;;  %v3893_v5 = vmul.f32 %v6849_v11, %v3879_v15  ;;  %vm3899_vm3 = vweird.f32 %v6849_v11 }
0x1ab2   : > { %vm3900_vm15 = vmor %vm3898_vm4, %vm3899_vm3 }
0x1ab3   : > { %v3894_v27 = vmul.f32 %v6849_v11, %v3893_v5  ;;  %v3891_v21 = vsel %vm3890_vm13, %v6847_v1, %v3887_v55 }
0x1ab4   : > { %v3922_v38 = vmul.f32 %v3891_v21, %v8862_v16 }
0x1ab5   : > { %v3895_v9 = vmul.f32 0.5, %v3894_v27 }
0x1ab6   : > { %v3927_v14 = vmul.f32 %v3926_v41, %v3922_v38 }
0x1ab7   : > { %v3896_v33 = vsub.f32 1.5, %v3895_v9 }
0x1ab8   : > { %v8940_v22 = vadd.f32 %v3931_v20, %v3927_v14 }
0x1ab9   : > { %v3897_v57 = vmul.f32 %v6849_v11, %v3896_v33 }
0x1aba   : > { %9675 = vst [vmem:[#allocation10_spill] sm:$0xff] %v8940_v22 }
0x1abb   : > { %v3901_v24 = vsel %vm3900_vm15, %v6849_v11, %v3897_v57 }
0x1abc   : > { %v3923_v53 = vmul.f32 %v3901_v24, %v8868_v0 }
0x1abe   : > { %v3928_v63 = vmul.f32 %v3926_v41, %v3923_v53 }
0x1ac0   : > { %v8942_v12 = vadd.f32 %v3931_v20, %v3928_v63 }
0x1ac2   : > { %9676 = vst [vmem:[#allocation11_spill] sm:$0xff] %v8942_v12  ;;  %v3936_v1 = vpack.c.bf16 %v8942_v12, %v8940_v22 }
0x1ac4   : > { %6187 = vmatmul.msk.bf16.vlgmr.msrb.gmra.mxu0 %vm855_vm12, %v3936_v1  ;;  %6189 = vmatmul.msk.bf16.vlgmr.msrb.gmra.mxu1 %vm855_vm12, %v3936_v1 }
0x1ad9   : > { %v3870_v16 = vpop.xlane.xlu0 %3869 }
0x1ada   : > { %v3876_v15 = vmul.f32 %v3870_v16, %v8698_v6 }
0x1adc   : > { %v3880_v17 = vadd.f32 1e-05, %v3876_v15 }
0x1ade   : > { %6850 = vrsqrt.f32 %v3880_v17  ;;  %vm3908_vm0 = vweird.f32 %v3880_v17 }
0x1ae1   : > { %v3873_v44 = vpop.xlane.xlu1 %3872 }
0x1ae2   : > { %v3877_v0 = vmul.f32 %v3873_v44, %v8698_v6 }
0x1ae4   : > { %v6851_v45 = vpop.eup %6850  ;;  %v3881_v28 = vadd.f32 1e-05, %v3877_v0 }
0x1ae5   : > { %v3903_v11 = vmul.f32 %v6851_v45, %v3880_v17  ;;  %vm3909_vm14 = vweird.f32 %v6851_v45 }
0x1ae6   : > { %6852 = vrsqrt.f32 %v3881_v28  ;;  %vm3910_vm13 = vmor %vm3908_vm0, %vm3909_vm14  ;;  %vm3918_vm4 = vweird.f32 %v3881_v28  ;;  %vm9699_vm14 = vcmask 72704  }
0x1ae7   : > { %v3904_v55 = vmul.f32 %v6851_v45, %v3903_v11  ;;  %vm9700_vm0 = vmmov %vm9699_vm14 }
0x1ae9   : > { %v3905_v5 = vmul.f32 0.5, %v3904_v55 }
0x1aeb   : > { %v3906_v27 = vsub.f32 1.5, %v3905_v5 }
0x1aec   : > { %v6853_v8 = vpop.eup %6852 }
0x1aed   : > { %v3907_v21 = vmul.f32 %v6851_v45, %v3906_v27  ;;  %v3913_v9 = vmul.f32 %v6853_v8, %v3881_v28  ;;  %vm3919_vm3 = vweird.f32 %v6853_v8 }
0x1aee   : > { %vm3920_vm15 = vmor %vm3918_vm4, %vm3919_vm3 }
0x1aef   : > { %v3914_v33 = vmul.f32 %v6853_v8, %v3913_v9  ;;  %v3911_v38 = vsel %vm3910_vm13, %v6851_v45, %v3907_v21  ;;  %vm9701_vm13 = vcmask 80896   ;;  %vm9705_vm4 = vmmov %vm9700_vm0 }
0x1af0   : > { %v3924_v14 = vmul.f32 %v3911_v38, %v8874_v35  ;;  %v6195_v35 = vld [vmem:[%s9590_s13 + $0x8] sm:$0xf] }
0x1af1   : > { %v3915_v57 = vmul.f32 0.5, %v3914_v33 }
0x1af2   : > { %v3929_v16 = vmul.f32 %v3926_v41, %v3924_v14 }
0x1af3   : > { %v3916_v24 = vsub.f32 1.5, %v3915_v57 }
0x1af4   : > { %v8952_v44 = vadd.f32 %v3931_v20, %v3929_v16 }
0x1af5   : > { %v3917_v53 = vmul.f32 %v6853_v8, %v3916_v24 }
0x1af6   : > { %9677 = vst [vmem:[#allocation12_spill] sm:$0xff] %v8952_v44 }
0x1af7   : > { %v3921_v63 = vsel %vm3920_vm15, %v6853_v8, %v3917_v53 }
0x1af8   : > { %v3925_v1 = vmul.f32 %v3921_v63, %v8880_v42  ;;  %v6508_v42 = vld [vmem:[%s9590_s13 + $0x8] sm:$0x10] }
0x1afa   : > { %v3930_v15 = vmul.f32 %v3926_v41, %v3925_v1  ;;  %v6196_v41 = vor.u32 %v6508_v42, %v6195_v35 }
0x1afc   : > { %v8954_v0 = vadd.f32 %v3931_v20, %v3930_v15  ;;  %v4056_v45 = vsel %vm855_vm12, %v6196_v41, 0 }
0x1afd   : > { %4065 = vmatpush.bf16.xpose.msra.mxu2 %v4056_v45 }
0x1afe   : > { %9678 = vst [vmem:[#allocation13_spill] sm:$0xff] %v8954_v0  ;;  %v3937_v17 = vpack.c.bf16 %v8954_v0, %v8952_v44 }
0x1b00   : > { %6188 = vmatmul.msk.bf16.gmra.mxu0 %vm855_vm12, %v3937_v17  ;;  %6190 = vmatmul.msk.bf16.gmra.mxu1 %vm855_vm12, %v3937_v17 }
0x1b41   : > { %v4002_v20 = vpop.f32.mrf.mxu0  ;;  %v4021_v28 = vpop.f32.mrf.mxu1 }
0x1b42   : > { %v4031_v11 = vpack.c.bf16 %v4002_v20, %v4002_v20  ;;  %v4035_v55 = vpack.c.bf16 %v4021_v28, %v4021_v28 }
0x1b44   : > { %v4323_v33 = vunpack.c.l.b16 %v4031_v11  ;;  %v4438_v38 = vunpack.c.l.b16 %v4035_v55 }
0x1b49   : > { %v4004_v5 = vpop.f32.mrf.mxu0  ;;  %v4023_v27 = vpop.f32.mrf.mxu1 }
0x1b4a   : > { %v4032_v8 = vpack.c.bf16 %v4004_v5, %v4004_v5  ;;  %v4039_v21 = vpack.c.bf16 %v4004_v5, %v4002_v20  ;;  %v4036_v9 = vpack.c.bf16 %v4023_v27, %v4023_v27 }
0x1b4c   : > { %v4324_v57 = vunpack.c.l.b16 %v4032_v8  ;;  %v4439_v24 = vunpack.c.l.b16 %v4036_v9  ;;  %6197 = vmatmul.msk.bf16.vlgmr.msra.gmra.mxu2 %vm855_vm12, %v4039_v21 }
0x1b4e   : > { %v4325_v14 = vpack.c.b16 %v4324_v57, %v4323_v33  ;;  %v4440_v53 = vpack.c.b16 %v4439_v24, %v4438_v38  ;;  %v9679_v33 = vmov 4   ;;  %v9680_v38 = vmov 2  }
0x1b4f   : > { %v9681_v57 = vmov 8   ;;  %v9682_v24 = vmov 5  }
0x1b50   : > { %4452 = vmatpush.bf16.msra.mxu1 %v4440_v53  ;;  %4326 = vrot.lane.b32.xlu2 %v4325_v14, %s6927_s22  ;;  %v9683_v53 = vmov 6  }
0x1b7d   : > { %v4007_v63 = vpop.f32.mrf.mxu0  ;;  %v4026_v45 = vpop.f32.mrf.mxu1 }
0x1b7e   : > { %v4033_v1 = vpack.c.bf16 %v4007_v63, %v4007_v63  ;;  %v4037_v11 = vpack.c.bf16 %v4026_v45, %v4026_v45 }
0x1b80   : > { %v4350_v35 = vunpack.c.l.b16 %v4033_v1  ;;  %v4466_v5 = vunpack.c.l.b16 %v4037_v11  ;;  %v9685_v1 = vmov 1  }
0x1b85   : > { %v4009_v16 = vpop.f32.mrf.mxu0  ;;  %v4028_v20 = vpop.f32.mrf.mxu1 }
0x1b86   : > { %v4034_v15 = vpack.c.bf16 %v4009_v16, %v4009_v16  ;;  %v4040_v17 = vpack.c.bf16 %v4009_v16, %v4007_v63  ;;  %v4038_v28 = vpack.c.bf16 %v4028_v20, %v4028_v20  ;;  %v9684_v63 = vmov 0  }
0x1b87   : > { %v9686_v16 = vmov 7  }
0x1b88   : > { %v4351_v42 = vunpack.c.l.b16 %v4034_v15  ;;  %6198 = vmatmul.msk.bf16.gmra.mxu2 %vm855_vm12, %v4040_v17  ;;  %v4467_v55 = vunpack.c.l.b16 %v4038_v28  ;;  %v9687_v15 = vmov 9   ;;  %v9688_v17 = vmov 3  }
0x1b8a   : > { %v4352_v41 = vpack.c.b16 %v4351_v42, %v4350_v35  ;;  %v4468_v8 = vpack.c.b16 %v4467_v55, %v4466_v5 }
0x1b8c   : > { %4353 = vrot.lane.b32.xlu0 %v4352_v41, %s6927_s22 }
0x1baa   : > { %v4327_v27 = vpop.permute.xlu2 %4326 }
0x1bab   : > { %v4332_v21 = vsel %vm855_vm12, %v4327_v27, 0 }
0x1bac   : > { %4341 = vmatpush.bf16.xpose.msrb.mxu3 %v4332_v21 }
0x1bb3   : > { %6199 = vmatmul.msk.bf16.vlgmr.msrb.gmra.mxu3 %vm855_vm12, %v4325_v14 }
0x1bb4   : > { %4480 = vmatpush.bf16.msra.mxu3 %v4468_v8 }
0x1bcf   : > { %v4067_v9 = vpop.f32.mrf.mxu2 }
0x1bd0   : > { %4079 = vperm.xlu1 %6609, %v4067_v9   ;;  %4106 = vperm.xlu2 %6610, %v4067_v9  }
0x1bd1   : > { %4154 = vperm.xlu0 %6612, %v4067_v9  }
0x1bd7   : > { %v4069_v14 = vpop.f32.mrf.mxu2 }
0x1bd8   : > { %6613 = vset.pattern.permute.xlu1 %v9679_v33  ;;  %6611 = vset.pattern.permute.xlu2 %v9680_v38 }
0x1bd9   : > { %6617 = vset.pattern.permute.xlu0 %v9681_v57  ;;  %4178 = vperm.xlu1 %6613, %v4067_v9  }
0x1bda   : > { %4130 = vperm.xlu2 %6611, %v4067_v9   ;;  %4274 = vperm.xlu0 %6617, %v4067_v9  }
0x1be1   : > { %6614 = vset.pattern.permute.xlu1 %v9682_v24 }
0x1be2   : > { %6615 = vset.pattern.permute.xlu2 %v9683_v53  ;;  %6619 = vset.pattern.permute.xlu0 %v9684_v63 }
0x1be3   : > { %4202 = vperm.xlu1 %6614, %v4067_v9   ;;  %4226 = vperm.xlu2 %6615, %v4067_v9  }
0x1be4   : > { %4084 = vperm.xlu0 %6619, %v4069_v14  }
0x1beb   : > { %6620 = vset.pattern.permute.xlu1 %v9685_v1  ;;  %6616 = vset.pattern.permute.xlu2 %v9686_v16 }
0x1bec   : > { %6624 = vset.pattern.permute.xlu0 %v9682_v24  ;;  %4110 = vperm.xlu1 %6620, %v4069_v14  }
0x1bed   : > { %4250 = vperm.xlu2 %6616, %v4067_v9   ;;  %4206 = vperm.xlu0 %6624, %v4069_v14  }
0x1bf4   : > { %6621 = vset.pattern.permute.xlu1 %v9680_v38 }
0x1bf5   : > { %6618 = vset.pattern.permute.xlu2 %v9687_v15  ;;  %4134 = vperm.xlu1 %6621, %v4069_v14  }
0x1bf6   : > { %4298 = vperm.xlu2 %6618, %v4067_v9   ;;  %6632 = vset.pattern.permute.xlu0 %v9688_v17 }
0x1bfd   : > { %6625 = vset.pattern.permute.xlu1 %v9683_v53 }
0x1bfe   : > { %6622 = vset.pattern.permute.xlu2 %v9688_v17  ;;  %4230 = vperm.xlu1 %6625, %v4069_v14   ;;  %v4354_v35 = vpop.permute.xlu0 %4353 }
0x1bff   : > { %4158 = vperm.xlu2 %6622, %v4069_v14   ;;  %v4359_v42 = vsel %vm855_vm12, %v4354_v35, 0 }
0x1c00   : > { %4368 = vmatpush.bf16.xpose.msra.mxu0 %v4359_v42 }
0x1c06   : > { %6626 = vset.pattern.permute.xlu1 %v9686_v16 }
0x1c07   : > { %6623 = vset.pattern.permute.xlu2 %v9679_v33  ;;  %4254 = vperm.xlu1 %6626, %v4069_v14  }
0x1c08   : > { %4182 = vperm.xlu2 %6623, %v4069_v14   ;;  %6200 = vmatmul.msk.bf16.vlgmr.msra.gmra.mxu0 %vm855_vm12, %v4352_v41 }
0x1c0b   : > { %v4072_v45 = vpop.f32.mrf.mxu2 }
0x1c0c   : > { %4162 = vperm.xlu0 %6632, %v4072_v45  }
0x1c0f   : > { %6628 = vset.pattern.permute.xlu1 %v9687_v15 }
0x1c10   : > { %6627 = vset.pattern.permute.xlu2 %v9681_v57  ;;  %4302 = vperm.xlu1 %6628, %v4069_v14  }
0x1c11   : > { %4278 = vperm.xlu2 %6627, %v4069_v14  }
0x1c13   : > { %v4074_v20 = vpop.f32.mrf.mxu2 }
0x1c14   : > { %6638 = vset.pattern.permute.xlu0 %v9685_v1 }
0x1c15   : > { %4118 = vperm.xlu0 %6638, %v4074_v20  }
0x1c18   : > { %6629 = vset.pattern.permute.xlu1 %v9684_v63 }
0x1c19   : > { %6631 = vset.pattern.permute.xlu2 %v9680_v38  ;;  %4089 = vperm.xlu1 %6629, %v4072_v45  }
0x1c1a   : > { %4138 = vperm.xlu2 %6631, %v4072_v45  }
0x1c1d   : > { %6642 = vset.pattern.permute.xlu0 %v9682_v24 }
0x1c1e   : > { %4214 = vperm.xlu0 %6642, %v4074_v20  }
0x1c21   : > { %6630 = vset.pattern.permute.xlu1 %v9685_v1 }
0x1c22   : > { %6635 = vset.pattern.permute.xlu2 %v9683_v53  ;;  %4114 = vperm.xlu1 %6630, %v4072_v45  }
0x1c23   : > { %4234 = vperm.xlu2 %6635, %v4072_v45  }
0x1c26   : > { %6643 = vset.pattern.permute.xlu0 %v9681_v57 }
0x1c27   : > { %4282 = vperm.xlu0 %6643, %v4072_v45  }
0x1c2a   : > { %6633 = vset.pattern.permute.xlu1 %v9679_v33  ;;  %v4107_v41 = vpop.permute.xlu2 %4106 }
0x1c2b   : > { %6636 = vset.pattern.permute.xlu2 %v9686_v16  ;;  %4186 = vperm.xlu1 %6633, %v4072_v45   ;;  %v4121_v9 = vmul.f32 %v8309_v54, %v4107_v41 }
0x1c2c   : > { %4258 = vperm.xlu2 %6636, %v4072_v45  }
0x1c2f   : > { %6649 = vset.pattern.permute.xlu0 %v9687_v15 }
0x1c33   : > { %6634 = vset.pattern.permute.xlu1 %v9682_v24 }
0x1c34   : > { %6637 = vset.pattern.permute.xlu2 %v9684_v63  ;;  %4210 = vperm.xlu1 %6634, %v4072_v45   ;;  %v4131_v28 = vpop.permute.xlu2 %4130 }
0x1c35   : > { %4094 = vperm.xlu2 %6637, %v4074_v20  }
0x1c3c   : > { %6639 = vset.pattern.permute.xlu1 %v9680_v38 }
0x1c3d   : > { %6640 = vset.pattern.permute.xlu2 %v9688_v17  ;;  %4142 = vperm.xlu1 %6639, %v4074_v20   ;;  %v4227_v11 = vpop.permute.xlu2 %4226 }
0x1c3e   : > { %4166 = vperm.xlu2 %6640, %v4074_v20  }
0x1c42   : > { %v4080_v55 = vpop.permute.xlu1 %4079 }
0x1c43   : > { %v4097_v8 = vmul.f32 %v8313_v58, %v4080_v55  ;;  %v4155_v21 = vpop.permute.xlu0 %4154 }
0x1c45   : > { %6644 = vset.pattern.permute.xlu1 %v9683_v53  ;;  %v4125_v38 = vadd.f32 %v4121_v9, %v4097_v8 }
0x1c46   : > { %6641 = vset.pattern.permute.xlu2 %v9679_v33  ;;  %4238 = vperm.xlu1 %6644, %v4074_v20   ;;  %v4145_v33 = vmul.f32 %v8316_v25, %v4131_v28  ;;  %v4241_v28 = vmul.f32 %v8343_v47, %v4227_v11 }
0x1c47   : > { %4190 = vperm.xlu2 %6641, %v4074_v20   ;;  %v4251_v5 = vpop.permute.xlu2 %4250 }
0x1c48   : > { %v4149_v63 = vadd.f32 %v4145_v33, %v4125_v38 }
0x1c4b   : > { %v4179_v27 = vpop.permute.xlu1 %4178 }
0x1c4c   : > { %v4193_v14 = vmul.f32 %v8332_v3, %v4179_v27  ;;  %v4275_v1 = vpop.permute.xlu0 %4274 }
0x1c4e   : > { %6645 = vset.pattern.permute.xlu1 %v9686_v16 }
0x1c4f   : > { %6647 = vset.pattern.permute.xlu2 %v9681_v57  ;;  %4262 = vperm.xlu1 %6645, %v4074_v20   ;;  %v4169_v57 = vmul.f32 %v8323_v36, %v4155_v21 }
0x1c50   : > { %4286 = vperm.xlu2 %6647, %v4074_v20   ;;  %v4299_v24 = vpop.permute.xlu2 %4298 }
0x1c51   : > { %v4173_v16 = vadd.f32 %v4169_v57, %v4149_v63  ;;  %v4313_v11 = vmul.f32 %v8356_v60, %v4299_v24 }
0x1c53   : > { %v4197_v42 = vadd.f32 %v4193_v14, %v4173_v16 }
0x1c55   : > { %v4203_v53 = vpop.permute.xlu1 %4202 }
0x1c56   : > { %v4217_v17 = vmul.f32 %v8336_v61, %v4203_v53  ;;  %v4085_v9 = vpop.permute.xlu0 %4084  ;;  %v4289_v53 = vmul.f32 %v8353_v29, %v4275_v1 }
0x1c57   : > { %6646 = vset.pattern.permute.xlu1 %v9687_v15  ;;  %v4098_v21 = vmul.f32 %v8360_v32, %v4085_v9 }
0x1c58   : > { %6648 = vset.pattern.permute.xlu2 %v9687_v15  ;;  %4306 = vperm.xlu1 %6646, %v4072_v45   ;;  %v4221_v55 = vadd.f32 %v4217_v17, %v4197_v42  ;;  %v4265_v15 = vmul.f32 %v8347_v18, %v4251_v5 }
0x1c59   : > { %4310 = vperm.xlu2 %6648, %v4074_v20   ;;  %v4159_v41 = vpop.permute.xlu2 %4158 }
0x1c5a   : > { %v4245_v8 = vadd.f32 %v4241_v28, %v4221_v55  ;;  %v4170_v16 = vmul.f32 %v8373_v49, %v4159_v41  ;;  %v4343_v28 = vpop.f32.mrf.mxu3 }
0x1c5c   : > { %v4269_v27 = vadd.f32 %v4265_v15, %v4245_v8 }
0x1c5e   : > { %v4111_v35 = vpop.permute.xlu1 %4110  ;;  %v4293_v57 = vadd.f32 %v4289_v53, %v4269_v27 }
0x1c5f   : > { %v4122_v45 = vmul.f32 %v8364_v26, %v4111_v35  ;;  %v4207_v8 = vpop.permute.xlu0 %4206 }
0x1c60   : > { %v4317_v42 = vadd.f32 %v4313_v11, %v4293_v57 }
0x1c61   : > { %v4126_v63 = vadd.f32 %v4122_v45, %v4098_v21 }
0x1c62   : > { %v4183_v38 = vpop.permute.xlu2 %4182  ;;  %v4344_v15 = vadd.f32 %v4343_v28, %v4317_v42 }
0x1c63   : > { %v4194_v35 = vmul.f32 %v8381_v46, %v4183_v38 }
0x1c64   : > { %v4375_v27 = vmul.f32 0.125, %v4344_v15 }
0x1c66   : > { %v9032_v53 = vadd.f32 %v4375_v27, %v8388_v62 }
0x1c67   : > { %v4135_v20 = vpop.permute.xlu1 %4134 }
0x1c68   : > { %v4146_v33 = vmul.f32 %v8370_v30, %v4135_v20  ;;  %v4218_v20 = vmul.f32 %v8385_v52, %v4207_v8  ;;  %v4383_v57 = vsel %vm3030_vm8, %v9032_v53, -inf }
0x1c6a   : > { %v4150_v14 = vadd.f32 %v4146_v33, %v4126_v63 }
0x1c6b   : > { %v4279_v55 = vpop.permute.xlu2 %4278 }
0x1c6c   : > { %v4174_v5 = vadd.f32 %v4170_v16, %v4150_v14  ;;  %v4290_v63 = vmul.f32 %v8405_v23, %v4279_v55 }
0x1c6e   : > { %v4198_v9 = vadd.f32 %v4194_v35, %v4174_v5  ;;  %v4345_v5 = vpop.f32.mrf.mxu3 }
0x1c70   : > { %v4231_v17 = vpop.permute.xlu1 %4230  ;;  %v4222_v1 = vadd.f32 %v4218_v20, %v4198_v9 }
0x1c71   : > { %v4242_v45 = vmul.f32 %v8391_v19, %v4231_v17 }
0x1c73   : > { %v4246_v41 = vadd.f32 %v4242_v45, %v4222_v1 }
0x1c74   : > { %v4139_v33 = vpop.permute.xlu2 %4138 }
0x1c75   : > { %v4147_v6 = vmul.f32 %v8427_v48, %v4139_v33 }
0x1c79   : > { %v4255_v21 = vpop.permute.xlu1 %4254 }
0x1c7a   : > { %v4266_v24 = vmul.f32 %v8395_v51, %v4255_v21 }
0x1c7c   : > { %v4270_v38 = vadd.f32 %v4266_v24, %v4246_v41 }
0x1c7d   : > { %v4235_v42 = vpop.permute.xlu2 %4234 }
0x1c7e   : > { %v4294_v11 = vadd.f32 %v4290_v63, %v4270_v38  ;;  %v4163_v21 = vpop.permute.xlu0 %4162 }
0x1c82   : > { %4384 = vmax.xlane.f32.xlu1 %v4383_v57  ;;  %v4303_v14 = vpop.permute.xlu1 %4302 }
0x1c83   : > { %v4314_v16 = vmul.f32 %v8410_v7, %v4303_v14 }
0x1c85   : > { %v4318_v17 = vadd.f32 %v4314_v16, %v4294_v11 }
0x1c86   : > { %v4259_v15 = vpop.permute.xlu2 %4258 }
0x1c87   : > { %v4346_v35 = vadd.f32 %v4345_v5, %v4318_v17  ;;  %v4119_v41 = vpop.permute.xlu0 %4118 }
0x1c88   : > { %v4124_v63 = vmul.f32 %v8464_v13, %v4119_v41 }
0x1c89   : > { %v4376_v28 = vmul.f32 0.125, %v4346_v35 }
0x1c8b   : > { %v4090_v8 = vpop.permute.xlu1 %4089  ;;  %v9039_v9 = vadd.f32 %v4376_v28, %v8388_v62 }
0x1c8c   : > { %v4099_v5 = vmul.f32 %v8424_v59, %v4090_v8 }
0x1c8d   : > { %v4386_v55 = vsel %vm3030_vm8, %v9039_v9, -inf }
0x1c8e   : > { %4387 = vmax.xlane.f32.xlu0 %v4386_v55 }
0x1c8f   : > { %v4095_v1 = vpop.permute.xlu2 %4094 }
0x1c90   : > { %v4100_v38 = vmul.f32 %v8461_v56, %v4095_v1  ;;  %v4215_v12 = vpop.permute.xlu0 %4214 }
0x1c92   : > { %v4128_v16 = vadd.f32 %v4124_v63, %v4100_v38 }
0x1c94   : > { %v4115_v20 = vpop.permute.xlu1 %4114 }
0x1c95   : > { %v4123_v57 = vmul.f32 %v8421_v37, %v4115_v20  ;;  %v4171_v20 = vmul.f32 %v8434_v39, %v4163_v21 }
0x1c97   : > { %v4127_v28 = vadd.f32 %v4123_v57, %v4099_v5  ;;  %v4220_v57 = vmul.f32 %v8493_v10, %v4215_v12 }
0x1c98   : > { %v4167_v27 = vpop.permute.xlu2 %4166 }
0x1c99   : > { %v4172_v55 = vmul.f32 %v8481_v43, %v4167_v27  ;;  %v4151_v44 = vadd.f32 %v4147_v6, %v4127_v28  ;;  %v4370_v6 = vpop.f32.mrf.mxu0  ;;  %v4283_v12 = vpop.permute.xlu0 %4282 }
0x1c9b   : > { %v4175_v22 = vadd.f32 %v4171_v20, %v4151_v44 }
0x1c9d   : > { %v4187_v45 = vpop.permute.xlu1 %4186 }
0x1c9e   : > { %v4195_v38 = vmul.f32 %v8438_v2, %v4187_v45 }
0x1ca0   : > { %v4199_v27 = vadd.f32 %v4195_v38, %v4175_v22  ;;  %v9692_v22 = vld [vmem:[#allocation8_spill] sm:$0xff] }
0x1ca1   : > { %v4191_v14 = vpop.permute.xlu2 %4190 }
0x1ca2   : > { %v4196_v1 = vmul.f32 %v8488_v4, %v4191_v14  ;;  %v4243_v14 = vmul.f32 %v8447_v31, %v4235_v42 }
0x1ca6   : > { %v4211_v24 = vpop.permute.xlu1 %4210 }
0x1ca7   : > { %v4219_v8 = vmul.f32 %v8444_v50, %v4211_v24  ;;  %v9691_v24 = vld [vmem:[#allocation2_spill] sm:$0xff] }
0x1ca8   : > { %v4267_v20 = vmul.f32 %v9691_v24, %v4259_v15 }
0x1caa   : > { %v4287_v63 = vpop.permute.xlu2 %4286 }
0x1caf   : > { %v4143_v11 = vpop.permute.xlu1 %4142 }
0x1cb0   : > { %v4148_v17 = vmul.f32 %v8478_v40, %v4143_v11 }
0x1cb2   : > { %v4152_v35 = vadd.f32 %v4148_v17, %v4128_v16  ;;  %v4223_v17 = vadd.f32 %v4219_v8, %v4199_v27  ;;  %v4372_v8 = vpop.f32.mrf.mxu0  ;;  %v9693_v27 = vld [vmem:[#allocation3_spill] sm:$0xff] }
0x1cb3   : > { %v4291_v42 = vmul.f32 %v9693_v27, %v4283_v12 }
0x1cb4   : > { %v4176_v0 = vadd.f32 %v4172_v55, %v4152_v35  ;;  %v9689_v35 = vld [vmem:[#allocation6_spill] sm:$0xff]  ;;  %v4247_v45 = vadd.f32 %v4243_v14, %v4223_v17  ;;  %v4311_v55 = vpop.permute.xlu2 %4310 }
0x1cb5   : > { %v4316_v38 = vmul.f32 %v9692_v22, %v4311_v55 }
0x1cb6   : > { %v4200_v11 = vadd.f32 %v4196_v1, %v4176_v0  ;;  %v9690_v0 = vld [vmem:[#allocation7_spill] sm:$0xff] }
0x1cb7   : > { %v4292_v44 = vmul.f32 %v9690_v0, %v4287_v63 }
0x1cb8   : > { %v4239_v41 = vpop.permute.xlu1 %4238  ;;  %v4224_v16 = vadd.f32 %v4220_v57, %v4200_v11 }
0x1cb9   : > { %v4244_v33 = vmul.f32 %v8499_v34, %v4239_v41  ;;  %v4271_v41 = vadd.f32 %v4267_v20, %v4247_v45 }
0x1cbb   : > { %v4248_v21 = vadd.f32 %v4244_v33, %v4224_v16  ;;  %v4295_v33 = vadd.f32 %v4291_v42, %v4271_v41 }
0x1cc1   : > { %v4263_v5 = vpop.permute.xlu1 %4262 }
0x1cc2   : > { %v4268_v28 = vmul.f32 %v9689_v35, %v4263_v5  ;;  %v9694_v5 = vld [vmem:[#allocation4_spill] sm:$0xff] }
0x1cc4   : > { %v4272_v1 = vadd.f32 %v4268_v28, %v4248_v21 }
0x1cc6   : > { %v4296_v11 = vadd.f32 %v4292_v44, %v4272_v1 }
0x1cc8   : > { %v4320_v57 = vadd.f32 %v4316_v38, %v4296_v11 }
0x1cca   : > { %v4307_v34 = vpop.permute.xlu1 %4306  ;;  %v4373_v16 = vadd.f32 %v4372_v8, %v4320_v57 }
0x1ccb   : > { %v4315_v17 = vmul.f32 %v9694_v5, %v4307_v34 }
0x1ccc   : > { %v4378_v14 = vmul.f32 0.125, %v4373_v16 }
0x1ccd   : > { %v4319_v35 = vadd.f32 %v4315_v17, %v4295_v33 }
0x1cce   : > { %v4382_v63 = vadd.f32 %v4378_v14, %v8388_v62 }
0x1ccf   : > { %v4371_v21 = vadd.f32 %v4370_v6, %v4319_v35 }
0x1cd0   : > { %v4392_v15 = vsel %vm3030_vm8, %v4382_v63, -inf }
0x1cd1   : > { %v4377_v28 = vmul.f32 0.125, %v4371_v21  ;;  %4393 = vmax.xlane.f32.xlu1 %v4392_v15 }
0x1cd3   : > { %v4381_v45 = vadd.f32 %v4377_v28, %v8388_v62 }
0x1cd5   : > { %v4389_v55 = vsel %vm3030_vm8, %v4381_v45, -inf }
0x1cd6   : > { %4390 = vmax.xlane.f32.xlu2 %v4389_v55 }
0x1cf5   : > { %v4385_v44 = vpop.xlane.xlu1 %4384 }
0x1cf6   : > { %v4395_v1 = vsub.f32 %v9032_v53, %v4385_v44 }
0x1cf8   : > { %v4399_v20 = vmul.f32 1.442695, %v4395_v1 }
0x1cfa   : > { %6854 = vpow2.f32 %v4399_v20 }
0x1d00   : > { %v6855_v34 = vpop.eup %6854 }
0x1d01   : > { %v4388_v12 = vpop.xlane.xlu0 %4387  ;;  %v4407_v38 = vsel %vm3030_vm8, %v6855_v34, 0.0 }
0x1d02   : > { %v4396_v6 = vsub.f32 %v9039_v9, %v4388_v12  ;;  %4408 = vadd.xlane.f32.xlu0 %v4407_v38 }
0x1d04   : > { %v4401_v35 = vmul.f32 1.442695, %v4396_v6 }
0x1d06   : > { %6856 = vpow2.f32 %v4401_v35 }
0x1d0c   : > { %v6857_v11 = vpop.eup %6856 }
0x1d0d   : > { %v4410_v62 = vsel %vm3030_vm8, %v6857_v11, 0.0 }
0x1d0e   : > { %4411 = vadd.xlane.f32.xlu2 %v4410_v62 }
0x1d44   : > { %v4394_v41 = vpop.xlane.xlu1 %4393 }
0x1d45   : > { %v4398_v57 = vsub.f32 %v4382_v63, %v4394_v41 }
0x1d47   : > { %v4405_v8 = vmul.f32 1.442695, %v4398_v57 }
0x1d49   : > { %6858 = vpow2.f32 %v4405_v8  ;;  %v4391_v53 = vpop.xlane.xlu2 %4390 }
0x1d4a   : > { %v4397_v42 = vsub.f32 %v4381_v45, %v4391_v53 }
0x1d4c   : > { %v4403_v16 = vmul.f32 1.442695, %v4397_v42 }
0x1d4e   : > { %6860 = vpow2.f32 %v4403_v16 }
0x1d4f   : > { %v9071_v33 = vpop.eup %6858 }
0x1d50   : > { %v4416_v9 = vsel %vm3030_vm8, %v9071_v33, 0.0 }
0x1d51   : > { %4417 = vadd.xlane.f32.xlu0 %v4416_v9 }
0x1d54   : > { %v9075_v17 = vpop.eup %6860 }
0x1d55   : > { %v4413_v14 = vsel %vm3030_vm8, %v9075_v17, 0.0 }
0x1d56   : > { %4414 = vadd.xlane.f32.xlu1 %v4413_v14 }
0x1d75   : > { %v4409_v21 = vpop.xlane.xlu0 %4408 }
0x1d76   : > { %6862 = vrcp.f32 %v4409_v21 }
0x1d7c   : > { %v6863_v63 = vpop.eup %6862 }
0x1d7d   : > { %v4423_v15 = vmul.f32 %v6863_v63, %v6855_v34 }
0x1d7f   : > { %v4519_v28 = vmul.f32 %v8316_v25, %v4423_v15  ;;  %v4487_v45 = vmul.f32 %v8313_v58, %v4423_v15  ;;  %v4503_v55 = vmul.f32 %v8309_v54, %v4423_v15  ;;  %v4567_v38 = vmul.f32 %v8336_v61, %v4423_v15 }
0x1d80   : > { %v4535_v34 = vmul.f32 %v8323_v36, %v4423_v15  ;;  %v4551_v25 = vmul.f32 %v8332_v3, %v4423_v15  ;;  %v4427_v62 = vpack.c.bf16 %v4423_v15, %v4423_v15  ;;  %v4615_v61 = vmul.f32 %v8353_v29, %v4423_v15 }
0x1d81   : > { %v4412_v44 = vpop.xlane.xlu2 %4411  ;;  %v4523_v1 = vsel %vm3030_vm8, %v4519_v28, 0.0  ;;  %v4491_v20 = vsel %vm3030_vm8, %v4487_v45, 0.0  ;;  %v4507_v12 = vsel %vm3030_vm8, %v4503_v55, 0.0  ;;  %v4571_v54 = vsel %vm3030_vm8, %v4567_v38, 0.0 }
0x1d82   : > { %6864 = vrcp.f32 %v4412_v44  ;;  %4524 = vadd.xlane.f32.xlu1 %v4523_v1  ;;  %4492 = vadd.xlane.f32.xlu2 %v4491_v20  ;;  %v4539_v35 = vsel %vm3030_vm8, %v4535_v34, 0.0  ;;  %v4555_v41 = vsel %vm3030_vm8, %v4551_v25, 0.0  ;;  %v4433_v8 = vunpack.c.l.b16 %v4427_v62 }
0x1d83   : > { %4508 = vadd.xlane.f32.xlu0 %v4507_v12  ;;  %v4583_v36 = vmul.f32 %v8343_v47, %v4423_v15  ;;  %v4599_v3 = vmul.f32 %v8347_v18, %v4423_v15  ;;  %v4619_v42 = vsel %vm3030_vm8, %v4615_v61, 0.0  ;;  %v4631_v29 = vmul.f32 %v8356_v60, %v4423_v15 }
0x1d85   : > { %v4587_v16 = vsel %vm3030_vm8, %v4583_v36, 0.0  ;;  %v4603_v9 = vsel %vm3030_vm8, %v4599_v3, 0.0  ;;  %v4635_v21 = vsel %vm3030_vm8, %v4631_v29, 0.0 }
0x1d88   : > { %v6865_v58 = vpop.eup %6864 }
0x1d89   : > { %v4424_v6 = vmul.f32 %v6865_v58, %v6857_v11 }
0x1d8a   : > { %4572 = vadd.xlane.f32.xlu1 %v4571_v54  ;;  %4540 = vadd.xlane.f32.xlu2 %v4539_v35 }
0x1d8b   : > { %4556 = vadd.xlane.f32.xlu0 %v4555_v41  ;;  %v4428_v57 = vpack.c.bf16 %v4424_v6, %v4424_v6  ;;  %v4488_v14 = vmul.f32 %v8360_v32, %v4424_v6  ;;  %v4520_v47 = vmul.f32 %v8370_v30, %v4424_v6  ;;  %v4536_v28 = vmul.f32 %v8373_v49, %v4424_v6 }
0x1d8c   : > { %v4504_v45 = vmul.f32 %v8364_v26, %v4424_v6  ;;  %v4568_v55 = vmul.f32 %v8385_v52, %v4424_v6  ;;  %v4584_v15 = vmul.f32 %v8391_v19, %v4424_v6  ;;  %v4552_v44 = vmul.f32 %v8381_v46, %v4424_v6 }
0x1d8d   : > { %v4434_v53 = vunpack.c.l.b16 %v4428_v57  ;;  %v4494_v18 = vsel %vm3030_vm8, %v4488_v14, 0.0  ;;  %v4526_v63 = vsel %vm3030_vm8, %v4520_v47, 0.0  ;;  %v4542_v32 = vsel %vm3030_vm8, %v4536_v28, 0.0 }
0x1d8e   : > { %v4510_v60 = vsel %vm3030_vm8, %v4504_v45, 0.0  ;;  %v4574_v30 = vsel %vm3030_vm8, %v4568_v55, 0.0  ;;  %v4616_v1 = vmul.f32 %v8405_v23, %v4424_v6  ;;  %v4590_v49 = vsel %vm3030_vm8, %v4584_v15, 0.0 }
0x1d8f   : > { %v4435_v11 = vpack.c.b16 %v4434_v53, %v4433_v8  ;;  %v4558_v26 = vsel %vm3030_vm8, %v4552_v44, 0.0  ;;  %v4632_v20 = vmul.f32 %v8410_v7, %v4424_v6  ;;  %v4600_v12 = vmul.f32 %v8395_v51, %v4424_v6 }
0x1d90   : > { %v4622_v52 = vsel %vm3030_vm8, %v4616_v1, 0.0 }
0x1d91   : > { %6201 = vmatmul.msk.bf16.vlgmr.msra.gmra.mxu1 %vm3030_vm8, %v4435_v11  ;;  %v4638_v38 = vsel %vm3030_vm8, %v4632_v20, 0.0  ;;  %v4606_v19 = vsel %vm3030_vm8, %v4600_v12, 0.0 }
0x1d92   : > { %4620 = vadd.xlane.f32.xlu1 %v4619_v42  ;;  %4588 = vadd.xlane.f32.xlu2 %v4587_v16 }
0x1d93   : > { %4604 = vadd.xlane.f32.xlu0 %v4603_v9 }
0x1d9a   : > { %4495 = vadd.xlane.f32.xlu1 %v4494_v18  ;;  %4636 = vadd.xlane.f32.xlu2 %v4635_v21 }
0x1d9b   : > { %4527 = vadd.xlane.f32.xlu0 %v4526_v63 }
0x1da2   : > { %4543 = vadd.xlane.f32.xlu1 %v4542_v32  ;;  %4511 = vadd.xlane.f32.xlu2 %v4510_v60 }
0x1da3   : > { %4575 = vadd.xlane.f32.xlu0 %v4574_v30 }
0x1daa   : > { %4591 = vadd.xlane.f32.xlu1 %v4590_v49  ;;  %4559 = vadd.xlane.f32.xlu2 %v4558_v26 }
0x1dab   : > { %4623 = vadd.xlane.f32.xlu0 %v4622_v52 }
0x1db2   : > { %4639 = vadd.xlane.f32.xlu1 %v4638_v38  ;;  %4607 = vadd.xlane.f32.xlu2 %v4606_v19 }
0x1dc4   : > { %v4418_v46 = vpop.xlane.xlu0 %4417 }
0x1dc5   : > { %6866 = vrcp.f32 %v4418_v46  ;;  %v6207_v46 = vld [vmem:[%s9591_s14 + $0x8] sm:$0xf] }
0x1dc9   : > { %v4415_v23 = vpop.xlane.xlu1 %4414 }
0x1dca   : > { %6868 = vrcp.f32 %v4415_v23 }
0x1dcb   : > { %v6867_v34 = vpop.eup %6866 }
0x1dcc   : > { %v9121_v25 = vmul.f32 %v6867_v34, %v9071_v33 }
0x1dce   : > { %v4430_v7 = vpack.c.bf16 %v9121_v25, %v9121_v25  ;;  %v4490_v9 = vmul.f32 %v8461_v56, %v9121_v25  ;;  %v4538_v47 = vmul.f32 %v8481_v43, %v9121_v25  ;;  %v4570_v56 = vmul.f32 %v8493_v10, %v9121_v25  ;;  %v9695_v43 = vld [vmem:[#allocation5_spill] sm:$0xff] }
0x1dcf   : > { %v4586_v55 = vmul.f32 %v9695_v43, %v9121_v25  ;;  %v4618_v10 = vmul.f32 %v9690_v0, %v9121_v25  ;;  %v4634_v26 = vmul.f32 %v9692_v22, %v9121_v25  ;;  %v6509_v22 = vld [vmem:[%s9591_s14 + $0x8] sm:$0x10] }
0x1dd0   : > { %v6869_v58 = vpop.eup %6868  ;;  %v4462_v62 = vunpack.c.l.b16 %v4430_v7  ;;  %v4548_v21 = vsel %vm3030_vm8, %v4538_v47, 0.0  ;;  %v4580_v63 = vsel %vm3030_vm8, %v4570_v56, 0.0  ;;  %v6208_v23 = vor.u32 %v6509_v22, %v6207_v46 }
0x1dd1   : > { %v9126_v51 = vmul.f32 %v6869_v58, %v9075_v17  ;;  %v4596_v15 = vsel %vm3030_vm8, %v4586_v55, 0.0  ;;  %v4628_v44 = vsel %vm3030_vm8, %v4618_v10, 0.0  ;;  %v4644_v12 = vsel %vm3030_vm8, %v4634_v26, 0.0 }
0x1dd3   : > { %v4521_v6 = vmul.f32 %v8427_v48, %v9126_v51  ;;  %v4505_v54 = vmul.f32 %v8421_v37, %v9126_v51  ;;  %v4489_v35 = vmul.f32 %v8424_v59, %v9126_v51  ;;  %v4429_v33 = vpack.c.bf16 %v9126_v51, %v9126_v51 }
0x1dd4   : > { %v4569_v37 = vmul.f32 %v8444_v50, %v9126_v51  ;;  %v4553_v59 = vmul.f32 %v8438_v2, %v9126_v51  ;;  %v4537_v53 = vmul.f32 %v8434_v39, %v9126_v51  ;;  %v4617_v11 = vmul.f32 %v9693_v27, %v9126_v51 }
0x1dd5   : > { %v4529_v41 = vsel %vm3030_vm8, %v4521_v6, 0.0  ;;  %v4513_v57 = vsel %vm3030_vm8, %v4505_v54, 0.0  ;;  %v4497_v17 = vsel %vm3030_vm8, %v4489_v35, 0.0  ;;  %v4461_v8 = vunpack.c.l.b16 %v4429_v33 }
0x1dd6   : > { %4530 = vadd.xlane.f32.xlu2 %v4529_v41  ;;  %4514 = vadd.xlane.f32.xlu1 %v4513_v57  ;;  %v4577_v61 = vsel %vm3030_vm8, %v4569_v37, 0.0  ;;  %v4561_v36 = vsel %vm3030_vm8, %v4553_v59, 0.0  ;;  %v4545_v3 = vsel %vm3030_vm8, %v4537_v53, 0.0  ;;  %v4601_v50 = vmul.f32 %v9691_v24, %v9126_v51 }
0x1dd7   : > { %4498 = vadd.xlane.f32.xlu0 %v4497_v17  ;;  %v4463_v48 = vpack.c.b16 %v4462_v62, %v4461_v8  ;;  %v4585_v2 = vmul.f32 %v8447_v31, %v9126_v51  ;;  %v4625_v39 = vsel %vm3030_vm8, %v4617_v11, 0.0  ;;  %v4522_v27 = vmul.f32 %v8478_v40, %v9121_v25 }
0x1dd8   : > { %v4609_v42 = vsel %vm3030_vm8, %v4601_v50, 0.0  ;;  %v4506_v24 = vmul.f32 %v8464_v13, %v9121_v25  ;;  %v4500_v31 = vsel %vm3030_vm8, %v4490_v9, 0.0  ;;  %v4554_v40 = vmul.f32 %v8488_v4, %v9121_v25  ;;  %v9696_v4 = vld [vmem:[#allocation6_spill] sm:$0xff] }
0x1dd9   : > { %6202 = vmatmul.msk.bf16.vlgmr.msra.gmra.mxu3 %vm3030_vm8, %v4463_v48  ;;  %v4593_v16 = vsel %vm3030_vm8, %v4585_v2, 0.0  ;;  %v4532_v14 = vsel %vm3030_vm8, %v4522_v27, 0.0  ;;  %v4602_v32 = vmul.f32 %v9696_v4, %v9121_v25  ;;  %v4633_v0 = vmul.f32 %v9694_v5, %v9126_v51 }
0x1dda   : > { %v4516_v29 = vsel %vm3030_vm8, %v4506_v24, 0.0  ;;  %v4564_v45 = vsel %vm3030_vm8, %v4554_v40, 0.0  ;;  %v4700_v5 = vsel %vm1677_vm1, %v6208_v23, 0  ;;  %vm9697_vm1 = vcmask 64512  }
0x1ddb   : > { %v4612_v49 = vsel %vm3030_vm8, %v4602_v32, 0.0  ;;  %v4641_v38 = vsel %vm3030_vm8, %v4633_v0, 0.0  ;;  %4709 = vmatpush.bf16.msrb.mxu0 %v4700_v5  ;;  %vm9698_vm8 = vmmov %vm9697_vm1 }
0x1ddc   : > { %vm9704_vm3 = vmmov %vm9697_vm1 }
0x1dde   : > { %4578 = vadd.xlane.f32.xlu2 %v4577_v61  ;;  %4562 = vadd.xlane.f32.xlu1 %v4561_v36 }
0x1ddf   : > { %4546 = vadd.xlane.f32.xlu0 %v4545_v3 }
0x1de6   : > { %4626 = vadd.xlane.f32.xlu2 %v4625_v39  ;;  %4610 = vadd.xlane.f32.xlu1 %v4609_v42 }
0x1de7   : > { %4594 = vadd.xlane.f32.xlu0 %v4593_v16 }
0x1dee   : > { %4501 = vadd.xlane.f32.xlu2 %v4500_v31  ;;  %4533 = vadd.xlane.f32.xlu1 %v4532_v14 }
0x1def   : > { %4517 = vadd.xlane.f32.xlu0 %v4516_v29 }
0x1df5   : > { %v4493_v18 = vpop.xlane.xlu2 %4492  ;;  %v4525_v13 = vpop.xlane.xlu1 %4524 }
0x1df6   : > { %v4509_v28 = vpop.xlane.xlu0 %4508  ;;  %4549 = vadd.xlane.f32.xlu2 %v4548_v21  ;;  %4581 = vadd.xlane.f32.xlu1 %v4580_v63  ;;  %v6513_v63 = vld [vmem:[%s9583_s6 + $0x38] sm:$0xff] }
0x1df7   : > { %4565 = vadd.xlane.f32.xlu0 %v4564_v45  ;;  %v4647_v6 = vsel %vm3295_vm10, %v4493_v18, %v4509_v28  ;;  %4770 = vmatpush.bf16.msrb.mxu1 %v6513_v63 }
0x1df8   : > { %v4651_v35 = vsel %vm3300_vm6, %v4647_v6, %v4525_v13 }
0x1dfd   : > { %v4541_v60 = vpop.xlane.xlu2 %4540  ;;  %v4573_v30 = vpop.xlane.xlu1 %4572 }
0x1dfe   : > { %v4557_v1 = vpop.xlane.xlu0 %4556  ;;  %4597 = vadd.xlane.f32.xlu2 %v4596_v15  ;;  %4629 = vadd.xlane.f32.xlu1 %v4628_v44  ;;  %v4655_v33 = vsel %vm3305_vm7, %v4651_v35, %v4541_v60  ;;  %v6511_v35 = vld [vmem:[%s9583_s6 + $0x28] sm:$0xff] }
0x1dff   : > { %4613 = vadd.xlane.f32.xlu0 %v4612_v49  ;;  %v4659_v57 = vsel %vm3310_vm5, %v4655_v33, %v4557_v1  ;;  %v6510_v33 = vld [vmem:[%s9583_s6 + $0x20] sm:$0xff] }
0x1e00   : > { %v4663_v59 = vsel %vm3315_vm2, %v4659_v57, %v4573_v30 }
0x1e05   : > { %v4589_v52 = vpop.xlane.xlu2 %4588  ;;  %v4621_v20 = vpop.xlane.xlu1 %4620 }
0x1e06   : > { %4645 = vadd.xlane.f32.xlu2 %v4644_v12  ;;  %v4605_v19 = vpop.xlane.xlu0 %4604  ;;  %v4667_v53 = vsel %vm3320_vm9, %v4663_v59, %v4589_v52 }
0x1e07   : > { %4642 = vadd.xlane.f32.xlu0 %v4641_v38  ;;  %v4671_v36 = vsel %vm3325_vm11, %v4667_v53, %v4605_v19 }
0x1e08   : > { %v4675_v39 = vsel %vm9697_vm1, %v4671_v36, %v4621_v20 }
0x1e0d   : > { %v4637_v34 = vpop.xlane.xlu2 %4636  ;;  %v4496_v25 = vpop.xlane.xlu1 %4495 }
0x1e0e   : > { %v4528_v58 = vpop.xlane.xlu0 %4527  ;;  %v4679_v9 = vsel %vm9699_vm14, %v4675_v39, %v4637_v34  ;;  %v9707_v39 = vld [vmem:[#allocation10_spill] sm:$0xff] }
0x1e15   : > { %v4512_v7 = vpop.xlane.xlu2 %4511  ;;  %v4544_v51 = vpop.xlane.xlu1 %4543 }
0x1e16   : > { %v4648_v54 = vsel %vm3295_vm10, %v4496_v25, %v4512_v7  ;;  %v4576_v41 = vpop.xlane.xlu0 %4575 }
0x1e17   : > { %v4652_v62 = vsel %vm3300_vm6, %v4648_v54, %v4528_v58  ;;  %v6512_v54 = vld [vmem:[%s9583_s6 + $0x30] sm:$0xff] }
0x1e18   : > { %v4656_v48 = vsel %vm3305_vm7, %v4652_v62, %v4544_v51  ;;  %4771 = vmatpush.bf16.msrb.mxu1 %v6512_v54  ;;  %v4454_v62 = vpop.f32.mrf.mxu1  ;;  %v6518_v54 = vld [vmem:[%s9585_s8 + $0x64] sm:$0xf] }
0x1e1c   : > { %4772 = vmatpush.bf16.msrb.mxu1 %v6511_v35 }
0x1e1d   : > { %v4560_v17 = vpop.xlane.xlu2 %4559  ;;  %v4592_v8 = vpop.xlane.xlu1 %4591 }
0x1e1e   : > { %v4660_v37 = vsel %vm3310_vm5, %v4656_v48, %v4560_v17  ;;  %v4624_v50 = vpop.xlane.xlu0 %4623 }
0x1e1f   : > { %v4664_v61 = vsel %vm3315_vm2, %v4660_v37, %v4576_v41 }
0x1e20   : > { %v4668_v3 = vsel %vm3320_vm9, %v4664_v61, %v4592_v8  ;;  %4773 = vmatpush.bf16.msrb.mxu1 %v6510_v33  ;;  %v4456_v57 = vpop.f32.mrf.mxu1  ;;  %v6267_v33 = vld [vmem:[%s9585_s8 + $0x68] sm:$0xf0] }
0x1e25   : > { %v4608_v11 = vpop.xlane.xlu2 %4607  ;;  %v4640_v16 = vpop.xlane.xlu1 %4639 }
0x1e26   : > { %v4672_v2 = vsel %vm3325_vm11, %v4668_v3, %v4608_v11 }
0x1e27   : > { %v4676_v42 = vsel %vm9698_vm8, %v4672_v2, %v4624_v50 }
0x1e28   : > { %v4680_v27 = vsel %vm9700_vm0, %v4676_v42, %v4640_v16 }
0x1e29   : > { %v4683_v24 = vpack.c.bf16 %v4680_v27, %v4679_v9  ;;  %v9708_v27 = vld [vmem:[#allocation11_spill] sm:$0xff] }
0x1e2b   : > { %6209 = vmatmul.msk.bf16.vlgmr.msrb.gmra.mxu0 %vm9701_vm13, %v4683_v24 }
0x1e49   : > { %v4531_v31 = vpop.xlane.xlu2 %4530  ;;  %v4515_v14 = vpop.xlane.xlu1 %4514 }
0x1e4a   : > { %v4499_v29 = vpop.xlane.xlu0 %4498 }
0x1e4b   : > { %v4649_v10 = vsel %vm3295_vm10, %v4499_v29, %v4515_v14  ;;  %v9709_v29 = vld [vmem:[#allocation12_spill] sm:$0xff] }
0x1e4c   : > { %v4653_v30 = vsel %vm3300_vm6, %v4649_v10, %v4531_v31 }
0x1e51   : > { %v4579_v47 = vpop.xlane.xlu2 %4578  ;;  %v4563_v56 = vpop.xlane.xlu1 %4562 }
0x1e52   : > { %v4547_v40 = vpop.xlane.xlu0 %4546 }
0x1e53   : > { %v4657_v44 = vsel %vm3305_vm7, %v4653_v30, %v4547_v40 }
0x1e54   : > { %v4661_v26 = vsel %vm3310_vm5, %v4657_v44, %v4563_v56 }
0x1e55   : > { %v4665_v12 = vsel %vm3315_vm2, %v4661_v26, %v4579_v47 }
0x1e59   : > { %v4627_v18 = vpop.xlane.xlu2 %4626  ;;  %v4611_v21 = vpop.xlane.xlu1 %4610 }
0x1e5a   : > { %v4595_v13 = vpop.xlane.xlu0 %4594 }
0x1e5b   : > { %v4669_v19 = vsel %vm3320_vm9, %v4665_v12, %v4595_v13 }
0x1e5c   : > { %v4673_v22 = vsel %vm3325_vm11, %v4669_v19, %v4611_v21  ;;  %v4482_v59 = vpop.f32.mrf.mxu3 }
0x1e5d   : > { %v4677_v7 = vsel %vm9704_vm3, %v4673_v22, %v4627_v18  ;;  %v9710_v18 = vld [vmem:[#allocation13_spill] sm:$0xff] }
0x1e5e   : > { %v6521_v22 = vld [vmem:[%s9585_s8 + $0x74] sm:$0xf0] }
0x1e61   : > { %v4502_v28 = vpop.xlane.xlu2 %4501  ;;  %v4534_v43 = vpop.xlane.xlu1 %4533 }
0x1e62   : > { %v4518_v45 = vpop.xlane.xlu0 %4517 }
0x1e63   : > { %v4650_v55 = vsel %vm3295_vm10, %v4502_v28, %v4518_v45  ;;  %vm9702_vm10 = vmmov %vm9697_vm1  ;;  %v9711_v28 = vld [vmem:[#allocation9_spill] sm:$0xff] }
0x1e64   : > { %v4654_v60 = vsel %vm3300_vm6, %v4650_v55, %v4534_v43  ;;  %v4484_v61 = vpop.f32.mrf.mxu3 }
0x1e69   : > { %v4550_v4 = vpop.xlane.xlu2 %4549  ;;  %v4582_v1 = vpop.xlane.xlu1 %4581 }
0x1e6a   : > { %v4566_v32 = vpop.xlane.xlu0 %4565  ;;  %v4658_v15 = vsel %vm3305_vm7, %v4654_v60, %v4550_v4  ;;  %vm9703_vm7 = vmmov %vm9700_vm0 }
0x1e6b   : > { %v4662_v49 = vsel %vm3310_vm5, %v4658_v15, %v4566_v32 }
0x1e6c   : > { %v4666_v52 = vsel %vm3315_vm2, %v4662_v49, %v4582_v1  ;;  %vm9706_vm2 = vmmov %vm9701_vm13 }
0x1e71   : > { %v4598_v0 = vpop.xlane.xlu2 %4597  ;;  %v4630_v23 = vpop.xlane.xlu1 %4629 }
0x1e72   : > { %v4614_v20 = vpop.xlane.xlu0 %4613  ;;  %v4670_v38 = vsel %vm3320_vm9, %v4666_v52, %v4598_v0 }
0x1e73   : > { %v4674_v46 = vsel %vm3325_vm11, %v4670_v38, %v4614_v20 }
0x1e74   : > { %v4678_v5 = vsel %vm9702_vm10, %v4674_v46, %v4630_v23  ;;  %v6273_v46 = vld [vmem:[%s9585_s8 + $0x70] sm:$0xf]  ;;  %v6520_v23 = vld [vmem:[%s9585_s8 + $0x74] sm:$0xf] }
0x1e79   : > { %v4646_v34 = vpop.xlane.xlu2 %4645 }
0x1e7a   : > { %v4682_v25 = vsel %vm9703_vm7, %v4678_v5, %v4646_v34  ;;  %v4643_v58 = vpop.xlane.xlu0 %4642  ;;  %v6274_v5 = vor.u32 %v6521_v22, %v6273_v46  ;;  %v6275_v34 = vld [vmem:[%s9585_s8 + $0x78] sm:$0xf0]  ;;  %v6528_v46 = vld [vmem:[%s9587_s10 + $0xb0] sm:$0xff] }
0x1e7b   : > { %v4681_v51 = vsel %vm9705_vm4, %v4677_v7, %v4643_v58  ;;  %v6536_v22 = vld [vmem:[%s9587_s10 + $0xf0] sm:$0xff] }
0x1e7c   : > { %v4684_v6 = vpack.c.bf16 %v4682_v25, %v4681_v51  ;;  %v6278_v25 = vor.u32 %v6520_v23, %v6275_v34  ;;  %4957 = vmatpush.bf16.msrb.mxu2 %v6274_v5  ;;  %v6265_v51 = vld [vmem:[%s9585_s8 + $0x60] sm:$0xf] }
0x1e7e   : > { %6210 = vmatmul.msk.bf16.gmra.mxu0 %vm9706_vm2, %v4684_v6  ;;  %4976 = vmatpush.bf16.msrb.mxu3 %v6278_v25  ;;  %v6519_v6 = vld [vmem:[%s9585_s8 + $0x64] sm:$0xf0] }
0x1e7f   : > { %v6266_v35 = vor.u32 %v6519_v6, %v6265_v51  ;;  %v6527_v25 = vld [vmem:[%s9587_s10 + $0xa8] sm:$0xff]  ;;  %v6526_v6 = vld [vmem:[%s9587_s10 + $0xa0] sm:$0xff] }
0x1e81   : > { %4958 = vmatpush.bf16.msrb.mxu2 %v6266_v35 }
0x1ea8   : > { %v4711_v41 = vpop.f32.mrf.mxu0 }
0x1ea9   : > { %v4721_v8 = vadd.f32 %v4711_v41, %v4454_v62  ;;  %v6270_v41 = vor.u32 %v6518_v54, %v6267_v33  ;;  %v6534_v54 = vld [vmem:[%s9587_s10 + $0xe0] sm:$0xff] }
0x1eab   : > { %4977 = vmatpush.bf16.msrb.mxu3 %v6270_v41 }
0x1eb0   : > { %v4713_v17 = vpop.f32.mrf.mxu0 }
0x1eb1   : > { %v4722_v48 = vadd.f32 %v4713_v17, %v4456_v57  ;;  %v6257_v57 = vld [vmem:[%s9585_s8 + $0x50] sm:$0xf]  ;;  %v6517_v17 = vld [vmem:[%s9585_s8 + $0x54] sm:$0xf0] }
0x1eb3   : > { %v4725_v37 = vpack.c.bf16 %v4722_v48, %v4721_v8  ;;  %v6516_v8 = vld [vmem:[%s9585_s8 + $0x54] sm:$0xf]  ;;  %v6258_v48 = vor.u32 %v6517_v17, %v6257_v57 }
0x1eb5   : > { %6235 = vmatmul.msk.bf16.vlgmr.msrb.gmra.mxu1 %vm855_vm12, %v4725_v37  ;;  %v6259_v37 = vld [vmem:[%s9585_s8 + $0x58] sm:$0xf0]  ;;  %4959 = vmatpush.bf16.msrb.mxu2 %v6258_v48 }
0x1efb   : > { %v4716_v53 = vpop.f32.mrf.mxu0 }
0x1efc   : > { %v4723_v3 = vadd.f32 %v4716_v53, %v4482_v59  ;;  %v6249_v59 = vld [vmem:[%s9585_s8 + $0x40] sm:$0xf]  ;;  %v6515_v53 = vld [vmem:[%s9585_s8 + $0x44] sm:$0xf0] }
0x1f03   : > { %v4718_v36 = vpop.f32.mrf.mxu0 }
0x1f04   : > { %v4724_v11 = vadd.f32 %v4718_v36, %v4484_v61  ;;  %v6262_v61 = vor.u32 %v6516_v8, %v6259_v37  ;;  %v6514_v36 = vld [vmem:[%s9585_s8 + $0x44] sm:$0xf] }
0x1f06   : > { %v4726_v50 = vpack.c.bf16 %v4724_v11, %v4723_v3  ;;  %v6251_v3 = vld [vmem:[%s9585_s8 + $0x48] sm:$0xf0]  ;;  %4978 = vmatpush.bf16.msrb.mxu3 %v6262_v61 }
0x1f08   : > { %6236 = vmatmul.msk.bf16.gmra.mxu1 %vm855_vm12, %v4726_v50  ;;  %v6250_v50 = vor.u32 %v6515_v53, %v6249_v59 }
0x1f0a   : > { %4960 = vmatpush.bf16.msrb.mxu2 %v6250_v50 }
0x1f32   : > { %v4775_v2 = vpop.f32.mrf.mxu1 }
0x1f33   : > { %v4787_v42 = vadd.f32 %v4775_v2, %v9707_v39  ;;  %v6254_v39 = vor.u32 %v6514_v36, %v6251_v3 }
0x1f35   : > { %v4791_v16 = vsel %vm855_vm12, %v4787_v42, 0.0  ;;  %4979 = vmatpush.bf16.msrb.mxu3 %v6254_v39  ;;  %v6524_v39 = vld [vmem:[%s9587_s10 + $0x90] sm:$0xff] }
0x1f36   : > { %4792 = vadd.xlane.f32.xlu1 %v4791_v16 }
0x1f3a   : > { %v4777_v9 = vpop.f32.mrf.mxu1 }
0x1f3b   : > { %v4788_v24 = vadd.f32 %v4777_v9, %v9708_v27 }
0x1f3d   : > { %v4794_v31 = vsel %vm855_vm12, %v4788_v24, 0.0 }
0x1f3e   : > { %4795 = vadd.xlane.f32.xlu0 %v4794_v31 }
0x1f85   : > { %v4780_v14 = vpop.f32.mrf.mxu1 }
0x1f86   : > { %v4789_v47 = vadd.f32 %v4780_v14, %v9709_v29 }
0x1f88   : > { %v4797_v56 = vsel %vm855_vm12, %v4789_v47, 0.0 }
0x1f89   : > { %4798 = vadd.xlane.f32.xlu2 %v4797_v56 }
0x1f8d   : > { %v4782_v40 = vpop.f32.mrf.mxu1 }
0x1f8e   : > { %v4790_v13 = vadd.f32 %v4782_v40, %v9710_v18  ;;  %v6237_v40 = vld [vmem:[%s9584_s7 + $0x2] sm:$0x3] }
0x1f90   : > { %v4800_v21 = vsel %vm855_vm12, %v4790_v13, 0.0 }
0x1f91   : > { %4801 = vadd.xlane.f32.xlu1 %v4800_v21 }
0x1fa9   : > { %v4793_v63 = vpop.xlane.xlu1 %4792 }
0x1faa   : > { %v4803_v45 = vmul.f32 %v4793_v63, %v9711_v28  ;;  %v4879_v63 = vperm.slane %v6237_v40, 0 }
0x1fac   : > { %v9259_v43 = vsub.f32 %v4787_v42, %v4803_v45 }
0x1fae   : > { %v4811_v55 = vmul.f32 %v9259_v43, %v9259_v43 }
0x1fb0   : > { %v4815_v10 = vsel %vm855_vm12, %v4811_v55, 0.0 }
0x1fb1   : > { %v4796_v4 = vpop.xlane.xlu0 %4795  ;;  %4816 = vadd.xlane.f32.xlu0 %v4815_v10 }
0x1fb2   : > { %v4804_v32 = vmul.f32 %v4796_v4, %v9711_v28  ;;  %v4884_v4 = vperm.slane %v6237_v40, 1 }
0x1fb4   : > { %v9265_v60 = vsub.f32 %v4788_v24, %v4804_v32 }
0x1fb6   : > { %v4812_v30 = vmul.f32 %v9265_v60, %v9265_v60 }
0x1fb8   : > { %v4818_v15 = vsel %vm855_vm12, %v4812_v30, 0.0 }
0x1fb9   : > { %4819 = vadd.xlane.f32.xlu2 %v4818_v15 }
0x1ffc   : > { %v4799_v44 = vpop.xlane.xlu2 %4798 }
0x1ffd   : > { %v4805_v1 = vmul.f32 %v4799_v44, %v9711_v28 }
0x1fff   : > { %v9271_v49 = vsub.f32 %v4789_v47, %v4805_v1 }
0x2001   : > { %v4813_v26 = vmul.f32 %v9271_v49, %v9271_v49 }
0x2003   : > { %v4821_v0 = vsel %vm855_vm12, %v4813_v26, 0.0 }
0x2004   : > { %4822 = vadd.xlane.f32.xlu1 %v4821_v0  ;;  %v4802_v52 = vpop.xlane.xlu1 %4801 }
0x2005   : > { %v4806_v20 = vmul.f32 %v4802_v52, %v9711_v28 }
0x2007   : > { %v9277_v12 = vsub.f32 %v4790_v13, %v4806_v20  ;;  %v6537_v20 = vld [vmem:[%s9587_s10 + $0xf8] sm:$0xff] }
0x2008   : > { %5156 = vmatpush.bf16.msra.mxu1 %v6537_v20 }
0x2009   : > { %v4814_v38 = vmul.f32 %v9277_v12, %v9277_v12 }
0x200b   : > { %v4824_v19 = vsel %vm855_vm12, %v4814_v38, 0.0 }
0x200c   : > { %4825 = vadd.xlane.f32.xlu0 %v4824_v19  ;;  %5157 = vmatpush.bf16.msra.mxu1 %v6536_v22 }
0x2024   : > { %v4817_v58 = vpop.xlane.xlu0 %4816 }
0x2025   : > { %v4827_v7 = vmul.f32 %v4817_v58, %v9711_v28  ;;  %v6535_v58 = vld [vmem:[%s9587_s10 + $0xe8] sm:$0xff] }
0x2026   : > { %5158 = vmatpush.bf16.msra.mxu1 %v6535_v58  ;;  %v6651_v58 = vld [vmem:[%s9588_s11 + $0x1] ss:$0 sm:$0xff] }
0x2027   : > { %v4831_v62 = vadd.f32 1e-05, %v4827_v7 }
0x2029   : > { %6870 = vrsqrt.f32 %v4831_v62  ;;  %vm4841_vm11 = vweird.f32 %v4831_v62 }
0x202a   : > { %5159 = vmatpush.bf16.msra.mxu1 %v6534_v54 }
0x202c   : > { %v4820_v11 = vpop.xlane.xlu2 %4819 }
0x202d   : > { %v4828_v2 = vmul.f32 %v4820_v11, %v9711_v28 }
0x202f   : > { %v6871_v42 = vpop.eup %6870  ;;  %v4832_v16 = vadd.f32 1e-05, %v4828_v2 }
0x2030   : > { %v4836_v9 = vmul.f32 %v6871_v42, %v4831_v62  ;;  %vm4842_vm9 = vweird.f32 %v6871_v42 }
0x2031   : > { %6872 = vrsqrt.f32 %v4832_v16  ;;  %vm4843_vm15 = vmor %vm4841_vm11, %vm4842_vm9  ;;  %vm4851_vm8 = vweird.f32 %v4832_v16 }
0x2032   : > { %v4837_v27 = vmul.f32 %v6871_v42, %v4836_v9  ;;  %v6531_v9 = vld [vmem:[%s9587_s10 + $0xc8] sm:$0xff] }
0x2034   : > { %v4838_v24 = vmul.f32 0.5, %v4837_v27  ;;  %v6522_v27 = vld [vmem:[%s9587_s10 + $0x80] sm:$0xff] }
0x2036   : > { %v4839_v31 = vsub.f32 1.5, %v4838_v24  ;;  %v6530_v24 = vld [vmem:[%s9587_s10 + $0xc0] sm:$0xff] }
0x2037   : > { %v6873_v14 = vpop.eup %6872 }
0x2038   : > { %v4840_v29 = vmul.f32 %v6871_v42, %v4839_v31  ;;  %v4846_v47 = vmul.f32 %v6873_v14, %v4832_v16  ;;  %vm4852_vm1 = vweird.f32 %v6873_v14  ;;  %v6523_v16 = vld [vmem:[%s9587_s10 + $0x88] sm:$0xff]  ;;  %v6246_v31 = vld [vmem:[%s9586_s9 + $0x2] sm:$0x3] }
0x2039   : > { %vm4853_vm14 = vmor %vm4851_vm8, %vm4852_vm1 }
0x203a   : > { %v4847_v56 = vmul.f32 %v6873_v14, %v4846_v47  ;;  %v4844_v18 = vsel %vm4843_vm15, %v6871_v42, %v4840_v29  ;;  %v6532_v42 = vld [vmem:[%s9587_s10 + $0xd0] sm:$0xff]  ;;  %v4903_v47 = vperm.slane %v6246_v31, 0 }
0x203b   : > { %v4875_v45 = vmul.f32 %v4844_v18, %v9259_v43 }
0x203c   : > { %v4848_v13 = vmul.f32 0.5, %v4847_v56  ;;  %v4904_v56 = vperm.slane %v6246_v31, 1 }
0x203d   : > { %v4880_v32 = vmul.f32 %v4879_v63, %v4875_v45 }
0x203e   : > { %v4849_v21 = vsub.f32 1.5, %v4848_v13 }
0x203f   : > { %v9337_v44 = vadd.f32 %v4884_v4, %v4880_v32 }
0x2040   : > { %v4850_v55 = vmul.f32 %v6873_v14, %v4849_v21 }
0x2042   : > { %v4854_v10 = vsel %vm4853_vm14, %v6873_v14, %v4850_v55 }
0x2043   : > { %v4876_v30 = vmul.f32 %v4854_v10, %v9265_v60  ;;  %v6529_v60 = vld [vmem:[%s9587_s10 + $0xb8] sm:$0xff] }
0x2044   : > { %5137 = vmatpush.bf16.msra.mxu0 %v6529_v60 }
0x2045   : > { %v4881_v15 = vmul.f32 %v4879_v63, %v4876_v30 }
0x2047   : > { %v9339_v1 = vadd.f32 %v4884_v4, %v4881_v15 }
0x2048   : > { %5138 = vmatpush.bf16.msra.mxu0 %v6528_v46 }
0x2049   : > { %v4889_v26 = vpack.c.bf16 %v9339_v1, %v9337_v44 }
0x204b   : > { %6279 = vmatmul.msk.bf16.vlgmr.msrb.gmra.mxu2 %vm855_vm12, %v4889_v26  ;;  %6281 = vmatmul.msk.bf16.vlgmr.msrb.gmra.mxu3 %vm855_vm12, %v4889_v26 }
0x204c   : > { %5139 = vmatpush.bf16.msra.mxu0 %v6527_v25 }
0x2050   : > { %5140 = vmatpush.bf16.msra.mxu0 %v6526_v6 }
0x2077   : > { %v4823_v43 = vpop.xlane.xlu1 %4822 }
0x2078   : > { %v4829_v0 = vmul.f32 %v4823_v43, %v9711_v28 }
0x207a   : > { %v4833_v52 = vadd.f32 1e-05, %v4829_v0 }
0x207c   : > { %6874 = vrsqrt.f32 %v4833_v52  ;;  %vm4861_vm13 = vweird.f32 %v4833_v52 }
0x207f   : > { %v4826_v38 = vpop.xlane.xlu0 %4825 }
0x2080   : > { %v4830_v19 = vmul.f32 %v4826_v38, %v9711_v28 }
0x2082   : > { %v6875_v23 = vpop.eup %6874  ;;  %v4834_v5 = vadd.f32 1e-05, %v4830_v19 }
0x2083   : > { %v4856_v34 = vmul.f32 %v6875_v23, %v4833_v52  ;;  %vm4862_vm0 = vweird.f32 %v6875_v23 }
0x2084   : > { %6876 = vrsqrt.f32 %v4834_v5  ;;  %vm4863_vm10 = vmor %vm4861_vm13, %vm4862_vm0  ;;  %vm4871_vm3 = vweird.f32 %v4834_v5 }
0x2085   : > { %v4857_v7 = vmul.f32 %v6875_v23, %v4856_v34 }
0x2087   : > { %v4858_v51 = vmul.f32 0.5, %v4857_v7 }
0x2089   : > { %v4859_v35 = vsub.f32 1.5, %v4858_v51 }
0x208a   : > { %v6877_v33 = vpop.eup %6876 }
0x208b   : > { %v4860_v62 = vmul.f32 %v6875_v23, %v4859_v35  ;;  %v4866_v41 = vmul.f32 %v6877_v33, %v4834_v5  ;;  %vm4872_vm7 = vweird.f32 %v6877_v33 }
0x208c   : > { %vm4873_vm4 = vmor %vm4871_vm3, %vm4872_vm7 }
0x208d   : > { %v4867_v57 = vmul.f32 %v6877_v33, %v4866_v41  ;;  %v4864_v17 = vsel %vm4863_vm10, %v6875_v23, %v4860_v62 }
0x208e   : > { %v4877_v37 = vmul.f32 %v4864_v17, %v9271_v49  ;;  %v6525_v49 = vld [vmem:[%s9587_s10 + $0x98] sm:$0xff] }
0x208f   : > { %v4868_v8 = vmul.f32 0.5, %v4867_v57  ;;  %5141 = vmatpush.bf16.msra.mxu0 %v6525_v49 }
0x2090   : > { %v4882_v36 = vmul.f32 %v4879_v63, %v4877_v37 }
0x2091   : > { %v4869_v48 = vsub.f32 1.5, %v4868_v8 }
0x2092   : > { %v9373_v11 = vadd.f32 %v4884_v4, %v4882_v36 }
0x2093   : > { %v4870_v59 = vmul.f32 %v6877_v33, %v4869_v48  ;;  %5142 = vmatpush.bf16.msra.mxu0 %v6524_v39 }
0x2095   : > { %v4874_v53 = vsel %vm4873_vm4, %v6877_v33, %v4870_v59 }
0x2096   : > { %v4878_v61 = vmul.f32 %v4874_v53, %v9277_v12  ;;  %v6533_v12 = vld [vmem:[%s9587_s10 + $0xd8] sm:$0xff] }
0x2097   : > { %5160 = vmatpush.bf16.msra.mxu1 %v6533_v12  ;;  %5143 = vmatpush.bf16.msra.mxu0 %v6523_v16 }
0x2098   : > { %v4883_v3 = vmul.f32 %v4879_v63, %v4878_v61 }
0x209a   : > { %v9375_v50 = vadd.f32 %v4884_v4, %v4883_v3 }
0x209b   : > { %5161 = vmatpush.bf16.msra.mxu1 %v6532_v42  ;;  %5144 = vmatpush.bf16.msra.mxu0 %v6522_v27 }
0x209c   : > { %v4890_v2 = vpack.c.bf16 %v9375_v50, %v9373_v11 }
0x209e   : > { %6280 = vmatmul.msk.bf16.gmra.mxu2 %vm855_vm12, %v4890_v2  ;;  %6282 = vmatmul.msk.bf16.gmra.mxu3 %vm855_vm12, %v4890_v2 }
0x209f   : > { %5162 = vmatpush.bf16.msra.mxu1 %v6531_v9 }
0x20a3   : > { %5163 = vmatpush.bf16.msra.mxu1 %v6530_v24 }
0x20ce   : > { %v4962_v14 = vpop.f32.mrf.mxu2  ;;  %v4981_v29 = vpop.f32.mrf.mxu3 }
0x20cf   : > { %v4963_v40 = vadd.f32 %v4962_v14, %v4903_v47  ;;  %v4982_v18 = vadd.f32 %v4981_v29, %v4904_v56 }
0x20d1   : > { %v4991_v55 = vmax.f32 %v4963_v40, 0.0  ;;  %v4992_v10 = vmax.f32 %v4982_v18, 0.0 }
0x20d6   : > { %v4964_v13 = vpop.f32.mrf.mxu2  ;;  %v4983_v21 = vpop.f32.mrf.mxu3 }
0x20d7   : > { %v4965_v63 = vadd.f32 %v4964_v13, %v4903_v47  ;;  %v4984_v45 = vadd.f32 %v4983_v21, %v4904_v56 }
0x20d9   : > { %v4993_v4 = vmax.f32 %v4965_v63, 0.0  ;;  %v4994_v32 = vmax.f32 %v4984_v45, 0.0 }
0x20db   : > { %v4999_v30 = vpack.c.bf16 %v4993_v4, %v4991_v55  ;;  %v5000_v15 = vpack.c.bf16 %v4994_v32, %v4992_v10  ;;  %v6407_v4 = vld [vmem:[%s9592_s15 + $0x30] sm:$0xf]  ;;  %v6545_v32 = vld [vmem:[%s9592_s15 + $0x34] sm:$0xf0] }
0x20dd   : > { %5145 = vmatmul.bf16.vlgmr.msra.gmra.mxu0 %v4999_v30  ;;  %5164 = vmatmul.bf16.vlgmr.msra.gmra.mxu1 %v5000_v15  ;;  %v6544_v30 = vld [vmem:[%s9592_s15 + $0x34] sm:$0xf]  ;;  %v6408_v15 = vor.u32 %v6545_v32, %v6407_v4 }
0x20df   : > { %5339 = vmatpush.bf16.msra.mxu2 %v6408_v15 }
0x2121   : > { %v4967_v26 = vpop.f32.mrf.mxu2  ;;  %v4986_v43 = vpop.f32.mrf.mxu3 }
0x2122   : > { %v4968_v0 = vadd.f32 %v4967_v26, %v4903_v47  ;;  %v4987_v52 = vadd.f32 %v4986_v43, %v4904_v56  ;;  %v6409_v26 = vld [vmem:[%s9592_s15 + $0x38] sm:$0xf0] }
0x2123   : > { %v6412_v43 = vor.u32 %v6544_v30, %v6409_v26 }
0x2124   : > { %v4995_v46 = vmax.f32 %v4968_v0, 0.0  ;;  %v4996_v22 = vmax.f32 %v4987_v52, 0.0 }
0x2125   : > { %5358 = vmatpush.bf16.msra.mxu3 %v6412_v43 }
0x2129   : > { %v4969_v60 = vpop.f32.mrf.mxu2  ;;  %v4988_v20 = vpop.f32.mrf.mxu3 }
0x212a   : > { %v4970_v38 = vadd.f32 %v4969_v60, %v4903_v47  ;;  %v4989_v19 = vadd.f32 %v4988_v20, %v4904_v56  ;;  %v6399_v60 = vld [vmem:[%s9592_s15 + $0x20] sm:$0xf]  ;;  %v6543_v20 = vld [vmem:[%s9592_s15 + $0x24] sm:$0xf0] }
0x212c   : > { %v4997_v23 = vmax.f32 %v4970_v38, 0.0  ;;  %v4998_v5 = vmax.f32 %v4989_v19, 0.0  ;;  %v6542_v38 = vld [vmem:[%s9592_s15 + $0x24] sm:$0xf]  ;;  %v6400_v19 = vor.u32 %v6543_v20, %v6399_v60 }
0x212e   : > { %v5001_v34 = vpack.c.bf16 %v4997_v23, %v4995_v46  ;;  %v5002_v25 = vpack.c.bf16 %v4998_v5, %v4996_v22  ;;  %v6401_v46 = vld [vmem:[%s9592_s15 + $0x28] sm:$0xf0]  ;;  %5340 = vmatpush.bf16.msra.mxu2 %v6400_v19  ;;  %v6391_v5 = vld [vmem:[%s9592_s15 + $0x10] sm:$0xf] }
0x212f   : > { %v6404_v23 = vor.u32 %v6542_v38, %v6401_v46 }
0x2130   : > { %5150 = vmatmul.bf16.gmra.mxu0 %v5001_v34  ;;  %5169 = vmatmul.bf16.gmra.mxu1 %v5002_v25  ;;  %v6541_v34 = vld [vmem:[%s9592_s15 + $0x14] sm:$0xf0]  ;;  %v6540_v25 = vld [vmem:[%s9592_s15 + $0x14] sm:$0xf] }
0x2131   : > { %5359 = vmatpush.bf16.msra.mxu3 %v6404_v23 }
0x215a   : > { %v5146_v7 = vpop.f32.mrf.mxu0  ;;  %v5165_v51 = vpop.f32.mrf.mxu1 }
0x215b   : > { %v5147_v6 = vadd.f32 %v6651_v58, %v5146_v7  ;;  %v6393_v7 = vld [vmem:[%s9592_s15 + $0x18] sm:$0xf0] }
0x215d   : > { %v5166_v54 = vadd.f32 %v5165_v51, %v5147_v6  ;;  %v6383_v51 = vld [vmem:[%s9592_s15] sm:$0xf]  ;;  %v6539_v6 = vld [vmem:[%s9592_s15 + $0x4] sm:$0xf0] }
0x215f   : > { %v5177_v35 = vadd.f32 %v5166_v54, %v9337_v44  ;;  %v6396_v54 = vor.u32 %v6540_v25, %v6393_v7 }
0x2161   : > { %v5181_v33 = vsel %vm855_vm12, %v5177_v35, 0.0  ;;  %5360 = vmatpush.bf16.msra.mxu3 %v6396_v54 }
0x2162   : > { %v5148_v62 = vpop.f32.mrf.mxu0  ;;  %5182 = vadd.xlane.f32.xlu2 %v5181_v33  ;;  %v5167_v57 = vpop.f32.mrf.mxu1  ;;  %v6385_v33 = vld [vmem:[%s9592_s15 + $0x8] sm:$0xf0] }
0x2163   : > { %v5149_v41 = vadd.f32 %v6651_v58, %v5148_v62 }
0x2165   : > { %v5168_v17 = vadd.f32 %v5167_v57, %v5149_v41  ;;  %v6384_v41 = vor.u32 %v6539_v6, %v6383_v51 }
0x2167   : > { %v5178_v8 = vadd.f32 %v5168_v17, %v9339_v1 }
0x2169   : > { %v5184_v48 = vsel %vm855_vm12, %v5178_v8, 0.0 }
0x216a   : > { %5185 = vadd.xlane.f32.xlu1 %v5184_v48 }
0x21ad   : > { %v5151_v37 = vpop.f32.mrf.mxu0  ;;  %v5170_v59 = vpop.f32.mrf.mxu1 }
0x21ae   : > { %v5152_v53 = vadd.f32 %v6651_v58, %v5151_v37 }
0x21b0   : > { %v5171_v61 = vadd.f32 %v5170_v59, %v5152_v53 }
0x21b2   : > { %v5179_v36 = vadd.f32 %v5171_v61, %v9373_v11 }
0x21b4   : > { %v5187_v44 = vsel %vm855_vm12, %v5179_v36, 0.0 }
0x21b5   : > { %v5153_v3 = vpop.f32.mrf.mxu0  ;;  %5188 = vadd.xlane.f32.xlu0 %v5187_v44  ;;  %v5172_v49 = vpop.f32.mrf.mxu1 }
0x21b6   : > { %v5154_v2 = vadd.f32 %v6651_v58, %v5153_v3  ;;  %v6392_v58 = vor.u32 %v6541_v34, %v6391_v5 }
0x21b8   : > { %v5173_v12 = vadd.f32 %v5172_v49, %v5154_v2  ;;  %5341 = vmatpush.bf16.msra.mxu2 %v6392_v58  ;;  %v6380_v49 = vld [vmem:[%s9589_s12 + $0x2] sm:$0x3] }
0x21ba   : > { %v5180_v39 = vadd.f32 %v5173_v12, %v9375_v50 }
0x21bc   : > { %v5190_v1 = vsel %vm855_vm12, %v5180_v39, 0.0  ;;  %5342 = vmatpush.bf16.msra.mxu2 %v6384_v41 }
0x21bd   : > { %5191 = vadd.xlane.f32.xlu2 %v5190_v1 }
0x21d5   : > { %v5183_v42 = vpop.xlane.xlu2 %5182 }
0x21d6   : > { %v5193_v16 = vmul.f32 %v5183_v42, %v9711_v28  ;;  %v5269_v42 = vperm.slane %v6380_v49, 0 }
0x21d8   : > { %v9420_v9 = vsub.f32 %v5177_v35, %v5193_v16  ;;  %v6538_v35 = vld [vmem:[%s9592_s15 + $0x4] sm:$0xf] }
0x21d9   : > { %v6388_v17 = vor.u32 %v6538_v35, %v6385_v33 }
0x21da   : > { %v5201_v11 = vmul.f32 %v9420_v9, %v9420_v9 }
0x21db   : > { %5361 = vmatpush.bf16.msra.mxu3 %v6388_v17 }
0x21dc   : > { %v5205_v27 = vsel %vm855_vm12, %v5201_v11, 0.0 }
0x21dd   : > { %5206 = vadd.xlane.f32.xlu1 %v5205_v27  ;;  %v5186_v24 = vpop.xlane.xlu1 %5185 }
0x21de   : > { %v5194_v31 = vmul.f32 %v5186_v24, %v9711_v28  ;;  %v5274_v24 = vperm.slane %v6380_v49, 1 }
0x21e0   : > { %v9426_v14 = vsub.f32 %v5178_v8, %v5194_v31 }
0x21e2   : > { %v5202_v50 = vmul.f32 %v9426_v14, %v9426_v14 }
0x21e4   : > { %v5208_v29 = vsel %vm855_vm12, %v5202_v50, 0.0 }
0x21e5   : > { %5209 = vadd.xlane.f32.xlu0 %v5208_v29 }
0x2228   : > { %v5189_v47 = vpop.xlane.xlu0 %5188 }
0x2229   : > { %v5195_v56 = vmul.f32 %v5189_v47, %v9711_v28 }
0x222b   : > { %v9432_v40 = vsub.f32 %v5179_v36, %v5195_v56 }
0x222d   : > { %v5203_v18 = vmul.f32 %v9432_v40, %v9432_v40 }
0x222f   : > { %v5211_v13 = vsel %vm855_vm12, %v5203_v18, 0.0 }
0x2230   : > { %v5192_v21 = vpop.xlane.xlu2 %5191  ;;  %5212 = vadd.xlane.f32.xlu2 %v5211_v13 }
0x2231   : > { %v5196_v63 = vmul.f32 %v5192_v21, %v9711_v28 }
0x2233   : > { %v9438_v45 = vsub.f32 %v5180_v39, %v5196_v63 }
0x2235   : > { %v5204_v55 = vmul.f32 %v9438_v45, %v9438_v45 }
0x2237   : > { %v5214_v10 = vsel %vm855_vm12, %v5204_v55, 0.0 }
0x2238   : > { %5215 = vadd.xlane.f32.xlu1 %v5214_v10 }
0x2250   : > { %v5207_v0 = vpop.xlane.xlu1 %5206 }
0x2251   : > { %v5217_v52 = vmul.f32 %v5207_v0, %v9711_v28 }
0x2253   : > { %v5221_v22 = vadd.f32 1e-05, %v5217_v52 }
0x2255   : > { %6878 = vrsqrt.f32 %v5221_v22  ;;  %vm5231_vm9 = vweird.f32 %v5221_v22 }
0x2258   : > { %v5210_v62 = vpop.xlane.xlu0 %5209 }
0x2259   : > { %v5218_v57 = vmul.f32 %v5210_v62, %v9711_v28 }
0x225b   : > { %v6879_v8 = vpop.eup %6878  ;;  %v5222_v48 = vadd.f32 1e-05, %v5218_v57 }
0x225c   : > { %v5226_v37 = vmul.f32 %v6879_v8, %v5221_v22  ;;  %vm5232_vm2 = vweird.f32 %v6879_v8 }
0x225d   : > { %6880 = vrsqrt.f32 %v5222_v48  ;;  %vm5233_vm11 = vmor %vm5231_vm9, %vm5232_vm2  ;;  %vm5241_vm1 = vweird.f32 %v5222_v48 }
0x225e   : > { %v5227_v59 = vmul.f32 %v6879_v8, %v5226_v37 }
0x2260   : > { %v5228_v53 = vmul.f32 0.5, %v5227_v59 }
0x2262   : > { %v5229_v61 = vsub.f32 1.5, %v5228_v53 }
0x2263   : > { %v6881_v36 = vpop.eup %6880 }
0x2264   : > { %v5230_v44 = vmul.f32 %v6879_v8, %v5229_v61  ;;  %v5236_v3 = vmul.f32 %v6881_v36, %v5222_v48  ;;  %vm5242_vm15 = vweird.f32 %v6881_v36 }
0x2265   : > { %vm5243_vm8 = vmor %vm5241_vm1, %vm5242_vm15 }
0x2266   : > { %v5237_v2 = vmul.f32 %v6881_v36, %v5236_v3  ;;  %v5234_v12 = vsel %vm5233_vm11, %v6879_v8, %v5230_v44 }
0x2267   : > { %v5265_v16 = vmul.f32 %v5234_v12, %v9420_v9 }
0x2268   : > { %v5238_v39 = vmul.f32 0.5, %v5237_v2 }
0x2269   : > { %v5270_v31 = vmul.f32 %v5269_v42, %v5265_v16 }
0x226a   : > { %v5239_v1 = vsub.f32 1.5, %v5238_v39 }
0x226b   : > { %v9498_v47 = vadd.f32 %v5274_v24, %v5270_v31 }
0x226c   : > { %v5240_v11 = vmul.f32 %v6881_v36, %v5239_v1 }
0x226e   : > { %v5244_v27 = vsel %vm5243_vm8, %v6881_v36, %v5240_v11 }
0x226f   : > { %v5266_v50 = vmul.f32 %v5244_v27, %v9426_v14 }
0x2271   : > { %v5271_v29 = vmul.f32 %v5269_v42, %v5266_v50 }
0x2273   : > { %v9500_v56 = vadd.f32 %v5274_v24, %v5271_v29 }
0x2275   : > { %v5279_v18 = vpack.c.bf16 %v9500_v56, %v9498_v47 }
0x2277   : > { %6413 = vmatmul.msk.bf16.vlgmr.msra.gmra.mxu2 %vm855_vm12, %v5279_v18  ;;  %6415 = vmatmul.msk.bf16.vlgmr.msra.gmra.mxu3 %vm855_vm12, %v5279_v18 }
0x22a3   : > { %v5213_v9 = vpop.xlane.xlu2 %5212 }
0x22a4   : > { %v5219_v13 = vmul.f32 %v5213_v9, %v9711_v28 }
0x22a6   : > { %v5223_v21 = vadd.f32 1e-05, %v5219_v13 }
0x22a8   : > { %6882 = vrsqrt.f32 %v5223_v21  ;;  %vm5251_vm0 = vweird.f32 %v5223_v21 }
0x22ab   : > { %v5216_v63 = vpop.xlane.xlu1 %5215 }
0x22ac   : > { %v5220_v14 = vmul.f32 %v5216_v63, %v9711_v28 }
0x22ae   : > { %v6883_v55 = vpop.eup %6882  ;;  %v5224_v10 = vadd.f32 1e-05, %v5220_v14 }
0x22af   : > { %v5246_v4 = vmul.f32 %v6883_v55, %v5223_v21  ;;  %vm5252_vm14 = vweird.f32 %v6883_v55 }
0x22b0   : > { %6884 = vrsqrt.f32 %v5224_v10  ;;  %vm5253_vm13 = vmor %vm5251_vm0, %vm5252_vm14  ;;  %vm5261_vm7 = vweird.f32 %v5224_v10 }
0x22b1   : > { %v5247_v32 = vmul.f32 %v6883_v55, %v5246_v4 }
0x22b3   : > { %v5248_v30 = vmul.f32 0.5, %v5247_v32 }
0x22b5   : > { %v5249_v15 = vsub.f32 1.5, %v5248_v30 }
0x22b6   : > { %v6885_v26 = vpop.eup %6884 }
0x22b7   : > { %v5250_v43 = vmul.f32 %v6883_v55, %v5249_v15  ;;  %v5256_v0 = vmul.f32 %v6885_v26, %v5224_v10  ;;  %vm5262_vm10 = vweird.f32 %v6885_v26 }
0x22b8   : > { %vm5263_vm3 = vmor %vm5261_vm7, %vm5262_vm10 }
0x22b9   : > { %v5257_v52 = vmul.f32 %v6885_v26, %v5256_v0  ;;  %v5254_v60 = vsel %vm5253_vm13, %v6883_v55, %v5250_v43 }
0x22ba   : > { %v5267_v28 = vmul.f32 %v5254_v60, %v9432_v40 }
0x22bb   : > { %v5258_v20 = vmul.f32 0.5, %v5257_v52 }
0x22bc   : > { %v5272_v23 = vmul.f32 %v5269_v42, %v5267_v28 }
0x22bd   : > { %v5259_v38 = vsub.f32 1.5, %v5258_v20 }
0x22be   : > { %v9510_v34 = vadd.f32 %v5274_v24, %v5272_v23 }
0x22bf   : > { %v5260_v19 = vmul.f32 %v6885_v26, %v5259_v38 }
0x22c1   : > { %v5264_v46 = vsel %vm5263_vm3, %v6885_v26, %v5260_v19 }
0x22c2   : > { %v5268_v22 = vmul.f32 %v5264_v46, %v9438_v45 }
0x22c4   : > { %v5273_v5 = vmul.f32 %v5269_v42, %v5268_v22 }
0x22c6   : > { %v9512_v25 = vadd.f32 %v5274_v24, %v5273_v5 }
0x22c8   : > { %v5280_v58 = vpack.c.bf16 %v9512_v25, %v9510_v34 }
0x22ca   : > { %6414 = vmatmul.msk.bf16.gmra.mxu2 %vm855_vm12, %v5280_v58  ;;  %6416 = vmatmul.msk.bf16.gmra.mxu3 %vm855_vm12, %v5280_v58 }
0x22fa   : > { %v5344_v40 = vpop.f32.mrf.mxu2  ;;  %v5363_v7 = vpop.f32.mrf.mxu3 }
0x22fb   : > { %v5373_v51 = vpack.c.bf16 %v5363_v7, %v5344_v40 }
0x22fd   : > { %v5380_v45 = vunpack.c.l.b16 %v5373_v51 }
0x2302   : > { %v5346_v6 = vpop.f32.mrf.mxu2  ;;  %v5365_v54 = vpop.f32.mrf.mxu3 }
0x2303   : > { %v5374_v35 = vpack.c.bf16 %v5365_v54, %v5346_v6 }
0x2305   : > { %v5378_v33 = vrot.slane %v5374_v35, 4  ;;  %v5381_v62 = vunpack.c.l.b16 %v5374_v35  ;;  %5477 = vrot.lane.b32.xlu0 %v5374_v35, %s6927_s22 }
0x2307   : > { %v5382_v41 = vpack.c.b16 %v5381_v62, %v5380_v45  ;;  %v5387_v57 = vsel %vm855_vm12, %v5378_v33, 0 }
0x2308   : > { %5396 = vmatpush.bf16.xpose.msrb.mxu0 %v5387_v57 }
0x2309   : > { %5480 = vrot.lane.b32.xlu1 %v5382_v41, %s6927_s22 }
0x230f   : > { %6417 = vmatmul.msk.bf16.vlgmr.msrb.gmra.mxu0 %vm855_vm12, %v5382_v41 }
0x234d   : > { %v5349_v17 = vpop.f32.mrf.mxu2  ;;  %v5368_v8 = vpop.f32.mrf.mxu3 }
0x234e   : > { %v5375_v48 = vpack.c.bf16 %v5368_v8, %v5349_v17 }
0x2350   : > { %v5406_v61 = vunpack.c.l.b16 %v5375_v48 }
0x2355   : > { %v5351_v37 = vpop.f32.mrf.mxu2  ;;  %v5370_v59 = vpop.f32.mrf.mxu3 }
0x2356   : > { %v5376_v53 = vpack.c.bf16 %v5370_v59, %v5351_v37 }
0x2358   : > { %v5404_v36 = vrot.slane %v5376_v53, 4  ;;  %v5407_v44 = vunpack.c.l.b16 %v5376_v53  ;;  %5505 = vrot.lane.b32.xlu2 %v5376_v53, %s6927_s22 }
0x235a   : > { %v5408_v3 = vpack.c.b16 %v5407_v44, %v5406_v61  ;;  %v5413_v2 = vsel %vm855_vm12, %v5404_v36, 0 }
0x235b   : > { %5422 = vmatpush.bf16.xpose.msrb.mxu1 %v5413_v2 }
0x235c   : > { %5508 = vrot.lane.b32.xlu0 %v5408_v3, %s6927_s22 }
0x2362   : > { %6418 = vmatmul.msk.bf16.vlgmr.msrb.gmra.mxu1 %vm855_vm12, %v5408_v3 }
0x2377   : > { %v5478_v49 = vpop.permute.xlu0 %5477 }
0x2378   : > { %v5479_v12 = vrot.slane %v5478_v49, 4 }
0x237a   : > { %v5482_v39 = vunpack.c.l.b16 %v5479_v12 }
0x237b   : > { %v5481_v11 = vpop.permute.xlu1 %5480 }
0x237c   : > { %v5483_v1 = vpack.c.b16 %v5482_v39, %v5482_v39 }
0x237e   : > { %v5484_v42 = vrot.slane %v5483_v1, 2 }
0x2380   : > { %v5489_v16 = vsel %vm855_vm12, %v5484_v42, 0 }
0x2381   : > { %5498 = vmatpush.bf16.xpose.msrb.mxu2 %v5489_v16 }
0x2388   : > { %6419 = vmatmul.msk.bf16.vlgmr.msrb.gmra.mxu2 %vm855_vm12, %v5481_v11 }
0x238c   : > { %v5398_v27 = vpop.f32.mrf.mxu0 }
0x238d   : > { %v5429_v24 = vmul.f32 0.125, %v5398_v27 }
0x238f   : > { %v5433_v31 = vsel %vm3310_vm5, %v5429_v24, -inf }
0x2390   : > { %5434 = vmax.xlane.f32.xlu2 %v5433_v31 }
0x2394   : > { %v5400_v50 = vpop.f32.mrf.mxu0 }
0x2395   : > { %v5430_v29 = vmul.f32 0.125, %v5400_v50 }
0x2397   : > { %v5436_v18 = vsel %vm3310_vm5, %v5430_v29, -inf }
0x2398   : > { %5437 = vmax.xlane.f32.xlu0 %v5436_v18 }
0x23b2   : > { %v5506_v9 = vpop.permute.xlu2 %5505 }
0x23b3   : > { %v5507_v13 = vrot.slane %v5506_v9, 4 }
0x23b5   : > { %v5510_v21 = vunpack.c.l.b16 %v5507_v13 }
0x23b7   : > { %v5511_v63 = vpack.c.b16 %v5510_v21, %v5510_v21 }
0x23b9   : > { %v5512_v14 = vrot.slane %v5511_v63, 2 }
0x23bb   : > { %v5517_v55 = vsel %vm855_vm12, %v5512_v14, 0 }
0x23bc   : > { %5526 = vmatpush.bf16.xpose.msrb.mxu3 %v5517_v55 }
0x23ce   : > { %v5509_v10 = vpop.permute.xlu0 %5508 }
0x23cf   : > { %6420 = vmatmul.msk.bf16.vlgmr.msrb.gmra.mxu3 %vm855_vm12, %v5509_v10 }
0x23df   : > { %v5424_v4 = vpop.f32.mrf.mxu1 }
0x23e0   : > { %v5431_v32 = vmul.f32 0.125, %v5424_v4 }
0x23e2   : > { %v5439_v30 = vsel %vm3310_vm5, %v5431_v32, -inf }
0x23e3   : > { %5440 = vmax.xlane.f32.xlu1 %v5439_v30 }
0x23e7   : > { %v5426_v15 = vpop.f32.mrf.mxu1 }
0x23e8   : > { %v5432_v26 = vmul.f32 0.125, %v5426_v15 }
0x23ea   : > { %v5442_v43 = vsel %vm3310_vm5, %v5432_v26, -inf }
0x23eb   : > { %5443 = vmax.xlane.f32.xlu2 %v5442_v43 }
0x2403   : > { %v5435_v0 = vpop.xlane.xlu2 %5434 }
0x2404   : > { %v5445_v20 = vsub.f32 %v5429_v24, %v5435_v0 }
0x2406   : > { %v5449_v28 = vmul.f32 1.442695, %v5445_v20 }
0x2408   : > { %6886 = vpow2.f32 %v5449_v28 }
0x240b   : > { %v5500_v52 = vpop.f32.mrf.mxu2  ;;  %v5438_v58 = vpop.xlane.xlu0 %5437 }
0x240c   : > { %v5533_v60 = vmul.f32 0.125, %v5500_v52  ;;  %v5446_v40 = vsub.f32 %v5430_v29, %v5438_v58 }
0x240e   : > { %v5537_v38 = vsel %vm3300_vm6, %v5533_v60, -inf  ;;  %v6887_v23 = vpop.eup %6886  ;;  %v5451_v7 = vmul.f32 1.442695, %v5446_v40 }
0x240f   : > { %5538 = vmax.xlane.f32.xlu0 %v5537_v38  ;;  %v5457_v5 = vsel %vm3310_vm5, %v6887_v23, 0.0 }
0x2410   : > { %6888 = vpow2.f32 %v5451_v7 }
0x2413   : > { %v5502_v19 = vpop.f32.mrf.mxu2 }
0x2414   : > { %v5534_v46 = vmul.f32 0.125, %v5502_v19 }
0x2416   : > { %v5540_v22 = vsel %vm3300_vm6, %v5534_v46, -inf  ;;  %v6889_v62 = vpop.eup %6888 }
0x2417   : > { %5541 = vmax.xlane.f32.xlu1 %v5540_v22  ;;  %v5460_v41 = vsel %vm3310_vm5, %v6889_v62, 0.0 }
0x241f   : > { %5458 = vadd.xlane.f32.xlu1 %v5457_v5 }
0x2452   : > { %v5528_v51 = vpop.f32.mrf.mxu3 }
0x2453   : > { %v9537_v6 = vmul.f32 0.125, %v5528_v51 }
0x2455   : > { %v5543_v54 = vsel %vm3300_vm6, %v9537_v6, -inf }
0x2456   : > { %5544 = vmax.xlane.f32.xlu2 %v5543_v54  ;;  %v5441_v35 = vpop.xlane.xlu1 %5440 }
0x2457   : > { %v5447_v45 = vsub.f32 %v5431_v32, %v5441_v35 }
0x2459   : > { %v5453_v33 = vmul.f32 1.442695, %v5447_v45 }
0x245a   : > { %v5530_v59 = vpop.f32.mrf.mxu3 }
0x245b   : > { %6890 = vpow2.f32 %v5453_v33  ;;  %v5536_v53 = vmul.f32 0.125, %v5530_v59 }
0x245d   : > { %v5546_v44 = vsel %vm3300_vm6, %v5536_v53, -inf }
0x245e   : > { %5461 = vadd.xlane.f32.xlu2 %v5460_v41  ;;  %v5444_v57 = vpop.xlane.xlu2 %5443 }
0x245f   : > { %v5448_v17 = vsub.f32 %v5432_v26, %v5444_v57 }
0x2461   : > { %v6891_v8 = vpop.eup %6890  ;;  %v5455_v48 = vmul.f32 1.442695, %v5448_v17 }
0x2462   : > { %v5463_v37 = vsel %vm3310_vm5, %v6891_v8, 0.0 }
0x2463   : > { %6892 = vpow2.f32 %v5455_v48  ;;  %5464 = vadd.xlane.f32.xlu0 %v5463_v37 }
0x2469   : > { %v6893_v61 = vpop.eup %6892 }
0x246a   : > { %v5466_v36 = vsel %vm3310_vm5, %v6893_v61, 0.0  ;;  %vm5622_vm5 = vcmask 572416  }
0x246b   : > { %5467 = vadd.xlane.f32.xlu1 %v5466_v36  ;;  %5547 = vmax.xlane.f32.xlu0 %v5546_v44 }
0x2482   : > { %v5539_v3 = vpop.xlane.xlu0 %5538 }
0x2483   : > { %v5549_v2 = vsub.f32 %v5533_v60, %v5539_v3 }
0x2485   : > { %v5553_v49 = vmul.f32 1.442695, %v5549_v2 }
0x2487   : > { %6894 = vpow2.f32 %v5553_v49 }
0x248a   : > { %v5542_v12 = vpop.xlane.xlu1 %5541 }
0x248b   : > { %v5550_v27 = vsub.f32 %v5534_v46, %v5542_v12 }
0x248d   : > { %v6895_v39 = vpop.eup %6894  ;;  %v5555_v24 = vmul.f32 1.442695, %v5550_v27 }
0x248e   : > { %v5561_v1 = vsel %vm3300_vm6, %v6895_v39, 0.0 }
0x248f   : > { %5562 = vadd.xlane.f32.xlu2 %v5561_v1 }
0x2492   : > { %v5459_v42 = vpop.xlane.xlu1 %5458 }
0x2493   : > { %6896 = vrcp.f32 %v5459_v42 }
0x2494   : > { %6898 = vpow2.f32 %v5555_v24 }
0x2499   : > { %v6897_v16 = vpop.eup %6896 }
0x249a   : > { %v5473_v11 = vmul.f32 %v6897_v16, %v6887_v23  ;;  %v6899_v31 = vpop.eup %6898 }
0x249b   : > { %v5564_v50 = vsel %vm3300_vm6, %v6899_v31, 0.0 }
0x249c   : > { %5585 = vrot.lane.b32.xlu0 %v5473_v11, %s6927_s22 }
0x24c6   : > { %5565 = vadd.xlane.f32.xlu0 %v5564_v50 }
0x24c9   : > { %v5545_v29 = vpop.xlane.xlu2 %5544 }
0x24ca   : > { %v5551_v26 = vsub.f32 %v9537_v6, %v5545_v29 }
0x24cc   : > { %v5557_v43 = vmul.f32 1.442695, %v5551_v26 }
0x24d1   : > { %v5462_v18 = vpop.xlane.xlu2 %5461 }
0x24d2   : > { %6900 = vrcp.f32 %v5462_v18 }
0x24d6   : > { %v5465_v9 = vpop.xlane.xlu0 %5464 }
0x24d8   : > { %v6901_v13 = vpop.eup %6900 }
0x24d9   : > { %v5474_v21 = vmul.f32 %v6901_v13, %v6889_v62 }
0x24db   : > { %5587 = vrot.lane.b32.xlu1 %v5474_v21, %s6927_s22 }
0x24de   : > { %v5548_v63 = vpop.xlane.xlu0 %5547  ;;  %v5468_v14 = vpop.xlane.xlu1 %5467 }
0x24df   : > { %v5552_v55 = vsub.f32 %v5536_v53, %v5548_v63  ;;  %6902 = vrcp.f32 %v5468_v14 }
0x24e1   : > { %v5559_v10 = vmul.f32 1.442695, %v5552_v55 }
0x24e3   : > { %6904 = vpow2.f32 %v5559_v10 }
0x24e4   : > { %6906 = vrcp.f32 %v5465_v9 }
0x24e5   : > { %v6903_v4 = vpop.eup %6902  ;;  %6908 = vpow2.f32 %v5557_v43 }
0x24e6   : > { %v5476_v32 = vmul.f32 %v6903_v4, %v6893_v61 }
0x24e8   : > { %5591 = vrot.lane.b32.xlu0 %v5476_v32, %s6927_s22 }
0x24e9   : > { %v6905_v30 = vpop.eup %6904 }
0x24ea   : > { %v5570_v15 = vsel %vm3300_vm6, %v6905_v30, 0.0  ;;  %v6907_v0 = vpop.eup %6906 }
0x24eb   : > { %5571 = vadd.xlane.f32.xlu2 %v5570_v15  ;;  %v6909_v52 = vpop.eup %6908  ;;  %v5475_v60 = vmul.f32 %v6907_v0, %v6891_v8 }
0x24ec   : > { %v5567_v20 = vsel %vm3300_vm6, %v6909_v52, 0.0  ;;  %vm5617_vm6 = vcmask 556032  }
0x2502   : > { %v5563_v38 = vpop.xlane.xlu2 %5562 }
0x2503   : > { %5589 = vrot.lane.b32.xlu2 %v5475_v60, %s6927_s22  ;;  %6910 = vrcp.f32 %v5563_v38 }
0x2505   : > { %5568 = vadd.xlane.f32.xlu1 %v5567_v20 }
0x2509   : > { %v6911_v28 = vpop.eup %6910 }
0x250a   : > { %v5577_v19 = vmul.f32 %v6911_v28, %v6895_v39 }
0x250e   : > { %v5586_v46 = vpop.permute.xlu0 %5585 }
0x250f   : > { %v5613_v45 = vsel %vm855_vm12, %v9498_v47, %v5586_v46 }
0x251e   : > { %5601 = vrot.lane.b32.xlu1 %v5577_v19, %s6940_s26 }
0x2539   : > { %v5566_v22 = vpop.xlane.xlu0 %5565 }
0x253a   : > { %6912 = vrcp.f32 %v5566_v22 }
0x2540   : > { %v6913_v23 = vpop.eup %6912 }
0x2541   : > { %v5578_v5 = vmul.f32 %v6913_v23, %v6899_v31 }
0x2543   : > { %5603 = vrot.lane.b32.xlu0 %v5578_v5, %s6940_s26 }
0x254d   : > { %v5588_v51 = vpop.permute.xlu1 %5587 }
0x254e   : > { %v5614_v17 = vsel %vm855_vm12, %v9500_v56, %v5588_v51 }
0x255a   : > { %v5592_v57 = vpop.permute.xlu0 %5591 }
0x255b   : > { %v5616_v59 = vsel %vm855_vm12, %v9512_v25, %v5592_v57 }
0x255e   : > { %v5572_v58 = vpop.xlane.xlu2 %5571 }
0x255f   : > { %6914 = vrcp.f32 %v5572_v58 }
0x2565   : > { %v6915_v40 = vpop.eup %6914 }
0x2566   : > { %v5580_v7 = vmul.f32 %v6915_v40, %v6905_v30  ;;  %v5590_v47 = vpop.permute.xlu2 %5589 }
0x2567   : > { %v5615_v36 = vsel %vm855_vm12, %v9510_v34, %v5590_v47 }
0x2568   : > { %5607 = vrot.lane.b32.xlu1 %v5580_v7, %s6940_s26 }
0x2578   : > { %v5569_v6 = vpop.xlane.xlu1 %5568 }
0x2579   : > { %6916 = vrcp.f32 %v5569_v6 }
0x257f   : > { %v6917_v54 = vpop.eup %6916 }
0x2580   : > { %v5579_v35 = vmul.f32 %v6917_v54, %v6909_v52 }
0x2582   : > { %5605 = vrot.lane.b32.xlu2 %v5579_v35, %s6940_s26 }
0x2590   : > { %v5602_v33 = vpop.permute.xlu1 %5601 }
0x2591   : > { %v5618_v62 = vsel %vm5617_vm6, %v5613_v45, %v5602_v33 }
0x2592   : > { %v5623_v41 = vsel %vm5622_vm5, %v5618_v62, 0.0 }
0x2593   : > { %5627 = vst [vmem:[%s553_s28] sm:$0xff] %v5623_v41 }
0x25b5   : > { %v5604_v8 = vpop.permute.xlu0 %5603 }
0x25b6   : > { %v5619_v48 = vsel %vm5617_vm6, %v5614_v17, %v5604_v8 }
0x25b7   : > { %v5624_v37 = vsel %vm5622_vm5, %v5619_v48, 0.0 }
0x25b8   : > { %5628 = vst [vmem:[%s553_s28 + $0x8] sm:$0xff] %v5624_v37 }
0x25da   : > { %v5608_v53 = vpop.permute.xlu1 %5607 }
0x25db   : > { %v5621_v61 = vsel %vm5617_vm6, %v5616_v59, %v5608_v53 }
0x25dc   : > { %v5626_v44 = vsel %vm5622_vm5, %v5621_v61, 0.0  ;;  %v5606_v3 = vpop.permute.xlu2 %5605 }
0x25dd   : > { %5630 = vst [vmem:[%s553_s28 + $0x18] sm:$0xff] %v5626_v44  ;;  %v5620_v56 = vsel %vm5617_vm6, %v5615_v36, %v5606_v3 }
0x25de   : > { %v5625_v2 = vsel %vm5622_vm5, %v5620_v56, 0.0 }
0x25df   : > { %5629 = vst [vmem:[%s553_s28 + $0x10] sm:$0xff] %v5625_v2 }
0x25e0 PF: > { %s26_s21 = sadd.s32 1, %s6924_s21  }
0x25e1   : > { %p23_p4 = scmp.ge.s32.totalorder %s26_s21, 4  }
0x25e3   :  { %25 = sbr.rel (!%p23_p4) target bundleno = 2 (0x2), region = 129 }

</bundles_post_ra>
